<compile_context>
chip_gen: v7x
topology: tpu7x:2x2x1
jax: 0.10.0
libtpu: 0.0.40
codegen_flags: <defaults>
</compile_context>

<pallas_src>
import functools
import numpy as np

import jax
import jax.numpy as jnp
from jax.experimental import pallas as pl
from jax.experimental.pallas import tpu as pltpu


# ---------------- hyperparameters (stand-in for the original `hp`) ----------
class hp:
    vocab_size = 40
    encoder_hidden = 32
    decoder_hidden = 32
    encoder_layers = 2
    decoder_layers = 2
    encoder_heads = 2
    decoder_heads = 2
    fft_conv1d_filter = 64
    fft_conv1d_kernel = (3, 1)       # (first conv k, second conv k)
    n_mel_channels = 20
    variance_filter = 32
    variance_kernel = 3
    postnet_dim = 32
    postnet_kernel = 5
    postnet_layers = 5
    max_seq_len = 64
    ln_eps = 1e-5
    bn_eps = 1e-5
    gauss_sigma = 1.0


# =========================== in-kernel helper math ===========================

def _recip(x):
    # approx reciprocal goes to the EUP slot (free alongside VPU work)
    return pl.reciprocal(x, approx=True)


def _layernorm(x, g, b, eps):
    mu = jnp.mean(x, axis=-1, keepdims=True)
    var = jnp.mean(jnp.square(x - mu), axis=-1, keepdims=True)
    return (x - mu) * jax.lax.rsqrt(var + eps) * g + b


def _softplus(x):
    # numerically stable softplus (works in- and out-of-kernel)
    return jnp.maximum(x, 0.0) + jnp.log(1.0 + jnp.exp(-jnp.abs(x)))


def _conv1d_same_flat(x_flat, w2d, bias, B, T, K):
    """'same' 1-D conv along time as ONE matmul over a shifted-stacked input.

    x_flat: (B*T, Cin)  w2d: (K*Cin, Cout)  bias: (1, Cout)
    The K taps are concatenated along channels (tap order matches the
    host-side w.reshape(K*Cin, Cout)).
    """
    Cin = x_flat.shape[-1]
    if K == 1:
        return jnp.dot(x_flat, w2d, preferred_element_type=jnp.float32) + bias
    pad = (K - 1) // 2
    x3 = x_flat.reshape(B, T, Cin)
    z = jnp.zeros((B, pad, Cin), jnp.float32)
    xp = jnp.concatenate([z, x3, z], axis=1)                   # (B, T+K-1, Cin)
    taps = jnp.concatenate([xp[:, k:k + T, :] for k in range(K)], axis=-1)
    return jnp.dot(taps.reshape(B * T, K * Cin), w2d,
                   preferred_element_type=jnp.float32) + bias


# =============================== Pallas kernels ==============================

def fft_stack_kernel(x_ref, kadd_ref, qkeep_ref,
                     wqkv_ref, bqkv_ref, wo_ref, bo_ref,
                     g1_ref, be1_ref, w1_ref, b1_ref, w2_ref, b2_ref,
                     g2_ref, be2_ref,
                     y_ref, attn_ref,
                     *, B, T, H, n_head, k1, k2, n_layers, eps):
    """All FFT blocks of one encoder/decoder stack, whole batch, fused."""
    dk = H // n_head
    scale = 1.0 / float(np.sqrt(dk))

    x = x_ref[...].reshape(B * T, H)          # flattened (B*T, H) activations
    kadd = kadd_ref[...]                      # (B, 1, T) additive key mask
    qkeep = qkeep_ref[...]                    # (B*T, 1) keep mask (1 valid / 0 pad)

    for l in range(n_layers):                 # static unroll over layers
        # fused QKV projection on the whole (B*T, H) slab
        qkv = jnp.dot(x, wqkv_ref[l],
                      preferred_element_type=jnp.float32) + bqkv_ref[l]

        ctx_rows = []
        for b in range(B):                    # static unroll: (T,T) attention
            qkv_b = qkv[b * T:(b + 1) * T, :]
            mask_b = kadd[b]                  # (1, T)
            heads = []
            for h in range(n_head):           # static unroll over heads
                qh = qkv_b[:, h * dk:(h + 1) * dk]
                kh = qkv_b[:, H + h * dk:H + (h + 1) * dk]
                vh = qkv_b[:, 2 * H + h * dk:2 * H + (h + 1) * dk]
                s = jnp.dot(qh, kh.T, preferred_element_type=jnp.float32) * scale
                s = s + mask_b
                s = s - jnp.max(s, axis=-1, keepdims=True)
                e = jnp.exp(s)
                a = e * _recip(jnp.sum(e, axis=-1, keepdims=True))
                attn_ref[l, b * n_head + h] = a          # direct per-head store
                heads.append(jnp.dot(a, vh, preferred_element_type=jnp.float32))
            ctx_rows.append(jnp.concatenate(heads, axis=-1))   # (T, H)

        # single wide output projection over the whole batch
        ctx = jnp.concatenate(ctx_rows, axis=0)                # (B*T, H)
        out = jnp.dot(ctx, wo_ref[l],
                      preferred_element_type=jnp.float32) + bo_ref[l]

        # residual + LayerNorm, zero padded query positions
        h1 = _layernorm(out + x, g1_ref[l], be1_ref[l], eps) * qkeep

        # conv feed-forward (each conv = one matmul), relu in between
        f = _conv1d_same_flat(h1, w1_ref[l], b1_ref[l], B, T, k1)
        f = jnp.maximum(f, 0.0)
        f2 = _conv1d_same_flat(f, w2_ref[l], b2_ref[l], B, T, k2)

        x = _layernorm(f2 + h1, g2_ref[l], be2_ref[l], eps) * qkeep

    y_ref[...] = x.reshape(B, T, H)


def variance_adaptor_kernel(enc_ref, kadd_ref, kmul_ref,
                            w1_ref, b1_ref, g1_ref, be1_ref,
                            w2_ref, b2_ref, g2_ref, be2_ref,
                            wl_ref, bl_ref,
                            d_ref, wout_ref, up_ref,
                            *, B, T_src, T_mel, VK, sigma, eps):
    """Duration predictor + Gaussian (Tacotron-style) upsampling, whole batch."""
    H = enc_ref.shape[-1]
    x = enc_ref[...].reshape(B * T_src, H)
    kadd = kadd_ref[...]                      # (B, 1, T_src) additive -1e9 mask
    kmul = kmul_ref[...]                      # (B, 1, T_src) keep mask

    # duration predictor convs on the flattened batch
    h = _conv1d_same_flat(x, w1_ref[...], b1_ref[...], B, T_src, VK)
    h = jnp.maximum(h, 0.0)
    h = _layernorm(h, g1_ref[...], be1_ref[...], eps)
    h = _conv1d_same_flat(h, w2_ref[...], b2_ref[...], B, T_src, VK)
    h = jnp.maximum(h, 0.0)
    h = _layernorm(h, g2_ref[...], be2_ref[...], eps)

    # constants built ONCE per call (hoisted out of the batch loop)
    r = jax.lax.broadcasted_iota(jnp.int32, (T_src, T_src), 0)
    c = jax.lax.broadcasted_iota(jnp.int32, (T_src, T_src), 1)
    cum_u = (r <= c).astype(jnp.float32)                     # upper-tri ones
    t = jax.lax.broadcasted_iota(jnp.int32, (T_mel, 1), 0).astype(jnp.float32)
    inv_two_sigma2 = 1.0 / (2.0 * sigma * sigma)

    for b in range(B):                                       # static unroll
        h_b = h[b * T_src:(b + 1) * T_src, :]                # (T_src, VF)
        x_b = x[b * T_src:(b + 1) * T_src, :]                # (T_src, H)

        # lane-dense (1, T_src) duration logits
        d_row = jnp.dot(wl_ref[...], h_b.T,
                        preferred_element_type=jnp.float32) + bl_ref[...]
        d_row = d_row * kmul[b]
        d_ref[b] = d_row

        # durations -> Gaussian centers (cumsum as matmul with upper-tri ones)
        dur = _softplus(d_row) * kmul[b]                     # (1, T_src)
        centers = jnp.dot(dur, cum_u,
                          preferred_element_type=jnp.float32) - 0.5 * dur
        diff = t - centers                                   # (T_mel, T_src)
        logits = -(diff * diff) * inv_two_sigma2 + kadd[b]
        logits = logits - jnp.max(logits, axis=-1, keepdims=True)
        e = jnp.exp(logits)
        W = e * _recip(jnp.sum(e, axis=-1, keepdims=True))
        wout_ref[b] = W
        up_ref[b] = jnp.dot(W, x_b, preferred_element_type=jnp.float32)


def mel_postnet_kernel(*args, B, T, H, nmel, PK, n_layers):
    """mel linear projection + 5-layer conv PostNet (BN folded), whole batch."""
    dec_ref, melw_ref, melb_ref = args[0:3]
    conv_refs = args[3:3 + 2 * n_layers]
    mel_ref, post_ref = args[3 + 2 * n_layers:5 + 2 * n_layers]

    x = dec_ref[...].reshape(B * T, H)
    mel = jnp.dot(x, melw_ref[...],
                  preferred_element_type=jnp.float32) + melb_ref[...]
    mel_ref[...] = mel.reshape(B, T, nmel)

    cur = mel
    for i in range(n_layers):                                # static unroll
        w_ref = conv_refs[2 * i]
        b_ref = conv_refs[2 * i + 1]
        cur = _conv1d_same_flat(cur, w_ref[...], b_ref[...], B, T, PK)
        if i < n_layers - 1:
            cur = jnp.tanh(cur)
    post_ref[...] = (cur + mel).reshape(B, T, nmel)


# =============================== Pallas wrappers =============================

def _full_spec(a):
    nd = a.ndim
    return pl.BlockSpec(a.shape, lambda i, _nd=nd: (0,) * _nd)


def fused_fft_stack(x, mask, p, n_head):
    """Run ALL FFT blocks of an encoder/decoder in one pallas_call."""
    B, T, H = x.shape
    L = p["wqkv"].shape[0]
    k1 = p["w1"].shape[1] // H
    F = p["w1"].shape[2]
    k2 = p["w2"].shape[1] // F

    kadd = jnp.where(mask, -1e9, 0.0).astype(jnp.float32)[:, None, :]   # (B,1,T)
    qkeep = (1.0 - mask.astype(jnp.float32)).reshape(B * T, 1)          # (B*T,1)

    kern = functools.partial(fft_stack_kernel, B=B, T=T, H=H, n_head=n_head,
                             k1=k1, k2=k2, n_layers=L, eps=hp.ln_eps)
    inputs = (x, kadd, qkeep, p["wqkv"], p["bqkv"], p["wo"], p["bo"],
              p["ln1_g"], p["ln1_b"], p["w1"], p["b1"], p["w2"], p["b2"],
              p["ln2_g"], p["ln2_b"])

    y, attn = pl.pallas_call(
        kern,
        out_shape=(jax.ShapeDtypeStruct((B, T, H), jnp.float32),
                   jax.ShapeDtypeStruct((L, B * n_head, T, T), jnp.float32)),
        grid=(1,),
        in_specs=[_full_spec(a) for a in inputs],
        out_specs=(pl.BlockSpec((B, T, H), lambda i: (0, 0, 0)),
                   pl.BlockSpec((L, B * n_head, T, T),
                                lambda i: (0, 0, 0, 0))),
        compiler_params=pltpu.CompilerParams(dimension_semantics=("arbitrary",)),
    )(*inputs)

    attn = attn.reshape(L, B, n_head, T, T)
    return y, [attn[l] for l in range(L)]


def fused_variance_adaptor(p, enc_out, src_mask, max_mel_len):
    B, T_src, H = enc_out.shape
    VK = p["dp_w1"].shape[0] // H

    kadd = jnp.where(src_mask, -1e9, 0.0).astype(jnp.float32)[:, None, :]
    kmul = (1.0 - src_mask.astype(jnp.float32))[:, None, :]

    kern = functools.partial(variance_adaptor_kernel, B=B, T_src=T_src,
                             T_mel=max_mel_len, VK=VK,
                             sigma=hp.gauss_sigma, eps=hp.ln_eps)
    inputs = (enc_out, kadd, kmul,
              p["dp_w1"], p["dp_b1"], p["dp_ln1_g"], p["dp_ln1_b"],
              p["dp_w2"], p["dp_b2"], p["dp_ln2_g"], p["dp_ln2_b"],
              p["dp_wl"], p["dp_bl"])

    d3, W, up = pl.pallas_call(
        kern,
        out_shape=(jax.ShapeDtypeStruct((B, 1, T_src), jnp.float32),
                   jax.ShapeDtypeStruct((B, max_mel_len, T_src), jnp.float32),
                   jax.ShapeDtypeStruct((B, max_mel_len, H), jnp.float32)),
        grid=(1,),
        in_specs=[_full_spec(a) for a in inputs],
        out_specs=(pl.BlockSpec((B, 1, T_src), lambda i: (0, 0, 0)),
                   pl.BlockSpec((B, max_mel_len, T_src), lambda i: (0, 0, 0)),
                   pl.BlockSpec((B, max_mel_len, H), lambda i: (0, 0, 0))),
        compiler_params=pltpu.CompilerParams(dimension_semantics=("arbitrary",)),
    )(*inputs)
    return d3[:, 0, :], W, up


def fused_mel_postnet(dec_out, mel_w, mel_b, postnet_p):
    B, T, H = dec_out.shape
    nmel = mel_w.shape[1]
    convs = postnet_p["convs"]
    PK = postnet_p["kernel_size"]
    n_layers = len(convs)

    # fold eval-mode BatchNorm into conv weights/biases and pre-reshape weights
    # to (K*Cin, Cout) so each conv is a single matmul in-kernel.
    conv_args = []
    for cp in convs:
        scale = cp["bn_g"] * jax.lax.rsqrt(cp["bn_rv"] + hp.bn_eps)
        w = (cp["w"] * scale[None, None, :]).reshape(-1, cp["w"].shape[-1])
        b = ((cp["b"] - cp["bn_rm"]) * scale + cp["bn_b"]).reshape(1, -1)
        conv_args += [w, b]

    inputs = (dec_out, mel_w, mel_b, *conv_args)
    kern = functools.partial(mel_postnet_kernel, B=B, T=T, H=H, nmel=nmel,
                             PK=PK, n_layers=n_layers)

    mel, post = pl.pallas_call(
        kern,
        out_shape=(jax.ShapeDtypeStruct((B, T, nmel), jnp.float32),
                   jax.ShapeDtypeStruct((B, T, nmel), jnp.float32)),
        grid=(1,),
        in_specs=[_full_spec(a) for a in inputs],
        out_specs=(pl.BlockSpec((B, T, nmel), lambda i: (0, 0, 0)),
                   pl.BlockSpec((B, T, nmel), lambda i: (0, 0, 0))),
        compiler_params=pltpu.CompilerParams(dimension_semantics=("arbitrary",)),
    )(*inputs)
    return mel, post


# =============================== model pieces ================================

def get_mask_from_lengths(lengths, max_len):
    ids = jnp.arange(max_len, dtype=jnp.int32)[None, :]
    return ids >= lengths[:, None]            # True = padding position


def encoder_forward(p, src_seq, src_mask):
    T = src_seq.shape[1]
    x = p["emb"][src_seq] + p["pos_enc"][:T][None, :, :]
    return fused_fft_stack(x, src_mask, p["stack"], hp.encoder_heads)


def decoder_forward(p, x, mel_mask):
    T = x.shape[1]
    x = x + p["pos_enc"][:T][None, :, :]
    return fused_fft_stack(x, mel_mask, p["stack"], hp.decoder_heads)


def fastspeech2_forward(params, src_seq, src_len, mel_len=None,
                        max_src_len=None, max_mel_len=None):
    src_mask = get_mask_from_lengths(src_len, max_src_len)
    # mel_mask from given mel_len is unused downstream (inference path)
    _ = get_mask_from_lengths(mel_len, max_mel_len) if mel_len is not None else None

    encoder_output, enc_attns = encoder_forward(params["encoder"], src_seq, src_mask)
    d_prediction, W, va_out = fused_variance_adaptor(
        params["variance_adaptor"], encoder_output, src_mask, max_mel_len)

    mask_f = src_mask.astype(jnp.float32)
    dur = _softplus(d_prediction) * (1.0 - mask_f)
    pred_mel_len = jnp.clip(jnp.round(jnp.sum(dur, axis=-1)).astype(jnp.int32),
                            1, max_mel_len)
    pred_mel_mask = get_mask_from_lengths(pred_mel_len, max_mel_len)

    decoder_output, dec_attns = decoder_forward(
        params["decoder"], va_out, pred_mel_mask)
    mel_output, mel_output_postnet = fused_mel_postnet(
        decoder_output, params["mel_w"], params["mel_b"], params["postnet"])
    return (mel_output, mel_output_postnet, d_prediction, src_mask,
            pred_mel_mask, enc_attns, dec_attns, W)


# =============================== parameter init ==============================

def sinusoid_table(n_pos, d):
    pos = np.arange(n_pos)[:, None].astype(np.float64)
    i = np.arange(d)[None, :].astype(np.float64)
    angle = pos / np.power(10000.0, 2.0 * (i // 2) / d)
    table = np.zeros((n_pos, d), np.float32)
    table[:, 0::2] = np.sin(angle[:, 0::2])
    table[:, 1::2] = np.cos(angle[:, 1::2])
    return jnp.asarray(table)


def init_params(key):
    keys = iter(jax.random.split(key, 512))

    def nrm(shape, scale=0.05):
        return scale * jax.random.normal(next(keys), shape, dtype=jnp.float32)

    H = hp.encoder_hidden
    F = hp.fft_conv1d_filter
    k1, k2 = hp.fft_conv1d_kernel

    def fft_stack_params(n_layers):
        # all layers stacked along a leading L axis; conv weights stored
        # pre-reshaped as (K*Cin, Cout) for the single-matmul conv path.
        return {"wqkv": nrm((n_layers, H, 3 * H)),
                "bqkv": jnp.zeros((n_layers, 1, 3 * H), jnp.float32),
                "wo": nrm((n_layers, H, H)),
                "bo": jnp.zeros((n_layers, 1, H), jnp.float32),
                "ln1_g": jnp.ones((n_layers, 1, H), jnp.float32),
                "ln1_b": jnp.zeros((n_layers, 1, H), jnp.float32),
                "w1": nrm((n_layers, k1 * H, F)),
                "b1": jnp.zeros((n_layers, 1, F), jnp.float32),
                "w2": nrm((n_layers, k2 * F, H)),
                "b2": jnp.zeros((n_layers, 1, H), jnp.float32),
                "ln2_g": jnp.ones((n_layers, 1, H), jnp.float32),
                "ln2_b": jnp.zeros((n_layers, 1, H), jnp.float32)}

    pos_enc = sinusoid_table(hp.max_seq_len, H)
    emb = nrm((hp.vocab_size, H), scale=0.1).at[0].set(0.0)   # padding_idx=0

    encoder = {"emb": emb, "pos_enc": pos_enc,
               "stack": fft_stack_params(hp.encoder_layers)}
    decoder = {"pos_enc": pos_enc,
               "stack": fft_stack_params(hp.decoder_layers)}

    VF, VK = hp.variance_filter, hp.variance_kernel
    variance_adaptor = {
        "dp_w1": nrm((VK * H, VF)), "dp_b1": jnp.zeros((1, VF), jnp.float32),
        "dp_ln1_g": jnp.ones((1, VF), jnp.float32),
        "dp_ln1_b": jnp.zeros((1, VF), jnp.float32),
        "dp_w2": nrm((VK * VF, VF)), "dp_b2": jnp.zeros((1, VF), jnp.float32),
        "dp_ln2_g": jnp.ones((1, VF), jnp.float32),
        "dp_ln2_b": jnp.zeros((1, VF), jnp.float32),
        "dp_wl": nrm((1, VF)), "dp_bl": jnp.zeros((1, 1), jnp.float32),
    }

    nmel, PD, PK = hp.n_mel_channels, hp.postnet_dim, hp.postnet_kernel
    chans = [nmel] + [PD] * (hp.postnet_layers - 1) + [nmel]
    postnet = {"kernel_size": PK, "convs": []}
    for i in range(hp.postnet_layers):
        cin, cout = chans[i], chans[i + 1]
        postnet["convs"].append({
            "w": nrm((PK, cin, cout)), "b": jnp.zeros((cout,), jnp.float32),
            "bn_g": jnp.ones((cout,), jnp.float32),
            "bn_b": jnp.zeros((cout,), jnp.float32),
            "bn_rm": nrm((cout,), scale=0.01),
            "bn_rv": jnp.ones((cout,), jnp.float32),
        })

    return {"encoder": encoder, "decoder": decoder,
            "variance_adaptor": variance_adaptor,
            "mel_w": nrm((hp.decoder_hidden, hp.n_mel_channels)),
            "mel_b": jnp.zeros((1, hp.n_mel_channels), jnp.float32),
            "postnet": postnet}


# =================================== main ====================================

if __name__ == "__main__":
    B, T_SRC, T_MEL = 2, 8, 16
    key = jax.random.PRNGKey(0)
    k_seq, _ = jax.random.split(key)
    src_seq = jax.random.randint(k_seq, (B, T_SRC), 1, hp.vocab_size, dtype=jnp.int32)
    src_len = jnp.array([T_SRC, T_SRC - 2], dtype=jnp.int32)

    params = init_params(jax.random.PRNGKey(42))

    fwd = jax.jit(functools.partial(fastspeech2_forward, params),
                  static_argnames=("max_src_len", "max_mel_len"))
    outs = fwd(src_seq, src_len, mel_len=None,
               max_src_len=T_SRC, max_mel_len=T_MEL)
    outs = jax.block_until_ready(outs)

    (mel_output, mel_post, d_pred, src_mask, pred_mel_mask,
     enc_attns, dec_attns, W) = outs
    assert mel_output.shape == (B, T_MEL, hp.n_mel_channels)
    assert mel_post.shape == (B, T_MEL, hp.n_mel_channels)
    assert d_pred.shape == (B, T_SRC)
    assert W.shape == (B, T_MEL, T_SRC)
    assert len(enc_attns) == hp.encoder_layers
    assert len(dec_attns) == hp.decoder_layers
    assert enc_attns[0].shape == (B, hp.encoder_heads, T_SRC, T_SRC)
    assert dec_attns[0].shape == (B, hp.decoder_heads, T_MEL, T_MEL)
    assert bool(jnp.all(jnp.isfinite(mel_post)))
    assert bool(jnp.all(jnp.isfinite(W)))
    print("KERNEL_OK")
</pallas_src>

<mosaic_0001>
module attributes {stable_mosaic.version = 11 : i64} {
  func.func @variance_adaptor_kernel(%arg0: i32, %arg1: memref<2x8x32xf32, #tpu.memory_space<vmem>>, %arg2: memref<2x1x8xf32, #tpu.memory_space<vmem>>, %arg3: memref<2x1x8xf32, #tpu.memory_space<vmem>>, %arg4: memref<96x32xf32, #tpu.memory_space<vmem>>, %arg5: memref<1x32xf32, #tpu.memory_space<vmem>>, %arg6: memref<1x32xf32, #tpu.memory_space<vmem>>, %arg7: memref<1x32xf32, #tpu.memory_space<vmem>>, %arg8: memref<96x32xf32, #tpu.memory_space<vmem>>, %arg9: memref<1x32xf32, #tpu.memory_space<vmem>>, %arg10: memref<1x32xf32, #tpu.memory_space<vmem>>, %arg11: memref<1x32xf32, #tpu.memory_space<vmem>>, %arg12: memref<1x32xf32, #tpu.memory_space<vmem>>, %arg13: memref<1x1xf32, #tpu.memory_space<vmem>>, %arg14: memref<2x1x8xf32, #tpu.memory_space<vmem>>, %arg15: memref<2x16x8xf32, #tpu.memory_space<vmem>>, %arg16: memref<2x16x32xf32, #tpu.memory_space<vmem>>) attributes {dimension_semantics = [#tpu.dimension_semantics<arbitrary>], iteration_bounds = array<i64: 1>, scalar_prefetch = 0 : i64, scratch_operands = 0 : i64, tpu.core_type = #tpu.core_type<tc>, window_params = [{pipeline_mode = #tpu.pipeline_mode<synchronous>, transform_indices = @transform_0, window_bounds = array<i64: 2, 8, 32>}, {pipeline_mode = #tpu.pipeline_mode<synchronous>, transform_indices = @transform_1, window_bounds = array<i64: 2, 1, 8>}, {pipeline_mode = #tpu.pipeline_mode<synchronous>, transform_indices = @transform_2, window_bounds = array<i64: 2, 1, 8>}, {pipeline_mode = #tpu.pipeline_mode<synchronous>, transform_indices = @transform_3, window_bounds = array<i64: 96, 32>}, {pipeline_mode = #tpu.pipeline_mode<synchronous>, transform_indices = @transform_4, window_bounds = array<i64: 1, 32>}, {pipeline_mode = #tpu.pipeline_mode<synchronous>, transform_indices = @transform_5, window_bounds = array<i64: 1, 32>}, {pipeline_mode = #tpu.pipeline_mode<synchronous>, transform_indices = @transform_6, window_bounds = array<i64: 1, 32>}, {pipeline_mode = #tpu.pipeline_mode<synchronous>, transform_indices = @transform_7, window_bounds = array<i64: 96, 32>}, {pipeline_mode = #tpu.pipeline_mode<synchronous>, transform_indices = @transform_8, window_bounds = array<i64: 1, 32>}, {pipeline_mode = #tpu.pipeline_mode<synchronous>, transform_indices = @transform_9, window_bounds = array<i64: 1, 32>}, {pipeline_mode = #tpu.pipeline_mode<synchronous>, transform_indices = @transform_10, window_bounds = array<i64: 1, 32>}, {pipeline_mode = #tpu.pipeline_mode<synchronous>, transform_indices = @transform_11, window_bounds = array<i64: 1, 32>}, {pipeline_mode = #tpu.pipeline_mode<synchronous>, transform_indices = @transform_12, window_bounds = array<i64: 1, 1>}, {pipeline_mode = #tpu.pipeline_mode<synchronous>, transform_indices = @transform_13, window_bounds = array<i64: 2, 1, 8>}, {pipeline_mode = #tpu.pipeline_mode<synchronous>, transform_indices = @transform_14, window_bounds = array<i64: 2, 16, 8>}, {pipeline_mode = #tpu.pipeline_mode<synchronous>, transform_indices = @transform_15, window_bounds = array<i64: 2, 16, 32>}]} {
    %c0 = arith.constant 0 : index
    %c0_0 = arith.constant 0 : index
    %c0_1 = arith.constant 0 : index
    %0 = vector.load %arg1[%c0, %c0_0, %c0_1] : memref<2x8x32xf32, #tpu.memory_space<vmem>>, vector<2x8x32xf32>
    %1 = vector.shape_cast %0 : vector<2x8x32xf32> to vector<16x32xf32>
    %c0_2 = arith.constant 0 : index
    %c0_3 = arith.constant 0 : index
    %c0_4 = arith.constant 0 : index
    %2 = vector.load %arg2[%c0_2, %c0_3, %c0_4] : memref<2x1x8xf32, #tpu.memory_space<vmem>>, vector<2x1x8xf32>
    %c0_5 = arith.constant 0 : index
    %c0_6 = arith.constant 0 : index
    %c0_7 = arith.constant 0 : index
    %3 = vector.load %arg3[%c0_5, %c0_6, %c0_7] : memref<2x1x8xf32, #tpu.memory_space<vmem>>, vector<2x1x8xf32>
    %c0_8 = arith.constant 0 : index
    %c0_9 = arith.constant 0 : index
    %4 = vector.load %arg4[%c0_8, %c0_9] : memref<96x32xf32, #tpu.memory_space<vmem>>, vector<96x32xf32>
    %c0_10 = arith.constant 0 : index
    %c0_11 = arith.constant 0 : index
    %5 = vector.load %arg5[%c0_10, %c0_11] : memref<1x32xf32, #tpu.memory_space<vmem>>, vector<1x32xf32>
    %6 = vector.shape_cast %1 : vector<16x32xf32> to vector<2x8x32xf32>
    %cst = arith.constant 0.000000e+00 : f32
    %7 = vector.broadcast %cst : f32 to vector<2x1x32xf32>
    %8 = tpu.concatenate %7, %6, %7 in 1 : vector<2x1x32xf32>, vector<2x8x32xf32>, vector<2x1x32xf32> -> vector<2x10x32xf32>
    %9 = vector.extract_strided_slice %8 {offsets = [0, 0, 0], sizes = [2, 8, 32], strides = [1, 1, 1]} : vector<2x10x32xf32> to vector<2x8x32xf32>
    %10 = vector.extract_strided_slice %8 {offsets = [0, 1, 0], sizes = [2, 8, 32], strides = [1, 1, 1]} : vector<2x10x32xf32> to vector<2x8x32xf32>
    %11 = vector.extract_strided_slice %8 {offsets = [0, 2, 0], sizes = [2, 8, 32], strides = [1, 1, 1]} : vector<2x10x32xf32> to vector<2x8x32xf32>
    %12 = tpu.concatenate %9, %10, %11 in 2 : vector<2x8x32xf32>, vector<2x8x32xf32>, vector<2x8x32xf32> -> vector<2x8x96xf32>
    %13 = vector.shape_cast %12 : vector<2x8x96xf32> to vector<16x96xf32>
    %cst_12 = arith.constant dense<0.000000e+00> : vector<16x32xf32>
    %14 = tpu.matmul %13, %4, %cst_12 {dimension_numbers = #tpu.dot_dimension_numbers<[1], [0], [0], [1], [0, 0, 1, 1], [], []>} : vector<16x96xf32>, vector<96x32xf32>, vector<16x32xf32> -> vector<16x32xf32>
    %15 = vector.broadcast %5 : vector<1x32xf32> to vector<16x32xf32>
    %16 = arith.addf %14, %15 : vector<16x32xf32>
    %cst_13 = arith.constant 0.000000e+00 : f32
    %17 = vector.broadcast %cst_13 : f32 to vector<16x32xf32>
    %18 = arith.maximumf %16, %17 : vector<16x32xf32>
    %c0_14 = arith.constant 0 : index
    %c0_15 = arith.constant 0 : index
    %19 = vector.load %arg6[%c0_14, %c0_15] : memref<1x32xf32, #tpu.memory_space<vmem>>, vector<1x32xf32>
    %c0_16 = arith.constant 0 : index
    %c0_17 = arith.constant 0 : index
    %20 = vector.load %arg7[%c0_16, %c0_17] : memref<1x32xf32, #tpu.memory_space<vmem>>, vector<1x32xf32>
    %cst_18 = arith.constant dense<0.000000e+00> : vector<16xf32>
    %21 = vector.multi_reduction <add>, %18, %cst_18 [1] : vector<16x32xf32> to vector<16xf32>
    %22 = vector.shape_cast %21 : vector<16xf32> to vector<16x1xf32>
    %cst_19 = arith.constant 3.200000e+01 : f32
    %23 = vector.broadcast %cst_19 : f32 to vector<16x1xf32>
    %24 = arith.divf %22, %23 : vector<16x1xf32>
    %25 = vector.broadcast %24 : vector<16x1xf32> to vector<16x32xf32>
    %26 = arith.subf %18, %25 : vector<16x32xf32>
    %27 = arith.mulf %26, %26 : vector<16x32xf32>
    %cst_20 = arith.constant dense<0.000000e+00> : vector<16xf32>
    %28 = vector.multi_reduction <add>, %27, %cst_20 [1] : vector<16x32xf32> to vector<16xf32>
    %29 = vector.shape_cast %28 : vector<16xf32> to vector<16x1xf32>
    %cst_21 = arith.constant 3.200000e+01 : f32
    %30 = vector.broadcast %cst_21 : f32 to vector<16x1xf32>
    %31 = arith.divf %29, %30 : vector<16x1xf32>
    %32 = vector.broadcast %24 : vector<16x1xf32> to vector<16x32xf32>
    %33 = arith.subf %18, %32 : vector<16x32xf32>
    %cst_22 = arith.constant 9.99999974E-6 : f32
    %34 = vector.broadcast %cst_22 : f32 to vector<16x1xf32>
    %35 = arith.addf %31, %34 : vector<16x1xf32>
    %36 = math.rsqrt %35 : vector<16x1xf32>
    %37 = vector.broadcast %36 : vector<16x1xf32> to vector<16x32xf32>
    %38 = arith.mulf %33, %37 : vector<16x32xf32>
    %39 = vector.broadcast %19 : vector<1x32xf32> to vector<16x32xf32>
    %40 = arith.mulf %38, %39 : vector<16x32xf32>
    %41 = vector.broadcast %20 : vector<1x32xf32> to vector<16x32xf32>
    %42 = arith.addf %40, %41 : vector<16x32xf32>
    %c0_23 = arith.constant 0 : index
    %c0_24 = arith.constant 0 : index
    %43 = vector.load %arg8[%c0_23, %c0_24] : memref<96x32xf32, #tpu.memory_space<vmem>>, vector<96x32xf32>
    %c0_25 = arith.constant 0 : index
    %c0_26 = arith.constant 0 : index
    %44 = vector.load %arg9[%c0_25, %c0_26] : memref<1x32xf32, #tpu.memory_space<vmem>>, vector<1x32xf32>
    %45 = vector.shape_cast %42 : vector<16x32xf32> to vector<2x8x32xf32>
    %cst_27 = arith.constant 0.000000e+00 : f32
    %46 = vector.broadcast %cst_27 : f32 to vector<2x1x32xf32>
    %47 = tpu.concatenate %46, %45, %46 in 1 : vector<2x1x32xf32>, vector<2x8x32xf32>, vector<2x1x32xf32> -> vector<2x10x32xf32>
    %48 = vector.extract_strided_slice %47 {offsets = [0, 0, 0], sizes = [2, 8, 32], strides = [1, 1, 1]} : vector<2x10x32xf32> to vector<2x8x32xf32>
    %49 = vector.extract_strided_slice %47 {offsets = [0, 1, 0], sizes = [2, 8, 32], strides = [1, 1, 1]} : vector<2x10x32xf32> to vector<2x8x32xf32>
    %50 = vector.extract_strided_slice %47 {offsets = [0, 2, 0], sizes = [2, 8, 32], strides = [1, 1, 1]} : vector<2x10x32xf32> to vector<2x8x32xf32>
    %51 = tpu.concatenate %48, %49, %50 in 2 : vector<2x8x32xf32>, vector<2x8x32xf32>, vector<2x8x32xf32> -> vector<2x8x96xf32>
    %52 = vector.shape_cast %51 : vector<2x8x96xf32> to vector<16x96xf32>
    %cst_28 = arith.constant dense<0.000000e+00> : vector<16x32xf32>
    %53 = tpu.matmul %52, %43, %cst_28 {dimension_numbers = #tpu.dot_dimension_numbers<[1], [0], [0], [1], [0, 0, 1, 1], [], []>} : vector<16x96xf32>, vector<96x32xf32>, vector<16x32xf32> -> vector<16x32xf32>
    %54 = vector.broadcast %44 : vector<1x32xf32> to vector<16x32xf32>
    %55 = arith.addf %53, %54 : vector<16x32xf32>
    %cst_29 = arith.constant 0.000000e+00 : f32
    %56 = vector.broadcast %cst_29 : f32 to vector<16x32xf32>
    %57 = arith.maximumf %55, %56 : vector<16x32xf32>
    %c0_30 = arith.constant 0 : index
    %c0_31 = arith.constant 0 : index
    %58 = vector.load %arg10[%c0_30, %c0_31] : memref<1x32xf32, #tpu.memory_space<vmem>>, vector<1x32xf32>
    %c0_32 = arith.constant 0 : index
    %c0_33 = arith.constant 0 : index
    %59 = vector.load %arg11[%c0_32, %c0_33] : memref<1x32xf32, #tpu.memory_space<vmem>>, vector<1x32xf32>
    %cst_34 = arith.constant dense<0.000000e+00> : vector<16xf32>
    %60 = vector.multi_reduction <add>, %57, %cst_34 [1] : vector<16x32xf32> to vector<16xf32>
    %61 = vector.shape_cast %60 : vector<16xf32> to vector<16x1xf32>
    %cst_35 = arith.constant 3.200000e+01 : f32
    %62 = vector.broadcast %cst_35 : f32 to vector<16x1xf32>
    %63 = arith.divf %61, %62 : vector<16x1xf32>
    %64 = vector.broadcast %63 : vector<16x1xf32> to vector<16x32xf32>
    %65 = arith.subf %57, %64 : vector<16x32xf32>
    %66 = arith.mulf %65, %65 : vector<16x32xf32>
    %cst_36 = arith.constant dense<0.000000e+00> : vector<16xf32>
    %67 = vector.multi_reduction <add>, %66, %cst_36 [1] : vector<16x32xf32> to vector<16xf32>
    %68 = vector.shape_cast %67 : vector<16xf32> to vector<16x1xf32>
    %cst_37 = arith.constant 3.200000e+01 : f32
    %69 = vector.broadcast %cst_37 : f32 to vector<16x1xf32>
    %70 = arith.divf %68, %69 : vector<16x1xf32>
    %71 = vector.broadcast %63 : vector<16x1xf32> to vector<16x32xf32>
    %72 = arith.subf %57, %71 : vector<16x32xf32>
    %cst_38 = arith.constant 9.99999974E-6 : f32
    %73 = vector.broadcast %cst_38 : f32 to vector<16x1xf32>
    %74 = arith.addf %70, %73 : vector<16x1xf32>
    %75 = math.rsqrt %74 : vector<16x1xf32>
    %76 = vector.broadcast %75 : vector<16x1xf32> to vector<16x32xf32>
    %77 = arith.mulf %72, %76 : vector<16x32xf32>
    %78 = vector.broadcast %58 : vector<1x32xf32> to vector<16x32xf32>
    %79 = arith.mulf %77, %78 : vector<16x32xf32>
    %80 = vector.broadcast %59 : vector<1x32xf32> to vector<16x32xf32>
    %81 = arith.addf %79, %80 : vector<16x32xf32>
    %82 = tpu.iota {dimensions = array<i32: 0>} : vector<8x8xi32>
    %83 = tpu.iota {dimensions = array<i32: 1>} : vector<8x8xi32>
    %84 = arith.cmpi sle, %82, %83 : vector<8x8xi32>
    %85 = arith.extui %84 : vector<8x8xi1> to vector<8x8xi32>
    %86 = arith.sitofp %85 : vector<8x8xi32> to vector<8x8xf32>
    %87 = tpu.iota {dimensions = array<i32: 0>} : vector<16x1xi32>
    %88 = arith.sitofp %87 : vector<16x1xi32> to vector<16x1xf32>
    %89 = vector.extract_strided_slice %81 {offsets = [0, 0], sizes = [8, 32], strides = [1, 1]} : vector<16x32xf32> to vector<8x32xf32>
    %90 = vector.extract_strided_slice %1 {offsets = [0, 0], sizes = [8, 32], strides = [1, 1]} : vector<16x32xf32> to vector<8x32xf32>
    %c0_39 = arith.constant 0 : index
    %c0_40 = arith.constant 0 : index
    %91 = vector.load %arg12[%c0_39, %c0_40] : memref<1x32xf32, #tpu.memory_space<vmem>>, vector<1x32xf32>
    %92 = tpu.transpose %89, [1, 0] : vector<8x32xf32> -> vector<32x8xf32>
    %cst_41 = arith.constant dense<0.000000e+00> : vector<1x8xf32>
    %93 = tpu.matmul %91, %92, %cst_41 {dimension_numbers = #tpu.dot_dimension_numbers<[1], [0], [0], [1], [0, 0, 1, 1], [], []>} : vector<1x32xf32>, vector<32x8xf32>, vector<1x8xf32> -> vector<1x8xf32>
    %c0_42 = arith.constant 0 : index
    %c0_43 = arith.constant 0 : index
    %94 = vector.load %arg13[%c0_42, %c0_43] : memref<1x1xf32, #tpu.memory_space<vmem>>, vector<1x1xf32>
    %95 = vector.broadcast %94 : vector<1x1xf32> to vector<1x8xf32>
    %96 = arith.addf %93, %95 : vector<1x8xf32>
    %97 = vector.extract_strided_slice %3 {offsets = [0, 0, 0], sizes = [1, 1, 8], strides = [1, 1, 1]} : vector<2x1x8xf32> to vector<1x1x8xf32>
    %98 = vector.shape_cast %97 : vector<1x1x8xf32> to vector<1x8xf32>
    %99 = arith.mulf %96, %98 : vector<1x8xf32>
    %c0_44 = arith.constant 0 : index
    %c0_45 = arith.constant 0 : index
    %c0_46 = arith.constant 0 : index
    %100 = vector.load %arg14[%c0_44, %c0_45, %c0_46] : memref<2x1x8xf32, #tpu.memory_space<vmem>>, vector<1x1x8xf32>
    %101 = vector.shape_cast %100 : vector<1x1x8xf32> to vector<1x8xf32>
    %102 = vector.shape_cast %99 : vector<1x8xf32> to vector<1x1x8xf32>
    tpu.vector_store %arg14[%c0_44, %c0_45, %c0_46], %102 {strides = array<i32>} : memref<2x1x8xf32, #tpu.memory_space<vmem>>, vector<1x1x8xf32>,
    %cst_47 = arith.constant 0.000000e+00 : f32
    %103 = vector.broadcast %cst_47 : f32 to vector<1x8xf32>
    %104 = arith.maximumf %99, %103 : vector<1x8xf32>
    %105 = math.absf %99 : vector<1x8xf32>
    %cst_48 = arith.constant 0.000000e+00 : f32
    %106 = vector.broadcast %cst_48 : f32 to vector<1x8xf32>
    %107 = arith.subf %106, %105 : vector<1x8xf32>
    %108 = math.exp %107 : vector<1x8xf32>
    %cst_49 = arith.constant 1.000000e+00 : f32
    %109 = vector.broadcast %cst_49 : f32 to vector<1x8xf32>
    %110 = arith.addf %109, %108 : vector<1x8xf32>
    %111 = math.log %110 : vector<1x8xf32>
    %112 = arith.addf %104, %111 : vector<1x8xf32>
    %113 = vector.extract_strided_slice %3 {offsets = [0, 0, 0], sizes = [1, 1, 8], strides = [1, 1, 1]} : vector<2x1x8xf32> to vector<1x1x8xf32>
    %114 = vector.shape_cast %113 : vector<1x1x8xf32> to vector<1x8xf32>
    %115 = arith.mulf %112, %114 : vector<1x8xf32>
    %cst_50 = arith.constant dense<0.000000e+00> : vector<1x8xf32>
    %116 = tpu.matmul %115, %86, %cst_50 {dimension_numbers = #tpu.dot_dimension_numbers<[1], [0], [0], [1], [0, 0, 1, 1], [], []>} : vector<1x8xf32>, vector<8x8xf32>, vector<1x8xf32> -> vector<1x8xf32>
    %cst_51 = arith.constant 5.000000e-01 : f32
    %117 = vector.broadcast %cst_51 : f32 to vector<1x8xf32>
    %118 = arith.mulf %117, %115 : vector<1x8xf32>
    %119 = arith.subf %116, %118 : vector<1x8xf32>
    %120 = vector.broadcast %88 : vector<16x1xf32> to vector<16x8xf32>
    %121 = vector.broadcast %119 : vector<1x8xf32> to vector<16x8xf32>
    %122 = arith.subf %120, %121 : vector<16x8xf32>
    %123 = arith.mulf %122, %122 : vector<16x8xf32>
    %cst_52 = arith.constant 0.000000e+00 : f32
    %124 = vector.broadcast %cst_52 : f32 to vector<16x8xf32>
    %125 = arith.subf %124, %123 : vector<16x8xf32>
    %cst_53 = arith.constant 5.000000e-01 : f32
    %126 = vector.broadcast %cst_53 : f32 to vector<16x8xf32>
    %127 = arith.mulf %125, %126 : vector<16x8xf32>
    %128 = vector.extract_strided_slice %2 {offsets = [0, 0, 0], sizes = [1, 1, 8], strides = [1, 1, 1]} : vector<2x1x8xf32> to vector<1x1x8xf32>
    %129 = vector.shape_cast %128 : vector<1x1x8xf32> to vector<1x8xf32>
    %130 = vector.broadcast %129 : vector<1x8xf32> to vector<16x8xf32>
    %131 = arith.addf %127, %130 : vector<16x8xf32>
    %cst_54 = arith.constant dense<0xFF800000> : vector<16xf32>
    %132 = vector.multi_reduction <maximumf>, %131, %cst_54 [1] : vector<16x8xf32> to vector<16xf32>
    %133 = vector.shape_cast %132 : vector<16xf32> to vector<16x1xf32>
    %134 = vector.broadcast %133 : vector<16x1xf32> to vector<16x8xf32>
    %135 = arith.subf %131, %134 : vector<16x8xf32>
    %136 = math.exp %135 : vector<16x8xf32>
    %cst_55 = arith.constant dense<0.000000e+00> : vector<16xf32>
    %137 = vector.multi_reduction <add>, %136, %cst_55 [1] : vector<16x8xf32> to vector<16xf32>
    %138 = vector.shape_cast %137 : vector<16xf32> to vector<16x1xf32>
    %139 = tpu.reciprocal %138 {approx = true} : vector<16x1xf32> -> vector<16x1xf32>
    %140 = vector.broadcast %139 : vector<16x1xf32> to vector<16x8xf32>
    %141 = arith.mulf %136, %140 : vector<16x8xf32>
    %c0_56 = arith.constant 0 : index
    %c0_57 = arith.constant 0 : index
    %c0_58 = arith.constant 0 : index
    %142 = vector.load %arg15[%c0_56, %c0_57, %c0_58] : memref<2x16x8xf32, #tpu.memory_space<vmem>>, vector<1x16x8xf32>
    %143 = vector.shape_cast %142 : vector<1x16x8xf32> to vector<16x8xf32>
    %144 = vector.shape_cast %141 : vector<16x8xf32> to vector<1x16x8xf32>
    tpu.vector_store %arg15[%c0_56, %c0_57, %c0_58], %144 {strides = array<i32>} : memref<2x16x8xf32, #tpu.memory_space<vmem>>, vector<1x16x8xf32>,
    %cst_59 = arith.constant dense<0.000000e+00> : vector<16x32xf32>
    %145 = tpu.matmul %141, %90, %cst_59 {dimension_numbers = #tpu.dot_dimension_numbers<[1], [0], [0], [1], [0, 0, 1, 1], [], []>} : vector<16x8xf32>, vector<8x32xf32>, vector<16x32xf32> -> vector<16x32xf32>
    %c0_60 = arith.constant 0 : index
    %c0_61 = arith.constant 0 : index
    %c0_62 = arith.constant 0 : index
    %146 = vector.load %arg16[%c0_60, %c0_61, %c0_62] : memref<2x16x32xf32, #tpu.memory_space<vmem>>, vector<1x16x32xf32>
    %147 = vector.shape_cast %146 : vector<1x16x32xf32> to vector<16x32xf32>
    %148 = vector.shape_cast %145 : vector<16x32xf32> to vector<1x16x32xf32>
    tpu.vector_store %arg16[%c0_60, %c0_61, %c0_62], %148 {strides = array<i32>} : memref<2x16x32xf32, #tpu.memory_space<vmem>>, vector<1x16x32xf32>,
    %149 = vector.extract_strided_slice %81 {offsets = [8, 0], sizes = [8, 32], strides = [1, 1]} : vector<16x32xf32> to vector<8x32xf32>
    %150 = vector.extract_strided_slice %1 {offsets = [8, 0], sizes = [8, 32], strides = [1, 1]} : vector<16x32xf32> to vector<8x32xf32>
    %c0_63 = arith.constant 0 : index
    %c0_64 = arith.constant 0 : index
    %151 = vector.load %arg12[%c0_63, %c0_64] : memref<1x32xf32, #tpu.memory_space<vmem>>, vector<1x32xf32>
    %152 = tpu.transpose %149, [1, 0] : vector<8x32xf32> -> vector<32x8xf32>
    %cst_65 = arith.constant dense<0.000000e+00> : vector<1x8xf32>
    %153 = tpu.matmul %151, %152, %cst_65 {dimension_numbers = #tpu.dot_dimension_numbers<[1], [0], [0], [1], [0, 0, 1, 1], [], []>} : vector<1x32xf32>, vector<32x8xf32>, vector<1x8xf32> -> vector<1x8xf32>
    %c0_66 = arith.constant 0 : index
    %c0_67 = arith.constant 0 : index
    %154 = vector.load %arg13[%c0_66, %c0_67] : memref<1x1xf32, #tpu.memory_space<vmem>>, vector<1x1xf32>
    %155 = vector.broadcast %154 : vector<1x1xf32> to vector<1x8xf32>
    %156 = arith.addf %153, %155 : vector<1x8xf32>
    %157 = vector.extract_strided_slice %3 {offsets = [1, 0, 0], sizes = [1, 1, 8], strides = [1, 1, 1]} : vector<2x1x8xf32> to vector<1x1x8xf32>
    %158 = vector.shape_cast %157 : vector<1x1x8xf32> to vector<1x8xf32>
    %159 = arith.mulf %156, %158 : vector<1x8xf32>
    %c1 = arith.constant 1 : index
    %c0_68 = arith.constant 0 : index
    %c0_69 = arith.constant 0 : index
    %160 = vector.load %arg14[%c1, %c0_68, %c0_69] : memref<2x1x8xf32, #tpu.memory_space<vmem>>, vector<1x1x8xf32>
    %161 = vector.shape_cast %160 : vector<1x1x8xf32> to vector<1x8xf32>
    %162 = vector.shape_cast %159 : vector<1x8xf32> to vector<1x1x8xf32>
    tpu.vector_store %arg14[%c1, %c0_68, %c0_69], %162 {strides = array<i32>} : memref<2x1x8xf32, #tpu.memory_space<vmem>>, vector<1x1x8xf32>,
    %cst_70 = arith.constant 0.000000e+00 : f32
    %163 = vector.broadcast %cst_70 : f32 to vector<1x8xf32>
    %164 = arith.maximumf %159, %163 : vector<1x8xf32>
    %165 = math.absf %159 : vector<1x8xf32>
    %cst_71 = arith.constant 0.000000e+00 : f32
    %166 = vector.broadcast %cst_71 : f32 to vector<1x8xf32>
    %167 = arith.subf %166, %165 : vector<1x8xf32>
    %168 = math.exp %167 : vector<1x8xf32>
    %cst_72 = arith.constant 1.000000e+00 : f32
    %169 = vector.broadcast %cst_72 : f32 to vector<1x8xf32>
    %170 = arith.addf %169, %168 : vector<1x8xf32>
    %171 = math.log %170 : vector<1x8xf32>
    %172 = arith.addf %164, %171 : vector<1x8xf32>
    %173 = vector.extract_strided_slice %3 {offsets = [1, 0, 0], sizes = [1, 1, 8], strides = [1, 1, 1]} : vector<2x1x8xf32> to vector<1x1x8xf32>
    %174 = vector.shape_cast %173 : vector<1x1x8xf32> to vector<1x8xf32>
    %175 = arith.mulf %172, %174 : vector<1x8xf32>
    %cst_73 = arith.constant dense<0.000000e+00> : vector<1x8xf32>
    %176 = tpu.matmul %175, %86, %cst_73 {dimension_numbers = #tpu.dot_dimension_numbers<[1], [0], [0], [1], [0, 0, 1, 1], [], []>} : vector<1x8xf32>, vector<8x8xf32>, vector<1x8xf32> -> vector<1x8xf32>
    %cst_74 = arith.constant 5.000000e-01 : f32
    %177 = vector.broadcast %cst_74 : f32 to vector<1x8xf32>
    %178 = arith.mulf %177, %175 : vector<1x8xf32>
    %179 = arith.subf %176, %178 : vector<1x8xf32>
    %180 = vector.broadcast %88 : vector<16x1xf32> to vector<16x8xf32>
    %181 = vector.broadcast %179 : vector<1x8xf32> to vector<16x8xf32>
    %182 = arith.subf %180, %181 : vector<16x8xf32>
    %183 = arith.mulf %182, %182 : vector<16x8xf32>
    %cst_75 = arith.constant 0.000000e+00 : f32
    %184 = vector.broadcast %cst_75 : f32 to vector<16x8xf32>
    %185 = arith.subf %184, %183 : vector<16x8xf32>
    %cst_76 = arith.constant 5.000000e-01 : f32
    %186 = vector.broadcast %cst_76 : f32 to vector<16x8xf32>
    %187 = arith.mulf %185, %186 : vector<16x8xf32>
    %188 = vector.extract_strided_slice %2 {offsets = [1, 0, 0], sizes = [1, 1, 8], strides = [1, 1, 1]} : vector<2x1x8xf32> to vector<1x1x8xf32>
    %189 = vector.shape_cast %188 : vector<1x1x8xf32> to vector<1x8xf32>
    %190 = vector.broadcast %189 : vector<1x8xf32> to vector<16x8xf32>
    %191 = arith.addf %187, %190 : vector<16x8xf32>
    %cst_77 = arith.constant dense<0xFF800000> : vector<16xf32>
    %192 = vector.multi_reduction <maximumf>, %191, %cst_77 [1] : vector<16x8xf32> to vector<16xf32>
    %193 = vector.shape_cast %192 : vector<16xf32> to vector<16x1xf32>
    %194 = vector.broadcast %193 : vector<16x1xf32> to vector<16x8xf32>
    %195 = arith.subf %191, %194 : vector<16x8xf32>
    %196 = math.exp %195 : vector<16x8xf32>
    %cst_78 = arith.constant dense<0.000000e+00> : vector<16xf32>
    %197 = vector.multi_reduction <add>, %196, %cst_78 [1] : vector<16x8xf32> to vector<16xf32>
    %198 = vector.shape_cast %197 : vector<16xf32> to vector<16x1xf32>
    %199 = tpu.reciprocal %198 {approx = true} : vector<16x1xf32> -> vector<16x1xf32>
    %200 = vector.broadcast %199 : vector<16x1xf32> to vector<16x8xf32>
    %201 = arith.mulf %196, %200 : vector<16x8xf32>
    %c1_79 = arith.constant 1 : index
    %c0_80 = arith.constant 0 : index
    %c0_81 = arith.constant 0 : index
    %202 = vector.load %arg15[%c1_79, %c0_80, %c0_81] : memref<2x16x8xf32, #tpu.memory_space<vmem>>, vector<1x16x8xf32>
    %203 = vector.shape_cast %202 : vector<1x16x8xf32> to vector<16x8xf32>
    %204 = vector.shape_cast %201 : vector<16x8xf32> to vector<1x16x8xf32>
    tpu.vector_store %arg15[%c1_79, %c0_80, %c0_81], %204 {strides = array<i32>} : memref<2x16x8xf32, #tpu.memory_space<vmem>>, vector<1x16x8xf32>,
    %cst_82 = arith.constant dense<0.000000e+00> : vector<16x32xf32>
    %205 = tpu.matmul %201, %150, %cst_82 {dimension_numbers = #tpu.dot_dimension_numbers<[1], [0], [0], [1], [0, 0, 1, 1], [], []>} : vector<16x8xf32>, vector<8x32xf32>, vector<16x32xf32> -> vector<16x32xf32>
    %c1_83 = arith.constant 1 : index
    %c0_84 = arith.constant 0 : index
    %c0_85 = arith.constant 0 : index
    %206 = vector.load %arg16[%c1_83, %c0_84, %c0_85] : memref<2x16x32xf32, #tpu.memory_space<vmem>>, vector<1x16x32xf32>
    %207 = vector.shape_cast %206 : vector<1x16x32xf32> to vector<16x32xf32>
    %208 = vector.shape_cast %205 : vector<16x32xf32> to vector<1x16x32xf32>
    tpu.vector_store %arg16[%c1_83, %c0_84, %c0_85], %208 {strides = array<i32>} : memref<2x16x32xf32, #tpu.memory_space<vmem>>, vector<1x16x32xf32>,
    return
  }
  func.func @transform_0(%arg0: i32) -> (i32, i32, i32) {
    %c0_i32 = arith.constant 0 : i32
    %c0_i32_0 = arith.constant 0 : i32
    %c0_i32_1 = arith.constant 0 : i32
    %c0_i32_2 = arith.constant 0 : i32
    return %c0_i32, %c0_i32_0, %c0_i32_1 : i32, i32, i32
  }
  func.func @transform_1(%arg0: i32) -> (i32, i32, i32) {
    %c0_i32 = arith.constant 0 : i32
    %c0_i32_0 = arith.constant 0 : i32
    %c0_i32_1 = arith.constant 0 : i32
    %c0_i32_2 = arith.constant 0 : i32
    return %c0_i32, %c0_i32_0, %c0_i32_1 : i32, i32, i32
  }
  func.func @transform_2(%arg0: i32) -> (i32, i32, i32) {
    %c0_i32 = arith.constant 0 : i32
    %c0_i32_0 = arith.constant 0 : i32
    %c0_i32_1 = arith.constant 0 : i32
    %c0_i32_2 = arith.constant 0 : i32
    return %c0_i32, %c0_i32_0, %c0_i32_1 : i32, i32, i32
  }
  func.func @transform_3(%arg0: i32) -> (i32, i32) {
    %c0_i32 = arith.constant 0 : i32
    %c0_i32_0 = arith.constant 0 : i32
    %c0_i32_1 = arith.constant 0 : i32
    return %c0_i32, %c0_i32_0 : i32, i32
  }
  func.func @transform_4(%arg0: i32) -> (i32, i32) {
    %c0_i32 = arith.constant 0 : i32
    %c0_i32_0 = arith.constant 0 : i32
    %c0_i32_1 = arith.constant 0 : i32
    return %c0_i32, %c0_i32_0 : i32, i32
  }
  func.func @transform_5(%arg0: i32) -> (i32, i32) {
    %c0_i32 = arith.constant 0 : i32
    %c0_i32_0 = arith.constant 0 : i32
    %c0_i32_1 = arith.constant 0 : i32
    return %c0_i32, %c0_i32_0 : i32, i32
  }
  func.func @transform_6(%arg0: i32) -> (i32, i32) {
    %c0_i32 = arith.constant 0 : i32
    %c0_i32_0 = arith.constant 0 : i32
    %c0_i32_1 = arith.constant 0 : i32
    return %c0_i32, %c0_i32_0 : i32, i32
  }
  func.func @transform_7(%arg0: i32) -> (i32, i32) {
    %c0_i32 = arith.constant 0 : i32
    %c0_i32_0 = arith.constant 0 : i32
    %c0_i32_1 = arith.constant 0 : i32
    return %c0_i32, %c0_i32_0 : i32, i32
  }
  func.func @transform_8(%arg0: i32) -> (i32, i32) {
    %c0_i32 = arith.constant 0 : i32
    %c0_i32_0 = arith.constant 0 : i32
    %c0_i32_1 = arith.constant 0 : i32
    return %c0_i32, %c0_i32_0 : i32, i32
  }
  func.func @transform_9(%arg0: i32) -> (i32, i32) {
    %c0_i32 = arith.constant 0 : i32
    %c0_i32_0 = arith.constant 0 : i32
    %c0_i32_1 = arith.constant 0 : i32
    return %c0_i32, %c0_i32_0 : i32, i32
  }
  func.func @transform_10(%arg0: i32) -> (i32, i32) {
    %c0_i32 = arith.constant 0 : i32
    %c0_i32_0 = arith.constant 0 : i32
    %c0_i32_1 = arith.constant 0 : i32
    return %c0_i32, %c0_i32_0 : i32, i32
  }
  func.func @transform_11(%arg0: i32) -> (i32, i32) {
    %c0_i32 = arith.constant 0 : i32
    %c0_i32_0 = arith.constant 0 : i32
    %c0_i32_1 = arith.constant 0 : i32
    return %c0_i32, %c0_i32_0 : i32, i32
  }
  func.func @transform_12(%arg0: i32) -> (i32, i32) {
    %c0_i32 = arith.constant 0 : i32
    %c0_i32_0 = arith.constant 0 : i32
    %c0_i32_1 = arith.constant 0 : i32
    return %c0_i32, %c0_i32_0 : i32, i32
  }
  func.func @transform_13(%arg0: i32) -> (i32, i32, i32) {
    %c0_i32 = arith.constant 0 : i32
    %c0_i32_0 = arith.constant 0 : i32
    %c0_i32_1 = arith.constant 0 : i32
    %c0_i32_2 = arith.constant 0 : i32
    return %c0_i32, %c0_i32_0, %c0_i32_1 : i32, i32, i32
  }
  func.func @transform_14(%arg0: i32) -> (i32, i32, i32) {
    %c0_i32 = arith.constant 0 : i32
    %c0_i32_0 = arith.constant 0 : i32
    %c0_i32_1 = arith.constant 0 : i32
    %c0_i32_2 = arith.constant 0 : i32
    return %c0_i32, %c0_i32_0, %c0_i32_1 : i32, i32, i32
  }
  func.func @transform_15(%arg0: i32) -> (i32, i32, i32) {
    %c0_i32 = arith.constant 0 : i32
    %c0_i32_0 = arith.constant 0 : i32
    %c0_i32_1 = arith.constant 0 : i32
    %c0_i32_2 = arith.constant 0 : i32
    return %c0_i32, %c0_i32_0, %c0_i32_1 : i32, i32, i32
  }
}

module attributes {stable_mosaic.version = 11 : i64} {
  func.func @fft_stack_kernel(%arg0: i32, %arg1: memref<2x8x32xf32, #tpu.memory_space<vmem>>, %arg2: memref<2x1x8xf32, #tpu.memory_space<vmem>>, %arg3: memref<16x1xf32, #tpu.memory_space<vmem>>, %arg4: memref<2x32x96xf32, #tpu.memory_space<vmem>>, %arg5: memref<2x1x96xf32, #tpu.memory_space<vmem>>, %arg6: memref<2x32x32xf32, #tpu.memory_space<vmem>>, %arg7: memref<2x1x32xf32, #tpu.memory_space<vmem>>, %arg8: memref<2x1x32xf32, #tpu.memory_space<vmem>>, %arg9: memref<2x1x32xf32, #tpu.memory_space<vmem>>, %arg10: memref<2x96x64xf32, #tpu.memory_space<vmem>>, %arg11: memref<2x1x64xf32, #tpu.memory_space<vmem>>, %arg12: memref<2x64x32xf32, #tpu.memory_space<vmem>>, %arg13: memref<2x1x32xf32, #tpu.memory_space<vmem>>, %arg14: memref<2x1x32xf32, #tpu.memory_space<vmem>>, %arg15: memref<2x1x32xf32, #tpu.memory_space<vmem>>, %arg16: memref<2x8x32xf32, #tpu.memory_space<vmem>>, %arg17: memref<2x4x8x8xf32, #tpu.memory_space<vmem>>) attributes {dimension_semantics = [#tpu.dimension_semantics<arbitrary>], iteration_bounds = array<i64: 1>, scalar_prefetch = 0 : i64, scratch_operands = 0 : i64, tpu.core_type = #tpu.core_type<tc>, window_params = [{pipeline_mode = #tpu.pipeline_mode<synchronous>, transform_indices = @transform_0, window_bounds = array<i64: 2, 8, 32>}, {pipeline_mode = #tpu.pipeline_mode<synchronous>, transform_indices = @transform_1, window_bounds = array<i64: 2, 1, 8>}, {pipeline_mode = #tpu.pipeline_mode<synchronous>, transform_indices = @transform_2, window_bounds = array<i64: 16, 1>}, {pipeline_mode = #tpu.pipeline_mode<synchronous>, transform_indices = @transform_3, window_bounds = array<i64: 2, 32, 96>}, {pipeline_mode = #tpu.pipeline_mode<synchronous>, transform_indices = @transform_4, window_bounds = array<i64: 2, 1, 96>}, {pipeline_mode = #tpu.pipeline_mode<synchronous>, transform_indices = @transform_5, window_bounds = array<i64: 2, 32, 32>}, {pipeline_mode = #tpu.pipeline_mode<synchronous>, transform_indices = @transform_6, window_bounds = array<i64: 2, 1, 32>}, {pipeline_mode = #tpu.pipeline_mode<synchronous>, transform_indices = @transform_7, window_bounds = array<i64: 2, 1, 32>}, {pipeline_mode = #tpu.pipeline_mode<synchronous>, transform_indices = @transform_8, window_bounds = array<i64: 2, 1, 32>}, {pipeline_mode = #tpu.pipeline_mode<synchronous>, transform_indices = @transform_9, window_bounds = array<i64: 2, 96, 64>}, {pipeline_mode = #tpu.pipeline_mode<synchronous>, transform_indices = @transform_10, window_bounds = array<i64: 2, 1, 64>}, {pipeline_mode = #tpu.pipeline_mode<synchronous>, transform_indices = @transform_11, window_bounds = array<i64: 2, 64, 32>}, {pipeline_mode = #tpu.pipeline_mode<synchronous>, transform_indices = @transform_12, window_bounds = array<i64: 2, 1, 32>}, {pipeline_mode = #tpu.pipeline_mode<synchronous>, transform_indices = @transform_13, window_bounds = array<i64: 2, 1, 32>}, {pipeline_mode = #tpu.pipeline_mode<synchronous>, transform_indices = @transform_14, window_bounds = array<i64: 2, 1, 32>}, {pipeline_mode = #tpu.pipeline_mode<synchronous>, transform_indices = @transform_15, window_bounds = array<i64: 2, 8, 32>}, {pipeline_mode = #tpu.pipeline_mode<synchronous>, transform_indices = @transform_16, window_bounds = array<i64: 2, 4, 8, 8>}]} {
    %c0 = arith.constant 0 : index
    %c0_0 = arith.constant 0 : index
    %c0_1 = arith.constant 0 : index
    %0 = vector.load %arg1[%c0, %c0_0, %c0_1] : memref<2x8x32xf32, #tpu.memory_space<vmem>>, vector<2x8x32xf32>
    %1 = vector.shape_cast %0 : vector<2x8x32xf32> to vector<16x32xf32>
    %c0_2 = arith.constant 0 : index
    %c0_3 = arith.constant 0 : index
    %c0_4 = arith.constant 0 : index
    %2 = vector.load %arg2[%c0_2, %c0_3, %c0_4] : memref<2x1x8xf32, #tpu.memory_space<vmem>>, vector<2x1x8xf32>
    %c0_5 = arith.constant 0 : index
    %c0_6 = arith.constant 0 : index
    %3 = vector.load %arg3[%c0_5, %c0_6] : memref<16x1xf32, #tpu.memory_space<vmem>>, vector<16x1xf32>
    %c0_7 = arith.constant 0 : index
    %c0_8 = arith.constant 0 : index
    %c0_9 = arith.constant 0 : index
    %4 = vector.load %arg4[%c0_7, %c0_8, %c0_9] : memref<2x32x96xf32, #tpu.memory_space<vmem>>, vector<1x32x96xf32>
    %5 = vector.shape_cast %4 : vector<1x32x96xf32> to vector<32x96xf32>
    %cst = arith.constant dense<0.000000e+00> : vector<16x96xf32>
    %6 = tpu.matmul %1, %5, %cst {dimension_numbers = #tpu.dot_dimension_numbers<[1], [0], [0], [1], [0, 0, 1, 1], [], []>} : vector<16x32xf32>, vector<32x96xf32>, vector<16x96xf32> -> vector<16x96xf32>
    %c0_10 = arith.constant 0 : index
    %c0_11 = arith.constant 0 : index
    %c0_12 = arith.constant 0 : index
    %7 = vector.load %arg5[%c0_10, %c0_11, %c0_12] : memref<2x1x96xf32, #tpu.memory_space<vmem>>, vector<1x1x96xf32>
    %8 = vector.shape_cast %7 : vector<1x1x96xf32> to vector<1x96xf32>
    %9 = vector.broadcast %8 : vector<1x96xf32> to vector<16x96xf32>
    %10 = arith.addf %6, %9 : vector<16x96xf32>
    %11 = vector.extract_strided_slice %10 {offsets = [0, 0], sizes = [8, 96], strides = [1, 1]} : vector<16x96xf32> to vector<8x96xf32>
    %12 = vector.extract_strided_slice %2 {offsets = [0, 0, 0], sizes = [1, 1, 8], strides = [1, 1, 1]} : vector<2x1x8xf32> to vector<1x1x8xf32>
    %13 = vector.shape_cast %12 : vector<1x1x8xf32> to vector<1x8xf32>
    %14 = vector.extract_strided_slice %11 {offsets = [0, 0], sizes = [8, 16], strides = [1, 1]} : vector<8x96xf32> to vector<8x16xf32>
    %15 = vector.extract_strided_slice %11 {offsets = [0, 32], sizes = [8, 16], strides = [1, 1]} : vector<8x96xf32> to vector<8x16xf32>
    %16 = vector.extract_strided_slice %11 {offsets = [0, 64], sizes = [8, 16], strides = [1, 1]} : vector<8x96xf32> to vector<8x16xf32>
    %17 = tpu.transpose %15, [1, 0] : vector<8x16xf32> -> vector<16x8xf32>
    %cst_13 = arith.constant dense<0.000000e+00> : vector<8x8xf32>
    %18 = tpu.matmul %14, %17, %cst_13 {dimension_numbers = #tpu.dot_dimension_numbers<[1], [0], [0], [1], [0, 0, 1, 1], [], []>} : vector<8x16xf32>, vector<16x8xf32>, vector<8x8xf32> -> vector<8x8xf32>
    %cst_14 = arith.constant 2.500000e-01 : f32
    %19 = vector.broadcast %cst_14 : f32 to vector<8x8xf32>
    %20 = arith.mulf %18, %19 : vector<8x8xf32>
    %21 = vector.broadcast %13 : vector<1x8xf32> to vector<8x8xf32>
    %22 = arith.addf %20, %21 : vector<8x8xf32>
    %cst_15 = arith.constant dense<0xFF800000> : vector<8xf32>
    %23 = vector.multi_reduction <maximumf>, %22, %cst_15 [1] : vector<8x8xf32> to vector<8xf32>
    %24 = vector.shape_cast %23 : vector<8xf32> to vector<8x1xf32>
    %25 = vector.broadcast %24 : vector<8x1xf32> to vector<8x8xf32>
    %26 = arith.subf %22, %25 : vector<8x8xf32>
    %27 = math.exp %26 : vector<8x8xf32>
    %cst_16 = arith.constant dense<0.000000e+00> : vector<8xf32>
    %28 = vector.multi_reduction <add>, %27, %cst_16 [1] : vector<8x8xf32> to vector<8xf32>
    %29 = vector.shape_cast %28 : vector<8xf32> to vector<8x1xf32>
    %30 = tpu.reciprocal %29 {approx = true} : vector<8x1xf32> -> vector<8x1xf32>
    %31 = vector.broadcast %30 : vector<8x1xf32> to vector<8x8xf32>
    %32 = arith.mulf %27, %31 : vector<8x8xf32>
    %c0_17 = arith.constant 0 : index
    %c0_18 = arith.constant 0 : index
    %c0_19 = arith.constant 0 : index
    %c0_20 = arith.constant 0 : index
    %33 = vector.load %arg17[%c0_17, %c0_18, %c0_19, %c0_20] : memref<2x4x8x8xf32, #tpu.memory_space<vmem>>, vector<1x1x8x8xf32>
    %34 = vector.shape_cast %33 : vector<1x1x8x8xf32> to vector<8x8xf32>
    %35 = vector.shape_cast %32 : vector<8x8xf32> to vector<1x1x8x8xf32>
    tpu.vector_store %arg17[%c0_17, %c0_18, %c0_19, %c0_20], %35 {strides = array<i32>} : memref<2x4x8x8xf32, #tpu.memory_space<vmem>>, vector<1x1x8x8xf32>,
    %cst_21 = arith.constant dense<0.000000e+00> : vector<8x16xf32>
    %36 = tpu.matmul %32, %16, %cst_21 {dimension_numbers = #tpu.dot_dimension_numbers<[1], [0], [0], [1], [0, 0, 1, 1], [], []>} : vector<8x8xf32>, vector<8x16xf32>, vector<8x16xf32> -> vector<8x16xf32>
    %37 = vector.extract_strided_slice %11 {offsets = [0, 16], sizes = [8, 16], strides = [1, 1]} : vector<8x96xf32> to vector<8x16xf32>
    %38 = vector.extract_strided_slice %11 {offsets = [0, 48], sizes = [8, 16], strides = [1, 1]} : vector<8x96xf32> to vector<8x16xf32>
    %39 = vector.extract_strided_slice %11 {offsets = [0, 80], sizes = [8, 16], strides = [1, 1]} : vector<8x96xf32> to vector<8x16xf32>
    %40 = tpu.transpose %38, [1, 0] : vector<8x16xf32> -> vector<16x8xf32>
    %cst_22 = arith.constant dense<0.000000e+00> : vector<8x8xf32>
    %41 = tpu.matmul %37, %40, %cst_22 {dimension_numbers = #tpu.dot_dimension_numbers<[1], [0], [0], [1], [0, 0, 1, 1], [], []>} : vector<8x16xf32>, vector<16x8xf32>, vector<8x8xf32> -> vector<8x8xf32>
    %cst_23 = arith.constant 2.500000e-01 : f32
    %42 = vector.broadcast %cst_23 : f32 to vector<8x8xf32>
    %43 = arith.mulf %41, %42 : vector<8x8xf32>
    %44 = vector.broadcast %13 : vector<1x8xf32> to vector<8x8xf32>
    %45 = arith.addf %43, %44 : vector<8x8xf32>
    %cst_24 = arith.constant dense<0xFF800000> : vector<8xf32>
    %46 = vector.multi_reduction <maximumf>, %45, %cst_24 [1] : vector<8x8xf32> to vector<8xf32>
    %47 = vector.shape_cast %46 : vector<8xf32> to vector<8x1xf32>
    %48 = vector.broadcast %47 : vector<8x1xf32> to vector<8x8xf32>
    %49 = arith.subf %45, %48 : vector<8x8xf32>
    %50 = math.exp %49 : vector<8x8xf32>
    %cst_25 = arith.constant dense<0.000000e+00> : vector<8xf32>
    %51 = vector.multi_reduction <add>, %50, %cst_25 [1] : vector<8x8xf32> to vector<8xf32>
    %52 = vector.shape_cast %51 : vector<8xf32> to vector<8x1xf32>
    %53 = tpu.reciprocal %52 {approx = true} : vector<8x1xf32> -> vector<8x1xf32>
    %54 = vector.broadcast %53 : vector<8x1xf32> to vector<8x8xf32>
    %55 = arith.mulf %50, %54 : vector<8x8xf32>
    %c0_26 = arith.constant 0 : index
    %c1 = arith.constant 1 : index
    %c0_27 = arith.constant 0 : index
    %c0_28 = arith.constant 0 : index
    %56 = vector.load %arg17[%c0_26, %c1, %c0_27, %c0_28] : memref<2x4x8x8xf32, #tpu.memory_space<vmem>>, vector<1x1x8x8xf32>
    %57 = vector.shape_cast %56 : vector<1x1x8x8xf32> to vector<8x8xf32>
    %58 = vector.shape_cast %55 : vector<8x8xf32> to vector<1x1x8x8xf32>
    tpu.vector_store %arg17[%c0_26, %c1, %c0_27, %c0_28], %58 {strides = array<i32>} : memref<2x4x8x8xf32, #tpu.memory_space<vmem>>, vector<1x1x8x8xf32>,
    %cst_29 = arith.constant dense<0.000000e+00> : vector<8x16xf32>
    %59 = tpu.matmul %55, %39, %cst_29 {dimension_numbers = #tpu.dot_dimension_numbers<[1], [0], [0], [1], [0, 0, 1, 1], [], []>} : vector<8x8xf32>, vector<8x16xf32>, vector<8x16xf32> -> vector<8x16xf32>
    %60 = tpu.concatenate %36, %59 in 1 : vector<8x16xf32>, vector<8x16xf32> -> vector<8x32xf32>
    %61 = vector.extract_strided_slice %10 {offsets = [8, 0], sizes = [8, 96], strides = [1, 1]} : vector<16x96xf32> to vector<8x96xf32>
    %62 = vector.extract_strided_slice %2 {offsets = [1, 0, 0], sizes = [1, 1, 8], strides = [1, 1, 1]} : vector<2x1x8xf32> to vector<1x1x8xf32>
    %63 = vector.shape_cast %62 : vector<1x1x8xf32> to vector<1x8xf32>
    %64 = vector.extract_strided_slice %61 {offsets = [0, 0], sizes = [8, 16], strides = [1, 1]} : vector<8x96xf32> to vector<8x16xf32>
    %65 = vector.extract_strided_slice %61 {offsets = [0, 32], sizes = [8, 16], strides = [1, 1]} : vector<8x96xf32> to vector<8x16xf32>
    %66 = vector.extract_strided_slice %61 {offsets = [0, 64], sizes = [8, 16], strides = [1, 1]} : vector<8x96xf32> to vector<8x16xf32>
    %67 = tpu.transpose %65, [1, 0] : vector<8x16xf32> -> vector<16x8xf32>
    %cst_30 = arith.constant dense<0.000000e+00> : vector<8x8xf32>
    %68 = tpu.matmul %64, %67, %cst_30 {dimension_numbers = #tpu.dot_dimension_numbers<[1], [0], [0], [1], [0, 0, 1, 1], [], []>} : vector<8x16xf32>, vector<16x8xf32>, vector<8x8xf32> -> vector<8x8xf32>
    %cst_31 = arith.constant 2.500000e-01 : f32
    %69 = vector.broadcast %cst_31 : f32 to vector<8x8xf32>
    %70 = arith.mulf %68, %69 : vector<8x8xf32>
    %71 = vector.broadcast %63 : vector<1x8xf32> to vector<8x8xf32>
    %72 = arith.addf %70, %71 : vector<8x8xf32>
    %cst_32 = arith.constant dense<0xFF800000> : vector<8xf32>
    %73 = vector.multi_reduction <maximumf>, %72, %cst_32 [1] : vector<8x8xf32> to vector<8xf32>
    %74 = vector.shape_cast %73 : vector<8xf32> to vector<8x1xf32>
    %75 = vector.broadcast %74 : vector<8x1xf32> to vector<8x8xf32>
    %76 = arith.subf %72, %75 : vector<8x8xf32>
    %77 = math.exp %76 : vector<8x8xf32>
    %cst_33 = arith.constant dense<0.000000e+00> : vector<8xf32>
    %78 = vector.multi_reduction <add>, %77, %cst_33 [1] : vector<8x8xf32> to vector<8xf32>
    %79 = vector.shape_cast %78 : vector<8xf32> to vector<8x1xf32>
    %80 = tpu.reciprocal %79 {approx = true} : vector<8x1xf32> -> vector<8x1xf32>
    %81 = vector.broadcast %80 : vector<8x1xf32> to vector<8x8xf32>
    %82 = arith.mulf %77, %81 : vector<8x8xf32>
    %c0_34 = arith.constant 0 : index
    %c2 = arith.constant 2 : index
    %c0_35 = arith.constant 0 : index
    %c0_36 = arith.constant 0 : index
    %83 = vector.load %arg17[%c0_34, %c2, %c0_35, %c0_36] : memref<2x4x8x8xf32, #tpu.memory_space<vmem>>, vector<1x1x8x8xf32>
    %84 = vector.shape_cast %83 : vector<1x1x8x8xf32> to vector<8x8xf32>
    %85 = vector.shape_cast %82 : vector<8x8xf32> to vector<1x1x8x8xf32>
    tpu.vector_store %arg17[%c0_34, %c2, %c0_35, %c0_36], %85 {strides = array<i32>} : memref<2x4x8x8xf32, #tpu.memory_space<vmem>>, vector<1x1x8x8xf32>,
    %cst_37 = arith.constant dense<0.000000e+00> : vector<8x16xf32>
    %86 = tpu.matmul %82, %66, %cst_37 {dimension_numbers = #tpu.dot_dimension_numbers<[1], [0], [0], [1], [0, 0, 1, 1], [], []>} : vector<8x8xf32>, vector<8x16xf32>, vector<8x16xf32> -> vector<8x16xf32>
    %87 = vector.extract_strided_slice %61 {offsets = [0, 16], sizes = [8, 16], strides = [1, 1]} : vector<8x96xf32> to vector<8x16xf32>
    %88 = vector.extract_strided_slice %61 {offsets = [0, 48], sizes = [8, 16], strides = [1, 1]} : vector<8x96xf32> to vector<8x16xf32>
    %89 = vector.extract_strided_slice %61 {offsets = [0, 80], sizes = [8, 16], strides = [1, 1]} : vector<8x96xf32> to vector<8x16xf32>
    %90 = tpu.transpose %88, [1, 0] : vector<8x16xf32> -> vector<16x8xf32>
    %cst_38 = arith.constant dense<0.000000e+00> : vector<8x8xf32>
    %91 = tpu.matmul %87, %90, %cst_38 {dimension_numbers = #tpu.dot_dimension_numbers<[1], [0], [0], [1], [0, 0, 1, 1], [], []>} : vector<8x16xf32>, vector<16x8xf32>, vector<8x8xf32> -> vector<8x8xf32>
    %cst_39 = arith.constant 2.500000e-01 : f32
    %92 = vector.broadcast %cst_39 : f32 to vector<8x8xf32>
    %93 = arith.mulf %91, %92 : vector<8x8xf32>
    %94 = vector.broadcast %63 : vector<1x8xf32> to vector<8x8xf32>
    %95 = arith.addf %93, %94 : vector<8x8xf32>
    %cst_40 = arith.constant dense<0xFF800000> : vector<8xf32>
    %96 = vector.multi_reduction <maximumf>, %95, %cst_40 [1] : vector<8x8xf32> to vector<8xf32>
    %97 = vector.shape_cast %96 : vector<8xf32> to vector<8x1xf32>
    %98 = vector.broadcast %97 : vector<8x1xf32> to vector<8x8xf32>
    %99 = arith.subf %95, %98 : vector<8x8xf32>
    %100 = math.exp %99 : vector<8x8xf32>
    %cst_41 = arith.constant dense<0.000000e+00> : vector<8xf32>
    %101 = vector.multi_reduction <add>, %100, %cst_41 [1] : vector<8x8xf32> to vector<8xf32>
    %102 = vector.shape_cast %101 : vector<8xf32> to vector<8x1xf32>
    %103 = tpu.reciprocal %102 {approx = true} : vector<8x1xf32> -> vector<8x1xf32>
    %104 = vector.broadcast %103 : vector<8x1xf32> to vector<8x8xf32>
    %105 = arith.mulf %100, %104 : vector<8x8xf32>
    %c0_42 = arith.constant 0 : index
    %c3 = arith.constant 3 : index
    %c0_43 = arith.constant 0 : index
    %c0_44 = arith.constant 0 : index
    %106 = vector.load %arg17[%c0_42, %c3, %c0_43, %c0_44] : memref<2x4x8x8xf32, #tpu.memory_space<vmem>>, vector<1x1x8x8xf32>
    %107 = vector.shape_cast %106 : vector<1x1x8x8xf32> to vector<8x8xf32>
    %108 = vector.shape_cast %105 : vector<8x8xf32> to vector<1x1x8x8xf32>
    tpu.vector_store %arg17[%c0_42, %c3, %c0_43, %c0_44], %108 {strides = array<i32>} : memref<2x4x8x8xf32, #tpu.memory_space<vmem>>, vector<1x1x8x8xf32>,
    %cst_45 = arith.constant dense<0.000000e+00> : vector<8x16xf32>
    %109 = tpu.matmul %105, %89, %cst_45 {dimension_numbers = #tpu.dot_dimension_numbers<[1], [0], [0], [1], [0, 0, 1, 1], [], []>} : vector<8x8xf32>, vector<8x16xf32>, vector<8x16xf32> -> vector<8x16xf32>
    %110 = tpu.concatenate %86, %109 in 1 : vector<8x16xf32>, vector<8x16xf32> -> vector<8x32xf32>
    %111 = tpu.concatenate %60, %110 in 0 : vector<8x32xf32>, vector<8x32xf32> -> vector<16x32xf32>
    %c0_46 = arith.constant 0 : index
    %c0_47 = arith.constant 0 : index
    %c0_48 = arith.constant 0 : index
    %112 = vector.load %arg6[%c0_46, %c0_47, %c0_48] : memref<2x32x32xf32, #tpu.memory_space<vmem>>, vector<1x32x32xf32>
    %113 = vector.shape_cast %112 : vector<1x32x32xf32> to vector<32x32xf32>
    %cst_49 = arith.constant dense<0.000000e+00> : vector<16x32xf32>
    %114 = tpu.matmul %111, %113, %cst_49 {dimension_numbers = #tpu.dot_dimension_numbers<[1], [0], [0], [1], [0, 0, 1, 1], [], []>} : vector<16x32xf32>, vector<32x32xf32>, vector<16x32xf32> -> vector<16x32xf32>
    %c0_50 = arith.constant 0 : index
    %c0_51 = arith.constant 0 : index
    %c0_52 = arith.constant 0 : index
    %115 = vector.load %arg7[%c0_50, %c0_51, %c0_52] : memref<2x1x32xf32, #tpu.memory_space<vmem>>, vector<1x1x32xf32>
    %116 = vector.shape_cast %115 : vector<1x1x32xf32> to vector<1x32xf32>
    %117 = vector.broadcast %116 : vector<1x32xf32> to vector<16x32xf32>
    %118 = arith.addf %114, %117 : vector<16x32xf32>
    %119 = arith.addf %118, %1 : vector<16x32xf32>
    %c0_53 = arith.constant 0 : index
    %c0_54 = arith.constant 0 : index
    %c0_55 = arith.constant 0 : index
    %120 = vector.load %arg8[%c0_53, %c0_54, %c0_55] : memref<2x1x32xf32, #tpu.memory_space<vmem>>, vector<1x1x32xf32>
    %121 = vector.shape_cast %120 : vector<1x1x32xf32> to vector<1x32xf32>
    %c0_56 = arith.constant 0 : index
    %c0_57 = arith.constant 0 : index
    %c0_58 = arith.constant 0 : index
    %122 = vector.load %arg9[%c0_56, %c0_57, %c0_58] : memref<2x1x32xf32, #tpu.memory_space<vmem>>, vector<1x1x32xf32>
    %123 = vector.shape_cast %122 : vector<1x1x32xf32> to vector<1x32xf32>
    %cst_59 = arith.constant dense<0.000000e+00> : vector<16xf32>
    %124 = vector.multi_reduction <add>, %119, %cst_59 [1] : vector<16x32xf32> to vector<16xf32>
    %125 = vector.shape_cast %124 : vector<16xf32> to vector<16x1xf32>
    %cst_60 = arith.constant 3.200000e+01 : f32
    %126 = vector.broadcast %cst_60 : f32 to vector<16x1xf32>
    %127 = arith.divf %125, %126 : vector<16x1xf32>
    %128 = vector.broadcast %127 : vector<16x1xf32> to vector<16x32xf32>
    %129 = arith.subf %119, %128 : vector<16x32xf32>
    %130 = arith.mulf %129, %129 : vector<16x32xf32>
    %cst_61 = arith.constant dense<0.000000e+00> : vector<16xf32>
    %131 = vector.multi_reduction <add>, %130, %cst_61 [1] : vector<16x32xf32> to vector<16xf32>
    %132 = vector.shape_cast %131 : vector<16xf32> to vector<16x1xf32>
    %cst_62 = arith.constant 3.200000e+01 : f32
    %133 = vector.broadcast %cst_62 : f32 to vector<16x1xf32>
    %134 = arith.divf %132, %133 : vector<16x1xf32>
    %135 = vector.broadcast %127 : vector<16x1xf32> to vector<16x32xf32>
    %136 = arith.subf %119, %135 : vector<16x32xf32>
    %cst_63 = arith.constant 9.99999974E-6 : f32
    %137 = vector.broadcast %cst_63 : f32 to vector<16x1xf32>
    %138 = arith.addf %134, %137 : vector<16x1xf32>
    %139 = math.rsqrt %138 : vector<16x1xf32>
    %140 = vector.broadcast %139 : vector<16x1xf32> to vector<16x32xf32>
    %141 = arith.mulf %136, %140 : vector<16x32xf32>
    %142 = vector.broadcast %121 : vector<1x32xf32> to vector<16x32xf32>
    %143 = arith.mulf %141, %142 : vector<16x32xf32>
    %144 = vector.broadcast %123 : vector<1x32xf32> to vector<16x32xf32>
    %145 = arith.addf %143, %144 : vector<16x32xf32>
    %146 = vector.broadcast %3 : vector<16x1xf32> to vector<16x32xf32>
    %147 = arith.mulf %145, %146 : vector<16x32xf32>
    %c0_64 = arith.constant 0 : index
    %c0_65 = arith.constant 0 : index
    %c0_66 = arith.constant 0 : index
    %148 = vector.load %arg10[%c0_64, %c0_65, %c0_66] : memref<2x96x64xf32, #tpu.memory_space<vmem>>, vector<1x96x64xf32>
    %149 = vector.shape_cast %148 : vector<1x96x64xf32> to vector<96x64xf32>
    %c0_67 = arith.constant 0 : index
    %c0_68 = arith.constant 0 : index
    %c0_69 = arith.constant 0 : index
    %150 = vector.load %arg11[%c0_67, %c0_68, %c0_69] : memref<2x1x64xf32, #tpu.memory_space<vmem>>, vector<1x1x64xf32>
    %151 = vector.shape_cast %150 : vector<1x1x64xf32> to vector<1x64xf32>
    %152 = vector.shape_cast %147 : vector<16x32xf32> to vector<2x8x32xf32>
    %cst_70 = arith.constant 0.000000e+00 : f32
    %153 = vector.broadcast %cst_70 : f32 to vector<2x1x32xf32>
    %154 = tpu.concatenate %153, %152, %153 in 1 : vector<2x1x32xf32>, vector<2x8x32xf32>, vector<2x1x32xf32> -> vector<2x10x32xf32>
    %155 = vector.extract_strided_slice %154 {offsets = [0, 0, 0], sizes = [2, 8, 32], strides = [1, 1, 1]} : vector<2x10x32xf32> to vector<2x8x32xf32>
    %156 = vector.extract_strided_slice %154 {offsets = [0, 1, 0], sizes = [2, 8, 32], strides = [1, 1, 1]} : vector<2x10x32xf32> to vector<2x8x32xf32>
    %157 = vector.extract_strided_slice %154 {offsets = [0, 2, 0], sizes = [2, 8, 32], strides = [1, 1, 1]} : vector<2x10x32xf32> to vector<2x8x32xf32>
    %158 = tpu.concatenate %155, %156, %157 in 2 : vector<2x8x32xf32>, vector<2x8x32xf32>, vector<2x8x32xf32> -> vector<2x8x96xf32>
    %159 = vector.shape_cast %158 : vector<2x8x96xf32> to vector<16x96xf32>
    %cst_71 = arith.constant dense<0.000000e+00> : vector<16x64xf32>
    %160 = tpu.matmul %159, %149, %cst_71 {dimension_numbers = #tpu.dot_dimension_numbers<[1], [0], [0], [1], [0, 0, 1, 1], [], []>} : vector<16x96xf32>, vector<96x64xf32>, vector<16x64xf32> -> vector<16x64xf32>
    %161 = vector.broadcast %151 : vector<1x64xf32> to vector<16x64xf32>
    %162 = arith.addf %160, %161 : vector<16x64xf32>
    %cst_72 = arith.constant 0.000000e+00 : f32
    %163 = vector.broadcast %cst_72 : f32 to vector<16x64xf32>
    %164 = arith.maximumf %162, %163 : vector<16x64xf32>
    %c0_73 = arith.constant 0 : index
    %c0_74 = arith.constant 0 : index
    %c0_75 = arith.constant 0 : index
    %165 = vector.load %arg12[%c0_73, %c0_74, %c0_75] : memref<2x64x32xf32, #tpu.memory_space<vmem>>, vector<1x64x32xf32>
    %166 = vector.shape_cast %165 : vector<1x64x32xf32> to vector<64x32xf32>
    %c0_76 = arith.constant 0 : index
    %c0_77 = arith.constant 0 : index
    %c0_78 = arith.constant 0 : index
    %167 = vector.load %arg13[%c0_76, %c0_77, %c0_78] : memref<2x1x32xf32, #tpu.memory_space<vmem>>, vector<1x1x32xf32>
    %168 = vector.shape_cast %167 : vector<1x1x32xf32> to vector<1x32xf32>
    %cst_79 = arith.constant dense<0.000000e+00> : vector<16x32xf32>
    %169 = tpu.matmul %164, %166, %cst_79 {dimension_numbers = #tpu.dot_dimension_numbers<[1], [0], [0], [1], [0, 0, 1, 1], [], []>} : vector<16x64xf32>, vector<64x32xf32>, vector<16x32xf32> -> vector<16x32xf32>
    %170 = vector.broadcast %168 : vector<1x32xf32> to vector<16x32xf32>
    %171 = arith.addf %169, %170 : vector<16x32xf32>
    %172 = arith.addf %171, %147 : vector<16x32xf32>
    %c0_80 = arith.constant 0 : index
    %c0_81 = arith.constant 0 : index
    %c0_82 = arith.constant 0 : index
    %173 = vector.load %arg14[%c0_80, %c0_81, %c0_82] : memref<2x1x32xf32, #tpu.memory_space<vmem>>, vector<1x1x32xf32>
    %174 = vector.shape_cast %173 : vector<1x1x32xf32> to vector<1x32xf32>
    %c0_83 = arith.constant 0 : index
    %c0_84 = arith.constant 0 : index
    %c0_85 = arith.constant 0 : index
    %175 = vector.load %arg15[%c0_83, %c0_84, %c0_85] : memref<2x1x32xf32, #tpu.memory_space<vmem>>, vector<1x1x32xf32>
    %176 = vector.shape_cast %175 : vector<1x1x32xf32> to vector<1x32xf32>
    %cst_86 = arith.constant dense<0.000000e+00> : vector<16xf32>
    %177 = vector.multi_reduction <add>, %172, %cst_86 [1] : vector<16x32xf32> to vector<16xf32>
    %178 = vector.shape_cast %177 : vector<16xf32> to vector<16x1xf32>
    %cst_87 = arith.constant 3.200000e+01 : f32
    %179 = vector.broadcast %cst_87 : f32 to vector<16x1xf32>
    %180 = arith.divf %178, %179 : vector<16x1xf32>
    %181 = vector.broadcast %180 : vector<16x1xf32> to vector<16x32xf32>
    %182 = arith.subf %172, %181 : vector<16x32xf32>
    %183 = arith.mulf %182, %182 : vector<16x32xf32>
    %cst_88 = arith.constant dense<0.000000e+00> : vector<16xf32>
    %184 = vector.multi_reduction <add>, %183, %cst_88 [1] : vector<16x32xf32> to vector<16xf32>
    %185 = vector.shape_cast %184 : vector<16xf32> to vector<16x1xf32>
    %cst_89 = arith.constant 3.200000e+01 : f32
    %186 = vector.broadcast %cst_89 : f32 to vector<16x1xf32>
    %187 = arith.divf %185, %186 : vector<16x1xf32>
    %188 = vector.broadcast %180 : vector<16x1xf32> to vector<16x32xf32>
    %189 = arith.subf %172, %188 : vector<16x32xf32>
    %cst_90 = arith.constant 9.99999974E-6 : f32
    %190 = vector.broadcast %cst_90 : f32 to vector<16x1xf32>
    %191 = arith.addf %187, %190 : vector<16x1xf32>
    %192 = math.rsqrt %191 : vector<16x1xf32>
    %193 = vector.broadcast %192 : vector<16x1xf32> to vector<16x32xf32>
    %194 = arith.mulf %189, %193 : vector<16x32xf32>
    %195 = vector.broadcast %174 : vector<1x32xf32> to vector<16x32xf32>
    %196 = arith.mulf %194, %195 : vector<16x32xf32>
    %197 = vector.broadcast %176 : vector<1x32xf32> to vector<16x32xf32>
    %198 = arith.addf %196, %197 : vector<16x32xf32>
    %199 = vector.broadcast %3 : vector<16x1xf32> to vector<16x32xf32>
    %200 = arith.mulf %198, %199 : vector<16x32xf32>
    %c1_91 = arith.constant 1 : index
    %c0_92 = arith.constant 0 : index
    %c0_93 = arith.constant 0 : index
    %201 = vector.load %arg4[%c1_91, %c0_92, %c0_93] : memref<2x32x96xf32, #tpu.memory_space<vmem>>, vector<1x32x96xf32>
    %202 = vector.shape_cast %201 : vector<1x32x96xf32> to vector<32x96xf32>
    %cst_94 = arith.constant dense<0.000000e+00> : vector<16x96xf32>
    %203 = tpu.matmul %200, %202, %cst_94 {dimension_numbers = #tpu.dot_dimension_numbers<[1], [0], [0], [1], [0, 0, 1, 1], [], []>} : vector<16x32xf32>, vector<32x96xf32>, vector<16x96xf32> -> vector<16x96xf32>
    %c1_95 = arith.constant 1 : index
    %c0_96 = arith.constant 0 : index
    %c0_97 = arith.constant 0 : index
    %204 = vector.load %arg5[%c1_95, %c0_96, %c0_97] : memref<2x1x96xf32, #tpu.memory_space<vmem>>, vector<1x1x96xf32>
    %205 = vector.shape_cast %204 : vector<1x1x96xf32> to vector<1x96xf32>
    %206 = vector.broadcast %205 : vector<1x96xf32> to vector<16x96xf32>
    %207 = arith.addf %203, %206 : vector<16x96xf32>
    %208 = vector.extract_strided_slice %207 {offsets = [0, 0], sizes = [8, 96], strides = [1, 1]} : vector<16x96xf32> to vector<8x96xf32>
    %209 = vector.extract_strided_slice %2 {offsets = [0, 0, 0], sizes = [1, 1, 8], strides = [1, 1, 1]} : vector<2x1x8xf32> to vector<1x1x8xf32>
    %210 = vector.shape_cast %209 : vector<1x1x8xf32> to vector<1x8xf32>
    %211 = vector.extract_strided_slice %208 {offsets = [0, 0], sizes = [8, 16], strides = [1, 1]} : vector<8x96xf32> to vector<8x16xf32>
    %212 = vector.extract_strided_slice %208 {offsets = [0, 32], sizes = [8, 16], strides = [1, 1]} : vector<8x96xf32> to vector<8x16xf32>
    %213 = vector.extract_strided_slice %208 {offsets = [0, 64], sizes = [8, 16], strides = [1, 1]} : vector<8x96xf32> to vector<8x16xf32>
    %214 = tpu.transpose %212, [1, 0] : vector<8x16xf32> -> vector<16x8xf32>
    %cst_98 = arith.constant dense<0.000000e+00> : vector<8x8xf32>
    %215 = tpu.matmul %211, %214, %cst_98 {dimension_numbers = #tpu.dot_dimension_numbers<[1], [0], [0], [1], [0, 0, 1, 1], [], []>} : vector<8x16xf32>, vector<16x8xf32>, vector<8x8xf32> -> vector<8x8xf32>
    %cst_99 = arith.constant 2.500000e-01 : f32
    %216 = vector.broadcast %cst_99 : f32 to vector<8x8xf32>
    %217 = arith.mulf %215, %216 : vector<8x8xf32>
    %218 = vector.broadcast %210 : vector<1x8xf32> to vector<8x8xf32>
    %219 = arith.addf %217, %218 : vector<8x8xf32>
    %cst_100 = arith.constant dense<0xFF800000> : vector<8xf32>
    %220 = vector.multi_reduction <maximumf>, %219, %cst_100 [1] : vector<8x8xf32> to vector<8xf32>
    %221 = vector.shape_cast %220 : vector<8xf32> to vector<8x1xf32>
    %222 = vector.broadcast %221 : vector<8x1xf32> to vector<8x8xf32>
    %223 = arith.subf %219, %222 : vector<8x8xf32>
    %224 = math.exp %223 : vector<8x8xf32>
    %cst_101 = arith.constant dense<0.000000e+00> : vector<8xf32>
    %225 = vector.multi_reduction <add>, %224, %cst_101 [1] : vector<8x8xf32> to vector<8xf32>
    %226 = vector.shape_cast %225 : vector<8xf32> to vector<8x1xf32>
    %227 = tpu.reciprocal %226 {approx = true} : vector<8x1xf32> -> vector<8x1xf32>
    %228 = vector.broadcast %227 : vector<8x1xf32> to vector<8x8xf32>
    %229 = arith.mulf %224, %228 : vector<8x8xf32>
    %c1_102 = arith.constant 1 : index
    %c0_103 = arith.constant 0 : index
    %c0_104 = arith.constant 0 : index
    %c0_105 = arith.constant 0 : index
    %230 = vector.load %arg17[%c1_102, %c0_103, %c0_104, %c0_105] : memref<2x4x8x8xf32, #tpu.memory_space<vmem>>, vector<1x1x8x8xf32>
    %231 = vector.shape_cast %230 : vector<1x1x8x8xf32> to vector<8x8xf32>
    %232 = vector.shape_cast %229 : vector<8x8xf32> to vector<1x1x8x8xf32>
    tpu.vector_store %arg17[%c1_102, %c0_103, %c0_104, %c0_105], %232 {strides = array<i32>} : memref<2x4x8x8xf32, #tpu.memory_space<vmem>>, vector<1x1x8x8xf32>,
    %cst_106 = arith.constant dense<0.000000e+00> : vector<8x16xf32>
    %233 = tpu.matmul %229, %213, %cst_106 {dimension_numbers = #tpu.dot_dimension_numbers<[1], [0], [0], [1], [0, 0, 1, 1], [], []>} : vector<8x8xf32>, vector<8x16xf32>, vector<8x16xf32> -> vector<8x16xf32>
    %234 = vector.extract_strided_slice %208 {offsets = [0, 16], sizes = [8, 16], strides = [1, 1]} : vector<8x96xf32> to vector<8x16xf32>
    %235 = vector.extract_strided_slice %208 {offsets = [0, 48], sizes = [8, 16], strides = [1, 1]} : vector<8x96xf32> to vector<8x16xf32>
    %236 = vector.extract_strided_slice %208 {offsets = [0, 80], sizes = [8, 16], strides = [1, 1]} : vector<8x96xf32> to vector<8x16xf32>
    %237 = tpu.transpose %235, [1, 0] : vector<8x16xf32> -> vector<16x8xf32>
    %cst_107 = arith.constant dense<0.000000e+00> : vector<8x8xf32>
    %238 = tpu.matmul %234, %237, %cst_107 {dimension_numbers = #tpu.dot_dimension_numbers<[1], [0], [0], [1], [0, 0, 1, 1], [], []>} : vector<8x16xf32>, vector<16x8xf32>, vector<8x8xf32> -> vector<8x8xf32>
    %cst_108 = arith.constant 2.500000e-01 : f32
    %239 = vector.broadcast %cst_108 : f32 to vector<8x8xf32>
    %240 = arith.mulf %238, %239 : vector<8x8xf32>
    %241 = vector.broadcast %210 : vector<1x8xf32> to vector<8x8xf32>
    %242 = arith.addf %240, %241 : vector<8x8xf32>
    %cst_109 = arith.constant dense<0xFF800000> : vector<8xf32>
    %243 = vector.multi_reduction <maximumf>, %242, %cst_109 [1] : vector<8x8xf32> to vector<8xf32>
    %244 = vector.shape_cast %243 : vector<8xf32> to vector<8x1xf32>
    %245 = vector.broadcast %244 : vector<8x1xf32> to vector<8x8xf32>
    %246 = arith.subf %242, %245 : vector<8x8xf32>
    %247 = math.exp %246 : vector<8x8xf32>
    %cst_110 = arith.constant dense<0.000000e+00> : vector<8xf32>
    %248 = vector.multi_reduction <add>, %247, %cst_110 [1] : vector<8x8xf32> to vector<8xf32>
    %249 = vector.shape_cast %248 : vector<8xf32> to vector<8x1xf32>
    %250 = tpu.reciprocal %249 {approx = true} : vector<8x1xf32> -> vector<8x1xf32>
    %251 = vector.broadcast %250 : vector<8x1xf32> to vector<8x8xf32>
    %252 = arith.mulf %247, %251 : vector<8x8xf32>
    %c1_111 = arith.constant 1 : index
    %c1_112 = arith.constant 1 : index
    %c0_113 = arith.constant 0 : index
    %c0_114 = arith.constant 0 : index
    %253 = vector.load %arg17[%c1_111, %c1_112, %c0_113, %c0_114] : memref<2x4x8x8xf32, #tpu.memory_space<vmem>>, vector<1x1x8x8xf32>
    %254 = vector.shape_cast %253 : vector<1x1x8x8xf32> to vector<8x8xf32>
    %255 = vector.shape_cast %252 : vector<8x8xf32> to vector<1x1x8x8xf32>
    tpu.vector_store %arg17[%c1_111, %c1_112, %c0_113, %c0_114], %255 {strides = array<i32>} : memref<2x4x8x8xf32, #tpu.memory_space<vmem>>, vector<1x1x8x8xf32>,
    %cst_115 = arith.constant dense<0.000000e+00> : vector<8x16xf32>
    %256 = tpu.matmul %252, %236, %cst_115 {dimension_numbers = #tpu.dot_dimension_numbers<[1], [0], [0], [1], [0, 0, 1, 1], [], []>} : vector<8x8xf32>, vector<8x16xf32>, vector<8x16xf32> -> vector<8x16xf32>
    %257 = tpu.concatenate %233, %256 in 1 : vector<8x16xf32>, vector<8x16xf32> -> vector<8x32xf32>
    %258 = vector.extract_strided_slice %207 {offsets = [8, 0], sizes = [8, 96], strides = [1, 1]} : vector<16x96xf32> to vector<8x96xf32>
    %259 = vector.extract_strided_slice %2 {offsets = [1, 0, 0], sizes = [1, 1, 8], strides = [1, 1, 1]} : vector<2x1x8xf32> to vector<1x1x8xf32>
    %260 = vector.shape_cast %259 : vector<1x1x8xf32> to vector<1x8xf32>
    %261 = vector.extract_strided_slice %258 {offsets = [0, 0], sizes = [8, 16], strides = [1, 1]} : vector<8x96xf32> to vector<8x16xf32>
    %262 = vector.extract_strided_slice %258 {offsets = [0, 32], sizes = [8, 16], strides = [1, 1]} : vector<8x96xf32> to vector<8x16xf32>
    %263 = vector.extract_strided_slice %258 {offsets = [0, 64], sizes = [8, 16], strides = [1, 1]} : vector<8x96xf32> to vector<8x16xf32>
    %264 = tpu.transpose %262, [1, 0] : vector<8x16xf32> -> vector<16x8xf32>
    %cst_116 = arith.constant dense<0.000000e+00> : vector<8x8xf32>
    %265 = tpu.matmul %261, %264, %cst_116 {dimension_numbers = #tpu.dot_dimension_numbers<[1], [0], [0], [1], [0, 0, 1, 1], [], []>} : vector<8x16xf32>, vector<16x8xf32>, vector<8x8xf32> -> vector<8x8xf32>
    %cst_117 = arith.constant 2.500000e-01 : f32
    %266 = vector.broadcast %cst_117 : f32 to vector<8x8xf32>
    %267 = arith.mulf %265, %266 : vector<8x8xf32>
    %268 = vector.broadcast %260 : vector<1x8xf32> to vector<8x8xf32>
    %269 = arith.addf %267, %268 : vector<8x8xf32>
    %cst_118 = arith.constant dense<0xFF800000> : vector<8xf32>
    %270 = vector.multi_reduction <maximumf>, %269, %cst_118 [1] : vector<8x8xf32> to vector<8xf32>
    %271 = vector.shape_cast %270 : vector<8xf32> to vector<8x1xf32>
    %272 = vector.broadcast %271 : vector<8x1xf32> to vector<8x8xf32>
    %273 = arith.subf %269, %272 : vector<8x8xf32>
    %274 = math.exp %273 : vector<8x8xf32>
    %cst_119 = arith.constant dense<0.000000e+00> : vector<8xf32>
    %275 = vector.multi_reduction <add>, %274, %cst_119 [1] : vector<8x8xf32> to vector<8xf32>
    %276 = vector.shape_cast %275 : vector<8xf32> to vector<8x1xf32>
    %277 = tpu.reciprocal %276 {approx = true} : vector<8x1xf32> -> vector<8x1xf32>
    %278 = vector.broadcast %277 : vector<8x1xf32> to vector<8x8xf32>
    %279 = arith.mulf %274, %278 : vector<8x8xf32>
    %c1_120 = arith.constant 1 : index
    %c2_121 = arith.constant 2 : index
    %c0_122 = arith.constant 0 : index
    %c0_123 = arith.constant 0 : index
    %280 = vector.load %arg17[%c1_120, %c2_121, %c0_122, %c0_123] : memref<2x4x8x8xf32, #tpu.memory_space<vmem>>, vector<1x1x8x8xf32>
    %281 = vector.shape_cast %280 : vector<1x1x8x8xf32> to vector<8x8xf32>
    %282 = vector.shape_cast %279 : vector<8x8xf32> to vector<1x1x8x8xf32>
    tpu.vector_store %arg17[%c1_120, %c2_121, %c0_122, %c0_123], %282 {strides = array<i32>} : memref<2x4x8x8xf32, #tpu.memory_space<vmem>>, vector<1x1x8x8xf32>,
    %cst_124 = arith.constant dense<0.000000e+00> : vector<8x16xf32>
    %283 = tpu.matmul %279, %263, %cst_124 {dimension_numbers = #tpu.dot_dimension_numbers<[1], [0], [0], [1], [0, 0, 1, 1], [], []>} : vector<8x8xf32>, vector<8x16xf32>, vector<8x16xf32> -> vector<8x16xf32>
    %284 = vector.extract_strided_slice %258 {offsets = [0, 16], sizes = [8, 16], strides = [1, 1]} : vector<8x96xf32> to vector<8x16xf32>
    %285 = vector.extract_strided_slice %258 {offsets = [0, 48], sizes = [8, 16], strides = [1, 1]} : vector<8x96xf32> to vector<8x16xf32>
    %286 = vector.extract_strided_slice %258 {offsets = [0, 80], sizes = [8, 16], strides = [1, 1]} : vector<8x96xf32> to vector<8x16xf32>
    %287 = tpu.transpose %285, [1, 0] : vector<8x16xf32> -> vector<16x8xf32>
    %cst_125 = arith.constant dense<0.000000e+00> : vector<8x8xf32>
    %288 = tpu.matmul %284, %287, %cst_125 {dimension_numbers = #tpu.dot_dimension_numbers<[1], [0], [0], [1], [0, 0, 1, 1], [], []>} : vector<8x16xf32>, vector<16x8xf32>, vector<8x8xf32> -> vector<8x8xf32>
    %cst_126 = arith.constant 2.500000e-01 : f32
    %289 = vector.broadcast %cst_126 : f32 to vector<8x8xf32>
    %290 = arith.mulf %288, %289 : vector<8x8xf32>
    %291 = vector.broadcast %260 : vector<1x8xf32> to vector<8x8xf32>
    %292 = arith.addf %290, %291 : vector<8x8xf32>
    %cst_127 = arith.constant dense<0xFF800000> : vector<8xf32>
    %293 = vector.multi_reduction <maximumf>, %292, %cst_127 [1] : vector<8x8xf32> to vector<8xf32>
    %294 = vector.shape_cast %293 : vector<8xf32> to vector<8x1xf32>
    %295 = vector.broadcast %294 : vector<8x1xf32> to vector<8x8xf32>
    %296 = arith.subf %292, %295 : vector<8x8xf32>
    %297 = math.exp %296 : vector<8x8xf32>
    %cst_128 = arith.constant dense<0.000000e+00> : vector<8xf32>
    %298 = vector.multi_reduction <add>, %297, %cst_128 [1] : vector<8x8xf32> to vector<8xf32>
    %299 = vector.shape_cast %298 : vector<8xf32> to vector<8x1xf32>
    %300 = tpu.reciprocal %299 {approx = true} : vector<8x1xf32> -> vector<8x1xf32>
    %301 = vector.broadcast %300 : vector<8x1xf32> to vector<8x8xf32>
    %302 = arith.mulf %297, %301 : vector<8x8xf32>
    %c1_129 = arith.constant 1 : index
    %c3_130 = arith.constant 3 : index
    %c0_131 = arith.constant 0 : index
    %c0_132 = arith.constant 0 : index
    %303 = vector.load %arg17[%c1_129, %c3_130, %c0_131, %c0_132] : memref<2x4x8x8xf32, #tpu.memory_space<vmem>>, vector<1x1x8x8xf32>
    %304 = vector.shape_cast %303 : vector<1x1x8x8xf32> to vector<8x8xf32>
    %305 = vector.shape_cast %302 : vector<8x8xf32> to vector<1x1x8x8xf32>
    tpu.vector_store %arg17[%c1_129, %c3_130, %c0_131, %c0_132], %305 {strides = array<i32>} : memref<2x4x8x8xf32, #tpu.memory_space<vmem>>, vector<1x1x8x8xf32>,
    %cst_133 = arith.constant dense<0.000000e+00> : vector<8x16xf32>
    %306 = tpu.matmul %302, %286, %cst_133 {dimension_numbers = #tpu.dot_dimension_numbers<[1], [0], [0], [1], [0, 0, 1, 1], [], []>} : vector<8x8xf32>, vector<8x16xf32>, vector<8x16xf32> -> vector<8x16xf32>
    %307 = tpu.concatenate %283, %306 in 1 : vector<8x16xf32>, vector<8x16xf32> -> vector<8x32xf32>
    %308 = tpu.concatenate %257, %307 in 0 : vector<8x32xf32>, vector<8x32xf32> -> vector<16x32xf32>
    %c1_134 = arith.constant 1 : index
    %c0_135 = arith.constant 0 : index
    %c0_136 = arith.constant 0 : index
    %309 = vector.load %arg6[%c1_134, %c0_135, %c0_136] : memref<2x32x32xf32, #tpu.memory_space<vmem>>, vector<1x32x32xf32>
    %310 = vector.shape_cast %309 : vector<1x32x32xf32> to vector<32x32xf32>
    %cst_137 = arith.constant dense<0.000000e+00> : vector<16x32xf32>
    %311 = tpu.matmul %308, %310, %cst_137 {dimension_numbers = #tpu.dot_dimension_numbers<[1], [0], [0], [1], [0, 0, 1, 1], [], []>} : vector<16x32xf32>, vector<32x32xf32>, vector<16x32xf32> -> vector<16x32xf32>
    %c1_138 = arith.constant 1 : index
    %c0_139 = arith.constant 0 : index
    %c0_140 = arith.constant 0 : index
    %312 = vector.load %arg7[%c1_138, %c0_139, %c0_140] : memref<2x1x32xf32, #tpu.memory_space<vmem>>, vector<1x1x32xf32>
    %313 = vector.shape_cast %312 : vector<1x1x32xf32> to vector<1x32xf32>
    %314 = vector.broadcast %313 : vector<1x32xf32> to vector<16x32xf32>
    %315 = arith.addf %311, %314 : vector<16x32xf32>
    %316 = arith.addf %315, %200 : vector<16x32xf32>
    %c1_141 = arith.constant 1 : index
    %c0_142 = arith.constant 0 : index
    %c0_143 = arith.constant 0 : index
    %317 = vector.load %arg8[%c1_141, %c0_142, %c0_143] : memref<2x1x32xf32, #tpu.memory_space<vmem>>, vector<1x1x32xf32>
    %318 = vector.shape_cast %317 : vector<1x1x32xf32> to vector<1x32xf32>
    %c1_144 = arith.constant 1 : index
    %c0_145 = arith.constant 0 : index
    %c0_146 = arith.constant 0 : index
    %319 = vector.load %arg9[%c1_144, %c0_145, %c0_146] : memref<2x1x32xf32, #tpu.memory_space<vmem>>, vector<1x1x32xf32>
    %320 = vector.shape_cast %319 : vector<1x1x32xf32> to vector<1x32xf32>
    %cst_147 = arith.constant dense<0.000000e+00> : vector<16xf32>
    %321 = vector.multi_reduction <add>, %316, %cst_147 [1] : vector<16x32xf32> to vector<16xf32>
    %322 = vector.shape_cast %321 : vector<16xf32> to vector<16x1xf32>
    %cst_148 = arith.constant 3.200000e+01 : f32
    %323 = vector.broadcast %cst_148 : f32 to vector<16x1xf32>
    %324 = arith.divf %322, %323 : vector<16x1xf32>
    %325 = vector.broadcast %324 : vector<16x1xf32> to vector<16x32xf32>
    %326 = arith.subf %316, %325 : vector<16x32xf32>
    %327 = arith.mulf %326, %326 : vector<16x32xf32>
    %cst_149 = arith.constant dense<0.000000e+00> : vector<16xf32>
    %328 = vector.multi_reduction <add>, %327, %cst_149 [1] : vector<16x32xf32> to vector<16xf32>
    %329 = vector.shape_cast %328 : vector<16xf32> to vector<16x1xf32>
    %cst_150 = arith.constant 3.200000e+01 : f32
    %330 = vector.broadcast %cst_150 : f32 to vector<16x1xf32>
    %331 = arith.divf %329, %330 : vector<16x1xf32>
    %332 = vector.broadcast %324 : vector<16x1xf32> to vector<16x32xf32>
    %333 = arith.subf %316, %332 : vector<16x32xf32>
    %cst_151 = arith.constant 9.99999974E-6 : f32
    %334 = vector.broadcast %cst_151 : f32 to vector<16x1xf32>
    %335 = arith.addf %331, %334 : vector<16x1xf32>
    %336 = math.rsqrt %335 : vector<16x1xf32>
    %337 = vector.broadcast %336 : vector<16x1xf32> to vector<16x32xf32>
    %338 = arith.mulf %333, %337 : vector<16x32xf32>
    %339 = vector.broadcast %318 : vector<1x32xf32> to vector<16x32xf32>
    %340 = arith.mulf %338, %339 : vector<16x32xf32>
    %341 = vector.broadcast %320 : vector<1x32xf32> to vector<16x32xf32>
    %342 = arith.addf %340, %341 : vector<16x32xf32>
    %343 = vector.broadcast %3 : vector<16x1xf32> to vector<16x32xf32>
    %344 = arith.mulf %342, %343 : vector<16x32xf32>
    %c1_152 = arith.constant 1 : index
    %c0_153 = arith.constant 0 : index
    %c0_154 = arith.constant 0 : index
    %345 = vector.load %arg10[%c1_152, %c0_153, %c0_154] : memref<2x96x64xf32, #tpu.memory_space<vmem>>, vector<1x96x64xf32>
    %346 = vector.shape_cast %345 : vector<1x96x64xf32> to vector<96x64xf32>
    %c1_155 = arith.constant 1 : index
    %c0_156 = arith.constant 0 : index
    %c0_157 = arith.constant 0 : index
    %347 = vector.load %arg11[%c1_155, %c0_156, %c0_157] : memref<2x1x64xf32, #tpu.memory_space<vmem>>, vector<1x1x64xf32>
    %348 = vector.shape_cast %347 : vector<1x1x64xf32> to vector<1x64xf32>
    %349 = vector.shape_cast %344 : vector<16x32xf32> to vector<2x8x32xf32>
    %cst_158 = arith.constant 0.000000e+00 : f32
    %350 = vector.broadcast %cst_158 : f32 to vector<2x1x32xf32>
    %351 = tpu.concatenate %350, %349, %350 in 1 : vector<2x1x32xf32>, vector<2x8x32xf32>, vector<2x1x32xf32> -> vector<2x10x32xf32>
    %352 = vector.extract_strided_slice %351 {offsets = [0, 0, 0], sizes = [2, 8, 32], strides = [1, 1, 1]} : vector<2x10x32xf32> to vector<2x8x32xf32>
    %353 = vector.extract_strided_slice %351 {offsets = [0, 1, 0], sizes = [2, 8, 32], strides = [1, 1, 1]} : vector<2x10x32xf32> to vector<2x8x32xf32>
    %354 = vector.extract_strided_slice %351 {offsets = [0, 2, 0], sizes = [2, 8, 32], strides = [1, 1, 1]} : vector<2x10x32xf32> to vector<2x8x32xf32>
    %355 = tpu.concatenate %352, %353, %354 in 2 : vector<2x8x32xf32>, vector<2x8x32xf32>, vector<2x8x32xf32> -> vector<2x8x96xf32>
    %356 = vector.shape_cast %355 : vector<2x8x96xf32> to vector<16x96xf32>
    %cst_159 = arith.constant dense<0.000000e+00> : vector<16x64xf32>
    %357 = tpu.matmul %356, %346, %cst_159 {dimension_numbers = #tpu.dot_dimension_numbers<[1], [0], [0], [1], [0, 0, 1, 1], [], []>} : vector<16x96xf32>, vector<96x64xf32>, vector<16x64xf32> -> vector<16x64xf32>
    %358 = vector.broadcast %348 : vector<1x64xf32> to vector<16x64xf32>
    %359 = arith.addf %357, %358 : vector<16x64xf32>
    %cst_160 = arith.constant 0.000000e+00 : f32
    %360 = vector.broadcast %cst_160 : f32 to vector<16x64xf32>
    %361 = arith.maximumf %359, %360 : vector<16x64xf32>
    %c1_161 = arith.constant 1 : index
    %c0_162 = arith.constant 0 : index
    %c0_163 = arith.constant 0 : index
    %362 = vector.load %arg12[%c1_161, %c0_162, %c0_163] : memref<2x64x32xf32, #tpu.memory_space<vmem>>, vector<1x64x32xf32>
    %363 = vector.shape_cast %362 : vector<1x64x32xf32> to vector<64x32xf32>
    %c1_164 = arith.constant 1 : index
    %c0_165 = arith.constant 0 : index
    %c0_166 = arith.constant 0 : index
    %364 = vector.load %arg13[%c1_164, %c0_165, %c0_166] : memref<2x1x32xf32, #tpu.memory_space<vmem>>, vector<1x1x32xf32>
    %365 = vector.shape_cast %364 : vector<1x1x32xf32> to vector<1x32xf32>
    %cst_167 = arith.constant dense<0.000000e+00> : vector<16x32xf32>
    %366 = tpu.matmul %361, %363, %cst_167 {dimension_numbers = #tpu.dot_dimension_numbers<[1], [0], [0], [1], [0, 0, 1, 1], [], []>} : vector<16x64xf32>, vector<64x32xf32>, vector<16x32xf32> -> vector<16x32xf32>
    %367 = vector.broadcast %365 : vector<1x32xf32> to vector<16x32xf32>
    %368 = arith.addf %366, %367 : vector<16x32xf32>
    %369 = arith.addf %368, %344 : vector<16x32xf32>
    %c1_168 = arith.constant 1 : index
    %c0_169 = arith.constant 0 : index
    %c0_170 = arith.constant 0 : index
    %370 = vector.load %arg14[%c1_168, %c0_169, %c0_170] : memref<2x1x32xf32, #tpu.memory_space<vmem>>, vector<1x1x32xf32>
    %371 = vector.shape_cast %370 : vector<1x1x32xf32> to vector<1x32xf32>
    %c1_171 = arith.constant 1 : index
    %c0_172 = arith.constant 0 : index
    %c0_173 = arith.constant 0 : index
    %372 = vector.load %arg15[%c1_171, %c0_172, %c0_173] : memref<2x1x32xf32, #tpu.memory_space<vmem>>, vector<1x1x32xf32>
    %373 = vector.shape_cast %372 : vector<1x1x32xf32> to vector<1x32xf32>
    %cst_174 = arith.constant dense<0.000000e+00> : vector<16xf32>
    %374 = vector.multi_reduction <add>, %369, %cst_174 [1] : vector<16x32xf32> to vector<16xf32>
    %375 = vector.shape_cast %374 : vector<16xf32> to vector<16x1xf32>
    %cst_175 = arith.constant 3.200000e+01 : f32
    %376 = vector.broadcast %cst_175 : f32 to vector<16x1xf32>
    %377 = arith.divf %375, %376 : vector<16x1xf32>
    %378 = vector.broadcast %377 : vector<16x1xf32> to vector<16x32xf32>
    %379 = arith.subf %369, %378 : vector<16x32xf32>
    %380 = arith.mulf %379, %379 : vector<16x32xf32>
    %cst_176 = arith.constant dense<0.000000e+00> : vector<16xf32>
    %381 = vector.multi_reduction <add>, %380, %cst_176 [1] : vector<16x32xf32> to vector<16xf32>
    %382 = vector.shape_cast %381 : vector<16xf32> to vector<16x1xf32>
    %cst_177 = arith.constant 3.200000e+01 : f32
    %383 = vector.broadcast %cst_177 : f32 to vector<16x1xf32>
    %384 = arith.divf %382, %383 : vector<16x1xf32>
    %385 = vector.broadcast %377 : vector<16x1xf32> to vector<16x32xf32>
    %386 = arith.subf %369, %385 : vector<16x32xf32>
    %cst_178 = arith.constant 9.99999974E-6 : f32
    %387 = vector.broadcast %cst_178 : f32 to vector<16x1xf32>
    %388 = arith.addf %384, %387 : vector<16x1xf32>
    %389 = math.rsqrt %388 : vector<16x1xf32>
    %390 = vector.broadcast %389 : vector<16x1xf32> to vector<16x32xf32>
    %391 = arith.mulf %386, %390 : vector<16x32xf32>
    %392 = vector.broadcast %371 : vector<1x32xf32> to vector<16x32xf32>
    %393 = arith.mulf %391, %392 : vector<16x32xf32>
    %394 = vector.broadcast %373 : vector<1x32xf32> to vector<16x32xf32>
    %395 = arith.addf %393, %394 : vector<16x32xf32>
    %396 = vector.broadcast %3 : vector<16x1xf32> to vector<16x32xf32>
    %397 = arith.mulf %395, %396 : vector<16x32xf32>
    %398 = vector.shape_cast %397 : vector<16x32xf32> to vector<2x8x32xf32>
    %c0_179 = arith.constant 0 : index
    %c0_180 = arith.constant 0 : index
    %c0_181 = arith.constant 0 : index
    %399 = vector.load %arg16[%c0_179, %c0_180, %c0_181] : memref<2x8x32xf32, #tpu.memory_space<vmem>>, vector<2x8x32xf32>
    tpu.vector_store %arg16[%c0_179, %c0_180, %c0_181], %398 {strides = array<i32>} : memref<2x8x32xf32, #tpu.memory_space<vmem>>, vector<2x8x32xf32>,
    return
  }
  func.func @transform_0(%arg0: i32) -> (i32, i32, i32) {
    %c0_i32 = arith.constant 0 : i32
    %c0_i32_0 = arith.constant 0 : i32
    %c0_i32_1 = arith.constant 0 : i32
    %c0_i32_2 = arith.constant 0 : i32
    return %c0_i32, %c0_i32_0, %c0_i32_1 : i32, i32, i32
  }
  func.func @transform_1(%arg0: i32) -> (i32, i32, i32) {
    %c0_i32 = arith.constant 0 : i32
    %c0_i32_0 = arith.constant 0 : i32
    %c0_i32_1 = arith.constant 0 : i32
    %c0_i32_2 = arith.constant 0 : i32
    return %c0_i32, %c0_i32_0, %c0_i32_1 : i32, i32, i32
  }
  func.func @transform_2(%arg0: i32) -> (i32, i32) {
    %c0_i32 = arith.constant 0 : i32
    %c0_i32_0 = arith.constant 0 : i32
    %c0_i32_1 = arith.constant 0 : i32
    return %c0_i32, %c0_i32_0 : i32, i32
  }
  func.func @transform_3(%arg0: i32) -> (i32, i32, i32) {
    %c0_i32 = arith.constant 0 : i32
    %c0_i32_0 = arith.constant 0 : i32
    %c0_i32_1 = arith.constant 0 : i32
    %c0_i32_2 = arith.constant 0 : i32
    return %c0_i32, %c0_i32_0, %c0_i32_1 : i32, i32, i32
  }
  func.func @transform_4(%arg0: i32) -> (i32, i32, i32) {
    %c0_i32 = arith.constant 0 : i32
    %c0_i32_0 = arith.constant 0 : i32
    %c0_i32_1 = arith.constant 0 : i32
    %c0_i32_2 = arith.constant 0 : i32
    return %c0_i32, %c0_i32_0, %c0_i32_1 : i32, i32, i32
  }
  func.func @transform_5(%arg0: i32) -> (i32, i32, i32) {
    %c0_i32 = arith.constant 0 : i32
    %c0_i32_0 = arith.constant 0 : i32
    %c0_i32_1 = arith.constant 0 : i32
    %c0_i32_2 = arith.constant 0 : i32
    return %c0_i32, %c0_i32_0, %c0_i32_1 : i32, i32, i32
  }
  func.func @transform_6(%arg0: i32) -> (i32, i32, i32) {
    %c0_i32 = arith.constant 0 : i32
    %c0_i32_0 = arith.constant 0 : i32
    %c0_i32_1 = arith.constant 0 : i32
    %c0_i32_2 = arith.constant 0 : i32
    return %c0_i32, %c0_i32_0, %c0_i32_1 : i32, i32, i32
  }
  func.func @transform_7(%arg0: i32) -> (i32, i32, i32) {
    %c0_i32 = arith.constant 0 : i32
    %c0_i32_0 = arith.constant 0 : i32
    %c0_i32_1 = arith.constant 0 : i32
    %c0_i32_2 = arith.constant 0 : i32
    return %c0_i32, %c0_i32_0, %c0_i32_1 : i32, i32, i32
  }
  func.func @transform_8(%arg0: i32) -> (i32, i32, i32) {
    %c0_i32 = arith.constant 0 : i32
    %c0_i32_0 = arith.constant 0 : i32
    %c0_i32_1 = arith.constant 0 : i32
    %c0_i32_2 = arith.constant 0 : i32
    return %c0_i32, %c0_i32_0, %c0_i32_1 : i32, i32, i32
  }
  func.func @transform_9(%arg0: i32) -> (i32, i32, i32) {
    %c0_i32 = arith.constant 0 : i32
    %c0_i32_0 = arith.constant 0 : i32
    %c0_i32_1 = arith.constant 0 : i32
    %c0_i32_2 = arith.constant 0 : i32
    return %c0_i32, %c0_i32_0, %c0_i32_1 : i32, i32, i32
  }
  func.func @transform_10(%arg0: i32) -> (i32, i32, i32) {
    %c0_i32 = arith.constant 0 : i32
    %c0_i32_0 = arith.constant 0 : i32
    %c0_i32_1 = arith.constant 0 : i32
    %c0_i32_2 = arith.constant 0 : i32
    return %c0_i32, %c0_i32_0, %c0_i32_1 : i32, i32, i32
  }
  func.func @transform_11(%arg0: i32) -> (i32, i32, i32) {
    %c0_i32 = arith.constant 0 : i32
    %c0_i32_0 = arith.constant 0 : i32
    %c0_i32_1 = arith.constant 0 : i32
    %c0_i32_2 = arith.constant 0 : i32
    return %c0_i32, %c0_i32_0, %c0_i32_1 : i32, i32, i32
  }
  func.func @transform_12(%arg0: i32) -> (i32, i32, i32) {
    %c0_i32 = arith.constant 0 : i32
    %c0_i32_0 = arith.constant 0 : i32
    %c0_i32_1 = arith.constant 0 : i32
    %c0_i32_2 = arith.constant 0 : i32
    return %c0_i32, %c0_i32_0, %c0_i32_1 : i32, i32, i32
  }
  func.func @transform_13(%arg0: i32) -> (i32, i32, i32) {
    %c0_i32 = arith.constant 0 : i32
    %c0_i32_0 = arith.constant 0 : i32
    %c0_i32_1 = arith.constant 0 : i32
    %c0_i32_2 = arith.constant 0 : i32
    return %c0_i32, %c0_i32_0, %c0_i32_1 : i32, i32, i32
  }
  func.func @transform_14(%arg0: i32) -> (i32, i32, i32) {
    %c0_i32 = arith.constant 0 : i32
    %c0_i32_0 = arith.constant 0 : i32
    %c0_i32_1 = arith.constant 0 : i32
    %c0_i32_2 = arith.constant 0 : i32
    return %c0_i32, %c0_i32_0, %c0_i32_1 : i32, i32, i32
  }
  func.func @transform_15(%arg0: i32) -> (i32, i32, i32) {
    %c0_i32 = arith.constant 0 : i32
    %c0_i32_0 = arith.constant 0 : i32
    %c0_i32_1 = arith.constant 0 : i32
    %c0_i32_2 = arith.constant 0 : i32
    return %c0_i32, %c0_i32_0, %c0_i32_1 : i32, i32, i32
  }
  func.func @transform_16(%arg0: i32) -> (i32, i32, i32, i32) {
    %c0_i32 = arith.constant 0 : i32
    %c0_i32_0 = arith.constant 0 : i32
    %c0_i32_1 = arith.constant 0 : i32
    %c0_i32_2 = arith.constant 0 : i32
    %c0_i32_3 = arith.constant 0 : i32
    return %c0_i32, %c0_i32_0, %c0_i32_1, %c0_i32_2 : i32, i32, i32, i32
  }
}

module attributes {stable_mosaic.version = 11 : i64} {
  func.func @fft_stack_kernel(%arg0: i32, %arg1: memref<2x16x32xf32, #tpu.memory_space<vmem>>, %arg2: memref<2x1x16xf32, #tpu.memory_space<vmem>>, %arg3: memref<32x1xf32, #tpu.memory_space<vmem>>, %arg4: memref<2x32x96xf32, #tpu.memory_space<vmem>>, %arg5: memref<2x1x96xf32, #tpu.memory_space<vmem>>, %arg6: memref<2x32x32xf32, #tpu.memory_space<vmem>>, %arg7: memref<2x1x32xf32, #tpu.memory_space<vmem>>, %arg8: memref<2x1x32xf32, #tpu.memory_space<vmem>>, %arg9: memref<2x1x32xf32, #tpu.memory_space<vmem>>, %arg10: memref<2x96x64xf32, #tpu.memory_space<vmem>>, %arg11: memref<2x1x64xf32, #tpu.memory_space<vmem>>, %arg12: memref<2x64x32xf32, #tpu.memory_space<vmem>>, %arg13: memref<2x1x32xf32, #tpu.memory_space<vmem>>, %arg14: memref<2x1x32xf32, #tpu.memory_space<vmem>>, %arg15: memref<2x1x32xf32, #tpu.memory_space<vmem>>, %arg16: memref<2x16x32xf32, #tpu.memory_space<vmem>>, %arg17: memref<2x4x16x16xf32, #tpu.memory_space<vmem>>) attributes {dimension_semantics = [#tpu.dimension_semantics<arbitrary>], iteration_bounds = array<i64: 1>, scalar_prefetch = 0 : i64, scratch_operands = 0 : i64, tpu.core_type = #tpu.core_type<tc>, window_params = [{pipeline_mode = #tpu.pipeline_mode<synchronous>, transform_indices = @transform_0, window_bounds = array<i64: 2, 16, 32>}, {pipeline_mode = #tpu.pipeline_mode<synchronous>, transform_indices = @transform_1, window_bounds = array<i64: 2, 1, 16>}, {pipeline_mode = #tpu.pipeline_mode<synchronous>, transform_indices = @transform_2, window_bounds = array<i64: 32, 1>}, {pipeline_mode = #tpu.pipeline_mode<synchronous>, transform_indices = @transform_3, window_bounds = array<i64: 2, 32, 96>}, {pipeline_mode = #tpu.pipeline_mode<synchronous>, transform_indices = @transform_4, window_bounds = array<i64: 2, 1, 96>}, {pipeline_mode = #tpu.pipeline_mode<synchronous>, transform_indices = @transform_5, window_bounds = array<i64: 2, 32, 32>}, {pipeline_mode = #tpu.pipeline_mode<synchronous>, transform_indices = @transform_6, window_bounds = array<i64: 2, 1, 32>}, {pipeline_mode = #tpu.pipeline_mode<synchronous>, transform_indices = @transform_7, window_bounds = array<i64: 2, 1, 32>}, {pipeline_mode = #tpu.pipeline_mode<synchronous>, transform_indices = @transform_8, window_bounds = array<i64: 2, 1, 32>}, {pipeline_mode = #tpu.pipeline_mode<synchronous>, transform_indices = @transform_9, window_bounds = array<i64: 2, 96, 64>}, {pipeline_mode = #tpu.pipeline_mode<synchronous>, transform_indices = @transform_10, window_bounds = array<i64: 2, 1, 64>}, {pipeline_mode = #tpu.pipeline_mode<synchronous>, transform_indices = @transform_11, window_bounds = array<i64: 2, 64, 32>}, {pipeline_mode = #tpu.pipeline_mode<synchronous>, transform_indices = @transform_12, window_bounds = array<i64: 2, 1, 32>}, {pipeline_mode = #tpu.pipeline_mode<synchronous>, transform_indices = @transform_13, window_bounds = array<i64: 2, 1, 32>}, {pipeline_mode = #tpu.pipeline_mode<synchronous>, transform_indices = @transform_14, window_bounds = array<i64: 2, 1, 32>}, {pipeline_mode = #tpu.pipeline_mode<synchronous>, transform_indices = @transform_15, window_bounds = array<i64: 2, 16, 32>}, {pipeline_mode = #tpu.pipeline_mode<synchronous>, transform_indices = @transform_16, window_bounds = array<i64: 2, 4, 16, 16>}]} {
    %c0 = arith.constant 0 : index
    %c0_0 = arith.constant 0 : index
    %c0_1 = arith.constant 0 : index
    %0 = vector.load %arg1[%c0, %c0_0, %c0_1] : memref<2x16x32xf32, #tpu.memory_space<vmem>>, vector<2x16x32xf32>
    %1 = vector.shape_cast %0 : vector<2x16x32xf32> to vector<32x32xf32>
    %c0_2 = arith.constant 0 : index
    %c0_3 = arith.constant 0 : index
    %c0_4 = arith.constant 0 : index
    %2 = vector.load %arg2[%c0_2, %c0_3, %c0_4] : memref<2x1x16xf32, #tpu.memory_space<vmem>>, vector<2x1x16xf32>
    %c0_5 = arith.constant 0 : index
    %c0_6 = arith.constant 0 : index
    %3 = vector.load %arg3[%c0_5, %c0_6] : memref<32x1xf32, #tpu.memory_space<vmem>>, vector<32x1xf32>
    %c0_7 = arith.constant 0 : index
    %c0_8 = arith.constant 0 : index
    %c0_9 = arith.constant 0 : index
    %4 = vector.load %arg4[%c0_7, %c0_8, %c0_9] : memref<2x32x96xf32, #tpu.memory_space<vmem>>, vector<1x32x96xf32>
    %5 = vector.shape_cast %4 : vector<1x32x96xf32> to vector<32x96xf32>
    %cst = arith.constant dense<0.000000e+00> : vector<32x96xf32>
    %6 = tpu.matmul %1, %5, %cst {dimension_numbers = #tpu.dot_dimension_numbers<[1], [0], [0], [1], [0, 0, 1, 1], [], []>} : vector<32x32xf32>, vector<32x96xf32>, vector<32x96xf32> -> vector<32x96xf32>
    %c0_10 = arith.constant 0 : index
    %c0_11 = arith.constant 0 : index
    %c0_12 = arith.constant 0 : index
    %7 = vector.load %arg5[%c0_10, %c0_11, %c0_12] : memref<2x1x96xf32, #tpu.memory_space<vmem>>, vector<1x1x96xf32>
    %8 = vector.shape_cast %7 : vector<1x1x96xf32> to vector<1x96xf32>
    %9 = vector.broadcast %8 : vector<1x96xf32> to vector<32x96xf32>
    %10 = arith.addf %6, %9 : vector<32x96xf32>
    %11 = vector.extract_strided_slice %10 {offsets = [0, 0], sizes = [16, 96], strides = [1, 1]} : vector<32x96xf32> to vector<16x96xf32>
    %12 = vector.extract_strided_slice %2 {offsets = [0, 0, 0], sizes = [1, 1, 16], strides = [1, 1, 1]} : vector<2x1x16xf32> to vector<1x1x16xf32>
    %13 = vector.shape_cast %12 : vector<1x1x16xf32> to vector<1x16xf32>
    %14 = vector.extract_strided_slice %11 {offsets = [0, 0], sizes = [16, 16], strides = [1, 1]} : vector<16x96xf32> to vector<16x16xf32>
    %15 = vector.extract_strided_slice %11 {offsets = [0, 32], sizes = [16, 16], strides = [1, 1]} : vector<16x96xf32> to vector<16x16xf32>
    %16 = vector.extract_strided_slice %11 {offsets = [0, 64], sizes = [16, 16], strides = [1, 1]} : vector<16x96xf32> to vector<16x16xf32>
    %17 = tpu.transpose %15, [1, 0] : vector<16x16xf32> -> vector<16x16xf32>
    %cst_13 = arith.constant dense<0.000000e+00> : vector<16x16xf32>
    %18 = tpu.matmul %14, %17, %cst_13 {dimension_numbers = #tpu.dot_dimension_numbers<[1], [0], [0], [1], [0, 0, 1, 1], [], []>} : vector<16x16xf32>, vector<16x16xf32>, vector<16x16xf32> -> vector<16x16xf32>
    %cst_14 = arith.constant 2.500000e-01 : f32
    %19 = vector.broadcast %cst_14 : f32 to vector<16x16xf32>
    %20 = arith.mulf %18, %19 : vector<16x16xf32>
    %21 = vector.broadcast %13 : vector<1x16xf32> to vector<16x16xf32>
    %22 = arith.addf %20, %21 : vector<16x16xf32>
    %cst_15 = arith.constant dense<0xFF800000> : vector<16xf32>
    %23 = vector.multi_reduction <maximumf>, %22, %cst_15 [1] : vector<16x16xf32> to vector<16xf32>
    %24 = vector.shape_cast %23 : vector<16xf32> to vector<16x1xf32>
    %25 = vector.broadcast %24 : vector<16x1xf32> to vector<16x16xf32>
    %26 = arith.subf %22, %25 : vector<16x16xf32>
    %27 = math.exp %26 : vector<16x16xf32>
    %cst_16 = arith.constant dense<0.000000e+00> : vector<16xf32>
    %28 = vector.multi_reduction <add>, %27, %cst_16 [1] : vector<16x16xf32> to vector<16xf32>
    %29 = vector.shape_cast %28 : vector<16xf32> to vector<16x1xf32>
    %30 = tpu.reciprocal %29 {approx = true} : vector<16x1xf32> -> vector<16x1xf32>
    %31 = vector.broadcast %30 : vector<16x1xf32> to vector<16x16xf32>
    %32 = arith.mulf %27, %31 : vector<16x16xf32>
    %c0_17 = arith.constant 0 : index
    %c0_18 = arith.constant 0 : index
    %c0_19 = arith.constant 0 : index
    %c0_20 = arith.constant 0 : index
    %33 = vector.load %arg17[%c0_17, %c0_18, %c0_19, %c0_20] : memref<2x4x16x16xf32, #tpu.memory_space<vmem>>, vector<1x1x16x16xf32>
    %34 = vector.shape_cast %33 : vector<1x1x16x16xf32> to vector<16x16xf32>
    %35 = vector.shape_cast %32 : vector<16x16xf32> to vector<1x1x16x16xf32>
    tpu.vector_store %arg17[%c0_17, %c0_18, %c0_19, %c0_20], %35 {strides = array<i32>} : memref<2x4x16x16xf32, #tpu.memory_space<vmem>>, vector<1x1x16x16xf32>,
    %cst_21 = arith.constant dense<0.000000e+00> : vector<16x16xf32>
    %36 = tpu.matmul %32, %16, %cst_21 {dimension_numbers = #tpu.dot_dimension_numbers<[1], [0], [0], [1], [0, 0, 1, 1], [], []>} : vector<16x16xf32>, vector<16x16xf32>, vector<16x16xf32> -> vector<16x16xf32>
    %37 = vector.extract_strided_slice %11 {offsets = [0, 16], sizes = [16, 16], strides = [1, 1]} : vector<16x96xf32> to vector<16x16xf32>
    %38 = vector.extract_strided_slice %11 {offsets = [0, 48], sizes = [16, 16], strides = [1, 1]} : vector<16x96xf32> to vector<16x16xf32>
    %39 = vector.extract_strided_slice %11 {offsets = [0, 80], sizes = [16, 16], strides = [1, 1]} : vector<16x96xf32> to vector<16x16xf32>
    %40 = tpu.transpose %38, [1, 0] : vector<16x16xf32> -> vector<16x16xf32>
    %cst_22 = arith.constant dense<0.000000e+00> : vector<16x16xf32>
    %41 = tpu.matmul %37, %40, %cst_22 {dimension_numbers = #tpu.dot_dimension_numbers<[1], [0], [0], [1], [0, 0, 1, 1], [], []>} : vector<16x16xf32>, vector<16x16xf32>, vector<16x16xf32> -> vector<16x16xf32>
    %cst_23 = arith.constant 2.500000e-01 : f32
    %42 = vector.broadcast %cst_23 : f32 to vector<16x16xf32>
    %43 = arith.mulf %41, %42 : vector<16x16xf32>
    %44 = vector.broadcast %13 : vector<1x16xf32> to vector<16x16xf32>
    %45 = arith.addf %43, %44 : vector<16x16xf32>
    %cst_24 = arith.constant dense<0xFF800000> : vector<16xf32>
    %46 = vector.multi_reduction <maximumf>, %45, %cst_24 [1] : vector<16x16xf32> to vector<16xf32>
    %47 = vector.shape_cast %46 : vector<16xf32> to vector<16x1xf32>
    %48 = vector.broadcast %47 : vector<16x1xf32> to vector<16x16xf32>
    %49 = arith.subf %45, %48 : vector<16x16xf32>
    %50 = math.exp %49 : vector<16x16xf32>
    %cst_25 = arith.constant dense<0.000000e+00> : vector<16xf32>
    %51 = vector.multi_reduction <add>, %50, %cst_25 [1] : vector<16x16xf32> to vector<16xf32>
    %52 = vector.shape_cast %51 : vector<16xf32> to vector<16x1xf32>
    %53 = tpu.reciprocal %52 {approx = true} : vector<16x1xf32> -> vector<16x1xf32>
    %54 = vector.broadcast %53 : vector<16x1xf32> to vector<16x16xf32>
    %55 = arith.mulf %50, %54 : vector<16x16xf32>
    %c0_26 = arith.constant 0 : index
    %c1 = arith.constant 1 : index
    %c0_27 = arith.constant 0 : index
    %c0_28 = arith.constant 0 : index
    %56 = vector.load %arg17[%c0_26, %c1, %c0_27, %c0_28] : memref<2x4x16x16xf32, #tpu.memory_space<vmem>>, vector<1x1x16x16xf32>
    %57 = vector.shape_cast %56 : vector<1x1x16x16xf32> to vector<16x16xf32>
    %58 = vector.shape_cast %55 : vector<16x16xf32> to vector<1x1x16x16xf32>
    tpu.vector_store %arg17[%c0_26, %c1, %c0_27, %c0_28], %58 {strides = array<i32>} : memref<2x4x16x16xf32, #tpu.memory_space<vmem>>, vector<1x1x16x16xf32>,
    %cst_29 = arith.constant dense<0.000000e+00> : vector<16x16xf32>
    %59 = tpu.matmul %55, %39, %cst_29 {dimension_numbers = #tpu.dot_dimension_numbers<[1], [0], [0], [1], [0, 0, 1, 1], [], []>} : vector<16x16xf32>, vector<16x16xf32>, vector<16x16xf32> -> vector<16x16xf32>
    %60 = tpu.concatenate %36, %59 in 1 : vector<16x16xf32>, vector<16x16xf32> -> vector<16x32xf32>
    %61 = vector.extract_strided_slice %10 {offsets = [16, 0], sizes = [16, 96], strides = [1, 1]} : vector<32x96xf32> to vector<16x96xf32>
    %62 = vector.extract_strided_slice %2 {offsets = [1, 0, 0], sizes = [1, 1, 16], strides = [1, 1, 1]} : vector<2x1x16xf32> to vector<1x1x16xf32>
    %63 = vector.shape_cast %62 : vector<1x1x16xf32> to vector<1x16xf32>
    %64 = vector.extract_strided_slice %61 {offsets = [0, 0], sizes = [16, 16], strides = [1, 1]} : vector<16x96xf32> to vector<16x16xf32>
    %65 = vector.extract_strided_slice %61 {offsets = [0, 32], sizes = [16, 16], strides = [1, 1]} : vector<16x96xf32> to vector<16x16xf32>
    %66 = vector.extract_strided_slice %61 {offsets = [0, 64], sizes = [16, 16], strides = [1, 1]} : vector<16x96xf32> to vector<16x16xf32>
    %67 = tpu.transpose %65, [1, 0] : vector<16x16xf32> -> vector<16x16xf32>
    %cst_30 = arith.constant dense<0.000000e+00> : vector<16x16xf32>
    %68 = tpu.matmul %64, %67, %cst_30 {dimension_numbers = #tpu.dot_dimension_numbers<[1], [0], [0], [1], [0, 0, 1, 1], [], []>} : vector<16x16xf32>, vector<16x16xf32>, vector<16x16xf32> -> vector<16x16xf32>
    %cst_31 = arith.constant 2.500000e-01 : f32
    %69 = vector.broadcast %cst_31 : f32 to vector<16x16xf32>
    %70 = arith.mulf %68, %69 : vector<16x16xf32>
    %71 = vector.broadcast %63 : vector<1x16xf32> to vector<16x16xf32>
    %72 = arith.addf %70, %71 : vector<16x16xf32>
    %cst_32 = arith.constant dense<0xFF800000> : vector<16xf32>
    %73 = vector.multi_reduction <maximumf>, %72, %cst_32 [1] : vector<16x16xf32> to vector<16xf32>
    %74 = vector.shape_cast %73 : vector<16xf32> to vector<16x1xf32>
    %75 = vector.broadcast %74 : vector<16x1xf32> to vector<16x16xf32>
    %76 = arith.subf %72, %75 : vector<16x16xf32>
    %77 = math.exp %76 : vector<16x16xf32>
    %cst_33 = arith.constant dense<0.000000e+00> : vector<16xf32>
    %78 = vector.multi_reduction <add>, %77, %cst_33 [1] : vector<16x16xf32> to vector<16xf32>
    %79 = vector.shape_cast %78 : vector<16xf32> to vector<16x1xf32>
    %80 = tpu.reciprocal %79 {approx = true} : vector<16x1xf32> -> vector<16x1xf32>
    %81 = vector.broadcast %80 : vector<16x1xf32> to vector<16x16xf32>
    %82 = arith.mulf %77, %81 : vector<16x16xf32>
    %c0_34 = arith.constant 0 : index
    %c2 = arith.constant 2 : index
    %c0_35 = arith.constant 0 : index
    %c0_36 = arith.constant 0 : index
    %83 = vector.load %arg17[%c0_34, %c2, %c0_35, %c0_36] : memref<2x4x16x16xf32, #tpu.memory_space<vmem>>, vector<1x1x16x16xf32>
    %84 = vector.shape_cast %83 : vector<1x1x16x16xf32> to vector<16x16xf32>
    %85 = vector.shape_cast %82 : vector<16x16xf32> to vector<1x1x16x16xf32>
    tpu.vector_store %arg17[%c0_34, %c2, %c0_35, %c0_36], %85 {strides = array<i32>} : memref<2x4x16x16xf32, #tpu.memory_space<vmem>>, vector<1x1x16x16xf32>,
    %cst_37 = arith.constant dense<0.000000e+00> : vector<16x16xf32>
    %86 = tpu.matmul %82, %66, %cst_37 {dimension_numbers = #tpu.dot_dimension_numbers<[1], [0], [0], [1], [0, 0, 1, 1], [], []>} : vector<16x16xf32>, vector<16x16xf32>, vector<16x16xf32> -> vector<16x16xf32>
    %87 = vector.extract_strided_slice %61 {offsets = [0, 16], sizes = [16, 16], strides = [1, 1]} : vector<16x96xf32> to vector<16x16xf32>
    %88 = vector.extract_strided_slice %61 {offsets = [0, 48], sizes = [16, 16], strides = [1, 1]} : vector<16x96xf32> to vector<16x16xf32>
    %89 = vector.extract_strided_slice %61 {offsets = [0, 80], sizes = [16, 16], strides = [1, 1]} : vector<16x96xf32> to vector<16x16xf32>
    %90 = tpu.transpose %88, [1, 0] : vector<16x16xf32> -> vector<16x16xf32>
    %cst_38 = arith.constant dense<0.000000e+00> : vector<16x16xf32>
    %91 = tpu.matmul %87, %90, %cst_38 {dimension_numbers = #tpu.dot_dimension_numbers<[1], [0], [0], [1], [0, 0, 1, 1], [], []>} : vector<16x16xf32>, vector<16x16xf32>, vector<16x16xf32> -> vector<16x16xf32>
    %cst_39 = arith.constant 2.500000e-01 : f32
    %92 = vector.broadcast %cst_39 : f32 to vector<16x16xf32>
    %93 = arith.mulf %91, %92 : vector<16x16xf32>
    %94 = vector.broadcast %63 : vector<1x16xf32> to vector<16x16xf32>
    %95 = arith.addf %93, %94 : vector<16x16xf32>
    %cst_40 = arith.constant dense<0xFF800000> : vector<16xf32>
    %96 = vector.multi_reduction <maximumf>, %95, %cst_40 [1] : vector<16x16xf32> to vector<16xf32>
    %97 = vector.shape_cast %96 : vector<16xf32> to vector<16x1xf32>
    %98 = vector.broadcast %97 : vector<16x1xf32> to vector<16x16xf32>
    %99 = arith.subf %95, %98 : vector<16x16xf32>
    %100 = math.exp %99 : vector<16x16xf32>
    %cst_41 = arith.constant dense<0.000000e+00> : vector<16xf32>
    %101 = vector.multi_reduction <add>, %100, %cst_41 [1] : vector<16x16xf32> to vector<16xf32>
    %102 = vector.shape_cast %101 : vector<16xf32> to vector<16x1xf32>
    %103 = tpu.reciprocal %102 {approx = true} : vector<16x1xf32> -> vector<16x1xf32>
    %104 = vector.broadcast %103 : vector<16x1xf32> to vector<16x16xf32>
    %105 = arith.mulf %100, %104 : vector<16x16xf32>
    %c0_42 = arith.constant 0 : index
    %c3 = arith.constant 3 : index
    %c0_43 = arith.constant 0 : index
    %c0_44 = arith.constant 0 : index
    %106 = vector.load %arg17[%c0_42, %c3, %c0_43, %c0_44] : memref<2x4x16x16xf32, #tpu.memory_space<vmem>>, vector<1x1x16x16xf32>
    %107 = vector.shape_cast %106 : vector<1x1x16x16xf32> to vector<16x16xf32>
    %108 = vector.shape_cast %105 : vector<16x16xf32> to vector<1x1x16x16xf32>
    tpu.vector_store %arg17[%c0_42, %c3, %c0_43, %c0_44], %108 {strides = array<i32>} : memref<2x4x16x16xf32, #tpu.memory_space<vmem>>, vector<1x1x16x16xf32>,
    %cst_45 = arith.constant dense<0.000000e+00> : vector<16x16xf32>
    %109 = tpu.matmul %105, %89, %cst_45 {dimension_numbers = #tpu.dot_dimension_numbers<[1], [0], [0], [1], [0, 0, 1, 1], [], []>} : vector<16x16xf32>, vector<16x16xf32>, vector<16x16xf32> -> vector<16x16xf32>
    %110 = tpu.concatenate %86, %109 in 1 : vector<16x16xf32>, vector<16x16xf32> -> vector<16x32xf32>
    %111 = tpu.concatenate %60, %110 in 0 : vector<16x32xf32>, vector<16x32xf32> -> vector<32x32xf32>
    %c0_46 = arith.constant 0 : index
    %c0_47 = arith.constant 0 : index
    %c0_48 = arith.constant 0 : index
    %112 = vector.load %arg6[%c0_46, %c0_47, %c0_48] : memref<2x32x32xf32, #tpu.memory_space<vmem>>, vector<1x32x32xf32>
    %113 = vector.shape_cast %112 : vector<1x32x32xf32> to vector<32x32xf32>
    %cst_49 = arith.constant dense<0.000000e+00> : vector<32x32xf32>
    %114 = tpu.matmul %111, %113, %cst_49 {dimension_numbers = #tpu.dot_dimension_numbers<[1], [0], [0], [1], [0, 0, 1, 1], [], []>} : vector<32x32xf32>, vector<32x32xf32>, vector<32x32xf32> -> vector<32x32xf32>
    %c0_50 = arith.constant 0 : index
    %c0_51 = arith.constant 0 : index
    %c0_52 = arith.constant 0 : index
    %115 = vector.load %arg7[%c0_50, %c0_51, %c0_52] : memref<2x1x32xf32, #tpu.memory_space<vmem>>, vector<1x1x32xf32>
    %116 = vector.shape_cast %115 : vector<1x1x32xf32> to vector<1x32xf32>
    %117 = vector.broadcast %116 : vector<1x32xf32> to vector<32x32xf32>
    %118 = arith.addf %114, %117 : vector<32x32xf32>
    %119 = arith.addf %118, %1 : vector<32x32xf32>
    %c0_53 = arith.constant 0 : index
    %c0_54 = arith.constant 0 : index
    %c0_55 = arith.constant 0 : index
    %120 = vector.load %arg8[%c0_53, %c0_54, %c0_55] : memref<2x1x32xf32, #tpu.memory_space<vmem>>, vector<1x1x32xf32>
    %121 = vector.shape_cast %120 : vector<1x1x32xf32> to vector<1x32xf32>
    %c0_56 = arith.constant 0 : index
    %c0_57 = arith.constant 0 : index
    %c0_58 = arith.constant 0 : index
    %122 = vector.load %arg9[%c0_56, %c0_57, %c0_58] : memref<2x1x32xf32, #tpu.memory_space<vmem>>, vector<1x1x32xf32>
    %123 = vector.shape_cast %122 : vector<1x1x32xf32> to vector<1x32xf32>
    %cst_59 = arith.constant dense<0.000000e+00> : vector<32xf32>
    %124 = vector.multi_reduction <add>, %119, %cst_59 [1] : vector<32x32xf32> to vector<32xf32>
    %125 = vector.shape_cast %124 : vector<32xf32> to vector<32x1xf32>
    %cst_60 = arith.constant 3.200000e+01 : f32
    %126 = vector.broadcast %cst_60 : f32 to vector<32x1xf32>
    %127 = arith.divf %125, %126 : vector<32x1xf32>
    %128 = vector.broadcast %127 : vector<32x1xf32> to vector<32x32xf32>
    %129 = arith.subf %119, %128 : vector<32x32xf32>
    %130 = arith.mulf %129, %129 : vector<32x32xf32>
    %cst_61 = arith.constant dense<0.000000e+00> : vector<32xf32>
    %131 = vector.multi_reduction <add>, %130, %cst_61 [1] : vector<32x32xf32> to vector<32xf32>
    %132 = vector.shape_cast %131 : vector<32xf32> to vector<32x1xf32>
    %cst_62 = arith.constant 3.200000e+01 : f32
    %133 = vector.broadcast %cst_62 : f32 to vector<32x1xf32>
    %134 = arith.divf %132, %133 : vector<32x1xf32>
    %135 = vector.broadcast %127 : vector<32x1xf32> to vector<32x32xf32>
    %136 = arith.subf %119, %135 : vector<32x32xf32>
    %cst_63 = arith.constant 9.99999974E-6 : f32
    %137 = vector.broadcast %cst_63 : f32 to vector<32x1xf32>
    %138 = arith.addf %134, %137 : vector<32x1xf32>
    %139 = math.rsqrt %138 : vector<32x1xf32>
    %140 = vector.broadcast %139 : vector<32x1xf32> to vector<32x32xf32>
    %141 = arith.mulf %136, %140 : vector<32x32xf32>
    %142 = vector.broadcast %121 : vector<1x32xf32> to vector<32x32xf32>
    %143 = arith.mulf %141, %142 : vector<32x32xf32>
    %144 = vector.broadcast %123 : vector<1x32xf32> to vector<32x32xf32>
    %145 = arith.addf %143, %144 : vector<32x32xf32>
    %146 = vector.broadcast %3 : vector<32x1xf32> to vector<32x32xf32>
    %147 = arith.mulf %145, %146 : vector<32x32xf32>
    %c0_64 = arith.constant 0 : index
    %c0_65 = arith.constant 0 : index
    %c0_66 = arith.constant 0 : index
    %148 = vector.load %arg10[%c0_64, %c0_65, %c0_66] : memref<2x96x64xf32, #tpu.memory_space<vmem>>, vector<1x96x64xf32>
    %149 = vector.shape_cast %148 : vector<1x96x64xf32> to vector<96x64xf32>
    %c0_67 = arith.constant 0 : index
    %c0_68 = arith.constant 0 : index
    %c0_69 = arith.constant 0 : index
    %150 = vector.load %arg11[%c0_67, %c0_68, %c0_69] : memref<2x1x64xf32, #tpu.memory_space<vmem>>, vector<1x1x64xf32>
    %151 = vector.shape_cast %150 : vector<1x1x64xf32> to vector<1x64xf32>
    %152 = vector.shape_cast %147 : vector<32x32xf32> to vector<2x16x32xf32>
    %cst_70 = arith.constant 0.000000e+00 : f32
    %153 = vector.broadcast %cst_70 : f32 to vector<2x1x32xf32>
    %154 = tpu.concatenate %153, %152, %153 in 1 : vector<2x1x32xf32>, vector<2x16x32xf32>, vector<2x1x32xf32> -> vector<2x18x32xf32>
    %155 = vector.extract_strided_slice %154 {offsets = [0, 0, 0], sizes = [2, 16, 32], strides = [1, 1, 1]} : vector<2x18x32xf32> to vector<2x16x32xf32>
    %156 = vector.extract_strided_slice %154 {offsets = [0, 1, 0], sizes = [2, 16, 32], strides = [1, 1, 1]} : vector<2x18x32xf32> to vector<2x16x32xf32>
    %157 = vector.extract_strided_slice %154 {offsets = [0, 2, 0], sizes = [2, 16, 32], strides = [1, 1, 1]} : vector<2x18x32xf32> to vector<2x16x32xf32>
    %158 = tpu.concatenate %155, %156, %157 in 2 : vector<2x16x32xf32>, vector<2x16x32xf32>, vector<2x16x32xf32> -> vector<2x16x96xf32>
    %159 = vector.shape_cast %158 : vector<2x16x96xf32> to vector<32x96xf32>
    %cst_71 = arith.constant dense<0.000000e+00> : vector<32x64xf32>
    %160 = tpu.matmul %159, %149, %cst_71 {dimension_numbers = #tpu.dot_dimension_numbers<[1], [0], [0], [1], [0, 0, 1, 1], [], []>} : vector<32x96xf32>, vector<96x64xf32>, vector<32x64xf32> -> vector<32x64xf32>
    %161 = vector.broadcast %151 : vector<1x64xf32> to vector<32x64xf32>
    %162 = arith.addf %160, %161 : vector<32x64xf32>
    %cst_72 = arith.constant 0.000000e+00 : f32
    %163 = vector.broadcast %cst_72 : f32 to vector<32x64xf32>
    %164 = arith.maximumf %162, %163 : vector<32x64xf32>
    %c0_73 = arith.constant 0 : index
    %c0_74 = arith.constant 0 : index
    %c0_75 = arith.constant 0 : index
    %165 = vector.load %arg12[%c0_73, %c0_74, %c0_75] : memref<2x64x32xf32, #tpu.memory_space<vmem>>, vector<1x64x32xf32>
    %166 = vector.shape_cast %165 : vector<1x64x32xf32> to vector<64x32xf32>
    %c0_76 = arith.constant 0 : index
    %c0_77 = arith.constant 0 : index
    %c0_78 = arith.constant 0 : index
    %167 = vector.load %arg13[%c0_76, %c0_77, %c0_78] : memref<2x1x32xf32, #tpu.memory_space<vmem>>, vector<1x1x32xf32>
    %168 = vector.shape_cast %167 : vector<1x1x32xf32> to vector<1x32xf32>
    %cst_79 = arith.constant dense<0.000000e+00> : vector<32x32xf32>
    %169 = tpu.matmul %164, %166, %cst_79 {dimension_numbers = #tpu.dot_dimension_numbers<[1], [0], [0], [1], [0, 0, 1, 1], [], []>} : vector<32x64xf32>, vector<64x32xf32>, vector<32x32xf32> -> vector<32x32xf32>
    %170 = vector.broadcast %168 : vector<1x32xf32> to vector<32x32xf32>
    %171 = arith.addf %169, %170 : vector<32x32xf32>
    %172 = arith.addf %171, %147 : vector<32x32xf32>
    %c0_80 = arith.constant 0 : index
    %c0_81 = arith.constant 0 : index
    %c0_82 = arith.constant 0 : index
    %173 = vector.load %arg14[%c0_80, %c0_81, %c0_82] : memref<2x1x32xf32, #tpu.memory_space<vmem>>, vector<1x1x32xf32>
    %174 = vector.shape_cast %173 : vector<1x1x32xf32> to vector<1x32xf32>
    %c0_83 = arith.constant 0 : index
    %c0_84 = arith.constant 0 : index
    %c0_85 = arith.constant 0 : index
    %175 = vector.load %arg15[%c0_83, %c0_84, %c0_85] : memref<2x1x32xf32, #tpu.memory_space<vmem>>, vector<1x1x32xf32>
    %176 = vector.shape_cast %175 : vector<1x1x32xf32> to vector<1x32xf32>
    %cst_86 = arith.constant dense<0.000000e+00> : vector<32xf32>
    %177 = vector.multi_reduction <add>, %172, %cst_86 [1] : vector<32x32xf32> to vector<32xf32>
    %178 = vector.shape_cast %177 : vector<32xf32> to vector<32x1xf32>
    %cst_87 = arith.constant 3.200000e+01 : f32
    %179 = vector.broadcast %cst_87 : f32 to vector<32x1xf32>
    %180 = arith.divf %178, %179 : vector<32x1xf32>
    %181 = vector.broadcast %180 : vector<32x1xf32> to vector<32x32xf32>
    %182 = arith.subf %172, %181 : vector<32x32xf32>
    %183 = arith.mulf %182, %182 : vector<32x32xf32>
    %cst_88 = arith.constant dense<0.000000e+00> : vector<32xf32>
    %184 = vector.multi_reduction <add>, %183, %cst_88 [1] : vector<32x32xf32> to vector<32xf32>
    %185 = vector.shape_cast %184 : vector<32xf32> to vector<32x1xf32>
    %cst_89 = arith.constant 3.200000e+01 : f32
    %186 = vector.broadcast %cst_89 : f32 to vector<32x1xf32>
    %187 = arith.divf %185, %186 : vector<32x1xf32>
    %188 = vector.broadcast %180 : vector<32x1xf32> to vector<32x32xf32>
    %189 = arith.subf %172, %188 : vector<32x32xf32>
    %cst_90 = arith.constant 9.99999974E-6 : f32
    %190 = vector.broadcast %cst_90 : f32 to vector<32x1xf32>
    %191 = arith.addf %187, %190 : vector<32x1xf32>
    %192 = math.rsqrt %191 : vector<32x1xf32>
    %193 = vector.broadcast %192 : vector<32x1xf32> to vector<32x32xf32>
    %194 = arith.mulf %189, %193 : vector<32x32xf32>
    %195 = vector.broadcast %174 : vector<1x32xf32> to vector<32x32xf32>
    %196 = arith.mulf %194, %195 : vector<32x32xf32>
    %197 = vector.broadcast %176 : vector<1x32xf32> to vector<32x32xf32>
    %198 = arith.addf %196, %197 : vector<32x32xf32>
    %199 = vector.broadcast %3 : vector<32x1xf32> to vector<32x32xf32>
    %200 = arith.mulf %198, %199 : vector<32x32xf32>
    %c1_91 = arith.constant 1 : index
    %c0_92 = arith.constant 0 : index
    %c0_93 = arith.constant 0 : index
    %201 = vector.load %arg4[%c1_91, %c0_92, %c0_93] : memref<2x32x96xf32, #tpu.memory_space<vmem>>, vector<1x32x96xf32>
    %202 = vector.shape_cast %201 : vector<1x32x96xf32> to vector<32x96xf32>
    %cst_94 = arith.constant dense<0.000000e+00> : vector<32x96xf32>
    %203 = tpu.matmul %200, %202, %cst_94 {dimension_numbers = #tpu.dot_dimension_numbers<[1], [0], [0], [1], [0, 0, 1, 1], [], []>} : vector<32x32xf32>, vector<32x96xf32>, vector<32x96xf32> -> vector<32x96xf32>
    %c1_95 = arith.constant 1 : index
    %c0_96 = arith.constant 0 : index
    %c0_97 = arith.constant 0 : index
    %204 = vector.load %arg5[%c1_95, %c0_96, %c0_97] : memref<2x1x96xf32, #tpu.memory_space<vmem>>, vector<1x1x96xf32>
    %205 = vector.shape_cast %204 : vector<1x1x96xf32> to vector<1x96xf32>
    %206 = vector.broadcast %205 : vector<1x96xf32> to vector<32x96xf32>
    %207 = arith.addf %203, %206 : vector<32x96xf32>
    %208 = vector.extract_strided_slice %207 {offsets = [0, 0], sizes = [16, 96], strides = [1, 1]} : vector<32x96xf32> to vector<16x96xf32>
    %209 = vector.extract_strided_slice %2 {offsets = [0, 0, 0], sizes = [1, 1, 16], strides = [1, 1, 1]} : vector<2x1x16xf32> to vector<1x1x16xf32>
    %210 = vector.shape_cast %209 : vector<1x1x16xf32> to vector<1x16xf32>
    %211 = vector.extract_strided_slice %208 {offsets = [0, 0], sizes = [16, 16], strides = [1, 1]} : vector<16x96xf32> to vector<16x16xf32>
    %212 = vector.extract_strided_slice %208 {offsets = [0, 32], sizes = [16, 16], strides = [1, 1]} : vector<16x96xf32> to vector<16x16xf32>
    %213 = vector.extract_strided_slice %208 {offsets = [0, 64], sizes = [16, 16], strides = [1, 1]} : vector<16x96xf32> to vector<16x16xf32>
    %214 = tpu.transpose %212, [1, 0] : vector<16x16xf32> -> vector<16x16xf32>
    %cst_98 = arith.constant dense<0.000000e+00> : vector<16x16xf32>
    %215 = tpu.matmul %211, %214, %cst_98 {dimension_numbers = #tpu.dot_dimension_numbers<[1], [0], [0], [1], [0, 0, 1, 1], [], []>} : vector<16x16xf32>, vector<16x16xf32>, vector<16x16xf32> -> vector<16x16xf32>
    %cst_99 = arith.constant 2.500000e-01 : f32
    %216 = vector.broadcast %cst_99 : f32 to vector<16x16xf32>
    %217 = arith.mulf %215, %216 : vector<16x16xf32>
    %218 = vector.broadcast %210 : vector<1x16xf32> to vector<16x16xf32>
    %219 = arith.addf %217, %218 : vector<16x16xf32>
    %cst_100 = arith.constant dense<0xFF800000> : vector<16xf32>
    %220 = vector.multi_reduction <maximumf>, %219, %cst_100 [1] : vector<16x16xf32> to vector<16xf32>
    %221 = vector.shape_cast %220 : vector<16xf32> to vector<16x1xf32>
    %222 = vector.broadcast %221 : vector<16x1xf32> to vector<16x16xf32>
    %223 = arith.subf %219, %222 : vector<16x16xf32>
    %224 = math.exp %223 : vector<16x16xf32>
    %cst_101 = arith.constant dense<0.000000e+00> : vector<16xf32>
    %225 = vector.multi_reduction <add>, %224, %cst_101 [1] : vector<16x16xf32> to vector<16xf32>
    %226 = vector.shape_cast %225 : vector<16xf32> to vector<16x1xf32>
    %227 = tpu.reciprocal %226 {approx = true} : vector<16x1xf32> -> vector<16x1xf32>
    %228 = vector.broadcast %227 : vector<16x1xf32> to vector<16x16xf32>
    %229 = arith.mulf %224, %228 : vector<16x16xf32>
    %c1_102 = arith.constant 1 : index
    %c0_103 = arith.constant 0 : index
    %c0_104 = arith.constant 0 : index
    %c0_105 = arith.constant 0 : index
    %230 = vector.load %arg17[%c1_102, %c0_103, %c0_104, %c0_105] : memref<2x4x16x16xf32, #tpu.memory_space<vmem>>, vector<1x1x16x16xf32>
    %231 = vector.shape_cast %230 : vector<1x1x16x16xf32> to vector<16x16xf32>
    %232 = vector.shape_cast %229 : vector<16x16xf32> to vector<1x1x16x16xf32>
    tpu.vector_store %arg17[%c1_102, %c0_103, %c0_104, %c0_105], %232 {strides = array<i32>} : memref<2x4x16x16xf32, #tpu.memory_space<vmem>>, vector<1x1x16x16xf32>,
    %cst_106 = arith.constant dense<0.000000e+00> : vector<16x16xf32>
    %233 = tpu.matmul %229, %213, %cst_106 {dimension_numbers = #tpu.dot_dimension_numbers<[1], [0], [0], [1], [0, 0, 1, 1], [], []>} : vector<16x16xf32>, vector<16x16xf32>, vector<16x16xf32> -> vector<16x16xf32>
    %234 = vector.extract_strided_slice %208 {offsets = [0, 16], sizes = [16, 16], strides = [1, 1]} : vector<16x96xf32> to vector<16x16xf32>
    %235 = vector.extract_strided_slice %208 {offsets = [0, 48], sizes = [16, 16], strides = [1, 1]} : vector<16x96xf32> to vector<16x16xf32>
    %236 = vector.extract_strided_slice %208 {offsets = [0, 80], sizes = [16, 16], strides = [1, 1]} : vector<16x96xf32> to vector<16x16xf32>
    %237 = tpu.transpose %235, [1, 0] : vector<16x16xf32> -> vector<16x16xf32>
    %cst_107 = arith.constant dense<0.000000e+00> : vector<16x16xf32>
    %238 = tpu.matmul %234, %237, %cst_107 {dimension_numbers = #tpu.dot_dimension_numbers<[1], [0], [0], [1], [0, 0, 1, 1], [], []>} : vector<16x16xf32>, vector<16x16xf32>, vector<16x16xf32> -> vector<16x16xf32>
    %cst_108 = arith.constant 2.500000e-01 : f32
    %239 = vector.broadcast %cst_108 : f32 to vector<16x16xf32>
    %240 = arith.mulf %238, %239 : vector<16x16xf32>
    %241 = vector.broadcast %210 : vector<1x16xf32> to vector<16x16xf32>
    %242 = arith.addf %240, %241 : vector<16x16xf32>
    %cst_109 = arith.constant dense<0xFF800000> : vector<16xf32>
    %243 = vector.multi_reduction <maximumf>, %242, %cst_109 [1] : vector<16x16xf32> to vector<16xf32>
    %244 = vector.shape_cast %243 : vector<16xf32> to vector<16x1xf32>
    %245 = vector.broadcast %244 : vector<16x1xf32> to vector<16x16xf32>
    %246 = arith.subf %242, %245 : vector<16x16xf32>
    %247 = math.exp %246 : vector<16x16xf32>
    %cst_110 = arith.constant dense<0.000000e+00> : vector<16xf32>
    %248 = vector.multi_reduction <add>, %247, %cst_110 [1] : vector<16x16xf32> to vector<16xf32>
    %249 = vector.shape_cast %248 : vector<16xf32> to vector<16x1xf32>
    %250 = tpu.reciprocal %249 {approx = true} : vector<16x1xf32> -> vector<16x1xf32>
    %251 = vector.broadcast %250 : vector<16x1xf32> to vector<16x16xf32>
    %252 = arith.mulf %247, %251 : vector<16x16xf32>
    %c1_111 = arith.constant 1 : index
    %c1_112 = arith.constant 1 : index
    %c0_113 = arith.constant 0 : index
    %c0_114 = arith.constant 0 : index
    %253 = vector.load %arg17[%c1_111, %c1_112, %c0_113, %c0_114] : memref<2x4x16x16xf32, #tpu.memory_space<vmem>>, vector<1x1x16x16xf32>
    %254 = vector.shape_cast %253 : vector<1x1x16x16xf32> to vector<16x16xf32>
    %255 = vector.shape_cast %252 : vector<16x16xf32> to vector<1x1x16x16xf32>
    tpu.vector_store %arg17[%c1_111, %c1_112, %c0_113, %c0_114], %255 {strides = array<i32>} : memref<2x4x16x16xf32, #tpu.memory_space<vmem>>, vector<1x1x16x16xf32>,
    %cst_115 = arith.constant dense<0.000000e+00> : vector<16x16xf32>
    %256 = tpu.matmul %252, %236, %cst_115 {dimension_numbers = #tpu.dot_dimension_numbers<[1], [0], [0], [1], [0, 0, 1, 1], [], []>} : vector<16x16xf32>, vector<16x16xf32>, vector<16x16xf32> -> vector<16x16xf32>
    %257 = tpu.concatenate %233, %256 in 1 : vector<16x16xf32>, vector<16x16xf32> -> vector<16x32xf32>
    %258 = vector.extract_strided_slice %207 {offsets = [16, 0], sizes = [16, 96], strides = [1, 1]} : vector<32x96xf32> to vector<16x96xf32>
    %259 = vector.extract_strided_slice %2 {offsets = [1, 0, 0], sizes = [1, 1, 16], strides = [1, 1, 1]} : vector<2x1x16xf32> to vector<1x1x16xf32>
    %260 = vector.shape_cast %259 : vector<1x1x16xf32> to vector<1x16xf32>
    %261 = vector.extract_strided_slice %258 {offsets = [0, 0], sizes = [16, 16], strides = [1, 1]} : vector<16x96xf32> to vector<16x16xf32>
    %262 = vector.extract_strided_slice %258 {offsets = [0, 32], sizes = [16, 16], strides = [1, 1]} : vector<16x96xf32> to vector<16x16xf32>
    %263 = vector.extract_strided_slice %258 {offsets = [0, 64], sizes = [16, 16], strides = [1, 1]} : vector<16x96xf32> to vector<16x16xf32>
    %264 = tpu.transpose %262, [1, 0] : vector<16x16xf32> -> vector<16x16xf32>
    %cst_116 = arith.constant dense<0.000000e+00> : vector<16x16xf32>
    %265 = tpu.matmul %261, %264, %cst_116 {dimension_numbers = #tpu.dot_dimension_numbers<[1], [0], [0], [1], [0, 0, 1, 1], [], []>} : vector<16x16xf32>, vector<16x16xf32>, vector<16x16xf32> -> vector<16x16xf32>
    %cst_117 = arith.constant 2.500000e-01 : f32
    %266 = vector.broadcast %cst_117 : f32 to vector<16x16xf32>
    %267 = arith.mulf %265, %266 : vector<16x16xf32>
    %268 = vector.broadcast %260 : vector<1x16xf32> to vector<16x16xf32>
    %269 = arith.addf %267, %268 : vector<16x16xf32>
    %cst_118 = arith.constant dense<0xFF800000> : vector<16xf32>
    %270 = vector.multi_reduction <maximumf>, %269, %cst_118 [1] : vector<16x16xf32> to vector<16xf32>
    %271 = vector.shape_cast %270 : vector<16xf32> to vector<16x1xf32>
    %272 = vector.broadcast %271 : vector<16x1xf32> to vector<16x16xf32>
    %273 = arith.subf %269, %272 : vector<16x16xf32>
    %274 = math.exp %273 : vector<16x16xf32>
    %cst_119 = arith.constant dense<0.000000e+00> : vector<16xf32>
    %275 = vector.multi_reduction <add>, %274, %cst_119 [1] : vector<16x16xf32> to vector<16xf32>
    %276 = vector.shape_cast %275 : vector<16xf32> to vector<16x1xf32>
    %277 = tpu.reciprocal %276 {approx = true} : vector<16x1xf32> -> vector<16x1xf32>
    %278 = vector.broadcast %277 : vector<16x1xf32> to vector<16x16xf32>
    %279 = arith.mulf %274, %278 : vector<16x16xf32>
    %c1_120 = arith.constant 1 : index
    %c2_121 = arith.constant 2 : index
    %c0_122 = arith.constant 0 : index
    %c0_123 = arith.constant 0 : index
    %280 = vector.load %arg17[%c1_120, %c2_121, %c0_122, %c0_123] : memref<2x4x16x16xf32, #tpu.memory_space<vmem>>, vector<1x1x16x16xf32>
    %281 = vector.shape_cast %280 : vector<1x1x16x16xf32> to vector<16x16xf32>
    %282 = vector.shape_cast %279 : vector<16x16xf32> to vector<1x1x16x16xf32>
    tpu.vector_store %arg17[%c1_120, %c2_121, %c0_122, %c0_123], %282 {strides = array<i32>} : memref<2x4x16x16xf32, #tpu.memory_space<vmem>>, vector<1x1x16x16xf32>,
    %cst_124 = arith.constant dense<0.000000e+00> : vector<16x16xf32>
    %283 = tpu.matmul %279, %263, %cst_124 {dimension_numbers = #tpu.dot_dimension_numbers<[1], [0], [0], [1], [0, 0, 1, 1], [], []>} : vector<16x16xf32>, vector<16x16xf32>, vector<16x16xf32> -> vector<16x16xf32>
    %284 = vector.extract_strided_slice %258 {offsets = [0, 16], sizes = [16, 16], strides = [1, 1]} : vector<16x96xf32> to vector<16x16xf32>
    %285 = vector.extract_strided_slice %258 {offsets = [0, 48], sizes = [16, 16], strides = [1, 1]} : vector<16x96xf32> to vector<16x16xf32>
    %286 = vector.extract_strided_slice %258 {offsets = [0, 80], sizes = [16, 16], strides = [1, 1]} : vector<16x96xf32> to vector<16x16xf32>
    %287 = tpu.transpose %285, [1, 0] : vector<16x16xf32> -> vector<16x16xf32>
    %cst_125 = arith.constant dense<0.000000e+00> : vector<16x16xf32>
    %288 = tpu.matmul %284, %287, %cst_125 {dimension_numbers = #tpu.dot_dimension_numbers<[1], [0], [0], [1], [0, 0, 1, 1], [], []>} : vector<16x16xf32>, vector<16x16xf32>, vector<16x16xf32> -> vector<16x16xf32>
    %cst_126 = arith.constant 2.500000e-01 : f32
    %289 = vector.broadcast %cst_126 : f32 to vector<16x16xf32>
    %290 = arith.mulf %288, %289 : vector<16x16xf32>
    %291 = vector.broadcast %260 : vector<1x16xf32> to vector<16x16xf32>
    %292 = arith.addf %290, %291 : vector<16x16xf32>
    %cst_127 = arith.constant dense<0xFF800000> : vector<16xf32>
    %293 = vector.multi_reduction <maximumf>, %292, %cst_127 [1] : vector<16x16xf32> to vector<16xf32>
    %294 = vector.shape_cast %293 : vector<16xf32> to vector<16x1xf32>
    %295 = vector.broadcast %294 : vector<16x1xf32> to vector<16x16xf32>
    %296 = arith.subf %292, %295 : vector<16x16xf32>
    %297 = math.exp %296 : vector<16x16xf32>
    %cst_128 = arith.constant dense<0.000000e+00> : vector<16xf32>
    %298 = vector.multi_reduction <add>, %297, %cst_128 [1] : vector<16x16xf32> to vector<16xf32>
    %299 = vector.shape_cast %298 : vector<16xf32> to vector<16x1xf32>
    %300 = tpu.reciprocal %299 {approx = true} : vector<16x1xf32> -> vector<16x1xf32>
    %301 = vector.broadcast %300 : vector<16x1xf32> to vector<16x16xf32>
    %302 = arith.mulf %297, %301 : vector<16x16xf32>
    %c1_129 = arith.constant 1 : index
    %c3_130 = arith.constant 3 : index
    %c0_131 = arith.constant 0 : index
    %c0_132 = arith.constant 0 : index
    %303 = vector.load %arg17[%c1_129, %c3_130, %c0_131, %c0_132] : memref<2x4x16x16xf32, #tpu.memory_space<vmem>>, vector<1x1x16x16xf32>
    %304 = vector.shape_cast %303 : vector<1x1x16x16xf32> to vector<16x16xf32>
    %305 = vector.shape_cast %302 : vector<16x16xf32> to vector<1x1x16x16xf32>
    tpu.vector_store %arg17[%c1_129, %c3_130, %c0_131, %c0_132], %305 {strides = array<i32>} : memref<2x4x16x16xf32, #tpu.memory_space<vmem>>, vector<1x1x16x16xf32>,
    %cst_133 = arith.constant dense<0.000000e+00> : vector<16x16xf32>
    %306 = tpu.matmul %302, %286, %cst_133 {dimension_numbers = #tpu.dot_dimension_numbers<[1], [0], [0], [1], [0, 0, 1, 1], [], []>} : vector<16x16xf32>, vector<16x16xf32>, vector<16x16xf32> -> vector<16x16xf32>
    %307 = tpu.concatenate %283, %306 in 1 : vector<16x16xf32>, vector<16x16xf32> -> vector<16x32xf32>
    %308 = tpu.concatenate %257, %307 in 0 : vector<16x32xf32>, vector<16x32xf32> -> vector<32x32xf32>
    %c1_134 = arith.constant 1 : index
    %c0_135 = arith.constant 0 : index
    %c0_136 = arith.constant 0 : index
    %309 = vector.load %arg6[%c1_134, %c0_135, %c0_136] : memref<2x32x32xf32, #tpu.memory_space<vmem>>, vector<1x32x32xf32>
    %310 = vector.shape_cast %309 : vector<1x32x32xf32> to vector<32x32xf32>
    %cst_137 = arith.constant dense<0.000000e+00> : vector<32x32xf32>
    %311 = tpu.matmul %308, %310, %cst_137 {dimension_numbers = #tpu.dot_dimension_numbers<[1], [0], [0], [1], [0, 0, 1, 1], [], []>} : vector<32x32xf32>, vector<32x32xf32>, vector<32x32xf32> -> vector<32x32xf32>
    %c1_138 = arith.constant 1 : index
    %c0_139 = arith.constant 0 : index
    %c0_140 = arith.constant 0 : index
    %312 = vector.load %arg7[%c1_138, %c0_139, %c0_140] : memref<2x1x32xf32, #tpu.memory_space<vmem>>, vector<1x1x32xf32>
    %313 = vector.shape_cast %312 : vector<1x1x32xf32> to vector<1x32xf32>
    %314 = vector.broadcast %313 : vector<1x32xf32> to vector<32x32xf32>
    %315 = arith.addf %311, %314 : vector<32x32xf32>
    %316 = arith.addf %315, %200 : vector<32x32xf32>
    %c1_141 = arith.constant 1 : index
    %c0_142 = arith.constant 0 : index
    %c0_143 = arith.constant 0 : index
    %317 = vector.load %arg8[%c1_141, %c0_142, %c0_143] : memref<2x1x32xf32, #tpu.memory_space<vmem>>, vector<1x1x32xf32>
    %318 = vector.shape_cast %317 : vector<1x1x32xf32> to vector<1x32xf32>
    %c1_144 = arith.constant 1 : index
    %c0_145 = arith.constant 0 : index
    %c0_146 = arith.constant 0 : index
    %319 = vector.load %arg9[%c1_144, %c0_145, %c0_146] : memref<2x1x32xf32, #tpu.memory_space<vmem>>, vector<1x1x32xf32>
    %320 = vector.shape_cast %319 : vector<1x1x32xf32> to vector<1x32xf32>
    %cst_147 = arith.constant dense<0.000000e+00> : vector<32xf32>
    %321 = vector.multi_reduction <add>, %316, %cst_147 [1] : vector<32x32xf32> to vector<32xf32>
    %322 = vector.shape_cast %321 : vector<32xf32> to vector<32x1xf32>
    %cst_148 = arith.constant 3.200000e+01 : f32
    %323 = vector.broadcast %cst_148 : f32 to vector<32x1xf32>
    %324 = arith.divf %322, %323 : vector<32x1xf32>
    %325 = vector.broadcast %324 : vector<32x1xf32> to vector<32x32xf32>
    %326 = arith.subf %316, %325 : vector<32x32xf32>
    %327 = arith.mulf %326, %326 : vector<32x32xf32>
    %cst_149 = arith.constant dense<0.000000e+00> : vector<32xf32>
    %328 = vector.multi_reduction <add>, %327, %cst_149 [1] : vector<32x32xf32> to vector<32xf32>
    %329 = vector.shape_cast %328 : vector<32xf32> to vector<32x1xf32>
    %cst_150 = arith.constant 3.200000e+01 : f32
    %330 = vector.broadcast %cst_150 : f32 to vector<32x1xf32>
    %331 = arith.divf %329, %330 : vector<32x1xf32>
    %332 = vector.broadcast %324 : vector<32x1xf32> to vector<32x32xf32>
    %333 = arith.subf %316, %332 : vector<32x32xf32>
    %cst_151 = arith.constant 9.99999974E-6 : f32
    %334 = vector.broadcast %cst_151 : f32 to vector<32x1xf32>
    %335 = arith.addf %331, %334 : vector<32x1xf32>
    %336 = math.rsqrt %335 : vector<32x1xf32>
    %337 = vector.broadcast %336 : vector<32x1xf32> to vector<32x32xf32>
    %338 = arith.mulf %333, %337 : vector<32x32xf32>
    %339 = vector.broadcast %318 : vector<1x32xf32> to vector<32x32xf32>
    %340 = arith.mulf %338, %339 : vector<32x32xf32>
    %341 = vector.broadcast %320 : vector<1x32xf32> to vector<32x32xf32>
    %342 = arith.addf %340, %341 : vector<32x32xf32>
    %343 = vector.broadcast %3 : vector<32x1xf32> to vector<32x32xf32>
    %344 = arith.mulf %342, %343 : vector<32x32xf32>
    %c1_152 = arith.constant 1 : index
    %c0_153 = arith.constant 0 : index
    %c0_154 = arith.constant 0 : index
    %345 = vector.load %arg10[%c1_152, %c0_153, %c0_154] : memref<2x96x64xf32, #tpu.memory_space<vmem>>, vector<1x96x64xf32>
    %346 = vector.shape_cast %345 : vector<1x96x64xf32> to vector<96x64xf32>
    %c1_155 = arith.constant 1 : index
    %c0_156 = arith.constant 0 : index
    %c0_157 = arith.constant 0 : index
    %347 = vector.load %arg11[%c1_155, %c0_156, %c0_157] : memref<2x1x64xf32, #tpu.memory_space<vmem>>, vector<1x1x64xf32>
    %348 = vector.shape_cast %347 : vector<1x1x64xf32> to vector<1x64xf32>
    %349 = vector.shape_cast %344 : vector<32x32xf32> to vector<2x16x32xf32>
    %cst_158 = arith.constant 0.000000e+00 : f32
    %350 = vector.broadcast %cst_158 : f32 to vector<2x1x32xf32>
    %351 = tpu.concatenate %350, %349, %350 in 1 : vector<2x1x32xf32>, vector<2x16x32xf32>, vector<2x1x32xf32> -> vector<2x18x32xf32>
    %352 = vector.extract_strided_slice %351 {offsets = [0, 0, 0], sizes = [2, 16, 32], strides = [1, 1, 1]} : vector<2x18x32xf32> to vector<2x16x32xf32>
    %353 = vector.extract_strided_slice %351 {offsets = [0, 1, 0], sizes = [2, 16, 32], strides = [1, 1, 1]} : vector<2x18x32xf32> to vector<2x16x32xf32>
    %354 = vector.extract_strided_slice %351 {offsets = [0, 2, 0], sizes = [2, 16, 32], strides = [1, 1, 1]} : vector<2x18x32xf32> to vector<2x16x32xf32>
    %355 = tpu.concatenate %352, %353, %354 in 2 : vector<2x16x32xf32>, vector<2x16x32xf32>, vector<2x16x32xf32> -> vector<2x16x96xf32>
    %356 = vector.shape_cast %355 : vector<2x16x96xf32> to vector<32x96xf32>
    %cst_159 = arith.constant dense<0.000000e+00> : vector<32x64xf32>
    %357 = tpu.matmul %356, %346, %cst_159 {dimension_numbers = #tpu.dot_dimension_numbers<[1], [0], [0], [1], [0, 0, 1, 1], [], []>} : vector<32x96xf32>, vector<96x64xf32>, vector<32x64xf32> -> vector<32x64xf32>
    %358 = vector.broadcast %348 : vector<1x64xf32> to vector<32x64xf32>
    %359 = arith.addf %357, %358 : vector<32x64xf32>
    %cst_160 = arith.constant 0.000000e+00 : f32
    %360 = vector.broadcast %cst_160 : f32 to vector<32x64xf32>
    %361 = arith.maximumf %359, %360 : vector<32x64xf32>
    %c1_161 = arith.constant 1 : index
    %c0_162 = arith.constant 0 : index
    %c0_163 = arith.constant 0 : index
    %362 = vector.load %arg12[%c1_161, %c0_162, %c0_163] : memref<2x64x32xf32, #tpu.memory_space<vmem>>, vector<1x64x32xf32>
    %363 = vector.shape_cast %362 : vector<1x64x32xf32> to vector<64x32xf32>
    %c1_164 = arith.constant 1 : index
    %c0_165 = arith.constant 0 : index
    %c0_166 = arith.constant 0 : index
    %364 = vector.load %arg13[%c1_164, %c0_165, %c0_166] : memref<2x1x32xf32, #tpu.memory_space<vmem>>, vector<1x1x32xf32>
    %365 = vector.shape_cast %364 : vector<1x1x32xf32> to vector<1x32xf32>
    %cst_167 = arith.constant dense<0.000000e+00> : vector<32x32xf32>
    %366 = tpu.matmul %361, %363, %cst_167 {dimension_numbers = #tpu.dot_dimension_numbers<[1], [0], [0], [1], [0, 0, 1, 1], [], []>} : vector<32x64xf32>, vector<64x32xf32>, vector<32x32xf32> -> vector<32x32xf32>
    %367 = vector.broadcast %365 : vector<1x32xf32> to vector<32x32xf32>
    %368 = arith.addf %366, %367 : vector<32x32xf32>
    %369 = arith.addf %368, %344 : vector<32x32xf32>
    %c1_168 = arith.constant 1 : index
    %c0_169 = arith.constant 0 : index
    %c0_170 = arith.constant 0 : index
    %370 = vector.load %arg14[%c1_168, %c0_169, %c0_170] : memref<2x1x32xf32, #tpu.memory_space<vmem>>, vector<1x1x32xf32>
    %371 = vector.shape_cast %370 : vector<1x1x32xf32> to vector<1x32xf32>
    %c1_171 = arith.constant 1 : index
    %c0_172 = arith.constant 0 : index
    %c0_173 = arith.constant 0 : index
    %372 = vector.load %arg15[%c1_171, %c0_172, %c0_173] : memref<2x1x32xf32, #tpu.memory_space<vmem>>, vector<1x1x32xf32>
    %373 = vector.shape_cast %372 : vector<1x1x32xf32> to vector<1x32xf32>
    %cst_174 = arith.constant dense<0.000000e+00> : vector<32xf32>
    %374 = vector.multi_reduction <add>, %369, %cst_174 [1] : vector<32x32xf32> to vector<32xf32>
    %375 = vector.shape_cast %374 : vector<32xf32> to vector<32x1xf32>
    %cst_175 = arith.constant 3.200000e+01 : f32
    %376 = vector.broadcast %cst_175 : f32 to vector<32x1xf32>
    %377 = arith.divf %375, %376 : vector<32x1xf32>
    %378 = vector.broadcast %377 : vector<32x1xf32> to vector<32x32xf32>
    %379 = arith.subf %369, %378 : vector<32x32xf32>
    %380 = arith.mulf %379, %379 : vector<32x32xf32>
    %cst_176 = arith.constant dense<0.000000e+00> : vector<32xf32>
    %381 = vector.multi_reduction <add>, %380, %cst_176 [1] : vector<32x32xf32> to vector<32xf32>
    %382 = vector.shape_cast %381 : vector<32xf32> to vector<32x1xf32>
    %cst_177 = arith.constant 3.200000e+01 : f32
    %383 = vector.broadcast %cst_177 : f32 to vector<32x1xf32>
    %384 = arith.divf %382, %383 : vector<32x1xf32>
    %385 = vector.broadcast %377 : vector<32x1xf32> to vector<32x32xf32>
    %386 = arith.subf %369, %385 : vector<32x32xf32>
    %cst_178 = arith.constant 9.99999974E-6 : f32
    %387 = vector.broadcast %cst_178 : f32 to vector<32x1xf32>
    %388 = arith.addf %384, %387 : vector<32x1xf32>
    %389 = math.rsqrt %388 : vector<32x1xf32>
    %390 = vector.broadcast %389 : vector<32x1xf32> to vector<32x32xf32>
    %391 = arith.mulf %386, %390 : vector<32x32xf32>
    %392 = vector.broadcast %371 : vector<1x32xf32> to vector<32x32xf32>
    %393 = arith.mulf %391, %392 : vector<32x32xf32>
    %394 = vector.broadcast %373 : vector<1x32xf32> to vector<32x32xf32>
    %395 = arith.addf %393, %394 : vector<32x32xf32>
    %396 = vector.broadcast %3 : vector<32x1xf32> to vector<32x32xf32>
    %397 = arith.mulf %395, %396 : vector<32x32xf32>
    %398 = vector.shape_cast %397 : vector<32x32xf32> to vector<2x16x32xf32>
    %c0_179 = arith.constant 0 : index
    %c0_180 = arith.constant 0 : index
    %c0_181 = arith.constant 0 : index
    %399 = vector.load %arg16[%c0_179, %c0_180, %c0_181] : memref<2x16x32xf32, #tpu.memory_space<vmem>>, vector<2x16x32xf32>
    tpu.vector_store %arg16[%c0_179, %c0_180, %c0_181], %398 {strides = array<i32>} : memref<2x16x32xf32, #tpu.memory_space<vmem>>, vector<2x16x32xf32>,
    return
  }
  func.func @transform_0(%arg0: i32) -> (i32, i32, i32) {
    %c0_i32 = arith.constant 0 : i32
    %c0_i32_0 = arith.constant 0 : i32
    %c0_i32_1 = arith.constant 0 : i32
    %c0_i32_2 = arith.constant 0 : i32
    return %c0_i32, %c0_i32_0, %c0_i32_1 : i32, i32, i32
  }
  func.func @transform_1(%arg0: i32) -> (i32, i32, i32) {
    %c0_i32 = arith.constant 0 : i32
    %c0_i32_0 = arith.constant 0 : i32
    %c0_i32_1 = arith.constant 0 : i32
    %c0_i32_2 = arith.constant 0 : i32
    return %c0_i32, %c0_i32_0, %c0_i32_1 : i32, i32, i32
  }
  func.func @transform_2(%arg0: i32) -> (i32, i32) {
    %c0_i32 = arith.constant 0 : i32
    %c0_i32_0 = arith.constant 0 : i32
    %c0_i32_1 = arith.constant 0 : i32
    return %c0_i32, %c0_i32_0 : i32, i32
  }
  func.func @transform_3(%arg0: i32) -> (i32, i32, i32) {
    %c0_i32 = arith.constant 0 : i32
    %c0_i32_0 = arith.constant 0 : i32
    %c0_i32_1 = arith.constant 0 : i32
    %c0_i32_2 = arith.constant 0 : i32
    return %c0_i32, %c0_i32_0, %c0_i32_1 : i32, i32, i32
  }
  func.func @transform_4(%arg0: i32) -> (i32, i32, i32) {
    %c0_i32 = arith.constant 0 : i32
    %c0_i32_0 = arith.constant 0 : i32
    %c0_i32_1 = arith.constant 0 : i32
    %c0_i32_2 = arith.constant 0 : i32
    return %c0_i32, %c0_i32_0, %c0_i32_1 : i32, i32, i32
  }
  func.func @transform_5(%arg0: i32) -> (i32, i32, i32) {
    %c0_i32 = arith.constant 0 : i32
    %c0_i32_0 = arith.constant 0 : i32
    %c0_i32_1 = arith.constant 0 : i32
    %c0_i32_2 = arith.constant 0 : i32
    return %c0_i32, %c0_i32_0, %c0_i32_1 : i32, i32, i32
  }
  func.func @transform_6(%arg0: i32) -> (i32, i32, i32) {
    %c0_i32 = arith.constant 0 : i32
    %c0_i32_0 = arith.constant 0 : i32
    %c0_i32_1 = arith.constant 0 : i32
    %c0_i32_2 = arith.constant 0 : i32
    return %c0_i32, %c0_i32_0, %c0_i32_1 : i32, i32, i32
  }
  func.func @transform_7(%arg0: i32) -> (i32, i32, i32) {
    %c0_i32 = arith.constant 0 : i32
    %c0_i32_0 = arith.constant 0 : i32
    %c0_i32_1 = arith.constant 0 : i32
    %c0_i32_2 = arith.constant 0 : i32
    return %c0_i32, %c0_i32_0, %c0_i32_1 : i32, i32, i32
  }
  func.func @transform_8(%arg0: i32) -> (i32, i32, i32) {
    %c0_i32 = arith.constant 0 : i32
    %c0_i32_0 = arith.constant 0 : i32
    %c0_i32_1 = arith.constant 0 : i32
    %c0_i32_2 = arith.constant 0 : i32
    return %c0_i32, %c0_i32_0, %c0_i32_1 : i32, i32, i32
  }
  func.func @transform_9(%arg0: i32) -> (i32, i32, i32) {
    %c0_i32 = arith.constant 0 : i32
    %c0_i32_0 = arith.constant 0 : i32
    %c0_i32_1 = arith.constant 0 : i32
    %c0_i32_2 = arith.constant 0 : i32
    return %c0_i32, %c0_i32_0, %c0_i32_1 : i32, i32, i32
  }
  func.func @transform_10(%arg0: i32) -> (i32, i32, i32) {
    %c0_i32 = arith.constant 0 : i32
    %c0_i32_0 = arith.constant 0 : i32
    %c0_i32_1 = arith.constant 0 : i32
    %c0_i32_2 = arith.constant 0 : i32
    return %c0_i32, %c0_i32_0, %c0_i32_1 : i32, i32, i32
  }
  func.func @transform_11(%arg0: i32) -> (i32, i32, i32) {
    %c0_i32 = arith.constant 0 : i32
    %c0_i32_0 = arith.constant 0 : i32
    %c0_i32_1 = arith.constant 0 : i32
    %c0_i32_2 = arith.constant 0 : i32
    return %c0_i32, %c0_i32_0, %c0_i32_1 : i32, i32, i32
  }
  func.func @transform_12(%arg0: i32) -> (i32, i32, i32) {
    %c0_i32 = arith.constant 0 : i32
    %c0_i32_0 = arith.constant 0 : i32
    %c0_i32_1 = arith.constant 0 : i32
    %c0_i32_2 = arith.constant 0 : i32
    return %c0_i32, %c0_i32_0, %c0_i32_1 : i32, i32, i32
  }
  func.func @transform_13(%arg0: i32) -> (i32, i32, i32) {
    %c0_i32 = arith.constant 0 : i32
    %c0_i32_0 = arith.constant 0 : i32
    %c0_i32_1 = arith.constant 0 : i32
    %c0_i32_2 = arith.constant 0 : i32
    return %c0_i32, %c0_i32_0, %c0_i32_1 : i32, i32, i32
  }
  func.func @transform_14(%arg0: i32) -> (i32, i32, i32) {
    %c0_i32 = arith.constant 0 : i32
    %c0_i32_0 = arith.constant 0 : i32
    %c0_i32_1 = arith.constant 0 : i32
    %c0_i32_2 = arith.constant 0 : i32
    return %c0_i32, %c0_i32_0, %c0_i32_1 : i32, i32, i32
  }
  func.func @transform_15(%arg0: i32) -> (i32, i32, i32) {
    %c0_i32 = arith.constant 0 : i32
    %c0_i32_0 = arith.constant 0 : i32
    %c0_i32_1 = arith.constant 0 : i32
    %c0_i32_2 = arith.constant 0 : i32
    return %c0_i32, %c0_i32_0, %c0_i32_1 : i32, i32, i32
  }
  func.func @transform_16(%arg0: i32) -> (i32, i32, i32, i32) {
    %c0_i32 = arith.constant 0 : i32
    %c0_i32_0 = arith.constant 0 : i32
    %c0_i32_1 = arith.constant 0 : i32
    %c0_i32_2 = arith.constant 0 : i32
    %c0_i32_3 = arith.constant 0 : i32
    return %c0_i32, %c0_i32_0, %c0_i32_1, %c0_i32_2 : i32, i32, i32, i32
  }
}

module attributes {stable_mosaic.version = 11 : i64} {
  func.func @mel_postnet_kernel(%arg0: i32, %arg1: memref<2x16x32xf32, #tpu.memory_space<vmem>>, %arg2: memref<32x20xf32, #tpu.memory_space<vmem>>, %arg3: memref<1x20xf32, #tpu.memory_space<vmem>>, %arg4: memref<100x32xf32, #tpu.memory_space<vmem>>, %arg5: memref<1x32xf32, #tpu.memory_space<vmem>>, %arg6: memref<160x32xf32, #tpu.memory_space<vmem>>, %arg7: memref<1x32xf32, #tpu.memory_space<vmem>>, %arg8: memref<160x32xf32, #tpu.memory_space<vmem>>, %arg9: memref<1x32xf32, #tpu.memory_space<vmem>>, %arg10: memref<160x32xf32, #tpu.memory_space<vmem>>, %arg11: memref<1x32xf32, #tpu.memory_space<vmem>>, %arg12: memref<160x20xf32, #tpu.memory_space<vmem>>, %arg13: memref<1x20xf32, #tpu.memory_space<vmem>>, %arg14: memref<2x16x20xf32, #tpu.memory_space<vmem>>, %arg15: memref<2x16x20xf32, #tpu.memory_space<vmem>>) attributes {dimension_semantics = [#tpu.dimension_semantics<arbitrary>], iteration_bounds = array<i64: 1>, scalar_prefetch = 0 : i64, scratch_operands = 0 : i64, tpu.core_type = #tpu.core_type<tc>, window_params = [{pipeline_mode = #tpu.pipeline_mode<synchronous>, transform_indices = @transform_0, window_bounds = array<i64: 2, 16, 32>}, {pipeline_mode = #tpu.pipeline_mode<synchronous>, transform_indices = @transform_1, window_bounds = array<i64: 32, 20>}, {pipeline_mode = #tpu.pipeline_mode<synchronous>, transform_indices = @transform_2, window_bounds = array<i64: 1, 20>}, {pipeline_mode = #tpu.pipeline_mode<synchronous>, transform_indices = @transform_3, window_bounds = array<i64: 100, 32>}, {pipeline_mode = #tpu.pipeline_mode<synchronous>, transform_indices = @transform_4, window_bounds = array<i64: 1, 32>}, {pipeline_mode = #tpu.pipeline_mode<synchronous>, transform_indices = @transform_5, window_bounds = array<i64: 160, 32>}, {pipeline_mode = #tpu.pipeline_mode<synchronous>, transform_indices = @transform_6, window_bounds = array<i64: 1, 32>}, {pipeline_mode = #tpu.pipeline_mode<synchronous>, transform_indices = @transform_7, window_bounds = array<i64: 160, 32>}, {pipeline_mode = #tpu.pipeline_mode<synchronous>, transform_indices = @transform_8, window_bounds = array<i64: 1, 32>}, {pipeline_mode = #tpu.pipeline_mode<synchronous>, transform_indices = @transform_9, window_bounds = array<i64: 160, 32>}, {pipeline_mode = #tpu.pipeline_mode<synchronous>, transform_indices = @transform_10, window_bounds = array<i64: 1, 32>}, {pipeline_mode = #tpu.pipeline_mode<synchronous>, transform_indices = @transform_11, window_bounds = array<i64: 160, 20>}, {pipeline_mode = #tpu.pipeline_mode<synchronous>, transform_indices = @transform_12, window_bounds = array<i64: 1, 20>}, {pipeline_mode = #tpu.pipeline_mode<synchronous>, transform_indices = @transform_13, window_bounds = array<i64: 2, 16, 20>}, {pipeline_mode = #tpu.pipeline_mode<synchronous>, transform_indices = @transform_14, window_bounds = array<i64: 2, 16, 20>}]} {
    %c0 = arith.constant 0 : index
    %c0_0 = arith.constant 0 : index
    %c0_1 = arith.constant 0 : index
    %0 = vector.load %arg1[%c0, %c0_0, %c0_1] : memref<2x16x32xf32, #tpu.memory_space<vmem>>, vector<2x16x32xf32>
    %1 = vector.shape_cast %0 : vector<2x16x32xf32> to vector<32x32xf32>
    %c0_2 = arith.constant 0 : index
    %c0_3 = arith.constant 0 : index
    %2 = vector.load %arg2[%c0_2, %c0_3] : memref<32x20xf32, #tpu.memory_space<vmem>>, vector<32x20xf32>
    %cst = arith.constant dense<0.000000e+00> : vector<32x20xf32>
    %3 = tpu.matmul %1, %2, %cst {dimension_numbers = #tpu.dot_dimension_numbers<[1], [0], [0], [1], [0, 0, 1, 1], [], []>} : vector<32x32xf32>, vector<32x20xf32>, vector<32x20xf32> -> vector<32x20xf32>
    %c0_4 = arith.constant 0 : index
    %c0_5 = arith.constant 0 : index
    %4 = vector.load %arg3[%c0_4, %c0_5] : memref<1x20xf32, #tpu.memory_space<vmem>>, vector<1x20xf32>
    %5 = vector.broadcast %4 : vector<1x20xf32> to vector<32x20xf32>
    %6 = arith.addf %3, %5 : vector<32x20xf32>
    %7 = vector.shape_cast %6 : vector<32x20xf32> to vector<2x16x20xf32>
    %c0_6 = arith.constant 0 : index
    %c0_7 = arith.constant 0 : index
    %c0_8 = arith.constant 0 : index
    %8 = vector.load %arg14[%c0_6, %c0_7, %c0_8] : memref<2x16x20xf32, #tpu.memory_space<vmem>>, vector<2x16x20xf32>
    tpu.vector_store %arg14[%c0_6, %c0_7, %c0_8], %7 {strides = array<i32>} : memref<2x16x20xf32, #tpu.memory_space<vmem>>, vector<2x16x20xf32>,
    %c0_9 = arith.constant 0 : index
    %c0_10 = arith.constant 0 : index
    %9 = vector.load %arg4[%c0_9, %c0_10] : memref<100x32xf32, #tpu.memory_space<vmem>>, vector<100x32xf32>
    %c0_11 = arith.constant 0 : index
    %c0_12 = arith.constant 0 : index
    %10 = vector.load %arg5[%c0_11, %c0_12] : memref<1x32xf32, #tpu.memory_space<vmem>>, vector<1x32xf32>
    %11 = vector.shape_cast %6 : vector<32x20xf32> to vector<2x16x20xf32>
    %cst_13 = arith.constant 0.000000e+00 : f32
    %12 = vector.broadcast %cst_13 : f32 to vector<2x2x20xf32>
    %13 = tpu.concatenate %12, %11, %12 in 1 : vector<2x2x20xf32>, vector<2x16x20xf32>, vector<2x2x20xf32> -> vector<2x20x20xf32>
    %14 = vector.extract_strided_slice %13 {offsets = [0, 0, 0], sizes = [2, 16, 20], strides = [1, 1, 1]} : vector<2x20x20xf32> to vector<2x16x20xf32>
    %15 = vector.extract_strided_slice %13 {offsets = [0, 1, 0], sizes = [2, 16, 20], strides = [1, 1, 1]} : vector<2x20x20xf32> to vector<2x16x20xf32>
    %16 = vector.extract_strided_slice %13 {offsets = [0, 2, 0], sizes = [2, 16, 20], strides = [1, 1, 1]} : vector<2x20x20xf32> to vector<2x16x20xf32>
    %17 = vector.extract_strided_slice %13 {offsets = [0, 3, 0], sizes = [2, 16, 20], strides = [1, 1, 1]} : vector<2x20x20xf32> to vector<2x16x20xf32>
    %18 = vector.extract_strided_slice %13 {offsets = [0, 4, 0], sizes = [2, 16, 20], strides = [1, 1, 1]} : vector<2x20x20xf32> to vector<2x16x20xf32>
    %19 = tpu.concatenate %14, %15, %16, %17, %18 in 2 : vector<2x16x20xf32>, vector<2x16x20xf32>, vector<2x16x20xf32>, vector<2x16x20xf32>, vector<2x16x20xf32> -> vector<2x16x100xf32>
    %20 = vector.shape_cast %19 : vector<2x16x100xf32> to vector<32x100xf32>
    %cst_14 = arith.constant dense<0.000000e+00> : vector<32x32xf32>
    %21 = tpu.matmul %20, %9, %cst_14 {dimension_numbers = #tpu.dot_dimension_numbers<[1], [0], [0], [1], [0, 0, 1, 1], [], []>} : vector<32x100xf32>, vector<100x32xf32>, vector<32x32xf32> -> vector<32x32xf32>
    %22 = vector.broadcast %10 : vector<1x32xf32> to vector<32x32xf32>
    %23 = arith.addf %21, %22 : vector<32x32xf32>
    %24 = math.tanh %23 : vector<32x32xf32>
    %c0_15 = arith.constant 0 : index
    %c0_16 = arith.constant 0 : index
    %25 = vector.load %arg6[%c0_15, %c0_16] : memref<160x32xf32, #tpu.memory_space<vmem>>, vector<160x32xf32>
    %c0_17 = arith.constant 0 : index
    %c0_18 = arith.constant 0 : index
    %26 = vector.load %arg7[%c0_17, %c0_18] : memref<1x32xf32, #tpu.memory_space<vmem>>, vector<1x32xf32>
    %27 = vector.shape_cast %24 : vector<32x32xf32> to vector<2x16x32xf32>
    %cst_19 = arith.constant 0.000000e+00 : f32
    %28 = vector.broadcast %cst_19 : f32 to vector<2x2x32xf32>
    %29 = tpu.concatenate %28, %27, %28 in 1 : vector<2x2x32xf32>, vector<2x16x32xf32>, vector<2x2x32xf32> -> vector<2x20x32xf32>
    %30 = vector.extract_strided_slice %29 {offsets = [0, 0, 0], sizes = [2, 16, 32], strides = [1, 1, 1]} : vector<2x20x32xf32> to vector<2x16x32xf32>
    %31 = vector.extract_strided_slice %29 {offsets = [0, 1, 0], sizes = [2, 16, 32], strides = [1, 1, 1]} : vector<2x20x32xf32> to vector<2x16x32xf32>
    %32 = vector.extract_strided_slice %29 {offsets = [0, 2, 0], sizes = [2, 16, 32], strides = [1, 1, 1]} : vector<2x20x32xf32> to vector<2x16x32xf32>
    %33 = vector.extract_strided_slice %29 {offsets = [0, 3, 0], sizes = [2, 16, 32], strides = [1, 1, 1]} : vector<2x20x32xf32> to vector<2x16x32xf32>
    %34 = vector.extract_strided_slice %29 {offsets = [0, 4, 0], sizes = [2, 16, 32], strides = [1, 1, 1]} : vector<2x20x32xf32> to vector<2x16x32xf32>
    %35 = tpu.concatenate %30, %31, %32, %33, %34 in 2 : vector<2x16x32xf32>, vector<2x16x32xf32>, vector<2x16x32xf32>, vector<2x16x32xf32>, vector<2x16x32xf32> -> vector<2x16x160xf32>
    %36 = vector.shape_cast %35 : vector<2x16x160xf32> to vector<32x160xf32>
    %cst_20 = arith.constant dense<0.000000e+00> : vector<32x32xf32>
    %37 = tpu.matmul %36, %25, %cst_20 {dimension_numbers = #tpu.dot_dimension_numbers<[1], [0], [0], [1], [0, 0, 1, 1], [], []>} : vector<32x160xf32>, vector<160x32xf32>, vector<32x32xf32> -> vector<32x32xf32>
    %38 = vector.broadcast %26 : vector<1x32xf32> to vector<32x32xf32>
    %39 = arith.addf %37, %38 : vector<32x32xf32>
    %40 = math.tanh %39 : vector<32x32xf32>
    %c0_21 = arith.constant 0 : index
    %c0_22 = arith.constant 0 : index
    %41 = vector.load %arg8[%c0_21, %c0_22] : memref<160x32xf32, #tpu.memory_space<vmem>>, vector<160x32xf32>
    %c0_23 = arith.constant 0 : index
    %c0_24 = arith.constant 0 : index
    %42 = vector.load %arg9[%c0_23, %c0_24] : memref<1x32xf32, #tpu.memory_space<vmem>>, vector<1x32xf32>
    %43 = vector.shape_cast %40 : vector<32x32xf32> to vector<2x16x32xf32>
    %cst_25 = arith.constant 0.000000e+00 : f32
    %44 = vector.broadcast %cst_25 : f32 to vector<2x2x32xf32>
    %45 = tpu.concatenate %44, %43, %44 in 1 : vector<2x2x32xf32>, vector<2x16x32xf32>, vector<2x2x32xf32> -> vector<2x20x32xf32>
    %46 = vector.extract_strided_slice %45 {offsets = [0, 0, 0], sizes = [2, 16, 32], strides = [1, 1, 1]} : vector<2x20x32xf32> to vector<2x16x32xf32>
    %47 = vector.extract_strided_slice %45 {offsets = [0, 1, 0], sizes = [2, 16, 32], strides = [1, 1, 1]} : vector<2x20x32xf32> to vector<2x16x32xf32>
    %48 = vector.extract_strided_slice %45 {offsets = [0, 2, 0], sizes = [2, 16, 32], strides = [1, 1, 1]} : vector<2x20x32xf32> to vector<2x16x32xf32>
    %49 = vector.extract_strided_slice %45 {offsets = [0, 3, 0], sizes = [2, 16, 32], strides = [1, 1, 1]} : vector<2x20x32xf32> to vector<2x16x32xf32>
    %50 = vector.extract_strided_slice %45 {offsets = [0, 4, 0], sizes = [2, 16, 32], strides = [1, 1, 1]} : vector<2x20x32xf32> to vector<2x16x32xf32>
    %51 = tpu.concatenate %46, %47, %48, %49, %50 in 2 : vector<2x16x32xf32>, vector<2x16x32xf32>, vector<2x16x32xf32>, vector<2x16x32xf32>, vector<2x16x32xf32> -> vector<2x16x160xf32>
    %52 = vector.shape_cast %51 : vector<2x16x160xf32> to vector<32x160xf32>
    %cst_26 = arith.constant dense<0.000000e+00> : vector<32x32xf32>
    %53 = tpu.matmul %52, %41, %cst_26 {dimension_numbers = #tpu.dot_dimension_numbers<[1], [0], [0], [1], [0, 0, 1, 1], [], []>} : vector<32x160xf32>, vector<160x32xf32>, vector<32x32xf32> -> vector<32x32xf32>
    %54 = vector.broadcast %42 : vector<1x32xf32> to vector<32x32xf32>
    %55 = arith.addf %53, %54 : vector<32x32xf32>
    %56 = math.tanh %55 : vector<32x32xf32>
    %c0_27 = arith.constant 0 : index
    %c0_28 = arith.constant 0 : index
    %57 = vector.load %arg10[%c0_27, %c0_28] : memref<160x32xf32, #tpu.memory_space<vmem>>, vector<160x32xf32>
    %c0_29 = arith.constant 0 : index
    %c0_30 = arith.constant 0 : index
    %58 = vector.load %arg11[%c0_29, %c0_30] : memref<1x32xf32, #tpu.memory_space<vmem>>, vector<1x32xf32>
    %59 = vector.shape_cast %56 : vector<32x32xf32> to vector<2x16x32xf32>
    %cst_31 = arith.constant 0.000000e+00 : f32
    %60 = vector.broadcast %cst_31 : f32 to vector<2x2x32xf32>
    %61 = tpu.concatenate %60, %59, %60 in 1 : vector<2x2x32xf32>, vector<2x16x32xf32>, vector<2x2x32xf32> -> vector<2x20x32xf32>
    %62 = vector.extract_strided_slice %61 {offsets = [0, 0, 0], sizes = [2, 16, 32], strides = [1, 1, 1]} : vector<2x20x32xf32> to vector<2x16x32xf32>
    %63 = vector.extract_strided_slice %61 {offsets = [0, 1, 0], sizes = [2, 16, 32], strides = [1, 1, 1]} : vector<2x20x32xf32> to vector<2x16x32xf32>
    %64 = vector.extract_strided_slice %61 {offsets = [0, 2, 0], sizes = [2, 16, 32], strides = [1, 1, 1]} : vector<2x20x32xf32> to vector<2x16x32xf32>
    %65 = vector.extract_strided_slice %61 {offsets = [0, 3, 0], sizes = [2, 16, 32], strides = [1, 1, 1]} : vector<2x20x32xf32> to vector<2x16x32xf32>
    %66 = vector.extract_strided_slice %61 {offsets = [0, 4, 0], sizes = [2, 16, 32], strides = [1, 1, 1]} : vector<2x20x32xf32> to vector<2x16x32xf32>
    %67 = tpu.concatenate %62, %63, %64, %65, %66 in 2 : vector<2x16x32xf32>, vector<2x16x32xf32>, vector<2x16x32xf32>, vector<2x16x32xf32>, vector<2x16x32xf32> -> vector<2x16x160xf32>
    %68 = vector.shape_cast %67 : vector<2x16x160xf32> to vector<32x160xf32>
    %cst_32 = arith.constant dense<0.000000e+00> : vector<32x32xf32>
    %69 = tpu.matmul %68, %57, %cst_32 {dimension_numbers = #tpu.dot_dimension_numbers<[1], [0], [0], [1], [0, 0, 1, 1], [], []>} : vector<32x160xf32>, vector<160x32xf32>, vector<32x32xf32> -> vector<32x32xf32>
    %70 = vector.broadcast %58 : vector<1x32xf32> to vector<32x32xf32>
    %71 = arith.addf %69, %70 : vector<32x32xf32>
    %72 = math.tanh %71 : vector<32x32xf32>
    %c0_33 = arith.constant 0 : index
    %c0_34 = arith.constant 0 : index
    %73 = vector.load %arg12[%c0_33, %c0_34] : memref<160x20xf32, #tpu.memory_space<vmem>>, vector<160x20xf32>
    %c0_35 = arith.constant 0 : index
    %c0_36 = arith.constant 0 : index
    %74 = vector.load %arg13[%c0_35, %c0_36] : memref<1x20xf32, #tpu.memory_space<vmem>>, vector<1x20xf32>
    %75 = vector.shape_cast %72 : vector<32x32xf32> to vector<2x16x32xf32>
    %cst_37 = arith.constant 0.000000e+00 : f32
    %76 = vector.broadcast %cst_37 : f32 to vector<2x2x32xf32>
    %77 = tpu.concatenate %76, %75, %76 in 1 : vector<2x2x32xf32>, vector<2x16x32xf32>, vector<2x2x32xf32> -> vector<2x20x32xf32>
    %78 = vector.extract_strided_slice %77 {offsets = [0, 0, 0], sizes = [2, 16, 32], strides = [1, 1, 1]} : vector<2x20x32xf32> to vector<2x16x32xf32>
    %79 = vector.extract_strided_slice %77 {offsets = [0, 1, 0], sizes = [2, 16, 32], strides = [1, 1, 1]} : vector<2x20x32xf32> to vector<2x16x32xf32>
    %80 = vector.extract_strided_slice %77 {offsets = [0, 2, 0], sizes = [2, 16, 32], strides = [1, 1, 1]} : vector<2x20x32xf32> to vector<2x16x32xf32>
    %81 = vector.extract_strided_slice %77 {offsets = [0, 3, 0], sizes = [2, 16, 32], strides = [1, 1, 1]} : vector<2x20x32xf32> to vector<2x16x32xf32>
    %82 = vector.extract_strided_slice %77 {offsets = [0, 4, 0], sizes = [2, 16, 32], strides = [1, 1, 1]} : vector<2x20x32xf32> to vector<2x16x32xf32>
    %83 = tpu.concatenate %78, %79, %80, %81, %82 in 2 : vector<2x16x32xf32>, vector<2x16x32xf32>, vector<2x16x32xf32>, vector<2x16x32xf32>, vector<2x16x32xf32> -> vector<2x16x160xf32>
    %84 = vector.shape_cast %83 : vector<2x16x160xf32> to vector<32x160xf32>
    %cst_38 = arith.constant dense<0.000000e+00> : vector<32x20xf32>
    %85 = tpu.matmul %84, %73, %cst_38 {dimension_numbers = #tpu.dot_dimension_numbers<[1], [0], [0], [1], [0, 0, 1, 1], [], []>} : vector<32x160xf32>, vector<160x20xf32>, vector<32x20xf32> -> vector<32x20xf32>
    %86 = vector.broadcast %74 : vector<1x20xf32> to vector<32x20xf32>
    %87 = arith.addf %85, %86 : vector<32x20xf32>
    %88 = arith.addf %87, %6 : vector<32x20xf32>
    %89 = vector.shape_cast %88 : vector<32x20xf32> to vector<2x16x20xf32>
    %c0_39 = arith.constant 0 : index
    %c0_40 = arith.constant 0 : index
    %c0_41 = arith.constant 0 : index
    %90 = vector.load %arg15[%c0_39, %c0_40, %c0_41] : memref<2x16x20xf32, #tpu.memory_space<vmem>>, vector<2x16x20xf32>
    tpu.vector_store %arg15[%c0_39, %c0_40, %c0_41], %89 {strides = array<i32>} : memref<2x16x20xf32, #tpu.memory_space<vmem>>, vector<2x16x20xf32>,
    return
  }
  func.func @transform_0(%arg0: i32) -> (i32, i32, i32) {
    %c0_i32 = arith.constant 0 : i32
    %c0_i32_0 = arith.constant 0 : i32
    %c0_i32_1 = arith.constant 0 : i32
    %c0_i32_2 = arith.constant 0 : i32
    return %c0_i32, %c0_i32_0, %c0_i32_1 : i32, i32, i32
  }
  func.func @transform_1(%arg0: i32) -> (i32, i32) {
    %c0_i32 = arith.constant 0 : i32
    %c0_i32_0 = arith.constant 0 : i32
    %c0_i32_1 = arith.constant 0 : i32
    return %c0_i32, %c0_i32_0 : i32, i32
  }
  func.func @transform_2(%arg0: i32) -> (i32, i32) {
    %c0_i32 = arith.constant 0 : i32
    %c0_i32_0 = arith.constant 0 : i32
    %c0_i32_1 = arith.constant 0 : i32
    return %c0_i32, %c0_i32_0 : i32, i32
  }
  func.func @transform_3(%arg0: i32) -> (i32, i32) {
    %c0_i32 = arith.constant 0 : i32
    %c0_i32_0 = arith.constant 0 : i32
    %c0_i32_1 = arith.constant 0 : i32
    return %c0_i32, %c0_i32_0 : i32, i32
  }
  func.func @transform_4(%arg0: i32) -> (i32, i32) {
    %c0_i32 = arith.constant 0 : i32
    %c0_i32_0 = arith.constant 0 : i32
    %c0_i32_1 = arith.constant 0 : i32
    return %c0_i32, %c0_i32_0 : i32, i32
  }
  func.func @transform_5(%arg0: i32) -> (i32, i32) {
    %c0_i32 = arith.constant 0 : i32
    %c0_i32_0 = arith.constant 0 : i32
    %c0_i32_1 = arith.constant 0 : i32
    return %c0_i32, %c0_i32_0 : i32, i32
  }
  func.func @transform_6(%arg0: i32) -> (i32, i32) {
    %c0_i32 = arith.constant 0 : i32
    %c0_i32_0 = arith.constant 0 : i32
    %c0_i32_1 = arith.constant 0 : i32
    return %c0_i32, %c0_i32_0 : i32, i32
  }
  func.func @transform_7(%arg0: i32) -> (i32, i32) {
    %c0_i32 = arith.constant 0 : i32
    %c0_i32_0 = arith.constant 0 : i32
    %c0_i32_1 = arith.constant 0 : i32
    return %c0_i32, %c0_i32_0 : i32, i32
  }
  func.func @transform_8(%arg0: i32) -> (i32, i32) {
    %c0_i32 = arith.constant 0 : i32
    %c0_i32_0 = arith.constant 0 : i32
    %c0_i32_1 = arith.constant 0 : i32
    return %c0_i32, %c0_i32_0 : i32, i32
  }
  func.func @transform_9(%arg0: i32) -> (i32, i32) {
    %c0_i32 = arith.constant 0 : i32
    %c0_i32_0 = arith.constant 0 : i32
    %c0_i32_1 = arith.constant 0 : i32
    return %c0_i32, %c0_i32_0 : i32, i32
  }
  func.func @transform_10(%arg0: i32) -> (i32, i32) {
    %c0_i32 = arith.constant 0 : i32
    %c0_i32_0 = arith.constant 0 : i32
    %c0_i32_1 = arith.constant 0 : i32
    return %c0_i32, %c0_i32_0 : i32, i32
  }
  func.func @transform_11(%arg0: i32) -> (i32, i32) {
    %c0_i32 = arith.constant 0 : i32
    %c0_i32_0 = arith.constant 0 : i32
    %c0_i32_1 = arith.constant 0 : i32
    return %c0_i32, %c0_i32_0 : i32, i32
  }
  func.func @transform_12(%arg0: i32) -> (i32, i32) {
    %c0_i32 = arith.constant 0 : i32
    %c0_i32_0 = arith.constant 0 : i32
    %c0_i32_1 = arith.constant 0 : i32
    return %c0_i32, %c0_i32_0 : i32, i32
  }
  func.func @transform_13(%arg0: i32) -> (i32, i32, i32) {
    %c0_i32 = arith.constant 0 : i32
    %c0_i32_0 = arith.constant 0 : i32
    %c0_i32_1 = arith.constant 0 : i32
    %c0_i32_2 = arith.constant 0 : i32
    return %c0_i32, %c0_i32_0, %c0_i32_1 : i32, i32, i32
  }
  func.func @transform_14(%arg0: i32) -> (i32, i32, i32) {
    %c0_i32 = arith.constant 0 : i32
    %c0_i32_0 = arith.constant 0 : i32
    %c0_i32_1 = arith.constant 0 : i32
    %c0_i32_2 = arith.constant 0 : i32
    return %c0_i32, %c0_i32_0, %c0_i32_1 : i32, i32, i32
  }
}

</mosaic_0001>

<bundles_post_ra>
// kernel: fastspeech2_forward.5
= control target key start
LH: loop header
LB: loop body
LE: loop exit
PB: predicated region body
PF: predicated region fallthrough
CT: control target
= control target key end

     0   :  { %vm74_vm0 = vcmask 1040384   ;;  %vm83_vm1 = vcmask 1046528   ;;  %vm96_vm2 = vcmask 1045504   ;;  %s1311_s18 = smov 32   ;;  %s1312_s19 = smov 64   ;;  %vm109_vm3 = vcmask 261120   ;;  %s1672_s0 = inlined_call_operand.vmem [shape: f32[2,8,32], index: 0, kind: input, shape index: {}]   ;;  %s1673_s3 = inlined_call_operand.vmem [shape: f32[96,32], index: 3, kind: input, shape index: {}]   ;;  %s1674_s4 = inlined_call_operand.vmem [shape: f32[1,32], index: 4, kind: input, shape index: {}, may-alias: {4,6,8,10}]   ;;  %s1675_s7 = inlined_call_operand.vmem [shape: f32[96,32], index: 7, kind: input, shape index: {}]   ;;  %s1676_s5 = inlined_call_operand.vmem [shape: f32[1,32], index: 5, kind: input, shape index: {}, may-alias: {5,9}]   ;;  %s1677_s6 = inlined_call_operand.vmem [shape: f32[1,32], index: 6, kind: input, shape index: {}, may-alias: {4,6,8,10}]   ;;  %s1678_s8 = inlined_call_operand.vmem [shape: f32[1,32], index: 8, kind: input, shape index: {}, may-alias: {4,6,8,10}]   ;;  %s1679_s12 = inlined_call_operand.<no memory space> [shape: f32[1,1], index: 12, kind: input, shape index: {}]   ;;  %s1680_s9 = inlined_call_operand.vmem [shape: f32[1,32], index: 9, kind: input, shape index: {}, may-alias: {5,9}]   ;;  %s1681_s10 = inlined_call_operand.vmem [shape: f32[1,32], index: 10, kind: input, shape index: {}, may-alias: {4,6,8,10}]   ;;  %s1682_s11 = inlined_call_operand.vmem [shape: f32[1,32], index: 11, kind: input, shape index: {}]   ;;  %s1683_s2 = inlined_call_operand.vmem [shape: f32[2,1,8], index: 2, kind: input, shape index: {}]   ;;  %s1684_s13 = inlined_call_operand.vmem [shape: f32[2,1,8], index: 13, kind: output, shape index: {0}]   ;;  %s1685_s1 = inlined_call_operand.vmem [shape: f32[2,1,8], index: 1, kind: input, shape index: {}]   ;;  %s1686_s14 = inlined_call_operand.vmem [shape: f32[2,16,8], index: 14, kind: output, shape index: {1}]   ;;  %s1687_s15 = inlined_call_operand.vmem [shape: f32[2,16,32], index: 15, kind: output, shape index: {2}]  }
   0x1   :  { %v1400_v0 = vld [vmem:[%s1672_s0] sm:$0xff]  ;;  %v1405_v1 = vld [vmem:[%s1672_s0 + $0x8] sm:$0xff]  ;;  %v57_v6 = vld [vmem:[%s1673_s3 + $0x10] sm:$0xff]  ;;  %vm112_vm4 = vcmask 523264   ;;  %vm121_vm5 = vcmask 785408   ;;  %vm1314_vm6 = vmmov 0  }
   0x2   :  { %v55_v2 = vld [vmem:[%s1673_s3] sm:$0xff]  ;;  %v70_v3 = vrot.slane %v1400_v0, 7  ;;  %v71_v4 = vrot.slane %v1405_v1, 7  ;;  %v56_v5 = vld [vmem:[%s1673_s3 + $0x8] sm:$0xff]  ;;  %v58_v7 = vld [vmem:[%s1673_s3 + $0x18] sm:$0xff]  ;;  %vm536_vm8 = vcmask 57344  }
   0x3   :  { %v1223_v8 = vpack.c.bf16 %v56_v5, %v55_v2  ;;  %v1227_v9 = vpack.c.bf16 %v58_v7, %v57_v6  ;;  %v59_v14 = vld [vmem:[%s1673_s3 + $0x20] sm:$0xff]  ;;  %v60_v15 = vld [vmem:[%s1673_s3 + $0x28] sm:$0xff]  ;;  %v61_v27 = vld [vmem:[%s1673_s3 + $0x30] sm:$0xff]  ;;  %vm548_vm9 = vcmask 64512  }
   0x4   :  { %v75_v10 = vsel %vm74_vm0, 0.0, %v70_v3  ;;  %v77_v11 = vsel %vm74_vm0, %v70_v3, 0.0  ;;  %v76_v12 = vsel %vm74_vm0, 0.0, %v71_v4  ;;  %v78_v13 = vsel %vm74_vm0, %v71_v4, 0.0  ;;  %v62_v28 = vld [vmem:[%s1673_s3 + $0x38] sm:$0xff]  ;;  %v63_v32 = vld [vmem:[%s1673_s3 + $0x40] sm:$0xff] }
   0x5   :  { %v84_v16 = vrot.slane %v75_v10, 1  ;;  %v85_v17 = vrot.slane %v77_v11, 1  ;;  %v97_v18 = vrot.slane %v75_v10, 2  ;;  %v98_v19 = vrot.slane %v77_v11, 2  ;;  %1224 = vmatprep.subr.bf16.mxu0 %v1223_v8  ;;  %v64_v33 = vld [vmem:[%s1673_s3 + $0x48] sm:$0xff]  ;;  %v65_v35 = vld [vmem:[%s1673_s3 + $0x50] sm:$0xff] }
   0x6   :  { %v87_v20 = vrot.slane %v76_v12, 1  ;;  %v88_v21 = vrot.slane %v78_v13, 1  ;;  %v100_v22 = vrot.slane %v76_v12, 2  ;;  %v101_v23 = vrot.slane %v78_v13, 2  ;;  %1226 = vmatpush3.bf16.msra.mxu0 %v1223_v8  ;;  %v66_v36 = vld [vmem:[%s1673_s3 + $0x58] sm:$0xff]  ;;  %v250_v3 = vld [vmem:[%s1675_s7] sm:$0xff] }
   0x7   :  { %v86_v24 = vsel %vm83_vm1, %v84_v16, %v85_v17  ;;  %v99_v25 = vsel %vm96_vm2, %v97_v18, %v98_v19  ;;  %1228 = vmatprep.subr.bf16.mxu0 %v1227_v9  ;;  %v1231_v26 = vpack.c.bf16 %v60_v15, %v59_v14  ;;  %v1235_v31 = vpack.c.bf16 %v62_v28, %v61_v27  ;;  %v1067_v46 = vld [vmem:[%s1674_s4] ss:$0 sm:$0xff]  ;;  %v251_v4 = vld [vmem:[%s1675_s7 + $0x8] sm:$0xff]  ;;  %v252_v5 = vld [vmem:[%s1675_s7 + $0x10] sm:$0xff] }
   0x8   :  { %90 = vrot.lane.b32.xlu0 %v86_v24, %s1311_s18  ;;  %103 = vrot.lane.b32.xlu1 %v99_v25, %s1312_s19  ;;  %v89_v29 = vsel %vm83_vm1, %v87_v20, %v88_v21  ;;  %v102_v30 = vsel %vm96_vm2, %v100_v22, %v101_v23  ;;  %v1239_v34 = vpack.c.bf16 %v64_v33, %v63_v32  ;;  %v253_v7 = vld [vmem:[%s1675_s7 + $0x18] sm:$0xff]  ;;  %v258_v21 = vld [vmem:[%s1675_s7 + $0x40] sm:$0xff] }
   0x9   :  { %v1243_v37 = vpack.c.bf16 %v66_v36, %v65_v35  ;;  %v1247_v6 = vpack.c.bf16 %v251_v4, %v250_v3  ;;  %v1251_v8 = vpack.c.bf16 %v253_v7, %v252_v5  ;;  %v257_v13 = vld [vmem:[%s1675_s7 + $0x38] sm:$0xff]  ;;  %v259_v22 = vld [vmem:[%s1675_s7 + $0x48] sm:$0xff]  ;;  %v1070_v25 = vld [vmem:[%s1676_s5] ss:$0 sm:$0xff] }
   0xa   :  { %1230 = vmatpush3.bf16.msra.mxu0 %v1227_v9  ;;  %v254_v9 = vld [vmem:[%s1675_s7 + $0x20] sm:$0xff]  ;;  %v1263_v23 = vpack.c.bf16 %v259_v22, %v258_v21  ;;  %v260_v28 = vld [vmem:[%s1675_s7 + $0x50] sm:$0xff] }
   0xb   :  { %1232 = vmatprep.subr.bf16.mxu0 %v1231_v26  ;;  %1248 = vmatprep.subr.bf16.mxu1 %v1247_v6  ;;  %v1071_v27 = vld [vmem:[%s1677_s6] ss:$0 sm:$0xff] }
   0xc   :  { %92 = vrot.lane.b32.xlu0 %v89_v29, %s1311_s18  ;;  %105 = vrot.lane.b32.xlu1 %v102_v30, %s1312_s19  ;;  %v261_v29 = vld [vmem:[%s1675_s7 + $0x58] sm:$0xff] }
   0xd   :  { %1250 = vmatpush3.bf16.msra.mxu1 %v1247_v6 }
   0xe   :  { %1234 = vmatpush3.bf16.msra.mxu0 %v1231_v26  ;;  %1252 = vmatprep.subr.bf16.mxu1 %v1251_v8 }
   0xf   :  { %1236 = vmatprep.subr.bf16.mxu0 %v1235_v31 }
  0x11   :  { %1254 = vmatpush3.bf16.msra.mxu1 %v1251_v8 }
  0x12   :  { %1238 = vmatpush3.bf16.msra.mxu0 %v1235_v31  ;;  %v1267_v31 = vpack.c.bf16 %v261_v29, %v260_v28  ;;  %v1075_v28 = vld [vmem:[%s1680_s9] ss:$0 sm:$0xff] }
  0x13   :  { %1240 = vmatprep.subr.bf16.mxu0 %v1239_v34 }
  0x16   :  { %1242 = vmatpush3.bf16.msra.mxu0 %v1239_v34 }
  0x17   :  { %1244 = vmatprep.subr.bf16.mxu0 %v1243_v37 }
  0x1a   :  { %1246 = vmatpush3.bf16.msra.mxu0 %v1243_v37 }
  0x7a   :  { %v91_v38 = vpop.permute.xlu0 %90  ;;  %v104_v39 = vpop.permute.xlu1 %103 }
  0x7b   :  { %v110_v40 = vsel %vm109_vm3, %v75_v10, %v91_v38  ;;  %v255_v10 = vld [vmem:[%s1675_s7 + $0x28] sm:$0xff] }
  0x7c   :  { %v113_v41 = vsel %vm112_vm4, %v110_v40, %v104_v39  ;;  %v1255_v11 = vpack.c.bf16 %v255_v10, %v254_v9 }
  0x7d   :  { %1163 = vmatprep.mubr.msk.f32.mxu0 %vm121_vm5, %v113_v41 }
  0x7e   :  { %v93_v42 = vpop.permute.xlu0 %92  ;;  %v106_v43 = vpop.permute.xlu1 %105  ;;  %1256 = vmatprep.subr.bf16.mxu1 %v1255_v11 }
  0x7f   :  { %v111_v44 = vsel %vm109_vm3, %v76_v12, %v93_v42  ;;  %v256_v12 = vld [vmem:[%s1675_s7 + $0x30] sm:$0xff]  ;;  %1258 = vmatpush3.bf16.msra.mxu1 %v1255_v11 }
  0x80   :  { %v114_v45 = vsel %vm112_vm4, %v111_v44, %v106_v43  ;;  %v1259_v14 = vpack.c.bf16 %v257_v13, %v256_v12 }
  0x81   :  { %1164 = vmatmul.mubr.msk.f32.vlgmr.msra.gmra.mrb[0].mxu0 %vm121_vm5, %v114_v45 }
  0x82   :  { %1260 = vmatprep.subr.bf16.mxu1 %v1259_v14 }
  0x83   :  { %1262 = vmatpush3.bf16.msra.mxu1 %v1259_v14 }
  0x84   :  { %1264 = vmatprep.subr.bf16.mxu1 %v1263_v23 }
  0x87   :  { %1266 = vmatpush3.bf16.msra.mxu1 %v1263_v23 }
  0x88   :  { %1268 = vmatprep.subr.bf16.mxu1 %v1267_v31 }
  0x8b   :  { %1270 = vmatpush3.bf16.msra.mxu1 %v1267_v31 }
 0x154   :  { %v1165_v47 = vpop.f32.mrb[0].mxu0 }
 0x155   :  { %v200_v48 = vadd.f32 %v1165_v47, %v1067_v46  ;;  %v194_v49 = vpop.f32.mrb[1].mxu0 }
 0x156   :  { %v195_v50 = vadd.f32 %v1067_v46, %v194_v49 }
 0x157   :  { %v204_v51 = vmax.f32 %v200_v48, 0.0 }
 0x158   :  { %v203_v52 = vmax.f32 %v195_v50, 0.0 }
 0x159   :  { %v210_v53 = vsel %vm109_vm3, %v204_v51, 0.0 }
 0x15a   :  { %211 = vadd.xlane.f32.xlu1 %v210_v53  ;;  %v207_v54 = vsel %vm109_vm3, %v203_v52, 0.0 }
 0x15b   :  { %208 = vadd.xlane.f32.xlu0 %v207_v54 }
 0x1e7   :  { %v212_v55 = vpop.xlane.xlu1 %211 }
 0x1e8   :  { %v215_v56 = vmul.f32 0.03125, %v212_v55  ;;  %v209_v57 = vpop.xlane.xlu0 %208 }
 0x1e9   :  { %v214_v58 = vmul.f32 0.03125, %v209_v57 }
 0x1ea   :  { %v217_v59 = vsub.f32 %v204_v51, %v215_v56 }
 0x1eb   :  { %v216_v60 = vsub.f32 %v203_v52, %v214_v58 }
 0x1ec   :  { %v219_v63 = vmul.f32 %v217_v59, %v217_v59 }
 0x1ed   :  { %v218_v61 = vmul.f32 %v216_v60, %v216_v60 }
 0x1ee   :  { %v223_v2 = vsel %vm109_vm3, %v219_v63, 0.0  ;;  %v1072_v63 = vld [vmem:[%s1678_s8] ss:$0 sm:$0xff] }
 0x1ef   :  { %v220_v62 = vsel %vm109_vm3, %v218_v61, 0.0 }
 0x1f0   :  { %221 = vadd.xlane.f32.xlu0 %v220_v62 }
 0x1f4   :  { %224 = vadd.xlane.f32.xlu0 %v223_v2 }
 0x27d   :  { %v222_v15 = vpop.xlane.xlu0 %221 }
 0x27e   :  { %v226_v16 = vmul.f32 0.03125, %v222_v15  ;;  %v1313_v15 = vmov 0.0  }
 0x27f   :  { %1193 = vmatprep.subr.mxu0 %v1313_v15  ;;  %1198 = vmatprep.subr.mxu1 %v1313_v15 }
 0x280   :  { %v228_v17 = vadd.f32 1e-05, %v226_v16  ;;  %1195 = vmatprep.mubr.msk.f32.mxu0 %vm1314_vm6, %v1313_v15  ;;  %v1315_v16 = vmov 0  }
 0x281   :  { %v225_v18 = vpop.xlane.xlu0 %224  ;;  %1277 = vset.pattern.permute.xlu0 %v1315_v16  ;;  %1278 = vset.pattern.permute.xlu1 %v1315_v16 }
 0x282   :  { %1279 = vrsqrt.f32 %v228_v17  ;;  %v227_v19 = vmul.f32 0.03125, %v225_v18  ;;  %v21_v17 = vstv %s1679_s12 }
 0x283   :  { %22 = vst [vmem:[#allocation2] sm:$0x1] %v21_v17 }
 0x284   :  { %v229_v20 = vadd.f32 1e-05, %v227_v19 }
 0x286   :  { %1281 = vrsqrt.f32 %v229_v20 }
 0x28a   :  { %v449_v18 = vld [vmem:[#allocation2] sm:$0x1] }
 0x28c   :  { %v1280_v24 = vpop.eup %1279 }
 0x28d   :  { %v232_v26 = vmul.f32 %v1280_v24, %v216_v60 }
 0x28f   :  { %v240_v30 = vmul.f32 %v1070_v25, %v232_v26 }
 0x290   :  { %v1282_v32 = vpop.eup %1281 }
 0x291   :  { %v233_v33 = vmul.f32 %v1282_v32, %v217_v59  ;;  %v248_v34 = vadd.f32 %v1071_v27, %v240_v30  ;;  %v1076_v30 = vld [vmem:[%s1681_s10] ss:$0 sm:$0xff] }
 0x293   :  { %v265_v35 = vrot.slane %v248_v34, 7  ;;  %v241_v36 = vmul.f32 %v1070_v25, %v233_v33  ;;  %v448_v33 = vld [vmem:[%s1682_s11] sm:$0x1]  ;;  %v438_v34 = vlaneseq }
 0x295   :  { %v269_v37 = vsel %vm74_vm0, 0.0, %v265_v35  ;;  %v271_v38 = vsel %vm74_vm0, %v265_v35, 0.0  ;;  %v249_v39 = vadd.f32 %v1071_v27, %v241_v36  ;;  %v1560_v35 = vshrl.u32 %v438_v34, 7 }
 0x296   :  { %v277_v40 = vrot.slane %v269_v37, 1  ;;  %v278_v41 = vrot.slane %v271_v38, 1  ;;  %v289_v44 = vrot.slane %v269_v37, 2  ;;  %v290_v45 = vrot.slane %v271_v38, 2 }
 0x297   :  { %v266_v42 = vrot.slane %v249_v39, 7  ;;  %v1562_v36 = vand.u32 127, %v438_v34 }
 0x298   :  { %v279_v43 = vsel %vm83_vm1, %v277_v40, %v278_v41  ;;  %v291_v50 = vsel %vm96_vm2, %v289_v44, %v290_v45  ;;  %v53_v40 = vld [vmem:[%s1683_s2] sm:$0x1] }
 0x299   :  { %283 = vrot.lane.b32.xlu1 %v279_v43, %s1311_s18  ;;  %v270_v46 = vsel %vm74_vm0, 0.0, %v266_v42  ;;  %v272_v47 = vsel %vm74_vm0, %v266_v42, 0.0  ;;  %vm442_vm7 = vcmp.le.s32.totalorder %v1560_v35, %v1562_v36 }
 0x29a   :  { %v280_v48 = vrot.slane %v270_v46, 1  ;;  %v281_v49 = vrot.slane %v272_v47, 1  ;;  %v292_v52 = vrot.slane %v270_v46, 2  ;;  %v293_v53 = vrot.slane %v272_v47, 2 }
 0x29c   :  { %v282_v51 = vsel %vm83_vm1, %v280_v48, %v281_v49  ;;  %v294_v54 = vsel %vm96_vm2, %v292_v52, %v293_v53 }
 0x29d   :  { %295 = vrot.lane.b32.xlu1 %v291_v50, %s1312_s19  ;;  %285 = vrot.lane.b32.xlu0 %v282_v51, %s1311_s18 }
 0x2a1   :  { %297 = vrot.lane.b32.xlu1 %v294_v54, %s1312_s19 }
 0x30b   :  { %v284_v55 = vpop.permute.xlu1 %283 }
 0x30c   :  { %v301_v56 = vsel %vm109_vm3, %v269_v37, %v284_v55  ;;  %v1316_v37 = vmov 1.0  }
 0x30f   :  { %v296_v57 = vpop.permute.xlu1 %295  ;;  %v286_v58 = vpop.permute.xlu0 %285 }
 0x310   :  { %v303_v59 = vsel %vm112_vm4, %v301_v56, %v296_v57  ;;  %v302_v60 = vsel %vm109_vm3, %v270_v46, %v286_v58 }
 0x311   :  { %1190 = vmatprep.mubr.msk.f32.mxu1 %vm121_vm5, %v303_v59 }
 0x313   :  { %v298_v61 = vpop.permute.xlu1 %297 }
 0x314   :  { %v304_v62 = vsel %vm112_vm4, %v302_v60, %v298_v61 }
 0x315   :  { %1191 = vmatmul.mubr.msk.f32.vlgmr.msra.gmra.mrb[0].mxu1 %vm121_vm5, %v304_v62  ;;  %v751_v62 = vld [vmem:[%s1682_s11] sm:$0x1] }
 0x316   :  { %1200 = vmatprep.mubr.msk.f32.mxu1 %vm1314_vm6, %v1313_v15  ;;  %1199 = vmatpush3.msk.msra.mxu1 %vm442_vm7, %v1316_v37 }
 0x317   :  { %1208 = vmatprep.subr.mxu1 %v1313_v15 }
 0x3e8   :  { %v1192_v2 = vpop.f32.mrb[0].mxu1 }
 0x3e9   :  { %v389_v3 = vadd.f32 %v1192_v2, %v1072_v63  ;;  %v383_v4 = vpop.f32.mrb[1].mxu1 }
 0x3ea   :  { %v384_v5 = vadd.f32 %v1072_v63, %v383_v4  ;;  %v1593_v63 = vadd.s32 8, %v1560_v35  ;;  %v446_v4 = vcvt.s32.f32 %v1560_v35 }
 0x3eb   :  { %v393_v12 = vmax.f32 %v389_v3, 0.0 }
 0x3ec   :  { %v392_v6 = vmax.f32 %v384_v5, 0.0  ;;  %v447_v5 = vcvt.s32.f32 %v1593_v63 }
 0x3ed   :  { %v399_v14 = vsel %vm109_vm3, %v393_v12, 0.0 }
 0x3ee   :  { %v396_v7 = vsel %vm109_vm3, %v392_v6, 0.0 }
 0x3ef   :  { %397 = vadd.xlane.f32.xlu0 %v396_v7 }
 0x405   :  { %452 = vperm.xlu0 %1277, %v449_v18  }
 0x47c   :  { %v398_v8 = vpop.xlane.xlu0 %397 }
 0x47d   :  { %v402_v9 = vmul.f32 0.03125, %v398_v8 }
 0x47f   :  { %v404_v10 = vsub.f32 %v392_v6, %v402_v9 }
 0x481   :  { %v406_v11 = vmul.f32 %v404_v10, %v404_v10 }
 0x483   :  { %v408_v13 = vsel %vm109_vm3, %v406_v11, 0.0 }
 0x484   :  { %409 = vadd.xlane.f32.xlu1 %v408_v13  ;;  %v453_v38 = vpop.permute.xlu0 %452 }
 0x488   :  { %400 = vadd.xlane.f32.xlu1 %v399_v14  ;;  %v1082_v14 = vld [vmem:[%s1685_s1] ss:$0 sm:$0xff] }
 0x511   :  { %v410_v19 = vpop.xlane.xlu1 %409 }
 0x512   :  { %v414_v20 = vmul.f32 0.03125, %v410_v19 }
 0x514   :  { %v416_v21 = vadd.f32 1e-05, %v414_v20 }
 0x515   :  { %v401_v22 = vpop.xlane.xlu1 %400 }
 0x516   :  { %1283 = vrsqrt.f32 %v416_v21  ;;  %v403_v23 = vmul.f32 0.03125, %v401_v22  ;;  %v752_v22 = vld [vmem:[#allocation2] sm:$0x1] }
 0x518   :  { %v405_v24 = vsub.f32 %v393_v12, %v403_v23 }
 0x51a   :  { %v407_v25 = vmul.f32 %v405_v24, %v405_v24 }
 0x51c   :  { %v411_v26 = vsel %vm109_vm3, %v407_v25, 0.0 }
 0x51d   :  { %412 = vadd.xlane.f32.xlu1 %v411_v26 }
 0x520   :  { %v1284_v27 = vpop.eup %1283 }
 0x521   :  { %v420_v29 = vmul.f32 %v1284_v27, %v404_v10 }
 0x523   :  { %v428_v31 = vmul.f32 %v1075_v28, %v420_v29 }
 0x525   :  { %v436_v32 = vadd.f32 %v1076_v30, %v428_v31 }
 0x527   :  { %1194 = vmatpush3.xpose.msk.msra.mxu0 %vm109_vm3, %v436_v32 }
 0x528   :  { %1203 = vmatprep.subr.mxu0 %v1400_v0 }
 0x52a   :  { %1196 = vmatmul.mubr.msk.f32.vlgmr.msra.gmra.mrb[2].mxu0 %vm109_vm3, %v448_v33  ;;  %v54_v33 = vld [vmem:[%s1683_s2 + $0x1] sm:$0x1] }
 0x52b   :  { %1204 = vmatpush3.msra.mxu0 %v1400_v0  ;;  %v1572_v0 = vsub.s32 0, %v1560_v35 }
 0x52c   :  { %1213 = vmatprep.subr.mxu0 %v1313_v15 }
 0x52d   :  { %v458_v39 = vrot.slane %v453_v38, %v1572_v0 }
 0x5aa   :  { %v413_v47 = vpop.xlane.xlu1 %412 }
 0x5ab   :  { %v415_v49 = vmul.f32 0.03125, %v413_v47 }
 0x5ad   :  { %v417_v50 = vadd.f32 1e-05, %v415_v49 }
 0x5fd   :  { %v531_v41 = vpop.f32.mrb[2].mxu0 }
 0x5fe   :  { %v532_v42 = vadd.f32 %v531_v41, %v458_v39  ;;  %v1197_v43 = vpop.f32.mrb[3].mxu0 }
 0x600   :  { %v535_v44 = vmul.f32 %v532_v42, %v53_v40 }
 0x602   :  { %537 = vst.msk [vmem:[%s1684_s13] sm:$0x1] %vm536_vm8, %v535_v44  ;;  %v539_v45 = vand.u32 2147483647, %v535_v44  ;;  %v538_v56 = vmax.f32 %v535_v44, 0.0 }
 0x604   :  { %v540_v46 = vsub.f32 0.0, %v539_v45 }
 0x606   :  { %v541_v48 = vmul.f32 1.442695, %v540_v46 }
 0x608   :  { %1285 = vpow2.f32 %v541_v48 }
 0x609   :  { %1287 = vrsqrt.f32 %v417_v50 }
 0x612   :  { %v1286_v51 = vpop.eup %1285 }
 0x613   :  { %v543_v52 = vadd.f32 1.0, %v1286_v51  ;;  %v1288_v53 = vpop.eup %1287 }
 0x614   :  { %v421_v54 = vmul.f32 %v1288_v53, %v405_v24 }
 0x615   :  { %1289 = vlog2.f32 %v543_v52 }
 0x616   :  { %v429_v58 = vmul.f32 %v1075_v28, %v421_v54 }
 0x618   :  { %v437_v61 = vadd.f32 %v1076_v30, %v429_v58 }
 0x61f   :  { %v1290_v55 = vpop.eup %1289 }
 0x620   :  { %v545_v57 = vmul.f32 0.6931472, %v1290_v55 }
 0x622   :  { %v546_v59 = vadd.f32 %v545_v57, %v538_v56 }
 0x624   :  { %v547_v60 = vmul.f32 %v546_v59, %v53_v40 }
 0x626   :  { %1201 = vmatmul.mubr.msk.f32.vlgmr.msra.gmra.mrb[2].mxu1 %vm548_vm9, %v547_v60  ;;  %v622_v2 = vmul.f32 0.5, %v547_v60 }
 0x627   :  { %1209 = vmatpush3.xpose.msk.msra.mxu1 %vm109_vm3, %v437_v61  ;;  %1210 = vmatprep.mubr.msk.f32.mxu1 %vm1314_vm6, %v1313_v15 }
 0x628   :  { %1218 = vmatprep.subr.mxu1 %v1405_v1 }
 0x62a   :  { %1211 = vmatmul.mubr.msk.f32.vlgmr.msra.gmra.mrb[4].mxu1 %vm109_vm3, %v751_v62 }
 0x62b   :  { %1219 = vmatpush3.msra.mxu1 %v1405_v1 }
 0x6f9   :  { %v618_v3 = vpop.f32.mrb[2].mxu1 }
 0x6fa   :  { %v623_v6 = vsub.f32 %v618_v3, %v622_v2  ;;  %v1202_v7 = vpop.f32.mrb[3].mxu1 }
 0x6fc   :  { %v627_v8 = vrot.slane %v623_v6, %v1572_v0 }
 0x6fd   :  { %v834_v23 = vpop.f32.mrb[4].mxu1 }
 0x6fe   :  { %v628_v9 = vsub.f32 %v446_v4, %v627_v8  ;;  %v629_v10 = vsub.f32 %v447_v5, %v627_v8  ;;  %v1212_v24 = vpop.f32.mrb[5].mxu1 }
 0x700   :  { %v630_v1 = vmul.f32 %v628_v9, %v628_v9  ;;  %v631_v11 = vmul.f32 %v629_v10, %v629_v10  ;;  %v1090_v10 = vld [vmem:[%s1685_s1 + $0x1] ss:$0 sm:$0xff] }
 0x702   :  { %v632_v12 = vsub.f32 0.0, %v630_v1  ;;  %v633_v13 = vsub.f32 0.0, %v631_v11 }
 0x704   :  { %v634_v16 = vmul.f32 0.5, %v632_v12  ;;  %v635_v17 = vmul.f32 0.5, %v633_v13 }
 0x706   :  { %v642_v18 = vadd.f32 %v1082_v14, %v634_v16  ;;  %v643_v20 = vadd.f32 %v1082_v14, %v635_v17 }
 0x708   :  { %v644_v19 = vsel %vm548_vm9, %v642_v18, -inf  ;;  %v647_v21 = vsel %vm548_vm9, %v643_v20, -inf }
 0x709   :  { %645 = vmax.xlane.f32.xlu1 %v644_v19 }
 0x70d   :  { %648 = vmax.xlane.f32.xlu1 %v647_v21 }
 0x71e   :  { %755 = vperm.xlu1 %1278, %v752_v22  }
 0x796   :  { %v646_v25 = vpop.xlane.xlu1 %645 }
 0x797   :  { %v650_v26 = vsub.f32 %v642_v18, %v646_v25 }
 0x799   :  { %v652_v27 = vmul.f32 1.442695, %v650_v26 }
 0x79a   :  { %v649_v28 = vpop.xlane.xlu1 %648 }
 0x79b   :  { %1291 = vpow2.f32 %v652_v27  ;;  %v651_v29 = vsub.f32 %v643_v20, %v649_v28 }
 0x79d   :  { %v654_v30 = vmul.f32 1.442695, %v651_v29 }
 0x79e   :  { %v756_v31 = vpop.permute.xlu1 %755 }
 0x79f   :  { %1293 = vpow2.f32 %v654_v30  ;;  %v761_v32 = vrot.slane %v756_v31, %v1572_v0 }
 0x7a1   :  { %v835_v34 = vadd.f32 %v834_v23, %v761_v32 }
 0x7a3   :  { %v838_v38 = vmul.f32 %v835_v34, %v54_v33 }
 0x7a5   :  { %v1292_v39 = vpop.eup %1291  ;;  %1087 = vst.msk [vmem:[%s1684_s13 + $0x1] sm:$0x1] %vm536_vm8, %v838_v38  ;;  %v842_v40 = vand.u32 2147483647, %v838_v38  ;;  %v841_v48 = vmax.f32 %v838_v38, 0.0 }
 0x7a6   :  { %v656_v41 = vsel %vm548_vm9, %v1292_v39, 0.0 }
 0x7a7   :  { %657 = vadd.xlane.f32.xlu1 %v656_v41  ;;  %v843_v42 = vsub.f32 0.0, %v842_v40 }
 0x7a9   :  { %v1294_v43 = vpop.eup %1293  ;;  %v844_v44 = vmul.f32 1.442695, %v843_v42 }
 0x7aa   :  { %v659_v45 = vsel %vm548_vm9, %v1294_v43, 0.0 }
 0x7ab   :  { %660 = vadd.xlane.f32.xlu0 %v659_v45  ;;  %1295 = vpow2.f32 %v844_v44 }
 0x7b5   :  { %v1296_v46 = vpop.eup %1295 }
 0x7b6   :  { %v846_v47 = vadd.f32 1.0, %v1296_v46 }
 0x7b8   :  { %1297 = vlog2.f32 %v846_v47 }
 0x7c2   :  { %v1298_v49 = vpop.eup %1297 }
 0x7c3   :  { %v848_v50 = vmul.f32 0.6931472, %v1298_v49 }
 0x7c5   :  { %v849_v51 = vadd.f32 %v848_v50, %v841_v48 }
 0x7c7   :  { %v850_v52 = vmul.f32 %v849_v51, %v54_v33 }
 0x7c9   :  { %v924_v61 = vmul.f32 0.5, %v850_v52 }
 0x834   :  { %v658_v53 = vpop.xlane.xlu1 %657 }
 0x835   :  { %1299 = vrcp.f32 %v658_v53 }
 0x838   :  { %v661_v54 = vpop.xlane.xlu0 %660 }
 0x839   :  { %1301 = vrcp.f32 %v661_v54 }
 0x83f   :  { %v1300_v55 = vpop.eup %1299 }
 0x840   :  { %v664_v56 = vmul.f32 %v1300_v55, %v1292_v39 }
 0x842   :  { %666 = vst.msk [vmem:[%s1686_s14] sm:$0xff] %vm548_vm9, %v664_v56  ;;  %1205 = vmatprep.mubr.msk.f32.mxu0 %vm548_vm9, %v664_v56 }
 0x843   :  { %v1302_v57 = vpop.eup %1301 }
 0x844   :  { %v665_v58 = vmul.f32 %v1302_v57, %v1294_v43 }
 0x846   :  { %667 = vst.msk [vmem:[%s1686_s14 + $0x8] sm:$0xff] %vm548_vm9, %v665_v58  ;;  %1206 = vmatmul.mubr.msk.f32.vlgmr.msra.gmra.mrb[4].mxu0 %vm548_vm9, %v665_v58 }
 0x847   :  { %1214 = vmatpush3.msk.msra.mxu0 %vm442_vm7, %v1316_v37  ;;  %1215 = vmatprep.mubr.msk.f32.mxu0 %vm1314_vm6, %v1313_v15 }
 0x84a   :  { %1216 = vmatmul.mubr.msk.f32.vlgmr.msra.gmra.mrb[6].mxu0 %vm548_vm9, %v850_v52 }
 0x919   :  { %v1207_v59 = vpop.f32.mrb[4].mxu0 }
 0x91a   :  { %750 = vst.msk [vmem:[%s1687_s15 + $0x8] sm:$0xff] %vm109_vm3, %v1207_v59  ;;  %v740_v60 = vpop.f32.mrb[5].mxu0 }
 0x91b   :  { %749 = vst.msk [vmem:[%s1687_s15] sm:$0xff] %vm109_vm3, %v740_v60 }
 0x91d   :  { %v920_v36 = vpop.f32.mrb[6].mxu0 }
 0x91e   :  { %v925_v37 = vsub.f32 %v920_v36, %v924_v61  ;;  %v1217_v62 = vpop.f32.mrb[7].mxu0 }
 0x920   :  { %v929_v15 = vrot.slane %v925_v37, %v1572_v0 }
 0x922   :  { %v930_v2 = vsub.f32 %v446_v4, %v929_v15  ;;  %v931_v3 = vsub.f32 %v447_v5, %v929_v15 }
 0x924   :  { %v932_v6 = vmul.f32 %v930_v2, %v930_v2  ;;  %v933_v7 = vmul.f32 %v931_v3, %v931_v3 }
 0x926   :  { %v935_v8 = vsub.f32 0.0, %v933_v7  ;;  %v934_v9 = vsub.f32 0.0, %v932_v6 }
 0x928   :  { %v937_v1 = vmul.f32 0.5, %v935_v8  ;;  %v936_v11 = vmul.f32 0.5, %v934_v9 }
 0x92a   :  { %v945_v12 = vadd.f32 %v1090_v10, %v937_v1  ;;  %v944_v13 = vadd.f32 %v1090_v10, %v936_v11 }
 0x92c   :  { %v949_v0 = vsel %vm548_vm9, %v945_v12, -inf  ;;  %v946_v35 = vsel %vm548_vm9, %v944_v13, -inf }
 0x92d   :  { %950 = vmax.xlane.f32.xlu0 %v949_v0  ;;  %947 = vmax.xlane.f32.xlu1 %v946_v35 }
 0x9ba   :  { %v951_v63 = vpop.xlane.xlu0 %950  ;;  %v948_v4 = vpop.xlane.xlu1 %947 }
 0x9bb   :  { %v953_v5 = vsub.f32 %v945_v12, %v951_v63  ;;  %v952_v14 = vsub.f32 %v944_v13, %v948_v4 }
 0x9bd   :  { %v956_v16 = vmul.f32 1.442695, %v953_v5  ;;  %v954_v17 = vmul.f32 1.442695, %v952_v14 }
 0x9bf   :  { %1303 = vpow2.f32 %v956_v16 }
 0x9c0   :  { %1305 = vpow2.f32 %v954_v17 }
 0x9c9   :  { %v1304_v18 = vpop.eup %1303 }
 0x9ca   :  { %v1306_v19 = vpop.eup %1305  ;;  %v961_v20 = vsel %vm548_vm9, %v1304_v18, 0.0 }
 0x9cb   :  { %962 = vadd.xlane.f32.xlu0 %v961_v20  ;;  %v958_v21 = vsel %vm548_vm9, %v1306_v19, 0.0 }
 0x9cc   :  { %959 = vadd.xlane.f32.xlu1 %v958_v21 }
 0xa58   :  { %v963_v22 = vpop.xlane.xlu0 %962 }
 0xa59   :  { %1307 = vrcp.f32 %v963_v22  ;;  %v960_v23 = vpop.xlane.xlu1 %959 }
 0xa5a   :  { %1309 = vrcp.f32 %v960_v23 }
 0xa63   :  { %v1308_v24 = vpop.eup %1307 }
 0xa64   :  { %v1310_v25 = vpop.eup %1309  ;;  %v967_v26 = vmul.f32 %v1308_v24, %v1304_v18 }
 0xa65   :  { %v966_v27 = vmul.f32 %v1310_v25, %v1306_v19 }
 0xa66   :  { %1092 = vst.msk [vmem:[%s1686_s14 + $0x18] sm:$0xff] %vm548_vm9, %v967_v26 }
 0xa67   :  { %1091 = vst.msk [vmem:[%s1686_s14 + $0x10] sm:$0xff] %vm548_vm9, %v966_v27  ;;  %1220 = vmatprep.mubr.msk.f32.mxu1 %vm548_vm9, %v966_v27 }
 0xa68   :  { %1221 = vmatmul.mubr.msk.f32.vlgmr.msra.gmra.mrb[6].mxu1 %vm548_vm9, %v967_v26 }
 0xb3b   :  { %v1222_v28 = vpop.f32.mrb[6].mxu1 }
 0xb3c   :  { %1096 = vst.msk [vmem:[%s1687_s15 + $0x18] sm:$0xff] %vm109_vm3, %v1222_v28  ;;  %v1043_v29 = vpop.f32.mrb[7].mxu1 }
 0xb3d   :  { %1095 = vst.msk [vmem:[%s1687_s15 + $0x10] sm:$0xff] %vm109_vm3, %v1043_v29 }

// kernel: fastspeech2_forward.7
= control target key start
LH: loop header
LB: loop body
LE: loop exit
PB: predicated region body
PF: predicated region fallthrough
CT: control target
= control target key end

     0   :  { %20 = vsyncpa [#allocation3], 0  ;;  %vm63_vm0 = vcmask 261120   ;;  %s2667_s0 = inlined_call_operand.vmem [shape: f32[2,16,32], index: 0, kind: input, shape index: {}]   ;;  %s2668_s1 = inlined_call_operand.vmem [shape: f32[32,20], index: 1, kind: input, shape index: {}]   ;;  %s2669_s2 = inlined_call_operand.vmem [shape: f32[1,20], index: 2, kind: input, shape index: {}]   ;;  %s2670_s3 = inlined_call_operand.vmem [shape: f32[100,32], index: 3, kind: input, shape index: {}]   ;;  %s2671_s4 = inlined_call_operand.vmem [shape: f32[1,32], index: 4, kind: input, shape index: {}]   ;;  %s2672_s5 = inlined_call_operand.vmem [shape: f32[160,32], index: 5, kind: input, shape index: {}]   ;;  %s2673_s6 = inlined_call_operand.vmem [shape: f32[1,32], index: 6, kind: input, shape index: {}]   ;;  %s2674_s7 = inlined_call_operand.vmem [shape: f32[160,32], index: 7, kind: input, shape index: {}]   ;;  %s2675_s8 = inlined_call_operand.vmem [shape: f32[1,32], index: 8, kind: input, shape index: {}]   ;;  %s2676_s9 = inlined_call_operand.vmem [shape: f32[160,32], index: 9, kind: input, shape index: {}]   ;;  %s2677_s10 = inlined_call_operand.vmem [shape: f32[1,32], index: 10, kind: input, shape index: {}]   ;;  %s2678_s11 = inlined_call_operand.vmem [shape: f32[160,20], index: 11, kind: input, shape index: {}]   ;;  %s2679_s12 = inlined_call_operand.vmem [shape: f32[1,20], index: 12, kind: input, shape index: {}]   ;;  %s2680_s13 = inlined_call_operand.hbm [shape: f32[2,16,20], index: 13, kind: output, shape index: {0}]   ;;  %s2681_s14 = inlined_call_operand.hbm [shape: f32[2,16,20], index: 14, kind: output, shape index: {1}]  }
   0x1   :  { %v52_v0 = vld [vmem:[%s2668_s1] sm:$0xff]  ;;  %v53_v1 = vld [vmem:[%s2668_s1 + $0x8] sm:$0xff]  ;;  %v54_v2 = vld [vmem:[%s2668_s1 + $0x10] sm:$0xff] }
   0x2   :  { %v1511_v3 = vpack.c.bf16 %v53_v1, %v52_v0  ;;  %v55_v4 = vld [vmem:[%s2668_s1 + $0x18] sm:$0xff]  ;;  %v48_v5 = vld [vmem:[%s2667_s0] sm:$0xff] }
   0x3   :  { %v1515_v6 = vpack.c.bf16 %v55_v4, %v54_v2  ;;  %1473 = vmatprep.mubr.msk.f32.mxu0 %vm63_vm0, %v48_v5 }
   0x4   :  { %21 = vsyncpa [#allocation5], 0  ;;  %1512 = vmatprep.subr.bf16.mxu0 %v1511_v3  ;;  %v49_v7 = vld [vmem:[%s2667_s0 + $0x8] sm:$0xff]  ;;  %v50_v8 = vld [vmem:[%s2667_s0 + $0x10] sm:$0xff]  ;;  %vm161_vm1 = vcmask 162816   ;;  %vm184_vm2 = vcmask 1041408  }
   0x5   :  { %1514 = vmatpush3.bf16.msra.mxu0 %v1511_v3  ;;  %v51_v9 = vld [vmem:[%s2667_s0 + $0x18] sm:$0xff]  ;;  %v166_v10 = vld [vmem:[%s2670_s3] sm:$0xff]  ;;  %v167_v11 = vld [vmem:[%s2670_s3 + $0x8] sm:$0xff]  ;;  %vm228_vm3 = vcmask 1045504   ;;  %vm205_vm4 = vcmask 1046528   ;;  %s1816_s16 = smov 20  }
   0x6   :  { %1516 = vmatprep.subr.bf16.mxu0 %v1515_v6  ;;  %v168_v12 = vld [vmem:[%s2670_s3 + $0x10] sm:$0xff]  ;;  %v1519_v13 = vpack.c.bf16 %v167_v11, %v166_v10  ;;  %v169_v14 = vld [vmem:[%s2670_s3 + $0x18] sm:$0xff]  ;;  %v170_v16 = vld [vmem:[%s2670_s3 + $0x20] sm:$0xff]  ;;  %vm251_vm5 = vcmask 1044480   ;;  %s1817_s20 = smov 60   ;;  %vm274_vm6 = vcmask 1043456  }
   0x7   :  { %v1523_v15 = vpack.c.bf16 %v169_v14, %v168_v12  ;;  %v171_v17 = vld [vmem:[%s2670_s3 + $0x28] sm:$0xff]  ;;  %v172_v19 = vld [vmem:[%s2670_s3 + $0x30] sm:$0xff]  ;;  %v173_v20 = vld [vmem:[%s2670_s3 + $0x38] sm:$0xff]  ;;  %s1818_s23 = smov 80   ;;  %vm301_vm7 = vcmask 326656   ;;  %vm306_vm8 = vcmask 490496  }
   0x8   :  { %1520 = vmatprep.subr.bf16.mxu1 %v1519_v13  ;;  %v1527_v18 = vpack.c.bf16 %v171_v17, %v170_v16  ;;  %v1409_v21 = vld [vmem:[%s2669_s2] ss:$0 sm:$0xff]  ;;  %v1531_v22 = vpack.c.bf16 %v173_v20, %v172_v19  ;;  %v175_v27 = vld [vmem:[%s2670_s3 + $0x48] sm:$0xff]  ;;  %s1815_s2 = smov 40   ;;  %v176_v54 = vld [vmem:[%s2670_s3 + $0x50] sm:$0xff]  ;;  %vm311_vm9 = vcmask 654336  }
   0x9   :  { %1518 = vmatpush3.bf16.msra.mxu0 %v1515_v6  ;;  %1522 = vmatpush3.bf16.msra.mxu1 %v1519_v13  ;;  %v174_v26 = vld [vmem:[%s2670_s3 + $0x40] sm:$0xff]  ;;  %v177_v55 = vld [vmem:[%s2670_s3 + $0x58] sm:$0xff]  ;;  %vm322_vm10 = vcmask 818176   ;;  %s1821_s24 = smov 32   ;;  %s1822_s25 = smov 96   ;;  %vm552_vm11 = vcmask 523264  }
   0xa   :  { %1524 = vmatprep.subr.bf16.mxu1 %v1523_v15  ;;  %v1535_v29 = vpack.c.bf16 %v175_v27, %v174_v26  ;;  %v1539_v0 = vpack.c.bf16 %v177_v55, %v176_v54  ;;  %v178_v1 = vld [vmem:[%s2670_s3 + $0x60] sm:$0xf]  ;;  %vm557_vm12 = vcmask 785408  }
   0xc   :  { %1474 = vmatmul.mubr.msk.f32.vlgmr.msra.gmra.mrb[0].mxu0 %vm63_vm0, %v49_v7 }
   0xd   :  { %1476 = vmatprep.mubr.msk.f32.mxu0 %vm63_vm0, %v50_v8  ;;  %1526 = vmatpush3.bf16.msra.mxu1 %v1523_v15 }
   0xe   :  { %1528 = vmatprep.subr.bf16.mxu1 %v1527_v18 }
  0x10   :  { %1477 = vmatmul.mubr.msk.f32.gmra.mrb[2].mxu0 %vm63_vm0, %v51_v9 }
  0x11   :  { %1530 = vmatpush3.bf16.msra.mxu1 %v1527_v18 }
  0x12   :  { %1532 = vmatprep.subr.bf16.mxu1 %v1531_v22 }
  0x15   :  { %1534 = vmatpush3.bf16.msra.mxu1 %v1531_v22 }
  0x16   :  { %1536 = vmatprep.subr.bf16.mxu1 %v1535_v29 }
  0x19   :  { %1538 = vmatpush3.bf16.msra.mxu1 %v1535_v29 }
  0x1a   :  { %1540 = vmatprep.subr.bf16.mxu1 %v1539_v0 }
  0x1d   :  { %1542 = vmatpush3.bf16.msra.mxu1 %v1539_v0 }
  0x1e   :  { %1503 = vmatprep.subr.msk.mxu1 %vm274_vm6, %v178_v1 }
  0x21   :  { %1504 = vmatpush3.msk.msra.mxu1 %vm274_vm6, %v178_v1  ;;  %v430_v1 = vld [vmem:[%s2672_s5 + $0x18] sm:$0xff] }
  0xdf   :  { %v1475_v23 = vpop.f32.mrb[0].mxu0 }
  0xe0   :  { %v1957_v24 = vadd.f32 %v1475_v23, %v1409_v21  ;;  %v142_v25 = vpop.f32.mrb[1].mxu0 }
  0xe1   :  { %v1965_v28 = vadd.f32 %v1409_v21, %v142_v25 }
  0xe2   :  { %163 = vst.msk [vmem:[#allocation2 + $0x8] sm:$0xff] %vm161_vm1, %v1957_v24  ;;  %v186_v30 = vrot.slane %v1957_v24, 6 }
  0xe3   :  { %162 = vst.msk [vmem:[#allocation2] sm:$0xff] %vm161_vm1, %v1965_v28  ;;  %v185_v31 = vrot.slane %v1965_v28, 6  ;;  %v1478_v32 = vpop.f32.mrb[2].mxu0 }
  0xe4   :  { %v1973_v33 = vadd.f32 %v1478_v32, %v1409_v21  ;;  %v152_v34 = vpop.f32.mrb[3].mxu0  ;;  %v199_v35 = vsel %vm184_vm2, %v186_v30, 0.0 }
  0xe5   :  { %v1977_v36 = vsel %vm184_vm2, %v185_v31, %v186_v30  ;;  %v1980_v37 = vsel %vm184_vm2, 0.0, %v185_v31  ;;  %v1988_v42 = vadd.f32 %v1409_v21, %v152_v34  ;;  %v232_v45 = vrot.slane %v199_v35, 2 }
  0xe6   :  { %v229_v38 = vrot.slane %v1980_v37, 2  ;;  %v230_v39 = vrot.slane %v1977_v36, 2  ;;  %v206_v40 = vrot.slane %v1980_v37, 1  ;;  %v207_v41 = vrot.slane %v1977_v36, 1  ;;  %165 = vst.msk [vmem:[#allocation2 + $0x18] sm:$0xff] %vm161_vm1, %v1973_v33 }
  0xe7   :  { %v209_v46 = vrot.slane %v199_v35, 1  ;;  %164 = vst.msk [vmem:[#allocation2 + $0x10] sm:$0xff] %vm161_vm1, %v1988_v42  ;;  %v189_v47 = vrot.slane %v1973_v33, 6  ;;  %v188_v48 = vrot.slane %v1988_v42, 6  ;;  %v253_v49 = vrot.slane %v1977_v36, 3 }
  0xe8   :  { %v231_v43 = vsel %vm228_vm3, %v229_v38, %v230_v39  ;;  %v208_v44 = vsel %vm205_vm4, %v206_v40, %v207_v41  ;;  %v255_v50 = vrot.slane %v199_v35, 3  ;;  %v233_v51 = vsel %vm228_vm3, %v230_v39, %v232_v45 }
  0xe9   :  { %239 = vrot.lane.b32.xlu1 %v231_v43, %s1815_s2  ;;  %216 = vrot.lane.b32.xlu0 %v208_v44, %s1816_s16  ;;  %v210_v52 = vsel %vm205_vm4, %v207_v41, %v209_v46  ;;  %v252_v53 = vrot.slane %v1980_v37, 3  ;;  %v200_v56 = vsel %vm184_vm2, %v189_v47, 0.0  ;;  %v2012_v57 = vsel %vm184_vm2, %v188_v48, %v189_v47 }
  0xea   :  { %v2015_v58 = vsel %vm184_vm2, 0.0, %v188_v48  ;;  %v256_v59 = vsel %vm251_vm5, %v253_v49, %v255_v50  ;;  %v276_v60 = vrot.slane %v1977_v36, 4  ;;  %v278_v62 = vrot.slane %v199_v35, 4 }
  0xeb   :  { %v254_v61 = vsel %vm251_vm5, %v252_v53, %v253_v49  ;;  %v275_v63 = vrot.slane %v1980_v37, 4  ;;  %v212_v2 = vrot.slane %v2012_v57, 1  ;;  %v214_v3 = vrot.slane %v200_v56, 1 }
  0xec   :  { %v211_v4 = vrot.slane %v2015_v58, 1  ;;  %v279_v5 = vsel %vm274_vm6, %v276_v60, %v278_v62  ;;  %v237_v7 = vrot.slane %v200_v56, 2  ;;  %v235_v10 = vrot.slane %v2012_v57, 2  ;;  %v429_v62 = vld [vmem:[%s2672_s5 + $0x10] sm:$0xff] }
  0xed   :  { %241 = vrot.lane.b32.xlu1 %v233_v51, %s1815_s2  ;;  %218 = vrot.lane.b32.xlu0 %v210_v52, %s1816_s16  ;;  %v277_v6 = vsel %vm274_vm6, %v275_v63, %v276_v60  ;;  %v215_v8 = vsel %vm205_vm4, %v212_v2, %v214_v3  ;;  %v234_v11 = vrot.slane %v2015_v58, 2  ;;  %v258_v14 = vrot.slane %v2012_v57, 3  ;;  %v431_v3 = vld [vmem:[%s2672_s5 + $0x20] sm:$0xff] }
  0xee   :  { %v213_v9 = vsel %vm205_vm4, %v211_v4, %v212_v2  ;;  %v238_v12 = vsel %vm228_vm3, %v235_v10, %v237_v7  ;;  %v260_v15 = vrot.slane %v200_v56, 3  ;;  %v257_v16 = vrot.slane %v2015_v58, 3  ;;  %v432_v4 = vld [vmem:[%s2672_s5 + $0x28] sm:$0xff]  ;;  %v434_v7 = vld [vmem:[%s2672_s5 + $0x38] sm:$0xff] }
  0xef   :  { %v236_v13 = vsel %vm228_vm3, %v234_v11, %v235_v10  ;;  %v281_v17 = vrot.slane %v2012_v57, 4  ;;  %v283_v20 = vrot.slane %v200_v56, 4  ;;  %v280_v21 = vrot.slane %v2015_v58, 4  ;;  %v436_v10 = vld [vmem:[%s2672_s5 + $0x48] sm:$0xff] }
  0xf0   :  { %v261_v18 = vsel %vm251_vm5, %v258_v14, %v260_v15  ;;  %v259_v19 = vsel %vm251_vm5, %v257_v16, %v258_v14  ;;  %v1819_v63 = vmov 0.0|0.0   ;;  %v1547_v2 = vpack.c.bf16 %v430_v1, %v429_v62  ;;  %v439_v15 = vld [vmem:[%s2672_s5 + $0x60] sm:$0xff]  ;;  %v440_v16 = vld [vmem:[%s2672_s5 + $0x68] sm:$0xff] }
  0xf1   :  { %264 = vrot.lane.b32.xlu1 %v256_v59, %s1817_s20  ;;  %262 = vrot.lane.b32.xlu0 %v254_v61, %s1817_s20  ;;  %v284_v22 = vsel %vm274_vm6, %v281_v17, %v283_v20  ;;  %v282_v23 = vsel %vm274_vm6, %v280_v21, %v281_v17  ;;  %v1562_v17 = vpack.c.bf16 %v440_v16, %v439_v15  ;;  %v1414_v21 = vld [vmem:[%s2671_s4] ss:$0 sm:$0xff] }
  0xf2   :  { %1543 = vmatprep.subr.bf16.mxu0 %v1819_v63  ;;  %1573 = vmatprep.subr.bf16.mxu1 %v1819_v63 }
  0xf5   :  { %287 = vrot.lane.b32.xlu1 %v279_v5, %s1818_s23  ;;  %285 = vrot.lane.b32.xlu0 %v277_v6, %s1818_s23  ;;  %v1550_v5 = vpack.c.bf16 %v432_v4, %v431_v3  ;;  %v433_v6 = vld [vmem:[%s2672_s5 + $0x30] sm:$0xff] }
  0xf9   :  { %222 = vrot.lane.b32.xlu1 %v215_v8, %s1816_s16  ;;  %220 = vrot.lane.b32.xlu0 %v213_v9, %s1816_s16  ;;  %v1553_v8 = vpack.c.bf16 %v434_v7, %v433_v6  ;;  %v435_v9 = vld [vmem:[%s2672_s5 + $0x40] sm:$0xff] }
  0xfa   :  { %v1556_v11 = vpack.c.bf16 %v436_v10, %v435_v9 }
  0xfd   :  { %245 = vrot.lane.b32.xlu1 %v238_v12, %s1815_s2  ;;  %243 = vrot.lane.b32.xlu0 %v236_v13, %s1815_s2  ;;  %v437_v12 = vld [vmem:[%s2672_s5 + $0x50] sm:$0xff]  ;;  %v438_v13 = vld [vmem:[%s2672_s5 + $0x58] sm:$0xff] }
  0xfe   :  { %v1559_v14 = vpack.c.bf16 %v438_v13, %v437_v12 }
 0x101   :  { %268 = vrot.lane.b32.xlu1 %v261_v18, %s1817_s20  ;;  %266 = vrot.lane.b32.xlu0 %v259_v19, %s1817_s20  ;;  %v441_v18 = vld [vmem:[%s2672_s5 + $0x70] sm:$0xff]  ;;  %v442_v19 = vld [vmem:[%s2672_s5 + $0x78] sm:$0xff] }
 0x102   :  { %v1565_v20 = vpack.c.bf16 %v442_v19, %v441_v18 }
 0x105   :  { %291 = vrot.lane.b32.xlu1 %v284_v22, %s1818_s23  ;;  %289 = vrot.lane.b32.xlu0 %v282_v23, %s1818_s23 }
 0x15b   :  { %v240_v25 = vpop.permute.xlu1 %239  ;;  %v217_v26 = vpop.permute.xlu0 %216 }
 0x15c   :  { %v297_v30 = vsel %vm161_vm1, %v1980_v37, %v217_v26 }
 0x15d   :  { %v302_v38 = vsel %vm301_vm7, %v297_v30, %v240_v25 }
 0x15f   :  { %v242_v27 = vpop.permute.xlu1 %241  ;;  %v219_v29 = vpop.permute.xlu0 %218 }
 0x160   :  { %v298_v31 = vsel %vm161_vm1, %v1977_v36, %v219_v29  ;;  %v444_v29 = vld [vmem:[%s2672_s5 + $0x88] sm:$0xff] }
 0x161   :  { %v303_v35 = vsel %vm301_vm7, %v298_v31, %v242_v27  ;;  %v443_v27 = vld [vmem:[%s2672_s5 + $0x80] sm:$0xff] }
 0x162   :  { %v1568_v31 = vpack.c.bf16 %v444_v29, %v443_v27 }
 0x163   :  { %v265_v32 = vpop.permute.xlu1 %264  ;;  %v263_v34 = vpop.permute.xlu0 %262 }
 0x164   :  { %v308_v39 = vsel %vm306_vm8, %v303_v35, %v265_v32  ;;  %v307_v40 = vsel %vm306_vm8, %v302_v38, %v263_v34 }
 0x167   :  { %v288_v41 = vpop.permute.xlu1 %287  ;;  %v286_v43 = vpop.permute.xlu0 %285 }
 0x168   :  { %v313_v37 = vsel %vm311_vm9, %v308_v39, %v288_v41  ;;  %v312_v36 = vsel %vm311_vm9, %v307_v40, %v286_v43 }
 0x169   :  { %1505 = vmatprep.mubr.msk.f32.mxu1 %vm322_vm10, %v312_v36 }
 0x16a   :  { %1506 = vmatmul.mubr.msk.f32.vlgmr.msra.gmra.mrb[0].mxu1 %vm322_vm10, %v313_v37 }
 0x16b   :  { %v223_v44 = vpop.permute.xlu1 %222  ;;  %v221_v45 = vpop.permute.xlu0 %220 }
 0x16c   :  { %v300_v50 = vsel %vm161_vm1, %v2012_v57, %v223_v44  ;;  %v299_v51 = vsel %vm161_vm1, %v2015_v58, %v221_v45  ;;  %v427_v57 = vld [vmem:[%s2672_s5] sm:$0xff]  ;;  %v428_v58 = vld [vmem:[%s2672_s5 + $0x8] sm:$0xff] }
 0x16d   :  { %v1544_v0 = vpack.c.bf16 %v428_v58, %v427_v57 }
 0x16f   :  { %v246_v46 = vpop.permute.xlu1 %245  ;;  %v244_v47 = vpop.permute.xlu0 %243  ;;  %1545 = vmatpush1.bf16.msra.mxu0 %v1544_v0 }
 0x170   :  { %v305_v52 = vsel %vm301_vm7, %v300_v50, %v246_v46  ;;  %v304_v53 = vsel %vm301_vm7, %v299_v51, %v244_v47  ;;  %1546 = vmatprep.subr.bf16.mxu0 %v1819_v63  ;;  %v445_v51 = vld [vmem:[%s2672_s5 + $0x90] sm:$0xff] }
 0x173   :  { %v269_v48 = vpop.permute.xlu1 %268  ;;  %v267_v49 = vpop.permute.xlu0 %266  ;;  %1548 = vmatpush1.bf16.msra.mxu0 %v1547_v2 }
 0x174   :  { %v310_v54 = vsel %vm306_vm8, %v305_v52, %v269_v48  ;;  %v309_v55 = vsel %vm306_vm8, %v304_v53, %v267_v49  ;;  %1549 = vmatprep.subr.bf16.mxu0 %v1819_v63  ;;  %v446_v52 = vld [vmem:[%s2672_s5 + $0x98] sm:$0xff]  ;;  %s1820_s5 = smov 64  }
 0x175   :  { %v1571_v0 = vpack.c.bf16 %v446_v52, %v445_v51 }
 0x177   :  { %v292_v56 = vpop.permute.xlu1 %291  ;;  %v290_v59 = vpop.permute.xlu0 %289  ;;  %1551 = vmatpush1.bf16.msra.mxu0 %v1550_v5 }
 0x178   :  { %v315_v60 = vsel %vm311_vm9, %v310_v54, %v292_v56  ;;  %v314_v61 = vsel %vm311_vm9, %v309_v55, %v290_v59  ;;  %1552 = vmatprep.subr.bf16.mxu0 %v1819_v63 }
 0x179   :  { %1508 = vmatprep.mubr.msk.f32.mxu1 %vm322_vm10, %v314_v61 }
 0x17a   :  { %1509 = vmatmul.mubr.msk.f32.gmra.mrb[2].mxu1 %vm322_vm10, %v315_v60 }
 0x17b   :  { %1554 = vmatpush1.bf16.msra.mxu0 %v1553_v8 }
 0x17c   :  { %1555 = vmatprep.subr.bf16.mxu0 %v1819_v63 }
 0x17f   :  { %1557 = vmatpush1.bf16.msra.mxu0 %v1556_v11 }
 0x180   :  { %1558 = vmatprep.subr.bf16.mxu0 %v1819_v63 }
 0x183   :  { %1560 = vmatpush1.bf16.msra.mxu0 %v1559_v14 }
 0x184   :  { %1561 = vmatprep.subr.bf16.mxu0 %v1819_v63 }
 0x187   :  { %1563 = vmatpush1.bf16.msra.mxu0 %v1562_v17 }
 0x188   :  { %1564 = vmatprep.subr.bf16.mxu0 %v1819_v63 }
 0x18b   :  { %1566 = vmatpush1.bf16.msra.mxu0 %v1565_v20 }
 0x18c   :  { %1567 = vmatprep.subr.bf16.mxu0 %v1819_v63 }
 0x18f   :  { %1569 = vmatpush1.bf16.msra.mxu0 %v1568_v31 }
 0x190   :  { %1570 = vmatprep.subr.bf16.mxu0 %v1819_v63 }
 0x193   :  { %1572 = vmatpush1.bf16.msra.mxu0 %v1571_v0 }
 0x194   :  { %1603 = vmatprep.subr.bf16.mxu0 %v1819_v63 }
 0x23d   :  { %v1507_v22 = vpop.f32.mrb[0].mxu1 }
 0x23e   :  { %v410_v23 = vadd.f32 %v1507_v22, %v1414_v21  ;;  %v404_v25 = vpop.f32.mrb[1].mxu1 }
 0x23f   :  { %v405_v26 = vadd.f32 %v1414_v21, %v404_v25 }
 0x240   :  { %1735 = vtanh.f32 %v410_v23 }
 0x241   :  { %1737 = vtanh.f32 %v405_v26 }
 0x24a   :  { %v1736_v30 = vpop.eup %1735 }
 0x24b   :  { %v1738_v32 = vpop.eup %1737  ;;  %v453_v34 = vrot.slane %v1736_v30, 6 }
 0x24c   :  { %v452_v35 = vrot.slane %v1738_v32, 6 }
 0x24d   :  { %v466_v38 = vsel %vm184_vm2, %v453_v34, 0.0  ;;  %v1510_v39 = vpop.f32.mrb[2].mxu1 }
 0x24e   :  { %v2146_v40 = vsel %vm184_vm2, %v452_v35, %v453_v34  ;;  %v2149_v41 = vsel %vm184_vm2, 0.0, %v452_v35  ;;  %v420_v43 = vadd.f32 %v1510_v39, %v1414_v21  ;;  %v414_v37 = vpop.f32.mrb[3].mxu1  ;;  %v497_v36 = vrot.slane %v466_v38, 2 }
 0x24f   :  { %v415_v44 = vadd.f32 %v1414_v21, %v414_v37  ;;  %v538_v45 = vrot.slane %v2149_v41, 4  ;;  %v539_v46 = vrot.slane %v2146_v40, 4  ;;  %v494_v47 = vrot.slane %v2149_v41, 2 }
 0x250   :  { %1739 = vtanh.f32 %v420_v43  ;;  %v495_v48 = vrot.slane %v2146_v40, 2  ;;  %v472_v49 = vrot.slane %v2149_v41, 1  ;;  %v473_v50 = vrot.slane %v2146_v40, 1 }
 0x251   :  { %1741 = vtanh.f32 %v415_v44  ;;  %v540_v53 = vsel %vm274_vm6, %v538_v45, %v539_v46  ;;  %v475_v54 = vrot.slane %v466_v38, 1  ;;  %v516_v55 = vrot.slane %v2149_v41, 3 }
 0x252   :  { %1421 = vmatprep.mubr.msk.f32.mxu0 %vm63_vm0, %v540_v53  ;;  %v496_v56 = vsel %vm228_vm3, %v494_v47, %v495_v48  ;;  %v498_v59 = vsel %vm228_vm3, %v495_v48, %v497_v36  ;;  %v474_v60 = vsel %vm205_vm4, %v472_v49, %v473_v50  ;;  %v517_v61 = vrot.slane %v2146_v40, 3 }
 0x253   :  { %v1680_v57 = vpack.i.bf16 %v498_v59, %v496_v56  ;;  %v476_v58 = vsel %vm205_vm4, %v473_v50, %v475_v54  ;;  %v519_v62 = vrot.slane %v466_v38, 3  ;;  %v541_v2 = vrot.slane %v466_v38, 4 }
 0x254   :  { %v1675_v1 = vpack.i.bf16 %v476_v58, %v474_v60  ;;  %v518_v3 = vsel %vm251_vm5, %v516_v55, %v517_v61 }
 0x255   :  { %1681 = vrot.lane.b32.xlu1 %v1680_v57, %s1820_s5  ;;  %v520_v4 = vsel %vm251_vm5, %v517_v61, %v519_v62  ;;  %v542_v5 = vsel %vm274_vm6, %v539_v46, %v541_v2  ;;  %v665_v2 = vld [vmem:[%s2674_s7] sm:$0xff] }
 0x256   :  { %1676 = vrot.lane.b32.xlu0 %v1675_v1, %s1821_s24  ;;  %v1685_v6 = vpack.i.bf16 %v520_v4, %v518_v3  ;;  %v666_v3 = vld [vmem:[%s2674_s7 + $0x8] sm:$0xff]  ;;  %v667_v4 = vld [vmem:[%s2674_s7 + $0x10] sm:$0xff] }
 0x25a   :  { %v1740_v7 = vpop.eup %1739  ;;  %1686 = vrot.lane.b32.xlu0 %v1685_v6, %s1822_s25  ;;  %v668_v6 = vld [vmem:[%s2674_s7 + $0x18] sm:$0xff] }
 0x25b   :  { %v1742_v8 = vpop.eup %1741  ;;  %v456_v9 = vrot.slane %v1740_v7, 6  ;;  %v1577_v7 = vpack.c.bf16 %v668_v6, %v667_v4 }
 0x25c   :  { %v455_v10 = vrot.slane %v1742_v8, 6  ;;  %v669_v8 = vld [vmem:[%s2674_s7 + $0x20] sm:$0xff] }
 0x25d   :  { %v467_v11 = vsel %vm184_vm2, %v456_v9, 0.0 }
 0x25e   :  { %v457_v12 = vsel %vm184_vm2, %v455_v10, %v456_v9  ;;  %v465_v13 = vsel %vm184_vm2, 0.0, %v455_v10  ;;  %v480_v18 = vrot.slane %v467_v11, 1  ;;  %v524_v26 = vrot.slane %v467_v11, 3  ;;  %v670_v9 = vld [vmem:[%s2674_s7 + $0x28] sm:$0xff] }
 0x25f   :  { %v499_v14 = vrot.slane %v465_v13, 2  ;;  %v500_v15 = vrot.slane %v457_v12, 2  ;;  %v477_v16 = vrot.slane %v465_v13, 1  ;;  %v478_v17 = vrot.slane %v457_v12, 1 }
 0x260   :  { %v521_v21 = vrot.slane %v465_v13, 3  ;;  %v522_v22 = vrot.slane %v457_v12, 3  ;;  %v502_v27 = vrot.slane %v467_v11, 2  ;;  %v543_v48 = vrot.slane %v465_v13, 4 }
 0x261   :  { %v501_v19 = vsel %vm228_vm3, %v499_v14, %v500_v15  ;;  %v479_v20 = vsel %vm205_vm4, %v477_v16, %v478_v17  ;;  %v481_v23 = vsel %vm205_vm4, %v478_v17, %v480_v18  ;;  %v544_v49 = vrot.slane %v457_v12, 4  ;;  %v673_v14 = vld [vmem:[%s2674_s7 + $0x40] sm:$0xff]  ;;  %v675_v17 = vld [vmem:[%s2674_s7 + $0x50] sm:$0xff]  ;;  %v676_v18 = vld [vmem:[%s2674_s7 + $0x58] sm:$0xff] }
 0x262   :  { %508 = vrot.lane.b32.xlu0 %v501_v19, %s1820_s5  ;;  %486 = vrot.lane.b32.xlu1 %v479_v20, %s1821_s24  ;;  %v523_v25 = vsel %vm251_vm5, %v521_v21, %v522_v22  ;;  %v525_v29 = vsel %vm251_vm5, %v522_v22, %v524_v26  ;;  %v503_v30 = vsel %vm228_vm3, %v500_v15, %v502_v27  ;;  %v546_v55 = vrot.slane %v467_v11, 4  ;;  %v671_v11 = vld [vmem:[%s2674_s7 + $0x30] sm:$0xff]  ;;  %v674_v15 = vld [vmem:[%s2674_s7 + $0x48] sm:$0xff] }
 0x263   :  { %v545_v51 = vsel %vm274_vm6, %v543_v48, %v544_v49  ;;  %v1580_v10 = vpack.c.bf16 %v670_v9, %v669_v8  ;;  %v1586_v16 = vpack.c.bf16 %v674_v15, %v673_v14  ;;  %v1589_v19 = vpack.c.bf16 %v676_v18, %v675_v17  ;;  %v677_v20 = vld [vmem:[%s2674_s7 + $0x60] sm:$0xff]  ;;  %v678_v21 = vld [vmem:[%s2674_s7 + $0x68] sm:$0xff] }
 0x264   :  { %v547_v61 = vsel %vm274_vm6, %v544_v49, %v546_v55  ;;  %v1592_v22 = vpack.c.bf16 %v678_v21, %v677_v20  ;;  %v1420_v27 = vld [vmem:[%s2673_s6] ss:$0 sm:$0xff] }
 0x266   :  { %488 = vrot.lane.b32.xlu0 %v481_v23, %s1821_s24  ;;  %530 = vrot.lane.b32.xlu1 %v523_v25, %s1822_s25  ;;  %v679_v23 = vld [vmem:[%s2674_s7 + $0x70] sm:$0xff]  ;;  %v680_v25 = vld [vmem:[%s2674_s7 + $0x78] sm:$0xff] }
 0x267   :  { %v1595_v26 = vpack.c.bf16 %v680_v25, %v679_v23 }
 0x26a   :  { %532 = vrot.lane.b32.xlu0 %v525_v29, %s1822_s25  ;;  %510 = vrot.lane.b32.xlu1 %v503_v30, %s1820_s5 }
 0x2c7   :  { %v1682_v31 = vpop.permute.xlu1 %1681 }
 0x2c8   :  { %v1677_v32 = vpop.permute.xlu0 %1676  ;;  %v1683_v35 = vunpack.i.l.bf16 %v1682_v31  ;;  %v1684_v36 = vunpack.i.h.bf16 %v1682_v31 }
 0x2c9   :  { %v1678_v34 = vunpack.i.l.bf16 %v1677_v32  ;;  %v1679_v38 = vunpack.i.h.bf16 %v1677_v32 }
 0x2cb   :  { %v548_v39 = vsel %vm63_vm0, %v2149_v41, %v1678_v34  ;;  %v549_v47 = vsel %vm63_vm0, %v2146_v40, %v1679_v38 }
 0x2cc   :  { %v1687_v43 = vpop.permute.xlu0 %1686  ;;  %v553_v44 = vsel %vm552_vm11, %v548_v39, %v1683_v35  ;;  %v554_v41 = vsel %vm552_vm11, %v549_v47, %v1684_v36 }
 0x2cd   :  { %v1688_v37 = vunpack.i.l.bf16 %v1687_v43  ;;  %v1689_v45 = vunpack.i.h.bf16 %v1687_v43 }
 0x2cf   :  { %v558_v46 = vsel %vm557_vm12, %v553_v44, %v1688_v37  ;;  %v559_v50 = vsel %vm557_vm12, %v554_v41, %v1689_v45  ;;  %v681_v44 = vld [vmem:[%s2674_s7 + $0x80] sm:$0xff]  ;;  %v682_v45 = vld [vmem:[%s2674_s7 + $0x88] sm:$0xff] }
 0x2d0   :  { %641 = vmatmul.mubr.f32.vlgmr.msra.gmra.mrb[4].mxu0 %v558_v46  ;;  %v1598_v47 = vpack.c.bf16 %v682_v45, %v681_v44 }
 0x2d1   :  { %1422 = vmatprep.mubr.msk.f32.mxu0 %vm63_vm0, %v542_v5  ;;  %v1574_v5 = vpack.c.bf16 %v666_v3, %v665_v2 }
 0x2d3   :  { %1575 = vmatpush1.bf16.msra.mxu1 %v1574_v5 }
 0x2d4   :  { %646 = vmatmul.mubr.f32.gmra.mrb[6].mxu0 %v559_v50  ;;  %v487_v52 = vpop.permute.xlu1 %486  ;;  %v509_v53 = vpop.permute.xlu0 %508  ;;  %1576 = vmatprep.subr.bf16.mxu1 %v1819_v63 }
 0x2d5   :  { %1423 = vmatprep.mubr.msk.f32.mxu0 %vm63_vm0, %v545_v51  ;;  %v550_v54 = vsel %vm63_vm0, %v465_v13, %v487_v52  ;;  %v683_v52 = vld [vmem:[%s2674_s7 + $0x90] sm:$0xff] }
 0x2d6   :  { %v555_v40 = vsel %vm552_vm11, %v550_v54, %v509_v53  ;;  %v684_v53 = vld [vmem:[%s2674_s7 + $0x98] sm:$0xff] }
 0x2d7   :  { %1578 = vmatpush1.bf16.msra.mxu1 %v1577_v7  ;;  %v1601_v55 = vpack.c.bf16 %v684_v53, %v683_v52 }
 0x2d8   :  { %v531_v56 = vpop.permute.xlu1 %530  ;;  %v489_v59 = vpop.permute.xlu0 %488  ;;  %1579 = vmatprep.subr.bf16.mxu1 %v1819_v63 }
 0x2d9   :  { %v560_v60 = vsel %vm557_vm12, %v555_v40, %v531_v56  ;;  %v551_v57 = vsel %vm63_vm0, %v457_v12, %v489_v59  ;;  %v672_v12 = vld [vmem:[%s2674_s7 + $0x38] sm:$0xff] }
 0x2da   :  { %651 = vmatmul.mubr.f32.gmra.mrb[8].mxu0 %v560_v60  ;;  %v1583_v13 = vpack.c.bf16 %v672_v12, %v671_v11 }
 0x2db   :  { %1424 = vmatprep.mubr.msk.f32.mxu0 %vm63_vm0, %v547_v61  ;;  %1581 = vmatpush1.bf16.msra.mxu1 %v1580_v10 }
 0x2dc   :  { %v511_v58 = vpop.permute.xlu1 %510  ;;  %v533_v62 = vpop.permute.xlu0 %532  ;;  %1582 = vmatprep.subr.bf16.mxu1 %v1819_v63 }
 0x2dd   :  { %v556_v0 = vsel %vm552_vm11, %v551_v57, %v511_v58 }
 0x2de   :  { %v561_v1 = vsel %vm557_vm12, %v556_v0, %v533_v62 }
 0x2df   :  { %656 = vmatmul.mubr.f32.gmra.mrb[10].mxu0 %v561_v1  ;;  %1584 = vmatpush1.bf16.msra.mxu1 %v1583_v13 }
 0x2e0   :  { %1585 = vmatprep.subr.bf16.mxu1 %v1819_v63 }
 0x2e3   :  { %1587 = vmatpush1.bf16.msra.mxu1 %v1586_v16 }
 0x2e4   :  { %1588 = vmatprep.subr.bf16.mxu1 %v1819_v63 }
 0x2e7   :  { %1590 = vmatpush1.bf16.msra.mxu1 %v1589_v19 }
 0x2e8   :  { %1591 = vmatprep.subr.bf16.mxu1 %v1819_v63 }
 0x2eb   :  { %1593 = vmatpush1.bf16.msra.mxu1 %v1592_v22 }
 0x2ec   :  { %1594 = vmatprep.subr.bf16.mxu1 %v1819_v63 }
 0x2ef   :  { %1596 = vmatpush1.bf16.msra.mxu1 %v1595_v26 }
 0x2f0   :  { %1597 = vmatprep.subr.bf16.mxu1 %v1819_v63 }
 0x2f3   :  { %1599 = vmatpush1.bf16.msra.mxu1 %v1598_v47 }
 0x2f4   :  { %1600 = vmatprep.subr.bf16.mxu1 %v1819_v63 }
 0x2f7   :  { %1602 = vmatpush1.bf16.msra.mxu1 %v1601_v55 }
 0x2f8   :  { %1633 = vmatprep.subr.bf16.mxu1 %v1819_v63 }
 0x3a3   :  { %v642_v29 = vpop.f32.mrb[4].mxu0 }
 0x3a4   :  { %v643_v30 = vadd.f32 %v1420_v27, %v642_v29  ;;  %v644_v31 = vpop.f32.mrb[5].mxu0 }
 0x3a6   :  { %1743 = vtanh.f32 %v643_v30 }
 0x3a7   :  { %v647_v32 = vpop.f32.mrb[6].mxu0 }
 0x3a8   :  { %v648_v34 = vadd.f32 %v1420_v27, %v647_v32  ;;  %v649_v35 = vpop.f32.mrb[7].mxu0 }
 0x3aa   :  { %1745 = vtanh.f32 %v648_v34 }
 0x3ad   :  { %v652_v38 = vpop.f32.mrb[8].mxu0 }
 0x3ae   :  { %v653_v39 = vadd.f32 %v1420_v27, %v652_v38  ;;  %v654_v43 = vpop.f32.mrb[9].mxu0 }
 0x3b0   :  { %v1744_v37 = vpop.eup %1743  ;;  %1747 = vtanh.f32 %v653_v39 }
 0x3b1   :  { %v690_v36 = vrot.slane %v1744_v37, 6 }
 0x3b2   :  { %v657_v46 = vpop.f32.mrb[10].mxu0 }
 0x3b3   :  { %v2278_v48 = vsel %vm184_vm2, 0.0, %v690_v36  ;;  %v658_v49 = vadd.f32 %v1420_v27, %v657_v46  ;;  %v659_v41 = vpop.f32.mrb[11].mxu0 }
 0x3b4   :  { %v1746_v50 = vpop.eup %1745  ;;  %v776_v54 = vrot.slane %v2278_v48, 4  ;;  %v732_v59 = vrot.slane %v2278_v48, 2  ;;  %v710_v60 = vrot.slane %v2278_v48, 1  ;;  %v754_v11 = vrot.slane %v2278_v48, 3 }
 0x3b5   :  { %v691_v51 = vrot.slane %v1746_v50, 6  ;;  %1749 = vtanh.f32 %v658_v49 }
 0x3b7   :  { %v2289_v40 = vsel %vm184_vm2, %v690_v36, %v691_v51  ;;  %v704_v56 = vsel %vm184_vm2, %v691_v51, 0.0 }
 0x3b8   :  { %v777_v61 = vrot.slane %v2289_v40, 4  ;;  %v733_v57 = vrot.slane %v2289_v40, 2  ;;  %v735_v58 = vrot.slane %v704_v56, 2  ;;  %v711_v62 = vrot.slane %v2289_v40, 1 }
 0x3b9   :  { %v713_v0 = vrot.slane %v704_v56, 1  ;;  %v755_v1 = vrot.slane %v2289_v40, 3  ;;  %v757_v2 = vrot.slane %v704_v56, 3  ;;  %v779_v3 = vrot.slane %v704_v56, 4 }
 0x3ba   :  { %v1748_v4 = vpop.eup %1747  ;;  %v778_v5 = vsel %vm274_vm6, %v776_v54, %v777_v61  ;;  %v734_v6 = vsel %vm228_vm3, %v732_v59, %v733_v57  ;;  %v736_v7 = vsel %vm228_vm3, %v733_v57, %v735_v58  ;;  %v712_v8 = vsel %vm205_vm4, %v710_v60, %v711_v62 }
 0x3bb   :  { %1426 = vmatprep.mubr.msk.f32.mxu1 %vm63_vm0, %v778_v5  ;;  %v1695_v9 = vpack.i.bf16 %v736_v7, %v734_v6  ;;  %v714_v10 = vsel %vm205_vm4, %v711_v62, %v713_v0  ;;  %v693_v12 = vrot.slane %v1748_v4, 6  ;;  %v780_v14 = vsel %vm274_vm6, %v777_v61, %v779_v3 }
 0x3bc   :  { %v1690_v13 = vpack.i.bf16 %v714_v10, %v712_v8  ;;  %v756_v15 = vsel %vm251_vm5, %v754_v11, %v755_v1  ;;  %v758_v16 = vsel %vm251_vm5, %v755_v1, %v757_v2  ;;  %v901_v11 = vld [vmem:[%s2676_s9] sm:$0xff] }
 0x3bd   :  { %1696 = vrot.lane.b32.xlu0 %v1695_v9, %s1820_s5  ;;  %v703_v18 = vsel %vm184_vm2, 0.0, %v693_v12  ;;  %v1700_v20 = vpack.i.bf16 %v758_v16, %v756_v15  ;;  %v904_v15 = vld [vmem:[%s2676_s9 + $0x18] sm:$0xff] }
 0x3be   :  { %1691 = vrot.lane.b32.xlu1 %v1690_v13, %s1821_s24  ;;  %v715_v23 = vrot.slane %v703_v18, 1  ;;  %v737_v26 = vrot.slane %v703_v18, 2  ;;  %v759_v34 = vrot.slane %v703_v18, 3  ;;  %v781_v58 = vrot.slane %v703_v18, 4  ;;  %v903_v13 = vld [vmem:[%s2676_s9 + $0x10] sm:$0xff] }
 0x3bf   :  { %v1750_v17 = vpop.eup %1749  ;;  %v1607_v16 = vpack.c.bf16 %v904_v15, %v903_v13 }
 0x3c0   :  { %v694_v19 = vrot.slane %v1750_v17, 6  ;;  %v905_v17 = vld [vmem:[%s2676_s9 + $0x20] sm:$0xff] }
 0x3c2   :  { %v695_v21 = vsel %vm184_vm2, %v693_v12, %v694_v19  ;;  %v705_v22 = vsel %vm184_vm2, %v694_v19, 0.0  ;;  %1701 = vrot.lane.b32.xlu1 %v1700_v20, %s1822_s25  ;;  %v902_v12 = vld [vmem:[%s2676_s9 + $0x8] sm:$0xff]  ;;  %v907_v20 = vld [vmem:[%s2676_s9 + $0x30] sm:$0xff] }
 0x3c3   :  { %v716_v25 = vrot.slane %v695_v21, 1  ;;  %v738_v27 = vrot.slane %v695_v21, 2  ;;  %v760_v31 = vrot.slane %v695_v21, 3  ;;  %v718_v32 = vrot.slane %v705_v22, 1 }
 0x3c4   :  { %v740_v39 = vrot.slane %v705_v22, 2  ;;  %v762_v43 = vrot.slane %v705_v22, 3  ;;  %v782_v61 = vrot.slane %v695_v21, 4  ;;  %v784_v3 = vrot.slane %v705_v22, 4 }
 0x3c5   :  { %v717_v29 = vsel %vm205_vm4, %v715_v23, %v716_v25  ;;  %v739_v30 = vsel %vm228_vm3, %v737_v26, %v738_v27  ;;  %v761_v35 = vsel %vm251_vm5, %v759_v34, %v760_v31  ;;  %v719_v38 = vsel %vm205_vm4, %v716_v25, %v718_v32  ;;  %v909_v23 = vld [vmem:[%s2676_s9 + $0x40] sm:$0xff]  ;;  %v910_v25 = vld [vmem:[%s2676_s9 + $0x48] sm:$0xff] }
 0x3c6   :  { %724 = vrot.lane.b32.xlu0 %v717_v29, %s1821_s24  ;;  %746 = vrot.lane.b32.xlu1 %v739_v30, %s1820_s5  ;;  %v741_v37 = vsel %vm228_vm3, %v738_v27, %v740_v39  ;;  %v763_v36 = vsel %vm251_vm5, %v760_v31, %v762_v43  ;;  %v783_v1 = vsel %vm274_vm6, %v781_v58, %v782_v61  ;;  %v911_v27 = vld [vmem:[%s2676_s9 + $0x50] sm:$0xff]  ;;  %v912_v29 = vld [vmem:[%s2676_s9 + $0x58] sm:$0xff] }
 0x3c7   :  { %v785_v6 = vsel %vm274_vm6, %v782_v61, %v784_v3  ;;  %v1616_v26 = vpack.c.bf16 %v910_v25, %v909_v23  ;;  %v1619_v30 = vpack.c.bf16 %v912_v29, %v911_v27  ;;  %v913_v31 = vld [vmem:[%s2676_s9 + $0x60] sm:$0xff]  ;;  %v914_v32 = vld [vmem:[%s2676_s9 + $0x68] sm:$0xff]  ;;  %v920_v58 = vld [vmem:[%s2676_s9 + $0x98] sm:$0xff] }
 0x3c8   :  { %v1622_v34 = vpack.c.bf16 %v914_v32, %v913_v31  ;;  %v1425_v43 = vld [vmem:[%s2675_s8] ss:$0 sm:$0xff] }
 0x3ca   :  { %768 = vrot.lane.b32.xlu0 %v761_v35, %s1822_s25  ;;  %726 = vrot.lane.b32.xlu1 %v719_v38, %s1821_s24  ;;  %v915_v35 = vld [vmem:[%s2676_s9 + $0x70] sm:$0xff]  ;;  %v916_v38 = vld [vmem:[%s2676_s9 + $0x78] sm:$0xff] }
 0x3cb   :  { %v1625_v39 = vpack.c.bf16 %v916_v38, %v915_v35 }
 0x3ce   :  { %748 = vrot.lane.b32.xlu0 %v741_v37, %s1820_s5  ;;  %770 = vrot.lane.b32.xlu1 %v763_v36, %s1822_s25 }
 0x42f   :  { %v1697_v44 = vpop.permute.xlu0 %1696 }
 0x430   :  { %v1692_v45 = vpop.permute.xlu1 %1691  ;;  %v1698_v47 = vunpack.i.l.bf16 %v1697_v44  ;;  %v1699_v52 = vunpack.i.h.bf16 %v1697_v44 }
 0x431   :  { %v1693_v46 = vunpack.i.l.bf16 %v1692_v45  ;;  %v1694_v49 = vunpack.i.h.bf16 %v1692_v45 }
 0x433   :  { %v786_v41 = vsel %vm63_vm0, %v2278_v48, %v1693_v46  ;;  %v787_v56 = vsel %vm63_vm0, %v2289_v40, %v1694_v49 }
 0x434   :  { %v1702_v50 = vpop.permute.xlu1 %1701  ;;  %v790_v53 = vsel %vm552_vm11, %v786_v41, %v1698_v47  ;;  %v791_v48 = vsel %vm552_vm11, %v787_v56, %v1699_v52  ;;  %v918_v56 = vld [vmem:[%s2676_s9 + $0x88] sm:$0xff] }
 0x435   :  { %v1703_v51 = vunpack.i.l.bf16 %v1702_v50  ;;  %v1704_v54 = vunpack.i.h.bf16 %v1702_v50 }
 0x437   :  { %v794_v55 = vsel %vm557_vm12, %v790_v53, %v1703_v51  ;;  %v795_v62 = vsel %vm557_vm12, %v791_v48, %v1704_v54  ;;  %v919_v48 = vld [vmem:[%s2676_s9 + $0x90] sm:$0xff] }
 0x438   :  { %877 = vmatmul.mubr.f32.vlgmr.msra.gmra.mrb[4].mxu1 %v794_v55  ;;  %v725_v59 = vpop.permute.xlu0 %724  ;;  %v747_v60 = vpop.permute.xlu1 %746  ;;  %v917_v55 = vld [vmem:[%s2676_s9 + $0x80] sm:$0xff] }
 0x439   :  { %1427 = vmatprep.mubr.msk.f32.mxu1 %vm63_vm0, %v780_v14  ;;  %v788_v57 = vsel %vm63_vm0, %v703_v18, %v725_v59  ;;  %v1604_v14 = vpack.c.bf16 %v902_v12, %v901_v11  ;;  %v906_v18 = vld [vmem:[%s2676_s9 + $0x28] sm:$0xff] }
 0x43a   :  { %v792_v0 = vsel %vm552_vm11, %v788_v57, %v747_v60  ;;  %v1610_v19 = vpack.c.bf16 %v906_v18, %v905_v17  ;;  %v1628_v60 = vpack.c.bf16 %v918_v56, %v917_v55 }
 0x43b   :  { %1605 = vmatpush1.bf16.msra.mxu0 %v1604_v14 }
 0x43c   :  { %882 = vmatmul.mubr.f32.gmra.mrb[6].mxu1 %v795_v62  ;;  %v769_v2 = vpop.permute.xlu0 %768  ;;  %v727_v40 = vpop.permute.xlu1 %726  ;;  %1606 = vmatprep.subr.bf16.mxu0 %v1819_v63 }
 0x43d   :  { %1428 = vmatprep.mubr.msk.f32.mxu1 %vm63_vm0, %v783_v1  ;;  %v796_v4 = vsel %vm557_vm12, %v792_v0, %v769_v2  ;;  %v789_v5 = vsel %vm63_vm0, %v695_v21, %v727_v40  ;;  %v908_v21 = vld [vmem:[%s2676_s9 + $0x38] sm:$0xff]  ;;  %v1631_v0 = vpack.c.bf16 %v920_v58, %v919_v48 }
 0x43e   :  { %v1613_v22 = vpack.c.bf16 %v908_v21, %v907_v20 }
 0x43f   :  { %1608 = vmatpush1.bf16.msra.mxu0 %v1607_v16 }
 0x440   :  { %887 = vmatmul.mubr.f32.gmra.mrb[8].mxu1 %v796_v4  ;;  %v749_v7 = vpop.permute.xlu0 %748  ;;  %v771_v8 = vpop.permute.xlu1 %770  ;;  %1609 = vmatprep.subr.bf16.mxu0 %v1819_v63 }
 0x441   :  { %1429 = vmatprep.mubr.msk.f32.mxu1 %vm63_vm0, %v785_v6  ;;  %v793_v9 = vsel %vm552_vm11, %v789_v5, %v749_v7 }
 0x442   :  { %v797_v10 = vsel %vm557_vm12, %v793_v9, %v771_v8 }
 0x443   :  { %1611 = vmatpush1.bf16.msra.mxu0 %v1610_v19 }
 0x444   :  { %892 = vmatmul.mubr.f32.gmra.mrb[10].mxu1 %v797_v10  ;;  %1612 = vmatprep.subr.bf16.mxu0 %v1819_v63 }
 0x447   :  { %1614 = vmatpush1.bf16.msra.mxu0 %v1613_v22 }
 0x448   :  { %1615 = vmatprep.subr.bf16.mxu0 %v1819_v63 }
 0x44b   :  { %1617 = vmatpush1.bf16.msra.mxu0 %v1616_v26 }
 0x44c   :  { %1618 = vmatprep.subr.bf16.mxu0 %v1819_v63 }
 0x44f   :  { %1620 = vmatpush1.bf16.msra.mxu0 %v1619_v30 }
 0x450   :  { %1621 = vmatprep.subr.bf16.mxu0 %v1819_v63 }
 0x453   :  { %1623 = vmatpush1.bf16.msra.mxu0 %v1622_v34 }
 0x454   :  { %1624 = vmatprep.subr.bf16.mxu0 %v1819_v63 }
 0x457   :  { %1626 = vmatpush1.bf16.msra.mxu0 %v1625_v39 }
 0x458   :  { %1627 = vmatprep.subr.bf16.mxu0 %v1819_v63 }
 0x45b   :  { %1629 = vmatpush1.bf16.msra.mxu0 %v1628_v60 }
 0x45c   :  { %1630 = vmatprep.subr.bf16.mxu0 %v1819_v63 }
 0x45f   :  { %1632 = vmatpush1.bf16.msra.mxu0 %v1631_v0 }
 0x50b   :  { %v878_v37 = vpop.f32.mrb[4].mxu1 }
 0x50c   :  { %v879_v36 = vadd.f32 %v1425_v43, %v878_v37  ;;  %v880_v44 = vpop.f32.mrb[5].mxu1 }
 0x50e   :  { %1751 = vtanh.f32 %v879_v36 }
 0x50f   :  { %v883_v45 = vpop.f32.mrb[6].mxu1 }
 0x510   :  { %v884_v46 = vadd.f32 %v1425_v43, %v883_v45  ;;  %v885_v47 = vpop.f32.mrb[7].mxu1 }
 0x512   :  { %1753 = vtanh.f32 %v884_v46 }
 0x513   :  { %v888_v49 = vpop.f32.mrb[8].mxu1 }
 0x514   :  { %v889_v41 = vadd.f32 %v1425_v43, %v888_v49  ;;  %v890_v50 = vpop.f32.mrb[9].mxu1 }
 0x516   :  { %1755 = vtanh.f32 %v889_v41 }
 0x517   :  { %v893_v51 = vpop.f32.mrb[10].mxu1 }
 0x518   :  { %v1752_v52 = vpop.eup %1751  ;;  %v894_v53 = vadd.f32 %v1425_v43, %v893_v51  ;;  %v895_v54 = vpop.f32.mrb[11].mxu1 }
 0x519   :  { %v926_v59 = vrot.slane %v1752_v52, 6 }
 0x51a   :  { %1757 = vtanh.f32 %v894_v53 }
 0x51b   :  { %v2412_v61 = vsel %vm184_vm2, 0.0, %v926_v59 }
 0x51c   :  { %v1754_v57 = vpop.eup %1753  ;;  %v1012_v1 = vrot.slane %v2412_v61, 4  ;;  %v968_v3 = vrot.slane %v2412_v61, 2  ;;  %v946_v4 = vrot.slane %v2412_v61, 1  ;;  %v990_v20 = vrot.slane %v2412_v61, 3 }
 0x51d   :  { %v927_v62 = vrot.slane %v1754_v57, 6 }
 0x51f   :  { %v2423_v2 = vsel %vm184_vm2, %v926_v59, %v927_v62  ;;  %v940_v40 = vsel %vm184_vm2, %v927_v62, 0.0 }
 0x520   :  { %v1756_v5 = vpop.eup %1755  ;;  %v1013_v6 = vrot.slane %v2423_v2, 4  ;;  %v969_v7 = vrot.slane %v2423_v2, 2  ;;  %v971_v8 = vrot.slane %v940_v40, 2  ;;  %v947_v9 = vrot.slane %v2423_v2, 1 }
 0x521   :  { %v929_v10 = vrot.slane %v1756_v5, 6  ;;  %v949_v11 = vrot.slane %v940_v40, 1  ;;  %v991_v12 = vrot.slane %v2423_v2, 3  ;;  %v993_v13 = vrot.slane %v940_v40, 3 }
 0x522   :  { %v1014_v14 = vsel %vm274_vm6, %v1012_v1, %v1013_v6  ;;  %v970_v15 = vsel %vm228_vm3, %v968_v3, %v969_v7  ;;  %v972_v16 = vsel %vm228_vm3, %v969_v7, %v971_v8  ;;  %v948_v17 = vsel %vm205_vm4, %v946_v4, %v947_v9 }
 0x523   :  { %1431 = vmatprep.mubr.msk.f32.mxu0 %vm63_vm0, %v1014_v14  ;;  %v1710_v18 = vpack.i.bf16 %v972_v16, %v970_v15  ;;  %v950_v19 = vsel %vm205_vm4, %v947_v9, %v949_v11  ;;  %v939_v22 = vsel %vm184_vm2, 0.0, %v929_v10  ;;  %v992_v26 = vsel %vm251_vm5, %v990_v20, %v991_v12  ;;  %v1137_v20 = vld [vmem:[%s2678_s11] sm:$0xff] }
 0x524   :  { %v1758_v21 = vpop.eup %1757  ;;  %v1705_v23 = vpack.i.bf16 %v950_v19, %v948_v17  ;;  %v994_v27 = vsel %vm251_vm5, %v991_v12, %v993_v13  ;;  %v1015_v29 = vrot.slane %v940_v40, 4  ;;  %v951_v34 = vrot.slane %v939_v22, 1 }
 0x525   :  { %v930_v25 = vrot.slane %v1758_v21, 6  ;;  %1711 = vrot.lane.b32.xlu1 %v1710_v18, %s1820_s5  ;;  %v1715_v32 = vpack.i.bf16 %v994_v27, %v992_v26  ;;  %v973_v39 = vrot.slane %v939_v22, 2  ;;  %v995_v45 = vrot.slane %v939_v22, 3  ;;  %v1138_v21 = vld [vmem:[%s2678_s11 + $0x8] sm:$0xff]  ;;  %v1141_v27 = vld [vmem:[%s2678_s11 + $0x20] sm:$0xff] }
 0x526   :  { %1706 = vrot.lane.b32.xlu0 %v1705_v23, %s1821_s24  ;;  %v1016_v31 = vsel %vm274_vm6, %v1013_v6, %v1015_v29  ;;  %v1017_v7 = vrot.slane %v939_v22, 4  ;;  %v1634_v23 = vpack.c.bf16 %v1138_v21, %v1137_v20  ;;  %v1142_v29 = vld [vmem:[%s2678_s11 + $0x28] sm:$0xff] }
 0x527   :  { %v2445_v30 = vsel %vm184_vm2, %v929_v10, %v930_v25  ;;  %v941_v43 = vsel %vm184_vm2, %v930_v25, 0.0  ;;  %v1140_v25 = vld [vmem:[%s2678_s11 + $0x18] sm:$0xff] }
 0x528   :  { %v952_v35 = vrot.slane %v2445_v30, 1  ;;  %v974_v38 = vrot.slane %v2445_v30, 2  ;;  %v996_v36 = vrot.slane %v2445_v30, 3  ;;  %v954_v46 = vrot.slane %v941_v43, 1  ;;  %1635 = vmatpush1.bf16.msra.mxu1 %v1634_v23 }
 0x529   :  { %v976_v49 = vrot.slane %v941_v43, 2  ;;  %v998_v50 = vrot.slane %v941_v43, 3  ;;  %v1018_v5 = vrot.slane %v2445_v30, 4  ;;  %v1020_v12 = vrot.slane %v941_v43, 4  ;;  %1636 = vmatprep.subr.bf16.mxu1 %v1819_v63  ;;  %v1147_v43 = vld [vmem:[%s2678_s11 + $0x50] sm:$0xff] }
 0x52a   :  { %1716 = vrot.lane.b32.xlu0 %v1715_v32, %s1822_s25  ;;  %v953_v37 = vsel %vm205_vm4, %v951_v34, %v952_v35  ;;  %v975_v44 = vsel %vm228_vm3, %v973_v39, %v974_v38  ;;  %v997_v47 = vsel %vm251_vm5, %v995_v45, %v996_v36  ;;  %v955_v41 = vsel %vm205_vm4, %v952_v35, %v954_v46  ;;  %v1144_v32 = vld [vmem:[%s2678_s11 + $0x38] sm:$0xff]  ;;  %v1145_v35 = vld [vmem:[%s2678_s11 + $0x40] sm:$0xff]  ;;  %v1150_v45 = vld [vmem:[%s2678_s11 + $0x68] sm:$0xff] }
 0x52b   :  { %960 = vrot.lane.b32.xlu1 %v953_v37, %s1821_s24  ;;  %v977_v51 = vsel %vm228_vm3, %v974_v38, %v976_v49  ;;  %v999_v52 = vsel %vm251_vm5, %v996_v36, %v998_v50  ;;  %v1019_v11 = vsel %vm274_vm6, %v1017_v7, %v1018_v5  ;;  %v1021_v18 = vsel %vm274_vm6, %v1018_v5, %v1020_v12  ;;  %v1146_v38 = vld [vmem:[%s2678_s11 + $0x48] sm:$0xff]  ;;  %v1148_v37 = vld [vmem:[%s2678_s11 + $0x58] sm:$0xff]  ;;  %v1430_v50 = vld [vmem:[%s2677_s10] ss:$0 sm:$0xff] }
 0x52c   :  { %v1646_v39 = vpack.c.bf16 %v1146_v38, %v1145_v35  ;;  %v1649_v36 = vpack.c.bf16 %v1148_v37, %v1147_v43  ;;  %v1152_v49 = vld [vmem:[%s2678_s11 + $0x78] sm:$0xff]  ;;  %v1155_v7 = vld [vmem:[%s2678_s11 + $0x90] sm:$0xff] }
 0x52e   :  { %982 = vrot.lane.b32.xlu0 %v975_v44, %s1820_s5  ;;  %v1149_v44 = vld [vmem:[%s2678_s11 + $0x60] sm:$0xff] }
 0x52f   :  { %1004 = vrot.lane.b32.xlu1 %v997_v47, %s1822_s25  ;;  %v1652_v46 = vpack.c.bf16 %v1150_v45, %v1149_v44  ;;  %v1151_v47 = vld [vmem:[%s2678_s11 + $0x70] sm:$0xff] }
 0x532   :  { %962 = vrot.lane.b32.xlu0 %v955_v41, %s1821_s24  ;;  %v1655_v41 = vpack.c.bf16 %v1152_v49, %v1151_v47 }
 0x533   :  { %984 = vrot.lane.b32.xlu1 %v977_v51, %s1820_s5 }
 0x536   :  { %1006 = vrot.lane.b32.xlu0 %v999_v52, %s1822_s25 }
 0x597   :  { %v1712_v53 = vpop.permute.xlu1 %1711 }
 0x598   :  { %v1707_v54 = vpop.permute.xlu0 %1706  ;;  %v1713_v56 = vunpack.i.l.bf16 %v1712_v53  ;;  %v1714_v62 = vunpack.i.h.bf16 %v1712_v53 }
 0x599   :  { %v1708_v55 = vunpack.i.l.bf16 %v1707_v54  ;;  %v1709_v59 = vunpack.i.h.bf16 %v1707_v54 }
 0x59b   :  { %v1022_v60 = vsel %vm63_vm0, %v2412_v61, %v1708_v55  ;;  %v1023_v3 = vsel %vm63_vm0, %v2423_v2, %v1709_v59 }
 0x59c   :  { %v1717_v57 = vpop.permute.xlu0 %1716  ;;  %v1026_v0 = vsel %vm552_vm11, %v1022_v60, %v1713_v56  ;;  %v1027_v61 = vsel %vm552_vm11, %v1023_v3, %v1714_v62  ;;  %v1154_v3 = vld [vmem:[%s2678_s11 + $0x88] sm:$0xff] }
 0x59d   :  { %v1718_v48 = vunpack.i.l.bf16 %v1717_v57  ;;  %v961_v58 = vpop.permute.xlu1 %960  ;;  %v1719_v1 = vunpack.i.h.bf16 %v1717_v57 }
 0x59e   :  { %v1024_v8 = vsel %vm63_vm0, %v939_v22, %v961_v58  ;;  %v1139_v22 = vld [vmem:[%s2678_s11 + $0x10] sm:$0xff] }
 0x59f   :  { %v1030_v40 = vsel %vm557_vm12, %v1026_v0, %v1718_v48  ;;  %v1031_v9 = vsel %vm557_vm12, %v1027_v61, %v1719_v1  ;;  %v1637_v26 = vpack.c.bf16 %v1140_v25, %v1139_v22 }
 0x5a0   :  { %v983_v4 = vpop.permute.xlu0 %982  ;;  %1113 = vmatmul.mubr.f32.vlgmr.msra.gmra.mrb[12].mxu0 %v1030_v40  ;;  %v1153_v40 = vld [vmem:[%s2678_s11 + $0x80] sm:$0xff] }
 0x5a1   :  { %1432 = vmatprep.mubr.msk.f32.mxu0 %vm63_vm0, %v1016_v31  ;;  %v1005_v6 = vpop.permute.xlu1 %1004  ;;  %v1028_v14 = vsel %vm552_vm11, %v1024_v8, %v983_v4  ;;  %1638 = vmatpush1.bf16.msra.mxu1 %v1637_v26  ;;  %v1143_v31 = vld [vmem:[%s2678_s11 + $0x30] sm:$0xff]  ;;  %v1658_v4 = vpack.c.bf16 %v1154_v3, %v1153_v40  ;;  %v1156_v8 = vld [vmem:[%s2678_s11 + $0x98] sm:$0xff]  ;;  %s1823_s11 = smov [#allocation2]  }
 0x5a2   :  { %v1032_v16 = vsel %vm557_vm12, %v1028_v14, %v1005_v6  ;;  %1639 = vmatprep.subr.bf16.mxu1 %v1819_v63  ;;  %v1643_v34 = vpack.c.bf16 %v1144_v32, %v1143_v31 }
 0x5a4   :  { %v963_v10 = vpop.permute.xlu0 %962  ;;  %1118 = vmatmul.mubr.f32.gmra.mrb[14].mxu0 %v1031_v9 }
 0x5a5   :  { %v1025_v2 = vsel %vm63_vm0, %v2445_v30, %v963_v10  ;;  %1433 = vmatprep.mubr.msk.f32.mxu0 %vm63_vm0, %v1019_v11  ;;  %v985_v13 = vpop.permute.xlu1 %984  ;;  %v1640_v30 = vpack.c.bf16 %v1142_v29, %v1141_v27  ;;  %v1661_v10 = vpack.c.bf16 %v1156_v8, %v1155_v7 }
 0x5a6   :  { %v1029_v15 = vsel %vm552_vm11, %v1025_v2, %v985_v13 }
 0x5a7   :  { %1641 = vmatpush1.bf16.msra.mxu1 %v1640_v30 }
 0x5a8   :  { %v1007_v17 = vpop.permute.xlu0 %1006  ;;  %1123 = vmatmul.mubr.f32.gmra.mrb[16].mxu0 %v1032_v16  ;;  %1642 = vmatprep.subr.bf16.mxu1 %v1819_v63 }
 0x5a9   :  { %1434 = vmatprep.mubr.msk.f32.mxu0 %vm63_vm0, %v1021_v18  ;;  %v1033_v19 = vsel %vm557_vm12, %v1029_v15, %v1007_v17 }
 0x5ab   :  { %1644 = vmatpush1.bf16.msra.mxu1 %v1643_v34 }
 0x5ac   :  { %1128 = vmatmul.mubr.f32.gmra.mrb[18].mxu0 %v1033_v19  ;;  %1645 = vmatprep.subr.bf16.mxu1 %v1819_v63 }
 0x5af   :  { %1647 = vmatpush1.bf16.msra.mxu1 %v1646_v39 }
 0x5b0   :  { %1648 = vmatprep.subr.bf16.mxu1 %v1819_v63 }
 0x5b3   :  { %1650 = vmatpush1.bf16.msra.mxu1 %v1649_v36 }
 0x5b4   :  { %1651 = vmatprep.subr.bf16.mxu1 %v1819_v63 }
 0x5b7   :  { %1653 = vmatpush1.bf16.msra.mxu1 %v1652_v46 }
 0x5b8   :  { %1654 = vmatprep.subr.bf16.mxu1 %v1819_v63 }
 0x5bb   :  { %1656 = vmatpush1.bf16.msra.mxu1 %v1655_v41 }
 0x5bc   :  { %1657 = vmatprep.subr.bf16.mxu1 %v1819_v63 }
 0x5bf   :  { %1659 = vmatpush1.bf16.msra.mxu1 %v1658_v4 }
 0x5c0   :  { %1660 = vmatprep.subr.bf16.mxu1 %v1819_v63 }
 0x5c3   :  { %1662 = vmatpush1.bf16.msra.mxu1 %v1661_v10 }
 0x673   :  { %v1114_v51 = vpop.f32.mrb[12].mxu0 }
 0x674   :  { %v1115_v52 = vadd.f32 %v1430_v50, %v1114_v51  ;;  %v1116_v53 = vpop.f32.mrb[13].mxu0 }
 0x676   :  { %1759 = vtanh.f32 %v1115_v52 }
 0x677   :  { %v1119_v54 = vpop.f32.mrb[14].mxu0 }
 0x678   :  { %v1120_v55 = vadd.f32 %v1430_v50, %v1119_v54  ;;  %v1121_v56 = vpop.f32.mrb[15].mxu0 }
 0x67a   :  { %1761 = vtanh.f32 %v1120_v55 }
 0x67b   :  { %v1124_v59 = vpop.f32.mrb[16].mxu0 }
 0x67c   :  { %v1125_v60 = vadd.f32 %v1430_v50, %v1124_v59  ;;  %v1126_v57 = vpop.f32.mrb[17].mxu0 }
 0x67e   :  { %1763 = vtanh.f32 %v1125_v60 }
 0x67f   :  { %v1129_v48 = vpop.f32.mrb[18].mxu0 }
 0x680   :  { %v1760_v58 = vpop.eup %1759  ;;  %v1130_v62 = vadd.f32 %v1430_v50, %v1129_v48  ;;  %v1131_v0 = vpop.f32.mrb[19].mxu0 }
 0x681   :  { %v1162_v1 = vrot.slane %v1760_v58, 6 }
 0x682   :  { %1765 = vtanh.f32 %v1130_v62 }
 0x683   :  { %v2552_v5 = vsel %vm184_vm2, 0.0, %v1162_v1 }
 0x684   :  { %v1762_v6 = vpop.eup %1761  ;;  %v1248_v9 = vrot.slane %v2552_v5, 4  ;;  %v1204_v2 = vrot.slane %v2552_v5, 2  ;;  %v1182_v63 = vrot.slane %v2552_v5, 1  ;;  %v1226_v30 = vrot.slane %v2552_v5, 3 }
 0x685   :  { %v1163_v61 = vrot.slane %v1762_v6, 6 }
 0x687   :  { %v2563_v11 = vsel %vm184_vm2, %v1162_v1, %v1163_v61  ;;  %v1176_v12 = vsel %vm184_vm2, %v1163_v61, 0.0 }
 0x688   :  { %v1764_v13 = vpop.eup %1763  ;;  %v1249_v14 = vrot.slane %v2563_v11, 4  ;;  %v1205_v15 = vrot.slane %v2563_v11, 2  ;;  %v1207_v16 = vrot.slane %v1176_v12, 2  ;;  %v1183_v17 = vrot.slane %v2563_v11, 1 }
 0x689   :  { %v1165_v18 = vrot.slane %v1764_v13, 6  ;;  %v1185_v19 = vrot.slane %v1176_v12, 1  ;;  %v1227_v20 = vrot.slane %v2563_v11, 3  ;;  %v1229_v21 = vrot.slane %v1176_v12, 3 }
 0x68a   :  { %v1250_v22 = vsel %vm274_vm6, %v1248_v9, %v1249_v14  ;;  %v1206_v23 = vsel %vm228_vm3, %v1204_v2, %v1205_v15  ;;  %v1208_v25 = vsel %vm228_vm3, %v1205_v15, %v1207_v16  ;;  %v1184_v26 = vsel %vm205_vm4, %v1182_v63, %v1183_v17 }
 0x68b   :  { %1436 = vmatprep.mubr.msk.f32.mxu1 %vm63_vm0, %v1250_v22  ;;  %v1725_v27 = vpack.i.bf16 %v1208_v25, %v1206_v23  ;;  %v1186_v29 = vsel %vm205_vm4, %v1183_v17, %v1185_v19  ;;  %v1175_v32 = vsel %vm184_vm2, 0.0, %v1165_v18  ;;  %v1228_v38 = vsel %vm251_vm5, %v1226_v30, %v1227_v20 }
 0x68c   :  { %v1766_v31 = vpop.eup %1765  ;;  %v1720_v34 = vpack.i.bf16 %v1186_v29, %v1184_v26  ;;  %v1230_v39 = vsel %vm251_vm5, %v1227_v20, %v1229_v21  ;;  %v1251_v43 = vrot.slane %v1176_v12, 4  ;;  %v1187_v45 = vrot.slane %v1175_v32, 1 }
 0x68d   :  { %v1166_v35 = vrot.slane %v1766_v31, 6  ;;  %1726 = vrot.lane.b32.xlu0 %v1725_v27, %s1820_s5  ;;  %v1730_v44 = vpack.i.bf16 %v1230_v39, %v1228_v38  ;;  %v1209_v51 = vrot.slane %v1175_v32, 2  ;;  %v1231_v52 = vrot.slane %v1175_v32, 3 }
 0x68e   :  { %1721 = vrot.lane.b32.xlu1 %v1720_v34, %s1821_s24  ;;  %v1252_v36 = vsel %vm274_vm6, %v1249_v14, %v1251_v43  ;;  %v1253_v15 = vrot.slane %v1175_v32, 4 }
 0x68f   :  { %v2585_v37 = vsel %vm184_vm2, %v1165_v18, %v1166_v35  ;;  %v1177_v49 = vsel %vm184_vm2, %v1166_v35, 0.0 }
 0x690   :  { %v1188_v46 = vrot.slane %v2585_v37, 1  ;;  %v1210_v47 = vrot.slane %v2585_v37, 2  ;;  %v1232_v50 = vrot.slane %v2585_v37, 3  ;;  %v1190_v54 = vrot.slane %v1177_v49, 1 }
 0x691   :  { %v1212_v56 = vrot.slane %v1177_v49, 2  ;;  %v1234_v60 = vrot.slane %v1177_v49, 3  ;;  %v1254_v63 = vrot.slane %v2585_v37, 4  ;;  %v1256_v19 = vrot.slane %v1177_v49, 4 }
 0x692   :  { %1731 = vrot.lane.b32.xlu1 %v1730_v44, %s1822_s25  ;;  %v1189_v41 = vsel %vm205_vm4, %v1187_v45, %v1188_v46  ;;  %v1211_v53 = vsel %vm228_vm3, %v1209_v51, %v1210_v47  ;;  %v1233_v55 = vsel %vm251_vm5, %v1231_v52, %v1232_v50  ;;  %v1191_v59 = vsel %vm205_vm4, %v1188_v46, %v1190_v54 }
 0x693   :  { %1196 = vrot.lane.b32.xlu0 %v1189_v41, %s1821_s24  ;;  %v1213_v57 = vsel %vm228_vm3, %v1210_v47, %v1212_v56  ;;  %v1235_v48 = vsel %vm251_vm5, %v1232_v50, %v1234_v60  ;;  %v1257_v26 = vsel %vm274_vm6, %v1254_v63, %v1256_v19 }
 0x696   :  { %1218 = vrot.lane.b32.xlu1 %v1211_v53, %s1820_s5 }
 0x697   :  { %1240 = vrot.lane.b32.xlu0 %v1233_v55, %s1822_s25 }
 0x69a   :  { %1198 = vrot.lane.b32.xlu1 %v1191_v59, %s1821_s24 }
 0x69b   :  { %1220 = vrot.lane.b32.xlu0 %v1213_v57, %s1820_s5  ;;  %s1382_s5 = sshll.u32 %s1823_s11, 4  ;;  %s1383_s5 = int_to_ptr.vmem [resolvable:$true] %s1382_s5 }
 0x69c   :  { %s1767_s24 = scalar_lea.vmem %s1383_s5, 512  ;;  %p1772_p1 = scmp.lt.s32.totalorder %s1383_s5, %s1383_s5 }
 0x69d   :  { %p1768_p0 = scmp.ne.s32.totalorder %s1383_s5, %s1767_s24  ;;  %p1773_p2 = scmp.lt.s32.totalorder %s1767_s24, %s1767_s24 }
 0x69e   :  { %1242 = vrot.lane.b32.xlu1 %v1235_v48, %s1822_s25 }
 0x69f   :  { %p1774_p3 = por %p1773_p2, %p1772_p1 }
 0x6a1   :  { %p1775_p4 = pnand %p1774_p3, %p1768_p0 }
 0x6ff   :  { %v1727_v58 = vpop.permute.xlu0 %1726 }
 0x700   :  { %v1722_v62 = vpop.permute.xlu1 %1721  ;;  %v1728_v1 = vunpack.i.l.bf16 %v1727_v58  ;;  %v1729_v7 = vunpack.i.h.bf16 %v1727_v58 }
 0x701   :  { %v1723_v0 = vunpack.i.l.bf16 %v1722_v62  ;;  %v1724_v40 = vunpack.i.h.bf16 %v1722_v62 }
 0x703   :  { %v1258_v3 = vsel %vm63_vm0, %v2552_v5, %v1723_v0  ;;  %v1259_v12 = vsel %vm63_vm0, %v2563_v11, %v1724_v40  ;;  %v1255_v11 = vsel %vm274_vm6, %v1253_v15, %v1254_v63 }
 0x704   :  { %v1732_v4 = vpop.permute.xlu1 %1731  ;;  %v1262_v8 = vsel %vm552_vm11, %v1258_v3, %v1728_v1  ;;  %v1263_v14 = vsel %vm552_vm11, %v1259_v12, %v1729_v7 }
 0x705   :  { %v1733_v6 = vunpack.i.l.bf16 %v1732_v4  ;;  %v1197_v61 = vpop.permute.xlu0 %1196  ;;  %v1734_v9 = vunpack.i.h.bf16 %v1732_v4 }
 0x706   :  { %v1260_v13 = vsel %vm63_vm0, %v1175_v32, %v1197_v61 }
 0x707   :  { %v1266_v10 = vsel %vm557_vm12, %v1262_v8, %v1733_v6  ;;  %v1267_v16 = vsel %vm557_vm12, %v1263_v14, %v1734_v9 }
 0x708   :  { %v1219_v2 = vpop.permute.xlu1 %1218  ;;  %1349 = vmatmul.mubr.f32.vlgmr.msra.gmra.mrb[12].mxu1 %v1266_v10 }
 0x709   :  { %1437 = vmatprep.mubr.msk.f32.mxu1 %vm63_vm0, %v1252_v36  ;;  %v1241_v5 = vpop.permute.xlu0 %1240  ;;  %v1264_v17 = vsel %vm552_vm11, %v1260_v13, %v1219_v2 }
 0x70a   :  { %v1268_v22 = vsel %vm557_vm12, %v1264_v17, %v1241_v5 }
 0x70c   :  { %v1199_v18 = vpop.permute.xlu1 %1198  ;;  %1354 = vmatmul.mubr.f32.gmra.mrb[14].mxu1 %v1267_v16 }
 0x70d   :  { %v1261_v20 = vsel %vm63_vm0, %v2585_v37, %v1199_v18  ;;  %1438 = vmatprep.mubr.msk.f32.mxu1 %vm63_vm0, %v1255_v11  ;;  %v1221_v21 = vpop.permute.xlu0 %1220 }
 0x70e   :  { %v1265_v23 = vsel %vm552_vm11, %v1261_v20, %v1221_v21 }
 0x710   :  { %v1243_v25 = vpop.permute.xlu1 %1242  ;;  %1359 = vmatmul.mubr.f32.gmra.mrb[16].mxu1 %v1268_v22 }
 0x711   :  { %1439 = vmatprep.mubr.msk.f32.mxu1 %vm63_vm0, %v1257_v26  ;;  %v1269_v27 = vsel %vm557_vm12, %v1265_v23, %v1243_v25 }
 0x714   :  { %1364 = vmatmul.mubr.f32.gmra.mrb[18].mxu1 %v1269_v27 }
 0x715   :  { %1778 = shalt.err (!%p1775_p4)
}
 0x716   :  { %s1779_s6 = scalar_lea.hbm %s2680_s13, 512 }
 0x717   :  { %p1780_p5 = scmp.ne.s32.totalorder %s2680_s13, %s1779_s6  ;;  %p1783_p6 = scmp.lt.u32.totalorder %s1779_s6, %s2680_s13 }
 0x719   :  { %p1785_p7 = pnand %p1783_p6, %p1780_p5 }
 0x71b   :  { %1788 = shalt.err (!%p1785_p7)
}
 0x71c   :  { %s1824_s27 = smov 128   ;;  %s1825_s7 = smov 8   ;;  %v1435_v29 = vld [vmem:[%s2679_s12] ss:$0 sm:$0xff] }
 0x71d   :  { %1388 = dma.vmem_to_hbm [thread:$0]  %s1383_s5, 512, %s2680_s13, [#allocation3], %s1824_s27, %s1824_s27, %s1825_s7  }
 0x71e   :  { %s1826_s12 = smov [#allocation4]  }
 0x71f   :  { %s1394_s13 = sshll.u32 %s1826_s12, 4  ;;  %s1395_s13 = int_to_ptr.vmem [resolvable:$true] %s1394_s13 }
 0x720   :  { %s1789_s2 = scalar_lea.vmem %s1395_s13, 512  ;;  %p1794_p9 = scmp.lt.s32.totalorder %s1395_s13, %s1395_s13 }
 0x721   :  { %p1790_p8 = scmp.ne.s32.totalorder %s1395_s13, %s1789_s2  ;;  %p1795_p10 = scmp.lt.s32.totalorder %s1789_s2, %s1789_s2 }
 0x723   :  { %p1796_p11 = por %p1795_p10, %p1794_p9 }
 0x725   :  { %p1797_p12 = pnand %p1796_p11, %p1790_p8 }
 0x7db   :  { %v1350_v30 = vpop.f32.mrb[12].mxu1 }
 0x7dc   :  { %v1351_v31 = vadd.f32 %v1435_v29, %v1350_v30  ;;  %v1352_v32 = vpop.f32.mrb[13].mxu1 }
 0x7de   :  { %v1369_v34 = vadd.f32 %v1351_v31, %v1965_v28 }
 0x7df   :  { %v1355_v35 = vpop.f32.mrb[14].mxu1 }
 0x7e0   :  { %1373 = vst.msk [vmem:[#allocation4] sm:$0xff] %vm161_vm1, %v1369_v34  ;;  %v1356_v38 = vadd.f32 %v1435_v29, %v1355_v35  ;;  %v1357_v39 = vpop.f32.mrb[15].mxu1 }
 0x7e2   :  { %v1370_v43 = vadd.f32 %v1356_v38, %v1957_v24 }
 0x7e3   :  { %v1360_v37 = vpop.f32.mrb[16].mxu1 }
 0x7e4   :  { %1374 = vst.msk [vmem:[#allocation4 + $0x8] sm:$0xff] %vm161_vm1, %v1370_v43  ;;  %v1361_v36 = vadd.f32 %v1435_v29, %v1360_v37  ;;  %v1362_v44 = vpop.f32.mrb[17].mxu1 }
 0x7e6   :  { %v1371_v45 = vadd.f32 %v1361_v36, %v1988_v42 }
 0x7e7   :  { %v1365_v46 = vpop.f32.mrb[18].mxu1 }
 0x7e8   :  { %1375 = vst.msk [vmem:[#allocation4 + $0x10] sm:$0xff] %vm161_vm1, %v1371_v45  ;;  %v1366_v28 = vadd.f32 %v1435_v29, %v1365_v46  ;;  %v1367_v47 = vpop.f32.mrb[19].mxu1 }
 0x7ea   :  { %v1372_v49 = vadd.f32 %v1366_v28, %v1973_v33 }
 0x7ec   :  { %1376 = vst.msk [vmem:[#allocation4 + $0x18] sm:$0xff] %vm161_vm1, %v1372_v49 }
 0x7ed   :  { %1800 = shalt.err (!%p1797_p12)
}
 0x7ee   :  { %s1801_s18 = scalar_lea.hbm %s2681_s14, 512 }
 0x7ef   :  { %p1802_p13 = scmp.ne.s32.totalorder %s2681_s14, %s1801_s18  ;;  %p1805_p0 = scmp.lt.u32.totalorder %s1801_s18, %s2681_s14 }
 0x7f1   :  { %p1807_p1 = pnand %p1805_p0, %p1802_p13 }
 0x7f3   :  { %1810 = shalt.err (!%p1807_p1)
}
 0x7f4   :  { %1400 = dma.vmem_to_hbm [thread:$0]  %s1395_s13, 512, %s2681_s14, [#allocation5], %s1824_s27, %s1824_s27, %s1825_s7  }
 0x7f5   :  { %1811 = dma.done.wait [#allocation3], 512  }
 0x7f6   :  { %1812 = vsyncadd [#allocation3], 4294966784 }
 0x7f7   :  { %1813 = dma.done.wait [#allocation5], 512  }
 0x7f8   :  { %1814 = vsyncadd [#allocation5], 4294966784 }
 0x7f9   :  { %1407 = vsyncpa [#allocation3], 1 }
 0x7fa   :  { %1408 = vsyncpa [#allocation5], 1 }

// kernel: fastspeech2_forward.4
= control target key start
LH: loop header
LB: loop body
LE: loop exit
PB: predicated region body
PF: predicated region fallthrough
CT: control target
= control target key end

     0   :  { %s3774_s0 = inlined_call_operand.vmem [shape: f32[2,8,32], index: 0, kind: input, shape index: {}]   ;;  %s3775_s1 = inlined_call_operand.vmem [shape: f32[2,1,8], index: 1, kind: input, shape index: {}]   ;;  %s3776_s2 = inlined_call_operand.vmem [shape: f32[16,1], index: 2, kind: input, shape index: {}]   ;;  %s3777_s3 = inlined_call_operand.hbm [shape: f32[2,32,96], index: 3, kind: input, shape index: {}]   ;;  %s3778_s4 = inlined_call_operand.vmem [shape: f32[2,1,96], index: 4, kind: input, shape index: {}]   ;;  %s3779_s5 = inlined_call_operand.vmem [shape: f32[2,32,32], index: 5, kind: input, shape index: {}]   ;;  %s3780_s6 = inlined_call_operand.vmem [shape: f32[2,1,32], index: 6, kind: input, shape index: {}, may-alias: {6,8,12,14}]   ;;  %s3781_s7 = inlined_call_operand.vmem [shape: f32[2,1,32], index: 7, kind: input, shape index: {}, may-alias: {7,13}]   ;;  %s3782_s8 = inlined_call_operand.vmem [shape: f32[2,1,32], index: 8, kind: input, shape index: {}, may-alias: {6,8,12,14}]   ;;  %s3783_s9 = inlined_call_operand.vmem [shape: f32[2,96,64], index: 9, kind: input, shape index: {}]   ;;  %s3784_s10 = inlined_call_operand.vmem [shape: f32[2,1,64], index: 10, kind: input, shape index: {}]   ;;  %s3785_s11 = inlined_call_operand.hbm [shape: f32[2,64,32], index: 11, kind: input, shape index: {}]   ;;  %s3786_s12 = inlined_call_operand.vmem [shape: f32[2,1,32], index: 12, kind: input, shape index: {}, may-alias: {6,8,12,14}]   ;;  %s3787_s13 = inlined_call_operand.vmem [shape: f32[2,1,32], index: 13, kind: input, shape index: {}, may-alias: {7,13}]   ;;  %s3788_s14 = inlined_call_operand.vmem [shape: f32[2,1,32], index: 14, kind: input, shape index: {}, may-alias: {6,8,12,14}]   ;;  %s3789_s15 = inlined_call_operand.vmem [shape: f32[2,8,32], index: 15, kind: output, shape index: {0}]   ;;  %s3790_s16 = inlined_call_operand.vmem [shape: f32[2,4,8,8], index: 16, kind: output, shape index: {1}]  }
   0x1   :  { %3792 = sst [smem:[#allocation8_spill]] %s3774_s0 }
   0x2   :  { %22 = vsyncpa [#allocation3], 0 }
   0x3   :  { %23 = vsyncpa [#allocation5], 0  ;;  %s3181_s21 = smov [#allocation2]   ;;  %s3133_s25 = scalar_lea.hbm %s3777_s3, 1024 }
   0x4   :  { %s35_s22 = sshll.u32 %s3181_s21, 4  ;;  %p3134_p0 = scmp.ne.s32.totalorder %s3777_s3, %s3133_s25  ;;  %s36_s22 = int_to_ptr.vmem [resolvable:$true] %s35_s22 }
   0x5   :  { %p3137_p1 = scmp.lt.u32.totalorder %s3133_s25, %s3777_s3 }
   0x7   :  { %p3139_p2 = pnand %p3137_p1, %p3134_p0 }
   0x9   :  { %3142 = shalt.err (!%p3139_p2)
}
   0xa   :  { %s3143_s30 = scalar_lea.vmem %s36_s22, 1024  ;;  %p3148_p4 = scmp.lt.s32.totalorder %s36_s22, %s36_s22 }
   0xb   :  { %p3144_p3 = scmp.ne.s32.totalorder %s36_s22, %s3143_s30  ;;  %p3149_p5 = scmp.lt.s32.totalorder %s3143_s30, %s3143_s30 }
   0xd   :  { %p3150_p6 = por %p3149_p5, %p3148_p4 }
   0xf   :  { %p3151_p7 = pnand %p3150_p6, %p3144_p3 }
  0x11   :  { %3154 = shalt.err (!%p3151_p7)
}
  0x12   :  { %s3182_s0 = smov 128   ;;  %s3183_s17 = smov 8  }
  0x13   :  { %41 = dma.hbm_to_vmem [thread:$0]  %s3777_s3, 1024, %s36_s22, [#allocation3], %s3182_s0, %s3182_s0, %s3183_s17  }
  0x14   :  { %s3184_s20 = smov [#allocation4]   ;;  %s3155_s25 = scalar_lea.hbm %s3785_s11, 2048 }
  0x15   :  { %s61_s21 = sshll.u32 %s3184_s20, 4  ;;  %p3156_p8 = scmp.ne.s32.totalorder %s3785_s11, %s3155_s25  ;;  %s62_s21 = int_to_ptr.vmem [resolvable:$true] %s61_s21 }
  0x16   :  { %p3159_p9 = scmp.lt.u32.totalorder %s3155_s25, %s3785_s11 }
  0x18   :  { %p3161_p10 = pnand %p3159_p9, %p3156_p8 }
  0x1a   :  { %3164 = shalt.err (!%p3161_p10)
}
  0x1b   :  { %s3165_s30 = scalar_lea.vmem %s62_s21, 2048  ;;  %p3170_p12 = scmp.lt.s32.totalorder %s62_s21, %s62_s21 }
  0x1c   :  { %p3166_p11 = scmp.ne.s32.totalorder %s62_s21, %s3165_s30  ;;  %p3171_p13 = scmp.lt.s32.totalorder %s3165_s30, %s3165_s30 }
  0x1e   :  { %p3172_p0 = por %p3171_p13, %p3170_p12 }
  0x20   :  { %p3173_p1 = pnand %p3172_p0, %p3166_p11 }
  0x22   :  { %3176 = shalt.err (!%p3173_p1)
}
  0x23   :  { %67 = dma.hbm_to_vmem [thread:$0]  %s3785_s11, 2048, %s62_s21, [#allocation5], %s3182_s0, %s3182_s0, %s3183_s17  }
  0x24   :  { %3177 = dma.done.wait [#allocation3], 1024  }
  0x25   :  { %3178 = vsyncadd [#allocation3], 4294966272 }
  0x26   :  { %3179 = dma.done.wait [#allocation5], 2048  }
  0x27   :  { %3180 = vsyncadd [#allocation5], 4294965248  ;;  %vm97_vm0 = vcmask 261120   ;;  %v86_v0 = vld [vmem:[#allocation2] sm:$0xff]  ;;  %v87_v1 = vld [vmem:[#allocation2 + $0x8] sm:$0xff]  ;;  %s3793_s20 = sld [smem:[#allocation8_spill]] }
  0x28   :  { %v88_v2 = vld [vmem:[#allocation2 + $0x10] sm:$0xff]  ;;  %v2957_v3 = vpack.c.bf16 %v87_v1, %v86_v0  ;;  %v89_v4 = vld [vmem:[#allocation2 + $0x18] sm:$0xff]  ;;  %v3185_v8 = vmov 0.0   ;;  %vm3186_vm1 = vmmov 0   ;;  %v2548_v9 = vld [vmem:[%s3778_s4] ss:$0 sm:$0xff] }
  0x29   :  { %v2961_v6 = vpack.c.bf16 %v89_v4, %v88_v2  ;;  %2752 = vmatprep.subr.mxu1 %v3185_v8  ;;  %2754 = vmatprep.mubr.msk.f32.mxu1 %vm3186_vm1, %v3185_v8  ;;  %s3187_s23 = smov 112   ;;  %s3188_s24 = smov 96   ;;  %vm182_vm2 = vcmask 130048   ;;  %v3365_v21 = vld [vmem:[%s3775_s1] ss:$0 sm:$0xff]  ;;  %vm265_vm3 = vcmask 64512  }
  0x2a   :  { %2958 = vmatprep.subr.bf16.mxu0 %v2957_v3  ;;  %s3189_s25 = smov 80   ;;  %v3373_v31 = vld [vmem:[%s3775_s1 + $0x1] ss:$0 sm:$0xff]  ;;  %s3190_s1 = smov 64   ;;  %vm1046_vm4 = vcmask 1040384   ;;  %vm1055_vm5 = vcmask 1046528  }
  0x2b   :  { %2960 = vmatpush3.bf16.msra.mxu0 %v2957_v3  ;;  %s3191_s30 = smov 48   ;;  %s3192_s19 = smov 16   ;;  %vm1068_vm6 = vcmask 1045504   ;;  %vm1083_vm7 = vcmask 523264   ;;  %vm1092_vm8 = vcmask 785408  }
  0x2c   :  { %2962 = vmatprep.subr.bf16.mxu0 %v2961_v6  ;;  %s3194_s29 = smov 32  }
  0x2d   :  { %v3307_v5 = vld [vmem:[%s3793_s20] sm:$0xff]  ;;  %v3314_v7 = vld [vmem:[%s3793_s20 + $0x8] sm:$0xff] }
  0x2e   :  { %2749 = vmatprep.mubr.msk.f32.mxu0 %vm97_vm0, %v3307_v5 }
  0x2f   :  { %2964 = vmatpush3.bf16.msra.mxu0 %v2961_v6 }
  0x30   :  { %2762 = vmatprep.subr.mxu0 %v3185_v8 }
  0x32   :  { %2750 = vmatmul.mubr.msk.f32.vlgmr.msra.gmra.mrb[0].mxu0 %vm97_vm0, %v3314_v7 }
  0x33   :  { %2764 = vmatprep.mubr.msk.f32.mxu0 %vm3186_vm1, %v3185_v8 }
 0x105   :  { %v2751_v10 = vpop.f32.mrb[0].mxu0 }
 0x106   :  { %v170_v11 = vpop.f32.mrb[1].mxu0  ;;  %v3333_v13 = vadd.f32 %v2751_v10, %v2548_v9 }
 0x107   :  { %v3327_v12 = vadd.f32 %v2548_v9, %v170_v11 }
 0x109   :  { %354 = vrot.lane.b32.xlu1 %v3327_v12, %s3187_s23  ;;  %180 = vrot.lane.b32.xlu0 %v3327_v12, %s3188_s24 }
 0x10d   :  { %529 = vrot.lane.b32.xlu1 %v3333_v13, %s3188_s24  ;;  %356 = vrot.lane.b32.xlu0 %v3327_v12, %s3189_s25 }
 0x111   :  { %702 = vrot.lane.b32.xlu1 %v3333_v13, %s3187_s23  ;;  %704 = vrot.lane.b32.xlu0 %v3333_v13, %s3189_s25 }
 0x17b   :  { %v181_v14 = vpop.permute.xlu0 %180  ;;  %v355_v15 = vpop.permute.xlu1 %354 }
 0x17c   :  { %2753 = vmatpush3.xpose.msk.msra.mxu1 %vm182_vm2, %v181_v14 }
 0x17d   :  { %2757 = vmatprep.subr.mxu1 %v3185_v8 }
 0x17f   :  { %2755 = vmatmul.mubr.msk.f32.vlgmr.msra.gmra.mrb[0].mxu1 %vm182_vm2, %v3327_v12  ;;  %v357_v16 = vpop.permute.xlu0 %356  ;;  %v530_v17 = vpop.permute.xlu1 %529 }
 0x180   :  { %2763 = vmatpush3.xpose.msk.msra.mxu0 %vm182_vm2, %v357_v16  ;;  %2759 = vmatprep.mubr.msk.f32.mxu1 %vm3186_vm1, %v3185_v8 }
 0x181   :  { %2772 = vmatprep.subr.mxu0 %v3185_v8 }
 0x183   :  { %2765 = vmatmul.mubr.msk.f32.vlgmr.msra.gmra.mrb[2].mxu0 %vm182_vm2, %v355_v15  ;;  %v705_v18 = vpop.permute.xlu0 %704  ;;  %v703_v19 = vpop.permute.xlu1 %702 }
 0x184   :  { %2773 = vmatpush3.xpose.msk.msra.mxu0 %vm182_vm2, %v530_v17  ;;  %2774 = vmatprep.mubr.msk.f32.mxu0 %vm3186_vm1, %v3185_v8  ;;  %v876_v17 = vld [vmem:[%s3779_s5] sm:$0xff] }
 0x185   :  { %2782 = vmatprep.subr.mxu0 %v3185_v8 }
 0x187   :  { %2775 = vmatmul.mubr.msk.f32.vlgmr.msra.gmra.mrb[4].mxu0 %vm182_vm2, %v3333_v13 }
 0x188   :  { %2783 = vmatpush3.xpose.msk.msra.mxu0 %vm182_vm2, %v705_v18  ;;  %2784 = vmatprep.mubr.msk.f32.mxu0 %vm3186_vm1, %v3185_v8  ;;  %v877_v18 = vld [vmem:[%s3779_s5 + $0x8] sm:$0xff] }
 0x18b   :  { %2785 = vmatmul.mubr.msk.f32.vlgmr.msra.gmra.mrb[6].mxu0 %vm182_vm2, %v703_v19  ;;  %v2965_v19 = vpack.c.bf16 %v877_v18, %v876_v17 }
 0x18d   :  { %2966 = vmatprep.subr.bf16.mxu0 %v2965_v19 }
 0x18e   :  { %2968 = vmatpush3.bf16.msra.mxu0 %v2965_v19 }
 0x252   :  { %v253_v20 = vpop.f32.mrb[0].mxu1 }
 0x253   :  { %v257_v22 = vmul.f32 0.25, %v253_v20  ;;  %v2756_v23 = vpop.f32.mrb[1].mxu1  ;;  %v878_v20 = vld [vmem:[%s3779_s5 + $0x10] sm:$0xff] }
 0x255   :  { %v264_v24 = vadd.f32 %v3365_v21, %v257_v22  ;;  %v879_v22 = vld [vmem:[%s3779_s5 + $0x18] sm:$0xff] }
 0x256   :  { %v428_v25 = vpop.f32.mrb[2].mxu0  ;;  %v2969_v23 = vpack.c.bf16 %v879_v22, %v878_v20 }
 0x257   :  { %v432_v26 = vmul.f32 0.25, %v428_v25  ;;  %v2766_v27 = vpop.f32.mrb[3].mxu0  ;;  %v266_v28 = vsel %vm265_vm3, %v264_v24, -inf }
 0x258   :  { %267 = vmax.xlane.f32.xlu0 %v266_v28  ;;  %2970 = vmatprep.subr.bf16.mxu0 %v2969_v23 }
 0x259   :  { %v433_v29 = vadd.f32 %v3365_v21, %v432_v26  ;;  %2972 = vmatpush3.bf16.msra.mxu0 %v2969_v23 }
 0x25a   :  { %v601_v30 = vpop.f32.mrb[4].mxu0 }
 0x25b   :  { %v605_v32 = vmul.f32 0.25, %v601_v30  ;;  %v2776_v33 = vpop.f32.mrb[5].mxu0  ;;  %v434_v34 = vsel %vm265_vm3, %v433_v29, -inf }
 0x25c   :  { %435 = vmax.xlane.f32.xlu1 %v434_v34 }
 0x25d   :  { %v612_v35 = vadd.f32 %v3373_v31, %v605_v32 }
 0x25e   :  { %v776_v36 = vpop.f32.mrb[6].mxu0 }
 0x25f   :  { %v780_v37 = vmul.f32 0.25, %v776_v36  ;;  %v2786_v38 = vpop.f32.mrb[7].mxu0  ;;  %v613_v39 = vsel %vm265_vm3, %v612_v35, -inf }
 0x260   :  { %614 = vmax.xlane.f32.xlu0 %v613_v39 }
 0x261   :  { %v781_v40 = vadd.f32 %v3373_v31, %v780_v37  ;;  %v2568_v37 = vld [vmem:[%s3780_s6] ss:$0 sm:$0xff] }
 0x263   :  { %v782_v41 = vsel %vm265_vm3, %v781_v40, -inf }
 0x264   :  { %783 = vmax.xlane.f32.xlu0 %v782_v41 }
 0x26d   :  { %278 = vrot.lane.b32.xlu1 %v3327_v12, %s3190_s1 }
 0x2e5   :  { %v268_v42 = vpop.xlane.xlu0 %267 }
 0x2e6   :  { %v269_v43 = vsub.f32 %v264_v24, %v268_v42 }
 0x2e8   :  { %v270_v44 = vmul.f32 1.442695, %v269_v43 }
 0x2e9   :  { %v436_v45 = vpop.xlane.xlu1 %435 }
 0x2ea   :  { %3085 = vpow2.f32 %v270_v44  ;;  %v437_v46 = vsub.f32 %v433_v29, %v436_v45 }
 0x2ec   :  { %v438_v47 = vmul.f32 1.442695, %v437_v46  ;;  %v3193_v46 = vmov 0  }
 0x2ed   :  { %v279_v48 = vpop.permute.xlu1 %278  ;;  %v615_v49 = vpop.xlane.xlu0 %614  ;;  %3084 = vset.pattern.permute.xlu0 %v3193_v46  ;;  %3083 = vset.pattern.permute.xlu1 %v3193_v46  ;;  %v1177_v46 = vld [vmem:[#allocation4 + $0x8] sm:$0xff] }
 0x2ee   :  { %3087 = vpow2.f32 %v438_v47  ;;  %v616_v50 = vsub.f32 %v612_v35, %v615_v49  ;;  %2758 = vmatpush3.msra.mxu1 %v279_v48  ;;  %v84_v47 = vld [vmem:[%s3776_s2] sm:$0xff] }
 0x2ef   :  { %2767 = vmatprep.subr.mxu1 %v3185_v8 }
 0x2f0   :  { %v617_v51 = vmul.f32 1.442695, %v616_v50 }
 0x2f1   :  { %v784_v52 = vpop.xlane.xlu0 %783 }
 0x2f2   :  { %3089 = vpow2.f32 %v617_v51  ;;  %v785_v53 = vsub.f32 %v781_v40, %v784_v52 }
 0x2f4   :  { %v3086_v54 = vpop.eup %3085  ;;  %v786_v55 = vmul.f32 1.442695, %v785_v53 }
 0x2f5   :  { %v272_v56 = vsel %vm265_vm3, %v3086_v54, 0.0 }
 0x2f6   :  { %3091 = vpow2.f32 %v786_v55  ;;  %273 = vadd.xlane.f32.xlu1 %v272_v56  ;;  %v85_v56 = vld [vmem:[%s3776_s2 + $0x8] sm:$0xff] }
 0x2f8   :  { %v3088_v57 = vpop.eup %3087 }
 0x2f9   :  { %v440_v58 = vsel %vm265_vm3, %v3088_v57, 0.0 }
 0x2fa   :  { %441 = vadd.xlane.f32.xlu0 %v440_v58  ;;  %v1028_v58 = vld [vmem:[%s3783_s9 + $0x8] sm:$0xff] }
 0x2fc   :  { %v3090_v59 = vpop.eup %3089 }
 0x2fd   :  { %v619_v60 = vsel %vm265_vm3, %v3090_v59, 0.0 }
 0x2fe   :  { %620 = vadd.xlane.f32.xlu1 %v619_v60 }
 0x300   :  { %v3092_v61 = vpop.eup %3091 }
 0x301   :  { %v788_v62 = vsel %vm265_vm3, %v3092_v61, 0.0 }
 0x302   :  { %789 = vadd.xlane.f32.xlu0 %v788_v62 }
 0x30f   :  { %626 = vrot.lane.b32.xlu1 %v3333_v13, %s3190_s1 }
 0x313   :  { %795 = vrot.lane.b32.xlu1 %v3333_v13, %s3191_s30 }
 0x318   :  { %447 = vrot.lane.b32.xlu0 %v3327_v12, %s3191_s30 }
 0x383   :  { %v274_v63 = vpop.xlane.xlu1 %273 }
 0x384   :  { %3093 = vrcp.f32 %v274_v63  ;;  %v1031_v63 = vld [vmem:[%s3783_s9 + $0x20] sm:$0xff] }
 0x387   :  { %v442_v0 = vpop.xlane.xlu0 %441 }
 0x388   :  { %3095 = vrcp.f32 %v442_v0  ;;  %v1032_v0 = vld [vmem:[%s3783_s9 + $0x28] sm:$0xff] }
 0x38b   :  { %v621_v1 = vpop.xlane.xlu1 %620 }
 0x38c   :  { %3097 = vrcp.f32 %v621_v1  ;;  %v2981_v1 = vpack.c.bf16 %v1032_v0, %v1031_v63 }
 0x38e   :  { %v3094_v2 = vpop.eup %3093 }
 0x38f   :  { %v276_v3 = vmul.f32 %v3094_v2, %v3086_v54  ;;  %v790_v4 = vpop.xlane.xlu0 %789  ;;  %v627_v10 = vpop.permute.xlu1 %626 }
 0x390   :  { %3099 = vrcp.f32 %v790_v4 }
 0x391   :  { %277 = vst.msk [vmem:[%s3790_s16] sm:$0xff] %vm265_vm3, %v276_v3  ;;  %2760 = vmatmul.mubr.msk.f32.vlgmr.msra.gmra.mrb[2].mxu1 %vm265_vm3, %v276_v3 }
 0x392   :  { %v3096_v6 = vpop.eup %3095  ;;  %2769 = vmatprep.mubr.msk.f32.mxu1 %vm3186_vm1, %v3185_v8 }
 0x393   :  { %v444_v9 = vmul.f32 %v3096_v6, %v3088_v57  ;;  %v448_v11 = vpop.permute.xlu0 %447  ;;  %v796_v14 = vpop.permute.xlu1 %795  ;;  %v1027_v57 = vld [vmem:[%s3783_s9] sm:$0xff] }
 0x394   :  { %2768 = vmatpush3.msra.mxu1 %v448_v11  ;;  %v2973_v60 = vpack.c.bf16 %v1028_v58, %v1027_v57 }
 0x395   :  { %2557 = vst.msk [vmem:[%s3790_s16 + $0x8] sm:$0xff] %vm265_vm3, %v444_v9  ;;  %2770 = vmatmul.mubr.msk.f32.vlgmr.msra.gmra.mrb[4].mxu1 %vm265_vm3, %v444_v9  ;;  %2777 = vmatprep.subr.mxu1 %v3185_v8 }
 0x396   :  { %v3098_v12 = vpop.eup %3097  ;;  %2778 = vmatpush3.msra.mxu1 %v627_v10  ;;  %2779 = vmatprep.mubr.msk.f32.mxu1 %vm3186_vm1, %v3185_v8 }
 0x397   :  { %v623_v13 = vmul.f32 %v3098_v12, %v3090_v59  ;;  %2787 = vmatprep.subr.mxu1 %v3185_v8  ;;  %v1029_v59 = vld [vmem:[%s3783_s9 + $0x10] sm:$0xff]  ;;  %v2571_v12 = vld [vmem:[%s3781_s7] ss:$0 sm:$0xff] }
 0x399   :  { %2562 = vst.msk [vmem:[%s3790_s16 + $0x10] sm:$0xff] %vm265_vm3, %v623_v13  ;;  %2780 = vmatmul.mubr.msk.f32.vlgmr.msra.gmra.mrb[6].mxu1 %vm265_vm3, %v623_v13 }
 0x39a   :  { %v3100_v15 = vpop.eup %3099  ;;  %2788 = vmatpush3.msra.mxu1 %v796_v14  ;;  %2789 = vmatprep.mubr.msk.f32.mxu1 %vm3186_vm1, %v3185_v8  ;;  %v1033_v14 = vld [vmem:[%s3783_s9 + $0x30] sm:$0xff] }
 0x39b   :  { %v792_v16 = vmul.f32 %v3100_v15, %v3092_v61  ;;  %v1030_v61 = vld [vmem:[%s3783_s9 + $0x18] sm:$0xff]  ;;  %2974 = vmatprep.subr.bf16.mxu1 %v2973_v60 }
 0x39c   :  { %v2977_v62 = vpack.c.bf16 %v1030_v61, %v1029_v59  ;;  %v1034_v15 = vld [vmem:[%s3783_s9 + $0x38] sm:$0xff] }
 0x39d   :  { %2566 = vst.msk [vmem:[%s3790_s16 + $0x18] sm:$0xff] %vm265_vm3, %v792_v16  ;;  %2790 = vmatmul.mubr.msk.f32.vlgmr.msra.gmra.mrb[8].mxu1 %vm265_vm3, %v792_v16  ;;  %v2572_v16 = vld [vmem:[%s3782_s8] ss:$0 sm:$0xff]  ;;  %v2985_v17 = vpack.c.bf16 %v1034_v15, %v1033_v14 }
 0x39e   :  { %2976 = vmatpush3.bf16.msra.mxu1 %v2973_v60 }
 0x39f   :  { %2978 = vmatprep.subr.bf16.mxu1 %v2977_v62 }
 0x3a2   :  { %2980 = vmatpush3.bf16.msra.mxu1 %v2977_v62 }
 0x3a3   :  { %2982 = vmatprep.subr.bf16.mxu1 %v2981_v1 }
 0x3a6   :  { %2984 = vmatpush3.bf16.msra.mxu1 %v2981_v1 }
 0x3a7   :  { %2986 = vmatprep.subr.bf16.mxu1 %v2985_v17 }
 0x3aa   :  { %2988 = vmatpush3.bf16.msra.mxu1 %v2985_v17 }
 0x464   :  { %v350_v24 = vpop.f32.mrb[2].mxu1 }
 0x465   :  { %v2761_v25 = vpop.f32.mrb[3].mxu1 }
 0x466   :  { %v1036_v25 = vld [vmem:[%s3783_s9 + $0x48] sm:$0xff] }
 0x468   :  { %v519_v26 = vpop.f32.mrb[4].mxu1 }
 0x469   :  { %524 = vrot.lane.b32.xlu0 %v519_v26, %s3192_s19  ;;  %v2771_v27 = vpop.f32.mrb[5].mxu1 }
 0x46c   :  { %v698_v28 = vpop.f32.mrb[6].mxu1 }
 0x46d   :  { %v2781_v29 = vpop.f32.mrb[7].mxu1 }
 0x470   :  { %v867_v30 = vpop.f32.mrb[8].mxu1 }
 0x471   :  { %872 = vrot.lane.b32.xlu1 %v867_v30, %s3192_s19  ;;  %v2791_v32 = vpop.f32.mrb[9].mxu1 }
 0x4db   :  { %v525_v33 = vpop.permute.xlu0 %524 }
 0x4dc   :  { %v527_v34 = vsel %vm182_vm2, %v350_v24, %v525_v33  ;;  %v1035_v24 = vld [vmem:[%s3783_s9 + $0x40] sm:$0xff]  ;;  %v1037_v33 = vld [vmem:[%s3783_s9 + $0x50] sm:$0xff] }
 0x4dd   :  { %2800 = vmatprep.mubr.msk.f32.mxu0 %vm97_vm0, %v527_v34  ;;  %v2989_v26 = vpack.c.bf16 %v1036_v25, %v1035_v24  ;;  %v1038_v34 = vld [vmem:[%s3783_s9 + $0x58] sm:$0xff] }
 0x4df   :  { %2990 = vmatprep.subr.bf16.mxu1 %v2989_v26 }
 0x4e0   :  { %2992 = vmatpush3.bf16.msra.mxu1 %v2989_v26 }
 0x4e3   :  { %v873_v35 = vpop.permute.xlu1 %872 }
 0x4e4   :  { %v875_v36 = vsel %vm182_vm2, %v698_v28, %v873_v35  ;;  %v2993_v35 = vpack.c.bf16 %v1038_v34, %v1037_v33 }
 0x4e5   :  { %2801 = vmatmul.mubr.msk.f32.vlgmr.msra.gmra.mrb[8].mxu0 %vm97_vm0, %v875_v36 }
 0x4e6   :  { %2994 = vmatprep.subr.bf16.mxu1 %v2993_v35 }
 0x4e7   :  { %2996 = vmatpush3.bf16.msra.mxu1 %v2993_v35 }
 0x4e8   :  { %2860 = vmatprep.subr.mxu1 %v3185_v8 }
 0x5b8   :  { %v2802_v38 = vpop.f32.mrb[8].mxu0 }
 0x5b9   :  { %v965_v39 = vadd.f32 %v2802_v38, %v2568_v37  ;;  %v959_v40 = vpop.f32.mrb[9].mxu0 }
 0x5ba   :  { %v960_v41 = vadd.f32 %v2568_v37, %v959_v40 }
 0x5bb   :  { %v969_v42 = vadd.f32 %v965_v39, %v3314_v7 }
 0x5bc   :  { %v968_v43 = vadd.f32 %v960_v41, %v3307_v5 }
 0x5bd   :  { %v975_v44 = vsel %vm97_vm0, %v969_v42, 0.0 }
 0x5be   :  { %976 = vadd.xlane.f32.xlu1 %v975_v44  ;;  %v972_v45 = vsel %vm97_vm0, %v968_v43, 0.0 }
 0x5bf   :  { %973 = vadd.xlane.f32.xlu0 %v972_v45  ;;  %v1176_v45 = vld [vmem:[#allocation4] sm:$0xff] }
 0x5cf   :  { %1017 = vperm.xlu1 %3083, %v84_v47   ;;  %v1178_v47 = vld [vmem:[#allocation4 + $0x10] sm:$0xff] }
 0x64b   :  { %v977_v48 = vpop.xlane.xlu1 %976 }
 0x64c   :  { %v980_v49 = vmul.f32 0.03125, %v977_v48  ;;  %v974_v50 = vpop.xlane.xlu0 %973 }
 0x64d   :  { %v979_v7 = vmul.f32 0.03125, %v974_v50  ;;  %v1179_v50 = vld [vmem:[#allocation4 + $0x18] sm:$0xff] }
 0x64e   :  { %v982_v51 = vsub.f32 %v969_v42, %v980_v49 }
 0x64f   :  { %v981_v5 = vsub.f32 %v968_v43, %v979_v7  ;;  %v3495_v29 = vpop.permute.xlu1 %1017  ;;  %v2997_v7 = vpack.c.bf16 %v1177_v46, %v1176_v45  ;;  %v1324_v45 = vld [vmem:[#allocation2 + $0x38] sm:$0xff] }
 0x650   :  { %v984_v52 = vmul.f32 %v982_v51, %v982_v51 }
 0x651   :  { %v983_v54 = vmul.f32 %v981_v5, %v981_v5  ;;  %2998 = vmatprep.subr.bf16.mxu0 %v2997_v7 }
 0x652   :  { %v988_v53 = vsel %vm97_vm0, %v984_v52, 0.0  ;;  %3000 = vmatpush3.bf16.msra.mxu0 %v2997_v7 }
 0x653   :  { %989 = vadd.xlane.f32.xlu0 %v988_v53  ;;  %v985_v55 = vsel %vm97_vm0, %v983_v54, 0.0  ;;  %v1180_v54 = vld [vmem:[#allocation4 + $0x20] sm:$0xff] }
 0x657   :  { %986 = vadd.xlane.f32.xlu0 %v985_v55  ;;  %v1181_v55 = vld [vmem:[#allocation4 + $0x28] sm:$0xff] }
 0x66d   :  { %1022 = vperm.xlu0 %3084, %v85_v56   ;;  %v3005_v56 = vpack.c.bf16 %v1181_v55, %v1180_v54  ;;  %v2580_v54 = vld [vmem:[%s3788_s14] ss:$0 sm:$0xff] }
 0x6e0   :  { %v990_v2 = vpop.xlane.xlu0 %989 }
 0x6e1   :  { %v992_v3 = vmul.f32 0.03125, %v990_v2 }
 0x6e3   :  { %v994_v4 = vadd.f32 1e-05, %v992_v3 }
 0x6e4   :  { %v987_v6 = vpop.xlane.xlu0 %986 }
 0x6e5   :  { %3101 = vrsqrt.f32 %v994_v4  ;;  %v991_v9 = vmul.f32 0.03125, %v987_v6  ;;  %v1182_v6 = vld [vmem:[#allocation4 + $0x30] sm:$0xff] }
 0x6e7   :  { %v993_v10 = vadd.f32 1e-05, %v991_v9  ;;  %v1183_v9 = vld [vmem:[#allocation4 + $0x38] sm:$0xff] }
 0x6e9   :  { %3103 = vrsqrt.f32 %v993_v10  ;;  %v3009_v10 = vpack.c.bf16 %v1183_v9, %v1182_v6 }
 0x6ec   :  { %v3484_v20 = vpop.permute.xlu0 %1022 }
 0x6ef   :  { %v3102_v11 = vpop.eup %3101 }
 0x6f0   :  { %v998_v13 = vmul.f32 %v3102_v11, %v982_v51  ;;  %v3001_v51 = vpack.c.bf16 %v1179_v50, %v1178_v47  ;;  %v2573_v11 = vld [vmem:[%s3784_s10] ss:$0 sm:$0xff] }
 0x6f2   :  { %v1006_v18 = vmul.f32 %v2571_v12, %v998_v13  ;;  %3002 = vmatprep.subr.bf16.mxu0 %v3001_v51 }
 0x6f3   :  { %v3104_v19 = vpop.eup %3103  ;;  %3004 = vmatpush3.bf16.msra.mxu0 %v3001_v51 }
 0x6f4   :  { %v1014_v22 = vadd.f32 %v2572_v16, %v1006_v18  ;;  %v997_v23 = vmul.f32 %v3104_v19, %v981_v5  ;;  %3006 = vmatprep.subr.bf16.mxu0 %v3005_v56  ;;  %v2576_v18 = vld [vmem:[%s3786_s12] ss:$0 sm:$0xff] }
 0x6f6   :  { %v3493_v27 = vmul.f32 %v3484_v20, %v1014_v22  ;;  %v1005_v28 = vmul.f32 %v2571_v12, %v997_v23 }
 0x6f7   :  { %3008 = vmatpush3.bf16.msra.mxu0 %v3005_v56 }
 0x6f8   :  { %v1043_v30 = vrot.slane %v3493_v27, 7  ;;  %v1013_v32 = vadd.f32 %v2572_v16, %v1005_v28  ;;  %3010 = vmatprep.subr.bf16.mxu0 %v3009_v10 }
 0x6fa   :  { %v3505_v36 = vmul.f32 %v3495_v29, %v1013_v32  ;;  %v1048_v37 = vsel %vm1046_vm4, 0.0, %v1043_v30  ;;  %v1050_v38 = vsel %vm1046_vm4, %v1043_v30, 0.0 }
 0x6fb   :  { %v1059_v39 = vrot.slane %v1048_v37, 1  ;;  %v1060_v40 = vrot.slane %v1050_v38, 1  ;;  %v1072_v58 = vrot.slane %v1048_v37, 2  ;;  %v1073_v59 = vrot.slane %v1050_v38, 2  ;;  %3012 = vmatpush3.bf16.msra.mxu0 %v3009_v10 }
 0x6fc   :  { %v1042_v41 = vrot.slane %v3505_v36, 7 }
 0x6fd   :  { %v1061_v42 = vsel %vm1055_vm5, %v1059_v39, %v1060_v40  ;;  %v1074_v60 = vsel %vm1068_vm6, %v1072_v58, %v1073_v59 }
 0x6fe   :  { %1064 = vrot.lane.b32.xlu1 %v1061_v42, %s3194_s29  ;;  %v1047_v43 = vsel %vm1046_vm4, 0.0, %v1042_v41  ;;  %v1049_v44 = vsel %vm1046_vm4, %v1042_v41, 0.0  ;;  %v1322_v42 = vld [vmem:[#allocation2 + $0x28] sm:$0xff] }
 0x6ff   :  { %v1056_v48 = vrot.slane %v1047_v43, 1  ;;  %v1057_v49 = vrot.slane %v1049_v44, 1  ;;  %v1069_v52 = vrot.slane %v1047_v43, 2  ;;  %v1070_v53 = vrot.slane %v1049_v44, 2  ;;  %v1323_v44 = vld [vmem:[#allocation2 + $0x30] sm:$0xff] }
 0x700   :  { %v3017_v46 = vpack.c.bf16 %v1324_v45, %v1323_v44 }
 0x701   :  { %v1058_v5 = vsel %vm1055_vm5, %v1056_v48, %v1057_v49  ;;  %v1071_v57 = vsel %vm1068_vm6, %v1069_v52, %v1070_v53  ;;  %v2579_v52 = vld [vmem:[%s3787_s13] ss:$0 sm:$0xff] }
 0x702   :  { %1062 = vrot.lane.b32.xlu1 %v1058_v5, %s3194_s29 }
 0x706   :  { %1075 = vrot.lane.b32.xlu1 %v1071_v57, %s3190_s1 }
 0x70a   :  { %1077 = vrot.lane.b32.xlu1 %v1074_v60, %s3190_s1 }
 0x770   :  { %v1065_v61 = vpop.permute.xlu1 %1064 }
 0x771   :  { %v1082_v2 = vsel %vm97_vm0, %v1048_v37, %v1065_v61 }
 0x774   :  { %v1063_v62 = vpop.permute.xlu1 %1062 }
 0x775   :  { %v1081_v63 = vsel %vm97_vm0, %v1047_v43, %v1063_v62 }
 0x778   :  { %v1076_v0 = vpop.permute.xlu1 %1075 }
 0x779   :  { %v1084_v1 = vsel %vm1083_vm7, %v1081_v63, %v1076_v0  ;;  %v2582_v63 = vld [vmem:[%s3778_s4 + $0x1] ss:$0 sm:$0xff] }
 0x77a   :  { %2827 = vmatprep.mubr.msk.f32.mxu1 %vm1092_vm8, %v1084_v1 }
 0x77c   :  { %v1078_v3 = vpop.permute.xlu1 %1077 }
 0x77d   :  { %v1085_v4 = vsel %vm1083_vm7, %v1082_v2, %v1078_v3 }
 0x77e   :  { %2828 = vmatmul.mubr.msk.f32.vlgmr.msra.gmra.mrb[10].mxu1 %vm1092_vm8, %v1085_v4 }
 0x77f   :  { %2862 = vmatprep.mubr.msk.f32.mxu1 %vm3186_vm1, %v3185_v8 }
 0x851   :  { %v2829_v12 = vpop.f32.mrb[10].mxu1 }
 0x852   :  { %v1171_v13 = vadd.f32 %v2829_v12, %v2573_v11  ;;  %v1165_v14 = vpop.f32.mrb[11].mxu1 }
 0x853   :  { %v1166_v15 = vadd.f32 %v2573_v11, %v1165_v14 }
 0x854   :  { %v1175_v17 = vmax.f32 %v1171_v13, 0.0 }
 0x855   :  { %v1174_v16 = vmax.f32 %v1166_v15, 0.0 }
 0x857   :  { %2846 = vmatprep.mubr.msk.f32.mxu0 %vm1083_vm7, %v1174_v16 }
 0x858   :  { %2847 = vmatmul.mubr.msk.f32.vlgmr.msra.gmra.mrb[10].mxu0 %vm1083_vm7, %v1175_v17 }
 0x92b   :  { %v2848_v19 = vpop.f32.mrb[10].mxu0 }
 0x92c   :  { %v1269_v22 = vadd.f32 %v2848_v19, %v2576_v18  ;;  %v1263_v23 = vpop.f32.mrb[11].mxu0 }
 0x92d   :  { %v1264_v24 = vadd.f32 %v2576_v18, %v1263_v23 }
 0x92e   :  { %v1273_v25 = vadd.f32 %v1269_v22, %v3493_v27 }
 0x92f   :  { %v1272_v26 = vadd.f32 %v1264_v24, %v3505_v36  ;;  %v1321_v36 = vld [vmem:[#allocation2 + $0x20] sm:$0xff] }
 0x930   :  { %v1279_v28 = vsel %vm97_vm0, %v1273_v25, 0.0  ;;  %v3013_v43 = vpack.c.bf16 %v1322_v42, %v1321_v36 }
 0x931   :  { %1280 = vadd.xlane.f32.xlu0 %v1279_v28  ;;  %v1276_v30 = vsel %vm97_vm0, %v1272_v26, 0.0 }
 0x932   :  { %1277 = vadd.xlane.f32.xlu1 %v1276_v30  ;;  %3014 = vmatprep.subr.bf16.mxu0 %v3013_v43 }
 0x933   :  { %3016 = vmatpush3.bf16.msra.mxu0 %v3013_v43 }
 0x934   :  { %3018 = vmatprep.subr.bf16.mxu0 %v3017_v46 }
 0x937   :  { %3020 = vmatpush3.bf16.msra.mxu0 %v3017_v46 }
 0x938   :  { %2870 = vmatprep.subr.mxu0 %v3185_v8 }
 0x9be   :  { %v1281_v32 = vpop.xlane.xlu0 %1280 }
 0x9bf   :  { %v1283_v33 = vmul.f32 0.03125, %v1281_v32  ;;  %v1278_v34 = vpop.xlane.xlu1 %1277 }
 0x9c0   :  { %v1282_v35 = vmul.f32 0.03125, %v1278_v34 }
 0x9c1   :  { %v1285_v37 = vsub.f32 %v1273_v25, %v1283_v33 }
 0x9c2   :  { %v1284_v38 = vsub.f32 %v1272_v26, %v1282_v35 }
 0x9c3   :  { %v1287_v41 = vmul.f32 %v1285_v37, %v1285_v37 }
 0x9c4   :  { %v1286_v39 = vmul.f32 %v1284_v38, %v1284_v38 }
 0x9c5   :  { %v1291_v27 = vsel %vm97_vm0, %v1287_v41, 0.0 }
 0x9c6   :  { %v1288_v40 = vsel %vm97_vm0, %v1286_v39, 0.0 }
 0x9c7   :  { %1289 = vadd.xlane.f32.xlu1 %v1288_v40 }
 0x9cb   :  { %1292 = vadd.xlane.f32.xlu1 %v1291_v27 }
 0xa54   :  { %v1290_v47 = vpop.xlane.xlu1 %1289 }
 0xa55   :  { %v1294_v48 = vmul.f32 0.03125, %v1290_v47 }
 0xa57   :  { %v1296_v49 = vadd.f32 1e-05, %v1294_v48 }
 0xa58   :  { %v1293_v50 = vpop.xlane.xlu1 %1292 }
 0xa59   :  { %3105 = vrsqrt.f32 %v1296_v49  ;;  %v1295_v7 = vmul.f32 0.03125, %v1293_v50 }
 0xa5b   :  { %v1297_v51 = vadd.f32 1e-05, %v1295_v7 }
 0xa5d   :  { %3107 = vrsqrt.f32 %v1297_v51 }
 0xa63   :  { %v3106_v5 = vpop.eup %3105 }
 0xa64   :  { %v1300_v53 = vmul.f32 %v3106_v5, %v1284_v38 }
 0xa66   :  { %v1308_v55 = vmul.f32 %v2579_v52, %v1300_v53 }
 0xa67   :  { %v3108_v56 = vpop.eup %3107 }
 0xa68   :  { %v1301_v57 = vmul.f32 %v3108_v56, %v1285_v37  ;;  %v1316_v58 = vadd.f32 %v2580_v54, %v1308_v55 }
 0xa6a   :  { %v1309_v59 = vmul.f32 %v2579_v52, %v1301_v57  ;;  %v3551_v60 = vmul.f32 %v1316_v58, %v3495_v29 }
 0xa6c   :  { %v1317_v61 = vadd.f32 %v2580_v54, %v1309_v59  ;;  %2857 = vmatprep.mubr.msk.f32.mxu0 %vm97_vm0, %v3551_v60 }
 0xa6e   :  { %v3556_v62 = vmul.f32 %v1317_v61, %v3484_v20 }
 0xa70   :  { %2858 = vmatmul.mubr.msk.f32.vlgmr.msra.gmra.mrb[12].mxu0 %vm97_vm0, %v3556_v62 }
 0xa71   :  { %2872 = vmatprep.mubr.msk.f32.mxu0 %vm3186_vm1, %v3185_v8 }
 0xb43   :  { %v2859_v0 = vpop.f32.mrb[12].mxu0 }
 0xb44   :  { %v1405_v1 = vpop.f32.mrb[13].mxu0  ;;  %v3571_v3 = vadd.f32 %v2859_v0, %v2582_v63 }
 0xb45   :  { %v3565_v2 = vadd.f32 %v2582_v63, %v1405_v1 }
 0xb47   :  { %1584 = vrot.lane.b32.xlu0 %v3565_v2, %s3189_s25  ;;  %1415 = vrot.lane.b32.xlu1 %v3565_v2, %s3188_s24 }
 0xb4b   :  { %1926 = vrot.lane.b32.xlu0 %v3571_v3, %s3189_s25  ;;  %1582 = vrot.lane.b32.xlu1 %v3565_v2, %s3187_s23 }
 0xb4f   :  { %1757 = vrot.lane.b32.xlu1 %v3571_v3, %s3188_s24 }
 0xb53   :  { %1924 = vrot.lane.b32.xlu1 %v3571_v3, %s3187_s23 }
 0xbb9   :  { %v1585_v4 = vpop.permute.xlu0 %1584  ;;  %v1416_v6 = vpop.permute.xlu1 %1415 }
 0xbba   :  { %2861 = vmatpush3.xpose.msk.msra.mxu1 %vm182_vm2, %v1416_v6  ;;  %2871 = vmatpush3.xpose.msk.msra.mxu0 %vm182_vm2, %v1585_v4 }
 0xbbb   :  { %2880 = vmatprep.subr.mxu0 %v3185_v8  ;;  %2865 = vmatprep.subr.mxu1 %v3185_v8 }
 0xbbd   :  { %2863 = vmatmul.mubr.msk.f32.vlgmr.msra.gmra.mrb[12].mxu1 %vm182_vm2, %v3565_v2  ;;  %v1583_v9 = vpop.permute.xlu1 %1582  ;;  %v1927_v11 = vpop.permute.xlu0 %1926 }
 0xbbe   :  { %2873 = vmatmul.mubr.msk.f32.vlgmr.msra.gmra.mrb[14].mxu0 %vm182_vm2, %v1583_v9  ;;  %2867 = vmatprep.mubr.msk.f32.mxu1 %vm3186_vm1, %v3185_v8 }
 0xbbf   :  { %2882 = vmatprep.mubr.msk.f32.mxu0 %vm3186_vm1, %v3185_v8 }
 0xbc1   :  { %v1758_v10 = vpop.permute.xlu1 %1757 }
 0xbc2   :  { %2881 = vmatpush3.xpose.msk.msra.mxu0 %vm182_vm2, %v1758_v10  ;;  %v2601_v10 = vld [vmem:[%s3779_s5 + $0x20] sm:$0xff] }
 0xbc3   :  { %2890 = vmatprep.subr.mxu0 %v3185_v8 }
 0xbc5   :  { %2883 = vmatmul.mubr.msk.f32.vlgmr.msra.gmra.mrb[16].mxu0 %vm182_vm2, %v3571_v3  ;;  %v1925_v12 = vpop.permute.xlu1 %1924 }
 0xbc6   :  { %2891 = vmatpush3.xpose.msk.msra.mxu0 %vm182_vm2, %v1927_v11  ;;  %2892 = vmatprep.mubr.msk.f32.mxu0 %vm3186_vm1, %v3185_v8  ;;  %v2602_v11 = vld [vmem:[%s3779_s5 + $0x28] sm:$0xff] }
 0xbc9   :  { %2893 = vmatmul.mubr.msk.f32.vlgmr.msra.gmra.mrb[18].mxu0 %vm182_vm2, %v1925_v12  ;;  %v3021_v12 = vpack.c.bf16 %v2602_v11, %v2601_v10 }
 0xbcb   :  { %3022 = vmatprep.subr.bf16.mxu0 %v3021_v12 }
 0xbcc   :  { %3024 = vmatpush3.bf16.msra.mxu0 %v3021_v12 }
 0xc90   :  { %v1487_v13 = vpop.f32.mrb[12].mxu1 }
 0xc91   :  { %v1491_v14 = vmul.f32 0.25, %v1487_v13  ;;  %v2864_v15 = vpop.f32.mrb[13].mxu1  ;;  %v1656_v16 = vpop.f32.mrb[14].mxu0  ;;  %v2604_v13 = vld [vmem:[%s3779_s5 + $0x38] sm:$0xff] }
 0xc92   :  { %v1660_v17 = vmul.f32 0.25, %v1656_v16  ;;  %v2874_v18 = vpop.f32.mrb[15].mxu0 }
 0xc93   :  { %v1492_v19 = vadd.f32 %v3365_v21, %v1491_v14 }
 0xc94   :  { %v1661_v22 = vadd.f32 %v3365_v21, %v1660_v17 }
 0xc95   :  { %v1493_v23 = vsel %vm265_vm3, %v1492_v19, -inf }
 0xc96   :  { %1494 = vmax.xlane.f32.xlu0 %v1493_v23  ;;  %v1662_v24 = vsel %vm265_vm3, %v1661_v22, -inf }
 0xc97   :  { %1663 = vmax.xlane.f32.xlu1 %v1662_v24 }
 0xc98   :  { %v1829_v25 = vpop.f32.mrb[16].mxu0 }
 0xc99   :  { %v1833_v26 = vmul.f32 0.25, %v1829_v25  ;;  %v2884_v28 = vpop.f32.mrb[17].mxu0 }
 0xc9b   :  { %v1834_v30 = vadd.f32 %v3373_v31, %v1833_v26 }
 0xc9c   :  { %v1998_v32 = vpop.f32.mrb[18].mxu0 }
 0xc9d   :  { %v2002_v33 = vmul.f32 0.25, %v1998_v32  ;;  %v2894_v34 = vpop.f32.mrb[19].mxu0  ;;  %v1835_v35 = vsel %vm265_vm3, %v1834_v30, -inf  ;;  %v2606_v32 = vld [vmem:[%s3780_s6 + $0x1] ss:$0 sm:$0xff] }
 0xc9e   :  { %1836 = vmax.xlane.f32.xlu0 %v1835_v35 }
 0xc9f   :  { %v2003_v37 = vadd.f32 %v3373_v31, %v2002_v33 }
 0xca1   :  { %v2004_v21 = vsel %vm265_vm3, %v2003_v37, -inf }
 0xca2   :  { %2005 = vmax.xlane.f32.xlu0 %v2004_v21 }
 0xca8   :  { %1506 = vrot.lane.b32.xlu1 %v3565_v2, %s3190_s1 }
 0xd23   :  { %v1495_v38 = vpop.xlane.xlu0 %1494 }
 0xd24   :  { %v1496_v39 = vsub.f32 %v1492_v19, %v1495_v38  ;;  %v1664_v40 = vpop.xlane.xlu1 %1663 }
 0xd25   :  { %v1665_v41 = vsub.f32 %v1661_v22, %v1664_v40 }
 0xd26   :  { %v1497_v27 = vmul.f32 1.442695, %v1496_v39 }
 0xd27   :  { %v1666_v36 = vmul.f32 1.442695, %v1665_v41 }
 0xd28   :  { %3109 = vpow2.f32 %v1497_v27  ;;  %v1507_v42 = vpop.permute.xlu1 %1506 }
 0xd29   :  { %3111 = vpow2.f32 %v1666_v36  ;;  %2866 = vmatpush3.msra.mxu1 %v1507_v42 }
 0xd2a   :  { %2875 = vmatprep.subr.mxu1 %v3185_v8 }
 0xd2b   :  { %v1837_v43 = vpop.xlane.xlu0 %1836 }
 0xd2c   :  { %v1838_v31 = vsub.f32 %v1834_v30, %v1837_v43 }
 0xd2e   :  { %v1839_v44 = vmul.f32 1.442695, %v1838_v31 }
 0xd2f   :  { %v2006_v45 = vpop.xlane.xlu0 %2005 }
 0xd30   :  { %3113 = vpow2.f32 %v1839_v44  ;;  %v2007_v46 = vsub.f32 %v2003_v37, %v2006_v45 }
 0xd32   :  { %v3110_v47 = vpop.eup %3109  ;;  %v2008_v48 = vmul.f32 1.442695, %v2007_v46 }
 0xd33   :  { %v3112_v49 = vpop.eup %3111  ;;  %v1499_v50 = vsel %vm265_vm3, %v3110_v47, 0.0 }
 0xd34   :  { %3115 = vpow2.f32 %v2008_v48  ;;  %1500 = vadd.xlane.f32.xlu1 %v1499_v50  ;;  %v1668_v7 = vsel %vm265_vm3, %v3112_v49, 0.0  ;;  %v2615_v48 = vld [vmem:[%s3783_s9 + $0x70] sm:$0xff]  ;;  %v2616_v50 = vld [vmem:[%s3783_s9 + $0x78] sm:$0xff] }
 0xd35   :  { %1669 = vadd.xlane.f32.xlu0 %v1668_v7  ;;  %v3033_v7 = vpack.c.bf16 %v2616_v50, %v2615_v48 }
 0xd3a   :  { %v3114_v51 = vpop.eup %3113 }
 0xd3b   :  { %v1841_v5 = vsel %vm265_vm3, %v3114_v51, 0.0 }
 0xd3c   :  { %1842 = vadd.xlane.f32.xlu1 %v1841_v5  ;;  %v2618_v5 = vld [vmem:[%s3783_s9 + $0x88] sm:$0xff] }
 0xd3e   :  { %v3116_v52 = vpop.eup %3115 }
 0xd3f   :  { %v2010_v53 = vsel %vm265_vm3, %v3116_v52, 0.0 }
 0xd40   :  { %2011 = vadd.xlane.f32.xlu0 %v2010_v53  ;;  %v2619_v53 = vld [vmem:[%s3783_s9 + $0x90] sm:$0xff] }
 0xd4d   :  { %1848 = vrot.lane.b32.xlu1 %v3571_v3, %s3190_s1 }
 0xd51   :  { %2017 = vrot.lane.b32.xlu1 %v3571_v3, %s3191_s30 }
 0xd56   :  { %1675 = vrot.lane.b32.xlu0 %v3565_v2, %s3191_s30 }
 0xdc1   :  { %v1501_v54 = vpop.xlane.xlu1 %1500 }
 0xdc2   :  { %3117 = vrcp.f32 %v1501_v54  ;;  %v1670_v55 = vpop.xlane.xlu0 %1669  ;;  %v2620_v54 = vld [vmem:[%s3783_s9 + $0x98] sm:$0xff] }
 0xdc3   :  { %3119 = vrcp.f32 %v1670_v55  ;;  %v3041_v55 = vpack.c.bf16 %v2620_v54, %v2619_v53  ;;  %v2395_v53 = vld [vmem:[#allocation4 + $0x70] sm:$0xff]  ;;  %v2396_v54 = vld [vmem:[#allocation4 + $0x78] sm:$0xff] }
 0xdc9   :  { %v1843_v56 = vpop.xlane.xlu1 %1842 }
 0xdca   :  { %3121 = vrcp.f32 %v1843_v56 }
 0xdcc   :  { %v3118_v57 = vpop.eup %3117 }
 0xdcd   :  { %v3120_v58 = vpop.eup %3119  ;;  %v1503_v59 = vmul.f32 %v3118_v57, %v3110_v47  ;;  %v2012_v61 = vpop.xlane.xlu0 %2011  ;;  %v2614_v47 = vld [vmem:[%s3783_s9 + $0x68] sm:$0xff] }
 0xdce   :  { %v1672_v63 = vmul.f32 %v3120_v58, %v3112_v49  ;;  %3123 = vrcp.f32 %v2012_v61  ;;  %v1849_v0 = vpop.permute.xlu1 %1848 }
 0xdcf   :  { %2587 = vst.msk [vmem:[%s3790_s16 + $0x20] sm:$0xff] %vm265_vm3, %v1503_v59  ;;  %2868 = vmatmul.mubr.msk.f32.vlgmr.msra.gmra.mrb[14].mxu1 %vm265_vm3, %v1503_v59 }
 0xdd0   :  { %2591 = vst.msk [vmem:[%s3790_s16 + $0x28] sm:$0xff] %vm265_vm3, %v1672_v63  ;;  %2877 = vmatprep.mubr.msk.f32.mxu1 %vm3186_vm1, %v3185_v8 }
 0xdd1   :  { %v1676_v1 = vpop.permute.xlu0 %1675 }
 0xdd2   :  { %2876 = vmatpush3.msra.mxu1 %v1676_v1  ;;  %v2018_v4 = vpop.permute.xlu1 %2017  ;;  %v2611_v1 = vld [vmem:[%s3781_s7 + $0x1] ss:$0 sm:$0xff] }
 0xdd3   :  { %2878 = vmatmul.mubr.msk.f32.vlgmr.msra.gmra.mrb[16].mxu1 %vm265_vm3, %v1672_v63  ;;  %2885 = vmatprep.subr.mxu1 %v3185_v8 }
 0xdd4   :  { %v3122_v2 = vpop.eup %3121  ;;  %2886 = vmatpush3.msra.mxu1 %v1849_v0  ;;  %2887 = vmatprep.mubr.msk.f32.mxu1 %vm3186_vm1, %v3185_v8 }
 0xdd5   :  { %v1845_v3 = vmul.f32 %v3122_v2, %v3114_v51  ;;  %2895 = vmatprep.subr.mxu1 %v3185_v8  ;;  %v2617_v51 = vld [vmem:[%s3783_s9 + $0x80] sm:$0xff] }
 0xdd7   :  { %2595 = vst.msk [vmem:[%s3790_s16 + $0x30] sm:$0xff] %vm265_vm3, %v1845_v3  ;;  %2888 = vmatmul.mubr.msk.f32.vlgmr.msra.gmra.mrb[18].mxu1 %vm265_vm3, %v1845_v3  ;;  %v2621_v3 = vld [vmem:[%s3783_s9 + $0xa0] sm:$0xff] }
 0xdd8   :  { %v3124_v6 = vpop.eup %3123  ;;  %2896 = vmatpush3.msra.mxu1 %v2018_v4  ;;  %2897 = vmatprep.mubr.msk.f32.mxu1 %vm3186_vm1, %v3185_v8  ;;  %v2603_v8 = vld [vmem:[%s3779_s5 + $0x30] sm:$0xff]  ;;  %v2622_v4 = vld [vmem:[%s3783_s9 + $0xa8] sm:$0xff] }
 0xdd9   :  { %v2014_v9 = vmul.f32 %v3124_v6, %v3116_v52  ;;  %v3025_v14 = vpack.c.bf16 %v2604_v13, %v2603_v8  ;;  %v3037_v52 = vpack.c.bf16 %v2618_v5, %v2617_v51  ;;  %v2612_v6 = vld [vmem:[%s3782_s8 + $0x1] ss:$0 sm:$0xff]  ;;  %v2623_v13 = vld [vmem:[%s3783_s9 + $0xb0] sm:$0xff] }
 0xddb   :  { %2599 = vst.msk [vmem:[%s3790_s16 + $0x38] sm:$0xff] %vm265_vm3, %v2014_v9  ;;  %2898 = vmatmul.mubr.msk.f32.vlgmr.msra.gmra.mrb[20].mxu1 %vm265_vm3, %v2014_v9  ;;  %3026 = vmatprep.subr.bf16.mxu0 %v3025_v14  ;;  %v3045_v9 = vpack.c.bf16 %v2622_v4, %v2621_v3 }
 0xddc   :  { %3028 = vmatpush3.bf16.msra.mxu0 %v3025_v14  ;;  %v2624_v14 = vld [vmem:[%s3783_s9 + $0xb8] sm:$0xff] }
 0xea2   :  { %v1578_v15 = vpop.f32.mrb[14].mxu1 }
 0xea3   :  { %v2869_v16 = vpop.f32.mrb[15].mxu1 }
 0xea6   :  { %v1747_v17 = vpop.f32.mrb[16].mxu1 }
 0xea7   :  { %1752 = vrot.lane.b32.xlu0 %v1747_v17, %s3192_s19  ;;  %v2879_v18 = vpop.f32.mrb[17].mxu1 }
 0xeaa   :  { %v1920_v19 = vpop.f32.mrb[18].mxu1 }
 0xeab   :  { %v2889_v22 = vpop.f32.mrb[19].mxu1 }
 0xeae   :  { %v2089_v23 = vpop.f32.mrb[20].mxu1 }
 0xeaf   :  { %2094 = vrot.lane.b32.xlu1 %v2089_v23, %s3192_s19  ;;  %v2899_v24 = vpop.f32.mrb[21].mxu1 }
 0xf19   :  { %v1753_v25 = vpop.permute.xlu0 %1752 }
 0xf1a   :  { %v1755_v26 = vsel %vm182_vm2, %v1578_v15, %v1753_v25  ;;  %v3049_v15 = vpack.c.bf16 %v2624_v14, %v2623_v13  ;;  %v2389_v25 = vld [vmem:[#allocation4 + $0x40] sm:$0xff] }
 0xf1b   :  { %2908 = vmatprep.mubr.msk.f32.mxu0 %vm97_vm0, %v1755_v26  ;;  %v2390_v26 = vld [vmem:[#allocation4 + $0x48] sm:$0xff] }
 0xf21   :  { %v2095_v28 = vpop.permute.xlu1 %2094 }
 0xf22   :  { %v2097_v30 = vsel %vm182_vm2, %v1920_v19, %v2095_v28  ;;  %v2391_v28 = vld [vmem:[#allocation4 + $0x50] sm:$0xff] }
 0xf23   :  { %2909 = vmatmul.mubr.msk.f32.vlgmr.msra.gmra.mrb[20].mxu0 %vm97_vm0, %v2097_v30 }
 0xff6   :  { %v2910_v33 = vpop.f32.mrb[20].mxu0 }
 0xff7   :  { %v2189_v34 = vadd.f32 %v2910_v33, %v2606_v32  ;;  %v2183_v35 = vpop.f32.mrb[21].mxu0  ;;  %v2392_v33 = vld [vmem:[#allocation4 + $0x58] sm:$0xff] }
 0xff8   :  { %v2184_v37 = vadd.f32 %v2606_v32, %v2183_v35  ;;  %v3053_v35 = vpack.c.bf16 %v2390_v26, %v2389_v25 }
 0xff9   :  { %v2193_v21 = vadd.f32 %v2189_v34, %v3556_v62 }
 0xffa   :  { %v2192_v38 = vadd.f32 %v2184_v37, %v3551_v60  ;;  %v2613_v60 = vld [vmem:[%s3783_s9 + $0x60] sm:$0xff]  ;;  %v3057_v37 = vpack.c.bf16 %v2392_v33, %v2391_v28  ;;  %3054 = vmatprep.subr.bf16.mxu0 %v3053_v35 }
 0xffb   :  { %v2201_v39 = vsel %vm97_vm0, %v2193_v21, 0.0  ;;  %v3029_v49 = vpack.c.bf16 %v2614_v47, %v2613_v60  ;;  %3056 = vmatpush3.bf16.msra.mxu0 %v3053_v35 }
 0xffc   :  { %2202 = vadd.xlane.f32.xlu1 %v2201_v39  ;;  %v2198_v40 = vsel %vm97_vm0, %v2192_v38, 0.0  ;;  %3058 = vmatprep.subr.bf16.mxu0 %v3057_v37 }
 0xffd   :  { %2199 = vadd.xlane.f32.xlu0 %v2198_v40  ;;  %3030 = vmatprep.subr.bf16.mxu1 %v3029_v49  ;;  %v2393_v40 = vld [vmem:[#allocation4 + $0x60] sm:$0xff] }
 0xffe   :  { %3032 = vmatpush3.bf16.msra.mxu1 %v3029_v49 }
 0xfff   :  { %3034 = vmatprep.subr.bf16.mxu1 %v3033_v7  ;;  %3060 = vmatpush3.bf16.msra.mxu0 %v3057_v37  ;;  %v2636_v37 = vld [vmem:[%s3788_s14 + $0x1] ss:$0 sm:$0xff] }
0x1002   :  { %3036 = vmatpush3.bf16.msra.mxu1 %v3033_v7 }
0x1003   :  { %3038 = vmatprep.subr.bf16.mxu1 %v3037_v52 }
0x1006   :  { %3040 = vmatpush3.bf16.msra.mxu1 %v3037_v52 }
0x1007   :  { %3042 = vmatprep.subr.bf16.mxu1 %v3041_v55 }
0x100a   :  { %3044 = vmatpush3.bf16.msra.mxu1 %v3041_v55  ;;  %v3065_v55 = vpack.c.bf16 %v2396_v54, %v2395_v53 }
0x100b   :  { %3046 = vmatprep.subr.bf16.mxu1 %v3045_v9 }
0x100e   :  { %3048 = vmatpush3.bf16.msra.mxu1 %v3045_v9 }
0x100f   :  { %3050 = vmatprep.subr.bf16.mxu1 %v3049_v15 }
0x1012   :  { %3052 = vmatpush3.bf16.msra.mxu1 %v3049_v15 }
0x1089   :  { %v2203_v41 = vpop.xlane.xlu1 %2202 }
0x108a   :  { %v2205_v27 = vmul.f32 0.03125, %v2203_v41  ;;  %v2200_v36 = vpop.xlane.xlu0 %2199  ;;  %v2394_v41 = vld [vmem:[#allocation4 + $0x68] sm:$0xff] }
0x108b   :  { %v2204_v42 = vmul.f32 0.03125, %v2200_v36 }
0x108c   :  { %v2207_v43 = vsub.f32 %v2193_v21, %v2205_v27 }
0x108d   :  { %v2206_v31 = vsub.f32 %v2192_v38, %v2204_v42 }
0x108e   :  { %v2209_v46 = vmul.f32 %v2207_v43, %v2207_v43 }
0x108f   :  { %v2208_v44 = vmul.f32 %v2206_v31, %v2206_v31 }
0x1090   :  { %v2213_v62 = vsel %vm97_vm0, %v2209_v46, 0.0 }
0x1091   :  { %v2210_v45 = vsel %vm97_vm0, %v2208_v44, 0.0 }
0x1092   :  { %2211 = vadd.xlane.f32.xlu0 %v2210_v45 }
0x1096   :  { %2214 = vadd.xlane.f32.xlu0 %v2213_v62 }
0x111f   :  { %v2212_v56 = vpop.xlane.xlu0 %2211 }
0x1120   :  { %v2216_v57 = vmul.f32 0.03125, %v2212_v56  ;;  %v2626_v56 = vld [vmem:[%s3784_s10 + $0x1] ss:$0 sm:$0xff] }
0x1122   :  { %v2218_v58 = vadd.f32 1e-05, %v2216_v57 }
0x1123   :  { %v2215_v59 = vpop.xlane.xlu0 %2214 }
0x1124   :  { %3125 = vrsqrt.f32 %v2218_v58  ;;  %v2217_v61 = vmul.f32 0.03125, %v2215_v59 }
0x1126   :  { %v2219_v63 = vadd.f32 1e-05, %v2217_v61 }
0x1128   :  { %3127 = vrsqrt.f32 %v2219_v63 }
0x112e   :  { %v3126_v0 = vpop.eup %3125 }
0x112f   :  { %v2222_v2 = vmul.f32 %v3126_v0, %v2206_v31  ;;  %v3061_v31 = vpack.c.bf16 %v2394_v41, %v2393_v40 }
0x1131   :  { %v2230_v10 = vmul.f32 %v2611_v1, %v2222_v2  ;;  %3062 = vmatprep.subr.bf16.mxu0 %v3061_v31 }
0x1132   :  { %v3128_v11 = vpop.eup %3127  ;;  %3064 = vmatpush3.bf16.msra.mxu0 %v3061_v31 }
0x1133   :  { %v2223_v12 = vmul.f32 %v3128_v11, %v2207_v43  ;;  %v2238_v8 = vadd.f32 %v2612_v6, %v2230_v10  ;;  %3066 = vmatprep.subr.bf16.mxu0 %v3065_v55 }
0x1135   :  { %v2231_v16 = vmul.f32 %v2611_v1, %v2223_v12  ;;  %v3719_v17 = vmul.f32 %v2238_v8, %v3495_v29  ;;  %v2630_v1 = vld [vmem:[%s3786_s12 + $0x1] ss:$0 sm:$0xff] }
0x1136   :  { %3068 = vmatpush3.bf16.msra.mxu0 %v3065_v55 }
0x1137   :  { %v2259_v18 = vrot.slane %v3719_v17, 7  ;;  %v2239_v19 = vadd.f32 %v2612_v6, %v2231_v16 }
0x1139   :  { %v2263_v22 = vsel %vm1046_vm4, 0.0, %v2259_v18  ;;  %v2265_v23 = vsel %vm1046_vm4, %v2259_v18, 0.0  ;;  %v3725_v24 = vmul.f32 %v2239_v19, %v3484_v20 }
0x113a   :  { %v2271_v30 = vrot.slane %v2263_v22, 1  ;;  %v2272_v32 = vrot.slane %v2265_v23, 1  ;;  %v2283_v38 = vrot.slane %v2263_v22, 2  ;;  %v2284_v39 = vrot.slane %v2265_v23, 2 }
0x113b   :  { %v2260_v34 = vrot.slane %v3725_v24, 7 }
0x113c   :  { %v2273_v21 = vsel %vm1055_vm5, %v2271_v30, %v2272_v32  ;;  %v2285_v44 = vsel %vm1068_vm6, %v2283_v38, %v2284_v39 }
0x113d   :  { %2277 = vrot.lane.b32.xlu1 %v2273_v21, %s3194_s29  ;;  %v2264_v27 = vsel %vm1046_vm4, 0.0, %v2260_v34  ;;  %v2266_v36 = vsel %vm1046_vm4, %v2260_v34, 0.0  ;;  %v2635_v34 = vld [vmem:[%s3787_s13 + $0x1] ss:$0 sm:$0xff] }
0x113e   :  { %v2274_v42 = vrot.slane %v2264_v27, 1  ;;  %v2275_v43 = vrot.slane %v2266_v36, 1  ;;  %v2286_v46 = vrot.slane %v2264_v27, 2  ;;  %v2287_v62 = vrot.slane %v2266_v36, 2 }
0x1140   :  { %v2276_v45 = vsel %vm1055_vm5, %v2274_v42, %v2275_v43  ;;  %v2288_v60 = vsel %vm1068_vm6, %v2286_v46, %v2287_v62 }
0x1141   :  { %2289 = vrot.lane.b32.xlu1 %v2285_v44, %s3190_s1  ;;  %2279 = vrot.lane.b32.xlu0 %v2276_v45, %s3194_s29 }
0x1145   :  { %2291 = vrot.lane.b32.xlu1 %v2288_v60, %s3190_s1 }
0x11af   :  { %v2278_v47 = vpop.permute.xlu1 %2277 }
0x11b0   :  { %v2295_v48 = vsel %vm97_vm0, %v2263_v22, %v2278_v47 }
0x11b3   :  { %v2290_v49 = vpop.permute.xlu1 %2289  ;;  %v2280_v7 = vpop.permute.xlu0 %2279 }
0x11b4   :  { %v2297_v50 = vsel %vm1083_vm7, %v2295_v48, %v2290_v49  ;;  %v2296_v51 = vsel %vm97_vm0, %v2264_v27, %v2280_v7 }
0x11b5   :  { %2935 = vmatprep.mubr.msk.f32.mxu1 %vm1092_vm8, %v2297_v50 }
0x11b7   :  { %v2292_v5 = vpop.permute.xlu1 %2291 }
0x11b8   :  { %v2298_v52 = vsel %vm1083_vm7, %v2296_v51, %v2292_v5 }
0x11b9   :  { %2936 = vmatmul.mubr.msk.f32.vlgmr.msra.gmra.mrb[22].mxu1 %vm1092_vm8, %v2298_v52 }
0x128c   :  { %v2937_v57 = vpop.f32.mrb[22].mxu1 }
0x128d   :  { %v2383_v58 = vadd.f32 %v2937_v57, %v2626_v56  ;;  %v2377_v59 = vpop.f32.mrb[23].mxu1 }
0x128e   :  { %v2378_v61 = vadd.f32 %v2626_v56, %v2377_v59 }
0x128f   :  { %v2387_v0 = vmax.f32 %v2383_v58, 0.0 }
0x1290   :  { %v2386_v63 = vmax.f32 %v2378_v61, 0.0 }
0x1292   :  { %2954 = vmatprep.mubr.msk.f32.mxu0 %vm1083_vm7, %v2386_v63 }
0x1293   :  { %2955 = vmatmul.mubr.msk.f32.vlgmr.msra.gmra.mrb[22].mxu0 %vm1083_vm7, %v2387_v0 }
0x1366   :  { %v2956_v2 = vpop.f32.mrb[22].mxu0 }
0x1367   :  { %v2483_v3 = vadd.f32 %v2956_v2, %v2630_v1  ;;  %v2477_v4 = vpop.f32.mrb[23].mxu0 }
0x1368   :  { %v2478_v6 = vadd.f32 %v2630_v1, %v2477_v4 }
0x1369   :  { %v2487_v9 = vadd.f32 %v2483_v3, %v3725_v24 }
0x136a   :  { %v2486_v10 = vadd.f32 %v2478_v6, %v3719_v17 }
0x136b   :  { %v2495_v11 = vsel %vm97_vm0, %v2487_v9, 0.0 }
0x136c   :  { %2496 = vadd.xlane.f32.xlu1 %v2495_v11  ;;  %v2492_v12 = vsel %vm97_vm0, %v2486_v10, 0.0 }
0x136d   :  { %2493 = vadd.xlane.f32.xlu0 %v2492_v12 }
0x13f9   :  { %v2497_v8 = vpop.xlane.xlu1 %2496 }
0x13fa   :  { %v2499_v13 = vmul.f32 0.03125, %v2497_v8  ;;  %v2494_v14 = vpop.xlane.xlu0 %2493 }
0x13fb   :  { %v2498_v15 = vmul.f32 0.03125, %v2494_v14 }
0x13fc   :  { %v2501_v16 = vsub.f32 %v2487_v9, %v2499_v13 }
0x13fd   :  { %v2500_v18 = vsub.f32 %v2486_v10, %v2498_v15 }
0x13fe   :  { %v2503_v23 = vmul.f32 %v2501_v16, %v2501_v16 }
0x13ff   :  { %v2502_v19 = vmul.f32 %v2500_v18, %v2500_v18 }
0x1400   :  { %v2507_v24 = vsel %vm97_vm0, %v2503_v23, 0.0 }
0x1401   :  { %v2504_v22 = vsel %vm97_vm0, %v2502_v19, 0.0 }
0x1402   :  { %2505 = vadd.xlane.f32.xlu0 %v2504_v22 }
0x1406   :  { %2508 = vadd.xlane.f32.xlu0 %v2507_v24 }
0x148f   :  { %v2506_v17 = vpop.xlane.xlu0 %2505 }
0x1490   :  { %v2510_v25 = vmul.f32 0.03125, %v2506_v17 }
0x1492   :  { %v2512_v26 = vadd.f32 1e-05, %v2510_v25 }
0x1493   :  { %v2509_v28 = vpop.xlane.xlu0 %2508 }
0x1494   :  { %3129 = vrsqrt.f32 %v2512_v26  ;;  %v2511_v30 = vmul.f32 0.03125, %v2509_v28 }
0x1496   :  { %v2513_v32 = vadd.f32 1e-05, %v2511_v30 }
0x1498   :  { %3131 = vrsqrt.f32 %v2513_v32 }
0x149e   :  { %v3130_v33 = vpop.eup %3129 }
0x149f   :  { %v2516_v35 = vmul.f32 %v3130_v33, %v2500_v18 }
0x14a1   :  { %v2524_v21 = vmul.f32 %v2635_v34, %v2516_v35 }
0x14a2   :  { %v3132_v38 = vpop.eup %3131 }
0x14a3   :  { %v2532_v39 = vadd.f32 %v2636_v37, %v2524_v21  ;;  %v2517_v40 = vmul.f32 %v3132_v38, %v2501_v16 }
0x14a5   :  { %v2534_v41 = vmul.f32 %v2532_v39, %v3495_v29  ;;  %v2525_v27 = vmul.f32 %v2635_v34, %v2517_v40 }
0x14a7   :  { %2536 = vst.msk [vmem:[%s3789_s15] sm:$0xff] %vm97_vm0, %v2534_v41  ;;  %v2533_v36 = vadd.f32 %v2636_v37, %v2525_v27 }
0x14a9   :  { %v2535_v42 = vmul.f32 %v2533_v36, %v3484_v20 }
0x14ab   :  { %2537 = vst.msk [vmem:[%s3789_s15 + $0x8] sm:$0xff] %vm97_vm0, %v2535_v42 }
0x14ac   :  { %2546 = vsyncpa [#allocation3], 1 }
0x14ad   :  { %2547 = vsyncpa [#allocation5], 1 }

// kernel: fastspeech2_forward.6
= control target key start
LH: loop header
LB: loop body
LE: loop exit
PB: predicated region body
PF: predicated region fallthrough
CT: control target
= control target key end

     0   :  { %vm73_vm0 = vcmask 261120   ;;  %vm177_vm1 = vcmask 130048   ;;  %s4141_s26 = smov 112   ;;  %s4143_s27 = smov 80   ;;  %vm1255_vm3 = vcmask 1040384   ;;  %vm1276_vm4 = vcmask 1046528   ;;  %s5050_s3 = inlined_call_operand.vmem [shape: f32[2,32,96], index: 3, kind: input, shape index: {}]   ;;  %s5051_s0 = inlined_call_operand.vmem [shape: f32[2,16,32], index: 0, kind: input, shape index: {}]   ;;  %s5052_s4 = inlined_call_operand.vmem [shape: f32[2,1,96], index: 4, kind: input, shape index: {}]   ;;  %s5053_s1 = inlined_call_operand.vmem [shape: f32[2,1,16], index: 1, kind: input, shape index: {}]   ;;  %s5054_s16 = inlined_call_operand.vmem [shape: f32[2,4,16,16], index: 16, kind: output, shape index: {1}]   ;;  %s5055_s5 = inlined_call_operand.vmem [shape: f32[2,32,32], index: 5, kind: input, shape index: {}]   ;;  %s5056_s6 = inlined_call_operand.vmem [shape: f32[2,1,32], index: 6, kind: input, shape index: {}, may-alias: {6,8,12,14}]   ;;  %s5057_s2 = inlined_call_operand.vmem [shape: f32[32,1], index: 2, kind: input, shape index: {}]   ;;  %s5058_s9 = inlined_call_operand.vmem [shape: f32[2,96,64], index: 9, kind: input, shape index: {}]   ;;  %s5059_s7 = inlined_call_operand.vmem [shape: f32[2,1,32], index: 7, kind: input, shape index: {}, may-alias: {7,13}]   ;;  %s5060_s8 = inlined_call_operand.vmem [shape: f32[2,1,32], index: 8, kind: input, shape index: {}, may-alias: {6,8,12,14}]   ;;  %s5061_s11 = inlined_call_operand.vmem [shape: f32[2,64,32], index: 11, kind: input, shape index: {}]   ;;  %s5062_s10 = inlined_call_operand.vmem [shape: f32[2,1,64], index: 10, kind: input, shape index: {}]   ;;  %s5063_s12 = inlined_call_operand.vmem [shape: f32[2,1,32], index: 12, kind: input, shape index: {}, may-alias: {6,8,12,14}]   ;;  %s5064_s13 = inlined_call_operand.vmem [shape: f32[2,1,32], index: 13, kind: input, shape index: {}, may-alias: {7,13}]   ;;  %s5065_s14 = inlined_call_operand.vmem [shape: f32[2,1,32], index: 14, kind: input, shape index: {}, may-alias: {6,8,12,14}]   ;;  %s5066_s15 = inlined_call_operand.vmem [shape: f32[2,16,32], index: 15, kind: output, shape index: {0}]  }
   0x1   :  { %5070 = sst [smem:[#allocation2_spill]] %s5050_s3  ;;  %v4249_v5 = vld [vmem:[%s5051_s0] sm:$0xff]  ;;  %v4256_v7 = vld [vmem:[%s5051_s0 + $0x8] sm:$0xff]  ;;  %v4261_v8 = vld [vmem:[%s5051_s0 + $0x10] sm:$0xff]  ;;  %s4144_s17 = smov 48   ;;  %vm1299_vm5 = vcmask 1045504  }
   0x2   :  { %s5071_s23 = sld [smem:[#allocation2_spill]]  ;;  %3497 = vmatprep.mubr.msk.f32.mxu0 %vm73_vm0, %v4249_v5  ;;  %v4270_v9 = vld [vmem:[%s5051_s0 + $0x18] sm:$0xff]  ;;  %v3189_v10 = vld [vmem:[%s5052_s4] ss:$0 sm:$0xff]  ;;  %s4142_s0 = smov 96   ;;  %vm4299_vm2 = vmpackc.low %vm177_vm1, %vm177_vm1  ;;  %vm1326_vm6 = vcmask 523264  }
   0x3   :  { %v3198_v37 = vld [vmem:[%s5053_s1] ss:$0 sm:$0xff]  ;;  %v4331_v54 = vld [vmem:[%s5053_s1 + $0x1] ss:$0 sm:$0xff]  ;;  %s4145_s18 = smov 64   ;;  %s5068_s21 = smov 16  }
   0x4   :  { %s4148_s22 = smov 32   ;;  %vm1337_vm7 = vcmask 785408  }
   0x8   :  { %v62_v0 = vld [vmem:[%s5071_s23] sm:$0xff]  ;;  %v63_v1 = vld [vmem:[%s5071_s23 + $0x8] sm:$0xff]  ;;  %v64_v2 = vld [vmem:[%s5071_s23 + $0x10] sm:$0xff] }
   0x9   :  { %v3761_v3 = vpack.c.bf16 %v63_v1, %v62_v0  ;;  %v65_v4 = vld [vmem:[%s5071_s23 + $0x18] sm:$0xff] }
   0xa   :  { %v3765_v6 = vpack.c.bf16 %v65_v4, %v64_v2 }
   0xb   :  { %3762 = vmatprep.subr.bf16.mxu0 %v3761_v3 }
   0xc   :  { %3764 = vmatpush3.bf16.msra.mxu0 %v3761_v3 }
   0xd   :  { %3766 = vmatprep.subr.bf16.mxu0 %v3765_v6 }
  0x10   :  { %3768 = vmatpush3.bf16.msra.mxu0 %v3765_v6 }
  0x13   :  { %3498 = vmatmul.mubr.msk.f32.vlgmr.msra.gmra.mrb[0].mxu0 %vm73_vm0, %v4256_v7 }
  0x14   :  { %3500 = vmatprep.mubr.msk.f32.mxu0 %vm73_vm0, %v4261_v8 }
  0x17   :  { %3501 = vmatmul.mubr.msk.f32.gmra.mrb[2].mxu0 %vm73_vm0, %v4270_v9 }
  0xe6   :  { %v3499_v11 = vpop.f32.mrb[0].mxu0 }
  0xe7   :  { %v158_v12 = vadd.f32 %v3499_v11, %v3189_v10  ;;  %v152_v13 = vpop.f32.mrb[1].mxu0 }
  0xe8   :  { %v153_v14 = vadd.f32 %v3189_v10, %v152_v13 }
  0xea   :  { %382 = vrot.lane.b32.xlu1 %v153_v14, %s4141_s26  ;;  %3507 = vmatprep.mubr.msk.f32.mxu1 %vm177_vm1, %v153_v14  ;;  %v4279_v15 = vpack.i.bf16 %v158_v12, %v153_v14  ;;  %v3502_v16 = vpop.f32.mrb[2].mxu0 }
  0xeb   :  { %v4281_v17 = vadd.f32 %v3502_v16, %v3189_v10  ;;  %v162_v18 = vpop.f32.mrb[3].mxu0 }
  0xec   :  { %3962 = vrot.lane.b32.xlu0 %v4279_v15, %s4142_s0  ;;  %v4285_v19 = vadd.f32 %v3189_v10, %v162_v18 }
  0xee   :  { %v4289_v20 = vpack.i.bf16 %v4281_v17, %v4285_v19 }
  0xf0   :  { %3967 = vrot.lane.b32.xlu0 %v4279_v15, %s4143_s27  ;;  %3972 = vrot.lane.b32.xlu1 %v4289_v20, %s4142_s0 }
  0xf4   :  { %384 = vrot.lane.b32.xlu0 %v158_v12, %s4141_s26 }
 0x15c   :  { %v383_v21 = vpop.permute.xlu1 %382 }
 0x15d   :  { %3521 = vmatprep.mubr.msk.f32.mxu0 %vm177_vm1, %v383_v21 }
 0x15e   :  { %v3963_v22 = vpop.permute.xlu0 %3962 }
 0x15f   :  { %v3965_v23 = vunpack.i.h.bf16 %v3963_v22  ;;  %v3964_v24 = vunpack.i.l.bf16 %v3963_v22 }
 0x161   :  { %v3769_v26 = vpack.c.bf16 %v3965_v23, %v3964_v24 }
 0x162   :  { %v3968_v27 = vpop.permute.xlu0 %3967  ;;  %v3973_v28 = vpop.permute.xlu1 %3972 }
 0x163   :  { %v3970_v29 = vunpack.i.h.bf16 %v3968_v27  ;;  %v3969_v30 = vunpack.i.l.bf16 %v3968_v27  ;;  %3771 = vmatprep.subr.msk.bf16.mxu1 %vm4299_vm2, %v3769_v26  ;;  %v3975_v31 = vunpack.i.h.bf16 %v3973_v28  ;;  %v3974_v32 = vunpack.i.l.bf16 %v3973_v28 }
 0x164   :  { %3774 = vmatpush3.bf16.xpose.msk.msra.mxu1 %vm4299_vm2, %v3769_v26 }
 0x165   :  { %v3779_v33 = vpack.c.bf16 %v3970_v29, %v3969_v30  ;;  %v3789_v34 = vpack.c.bf16 %v3975_v31, %v3974_v32 }
 0x166   :  { %v385_v35 = vpop.permute.xlu0 %384 }
 0x167   :  { %3781 = vmatprep.subr.msk.bf16.mxu0 %vm4299_vm2, %v3779_v33 }
 0x168   :  { %3784 = vmatpush3.bf16.xpose.msk.msra.mxu0 %vm4299_vm2, %v3779_v33 }
 0x169   :  { %3791 = vmatprep.subr.msk.bf16.mxu0 %vm4299_vm2, %v3789_v34 }
 0x16b   :  { %3508 = vmatmul.mubr.msk.f32.vlgmr.msra.gmra.mrb[0].mxu1 %vm177_vm1, %v158_v12 }
 0x16f   :  { %3522 = vmatmul.mubr.msk.f32.vlgmr.msra.gmra.mrb[4].mxu0 %vm177_vm1, %v385_v35 }
 0x170   :  { %3794 = vmatpush3.bf16.xpose.msk.msra.mxu0 %vm4299_vm2, %v3789_v34  ;;  %3535 = vmatprep.mubr.msk.f32.mxu0 %vm177_vm1, %v4285_v19 }
 0x177   :  { %3536 = vmatmul.mubr.msk.f32.vlgmr.msra.gmra.mrb[6].mxu0 %vm177_vm1, %v4281_v17 }
 0x23e   :  { %v3509_v36 = vpop.f32.mrb[0].mxu1 }
 0x23f   :  { %v262_v38 = vmul.f32 0.25, %v3509_v36  ;;  %v252_v39 = vpop.f32.mrb[1].mxu1 }
 0x240   :  { %v261_v40 = vmul.f32 0.25, %v252_v39 }
 0x241   :  { %v270_v41 = vadd.f32 %v3198_v37, %v262_v38 }
 0x242   :  { %v3523_v42 = vpop.f32.mrb[4].mxu0  ;;  %v269_v43 = vadd.f32 %v3198_v37, %v261_v40 }
 0x243   :  { %v474_v44 = vmul.f32 0.25, %v3523_v42  ;;  %v464_v45 = vpop.f32.mrb[5].mxu0  ;;  %v274_v46 = vsel %vm177_vm1, %v270_v41, -inf }
 0x244   :  { %v473_v47 = vmul.f32 0.25, %v464_v45  ;;  %275 = vmax.xlane.f32.xlu0 %v274_v46  ;;  %v271_v48 = vsel %vm177_vm1, %v269_v43, -inf }
 0x245   :  { %272 = vmax.xlane.f32.xlu1 %v271_v48  ;;  %v476_v49 = vadd.f32 %v3198_v37, %v474_v44 }
 0x246   :  { %v475_v50 = vadd.f32 %v3198_v37, %v473_v47 }
 0x247   :  { %v480_v51 = vsel %vm177_vm1, %v476_v49, -inf }
 0x248   :  { %v477_v52 = vsel %vm177_vm1, %v475_v50, -inf }
 0x249   :  { %478 = vmax.xlane.f32.xlu0 %v477_v52  ;;  %481 = vmax.xlane.f32.xlu1 %v480_v51 }
 0x24a   :  { %v3537_v53 = vpop.f32.mrb[6].mxu0 }
 0x24b   :  { %v689_v55 = vmul.f32 0.25, %v3537_v53  ;;  %v679_v56 = vpop.f32.mrb[7].mxu0 }
 0x24c   :  { %v688_v57 = vmul.f32 0.25, %v679_v56 }
 0x24d   :  { %v697_v58 = vadd.f32 %v4331_v54, %v689_v55 }
 0x24e   :  { %v696_v59 = vadd.f32 %v4331_v54, %v688_v57 }
 0x24f   :  { %v701_v60 = vsel %vm177_vm1, %v697_v58, -inf }
 0x250   :  { %702 = vmax.xlane.f32.xlu1 %v701_v60  ;;  %v698_v61 = vsel %vm177_vm1, %v696_v59, -inf }
 0x251   :  { %699 = vmax.xlane.f32.xlu0 %v698_v61 }
 0x261   :  { %3982 = vrot.lane.b32.xlu1 %v4279_v15, %s4144_s17 }
 0x267   :  { %3977 = vrot.lane.b32.xlu0 %v4279_v15, %s4145_s18 }
 0x2d1   :  { %v276_v62 = vpop.xlane.xlu0 %275 }
 0x2d2   :  { %v278_v63 = vsub.f32 %v270_v41, %v276_v62  ;;  %v273_v0 = vpop.xlane.xlu1 %272 }
 0x2d3   :  { %v277_v1 = vsub.f32 %v269_v43, %v273_v0 }
 0x2d4   :  { %v281_v2 = vmul.f32 1.442695, %v278_v63 }
 0x2d5   :  { %v279_v3 = vmul.f32 1.442695, %v277_v1 }
 0x2d6   :  { %4043 = vpow2.f32 %v281_v2  ;;  %v479_v4 = vpop.xlane.xlu0 %478  ;;  %v482_v6 = vpop.xlane.xlu1 %481 }
 0x2d7   :  { %4045 = vpow2.f32 %v279_v3  ;;  %v483_v10 = vsub.f32 %v475_v50, %v479_v4  ;;  %v484_v11 = vsub.f32 %v476_v49, %v482_v6 }
 0x2d9   :  { %v485_v12 = vmul.f32 1.442695, %v483_v10  ;;  %v487_v13 = vmul.f32 1.442695, %v484_v11 }
 0x2db   :  { %4047 = vpow2.f32 %v485_v12 }
 0x2dc   :  { %4049 = vpow2.f32 %v487_v13 }
 0x2dd   :  { %v703_v14 = vpop.xlane.xlu1 %702 }
 0x2de   :  { %v700_v16 = vpop.xlane.xlu0 %699  ;;  %v705_v40 = vsub.f32 %v697_v58, %v703_v14 }
 0x2df   :  { %v704_v18 = vsub.f32 %v696_v59, %v700_v16 }
 0x2e0   :  { %v4044_v15 = vpop.eup %4043  ;;  %v708_v41 = vmul.f32 1.442695, %v705_v40 }
 0x2e1   :  { %v4046_v21 = vpop.eup %4045  ;;  %v706_v22 = vmul.f32 1.442695, %v704_v18  ;;  %v3983_v23 = vpop.permute.xlu1 %3982  ;;  %v286_v24 = vsel %vm177_vm1, %v4044_v15, 0.0 }
 0x2e2   :  { %v3985_v26 = vunpack.i.h.bf16 %v3983_v23  ;;  %v3978_v27 = vpop.permute.xlu0 %3977  ;;  %287 = vadd.xlane.f32.xlu1 %v286_v24  ;;  %v283_v28 = vsel %vm177_vm1, %v4046_v21, 0.0  ;;  %v3984_v29 = vunpack.i.l.bf16 %v3983_v23 }
 0x2e3   :  { %4051 = vpow2.f32 %v706_v22  ;;  %v3980_v30 = vunpack.i.h.bf16 %v3978_v27  ;;  %v3979_v31 = vunpack.i.l.bf16 %v3978_v27  ;;  %284 = vadd.xlane.f32.xlu0 %v283_v28 }
 0x2e4   :  { %v3785_v37 = vpack.c.bf16 %v3985_v26, %v3984_v29  ;;  %4053 = vpow2.f32 %v708_v41  ;;  %v1027_v41 = vld [vmem:[%s5055_s5] sm:$0xff] }
 0x2e5   :  { %v4048_v32 = vpop.eup %4047  ;;  %v3775_v33 = vpack.c.bf16 %v3980_v30, %v3979_v31 }
 0x2e6   :  { %v4050_v34 = vpop.eup %4049  ;;  %v489_v35 = vsel %vm177_vm1, %v4048_v32, 0.0 }
 0x2e7   :  { %3776 = vmatprep.subr.bf16.mxu1 %v3775_v33  ;;  %490 = vadd.xlane.f32.xlu0 %v489_v35  ;;  %v492_v36 = vsel %vm177_vm1, %v4050_v34, 0.0 }
 0x2e8   :  { %493 = vadd.xlane.f32.xlu1 %v492_v36  ;;  %3778 = vmatpush3.bf16.msra.mxu1 %v3775_v33 }
 0x2e9   :  { %3786 = vmatprep.subr.bf16.mxu1 %v3785_v37 }
 0x2ed   :  { %v4052_v38 = vpop.eup %4051 }
 0x2ee   :  { %v710_v39 = vsel %vm177_vm1, %v4052_v38, 0.0  ;;  %v4054_v42 = vpop.eup %4053 }
 0x2ef   :  { %711 = vadd.xlane.f32.xlu0 %v710_v39  ;;  %v713_v43 = vsel %vm177_vm1, %v4054_v42, 0.0 }
 0x2f9   :  { %3987 = vrot.lane.b32.xlu1 %v4289_v20, %s4145_s18 }
 0x305   :  { %3992 = vrot.lane.b32.xlu0 %v4289_v20, %s4143_s27 }
 0x309   :  { %812 = vrot.lane.b32.xlu0 %v4281_v17, %s4141_s26 }
 0x31d   :  { %714 = vadd.xlane.f32.xlu1 %v713_v43 }
 0x32e   :  { %810 = vrot.lane.b32.xlu1 %v4285_v19, %s4141_s26 }
 0x36f   :  { %v288_v44 = vpop.xlane.xlu1 %287 }
 0x370   :  { %4055 = vrcp.f32 %v288_v44  ;;  %v285_v45 = vpop.xlane.xlu0 %284 }
 0x371   :  { %4057 = vrcp.f32 %v285_v45 }
 0x374   :  { %v491_v46 = vpop.xlane.xlu0 %490 }
 0x375   :  { %4059 = vrcp.f32 %v491_v46  ;;  %v494_v47 = vpop.xlane.xlu1 %493 }
 0x376   :  { %4061 = vrcp.f32 %v494_v47 }
 0x379   :  { %v3988_v48 = vpop.permute.xlu1 %3987 }
 0x37a   :  { %v4056_v49 = vpop.eup %4055  ;;  %v3990_v50 = vunpack.i.h.bf16 %v3988_v48  ;;  %v3989_v51 = vunpack.i.l.bf16 %v3988_v48  ;;  %v1030_v48 = vld [vmem:[%s5055_s5 + $0x18] sm:$0xff] }
 0x37b   :  { %v4058_v17 = vpop.eup %4057  ;;  %v292_v52 = vmul.f32 %v4056_v49, %v4044_v15 }
 0x37c   :  { %v712_v53 = vpop.xlane.xlu0 %711  ;;  %v291_v55 = vmul.f32 %v4058_v17, %v4046_v21  ;;  %v3795_v56 = vpack.c.bf16 %v3990_v50, %v3989_v51 }
 0x37d   :  { %4063 = vrcp.f32 %v712_v53  ;;  %294 = vst.msk [vmem:[%s5054_s16 + $0x8] sm:$0xff] %vm177_vm1, %v292_v52 }
 0x37e   :  { %293 = vst.msk [vmem:[%s5054_s16] sm:$0xff] %vm177_vm1, %v291_v55  ;;  %3514 = vmatprep.mubr.msk.f32.mxu1 %vm177_vm1, %v291_v55 }
 0x37f   :  { %v4060_v19 = vpop.eup %4059  ;;  %3515 = vmatmul.mubr.msk.f32.vlgmr.msra.gmra.mrb[2].mxu1 %vm177_vm1, %v292_v52 }
 0x380   :  { %v4062_v57 = vpop.eup %4061  ;;  %3788 = vmatpush3.bf16.msra.mxu1 %v3785_v37  ;;  %v3993_v58 = vpop.permute.xlu0 %3992  ;;  %v497_v59 = vmul.f32 %v4060_v19, %v4048_v32 }
 0x381   :  { %v3995_v60 = vunpack.i.h.bf16 %v3993_v58  ;;  %v3994_v61 = vunpack.i.l.bf16 %v3993_v58  ;;  %3796 = vmatprep.subr.bf16.mxu1 %v3795_v56  ;;  %v498_v62 = vmul.f32 %v4062_v57, %v4050_v34 }
 0x382   :  { %3205 = vst.msk [vmem:[%s5054_s16 + $0x10] sm:$0xff] %vm177_vm1, %v497_v59  ;;  %3528 = vmatprep.mubr.msk.f32.mxu1 %vm177_vm1, %v497_v59 }
 0x383   :  { %v3799_v63 = vpack.c.bf16 %v3995_v60, %v3994_v61  ;;  %3206 = vst.msk [vmem:[%s5054_s16 + $0x18] sm:$0xff] %vm177_vm1, %v498_v62  ;;  %3529 = vmatmul.mubr.msk.f32.vlgmr.msra.gmra.mrb[4].mxu1 %vm177_vm1, %v498_v62  ;;  %v3226_v60 = vld [vmem:[%s5056_s6] ss:$0 sm:$0xff] }
 0x384   :  { %3798 = vmatpush3.bf16.msra.mxu1 %v3795_v56  ;;  %v813_v10 = vpop.permute.xlu0 %812 }
 0x385   :  { %3801 = vmatprep.subr.msk.bf16.mxu1 %vm4299_vm2, %v3799_v63 }
 0x387   :  { %v4064_v0 = vpop.eup %4063 }
 0x388   :  { %v718_v1 = vmul.f32 %v4064_v0, %v4052_v38 }
 0x38a   :  { %3214 = vst.msk [vmem:[%s5054_s16 + $0x20] sm:$0xff] %vm177_vm1, %v718_v1  ;;  %3542 = vmatprep.mubr.msk.f32.mxu1 %vm177_vm1, %v718_v1 }
 0x3aa   :  { %v715_v2 = vpop.xlane.xlu1 %714 }
 0x3ab   :  { %4065 = vrcp.f32 %v715_v2 }
 0x3ae   :  { %v811_v6 = vpop.permute.xlu1 %810 }
 0x3b5   :  { %v4066_v3 = vpop.eup %4065 }
 0x3b6   :  { %v719_v4 = vmul.f32 %v4066_v3, %v4054_v42  ;;  %v1028_v42 = vld [vmem:[%s5055_s5 + $0x8] sm:$0xff]  ;;  %v4147_v3 = vmov 0  }
 0x3b7   :  { %v3809_v46 = vpack.c.bf16 %v1028_v42, %v1027_v41  ;;  %4001 = vset.pattern.permute.xlu1 %v4147_v3  ;;  %4002 = vset.pattern.permute.xlu0 %v4147_v3  ;;  %v61_v41 = vld [vmem:[%s5057_s2 + $0x18] sm:$0xff]  ;;  %v59_v42 = vld [vmem:[%s5057_s2 + $0x8] sm:$0xff] }
 0x3b8   :  { %3215 = vst.msk [vmem:[%s5054_s16 + $0x28] sm:$0xff] %vm177_vm1, %v719_v4  ;;  %3543 = vmatmul.mubr.msk.f32.vlgmr.msra.gmra.mrb[6].mxu1 %vm177_vm1, %v719_v4 }
 0x3b9   :  { %3804 = vmatpush3.bf16.xpose.msk.msra.mxu1 %vm4299_vm2, %v3799_v63  ;;  %3549 = vmatprep.mubr.msk.f32.mxu1 %vm177_vm1, %v811_v6 }
 0x3c0   :  { %3550 = vmatmul.mubr.msk.f32.vlgmr.msra.gmra.mrb[8].mxu1 %vm177_vm1, %v813_v10 }
 0x452   :  { %v4391_v11 = vpop.f32.mrb[2].mxu1 }
 0x453   :  { %v373_v12 = vpop.f32.mrb[3].mxu1 }
 0x456   :  { %v3530_v13 = vpop.f32.mrb[4].mxu1 }
 0x457   :  { %v580_v14 = vpop.f32.mrb[5].mxu1 }
 0x48b   :  { %v4393_v16 = vpop.f32.mrb[6].mxu1 }
 0x48c   :  { %v4395_v18 = vpop.f32.mrb[7].mxu1 }
 0x493   :  { %v3551_v15 = vpop.f32.mrb[8].mxu1 }
 0x494   :  { %v902_v21 = vmul.f32 0.25, %v3551_v15  ;;  %v892_v22 = vpop.f32.mrb[9].mxu1 }
 0x495   :  { %v901_v23 = vmul.f32 0.25, %v892_v22 }
 0x496   :  { %v904_v24 = vadd.f32 %v4331_v54, %v902_v21 }
 0x497   :  { %v903_v26 = vadd.f32 %v4331_v54, %v901_v23 }
 0x498   :  { %v908_v27 = vsel %vm177_vm1, %v904_v24, -inf }
 0x499   :  { %909 = vmax.xlane.f32.xlu0 %v908_v27  ;;  %v905_v28 = vsel %vm177_vm1, %v903_v26, -inf }
 0x49a   :  { %906 = vmax.xlane.f32.xlu1 %v905_v28 }
 0x526   :  { %v910_v29 = vpop.xlane.xlu0 %909 }
 0x527   :  { %v912_v30 = vsub.f32 %v904_v24, %v910_v29  ;;  %v907_v31 = vpop.xlane.xlu1 %906 }
 0x528   :  { %v911_v32 = vsub.f32 %v903_v26, %v907_v31 }
 0x529   :  { %v915_v33 = vmul.f32 1.442695, %v912_v30 }
 0x52a   :  { %v913_v34 = vmul.f32 1.442695, %v911_v32 }
 0x52b   :  { %4067 = vpow2.f32 %v915_v33 }
 0x52c   :  { %4069 = vpow2.f32 %v913_v34 }
 0x535   :  { %v4068_v35 = vpop.eup %4067 }
 0x536   :  { %v4070_v36 = vpop.eup %4069  ;;  %v920_v37 = vsel %vm177_vm1, %v4068_v35, 0.0 }
 0x537   :  { %921 = vadd.xlane.f32.xlu1 %v920_v37  ;;  %v917_v54 = vsel %vm177_vm1, %v4070_v36, 0.0 }
 0x538   :  { %918 = vadd.xlane.f32.xlu0 %v917_v54 }
 0x548   :  { %591 = vrot.lane.b32.xlu1 %v580_v14, %s5068_s21 }
 0x54c   :  { %593 = vrot.lane.b32.xlu1 %v3530_v13, %s5068_s21 }
 0x54e   :  { %3997 = vrot.lane.b32.xlu0 %v4289_v20, %s4144_s17  ;;  %v1029_v20 = vld [vmem:[%s5055_s5 + $0x10] sm:$0xff] }
 0x54f   :  { %v3813_v52 = vpack.c.bf16 %v1030_v48, %v1029_v20  ;;  %v1242_v48 = vld [vmem:[%s5058_s9 + $0x20] sm:$0xff] }
 0x5c4   :  { %v922_v38 = vpop.xlane.xlu1 %921 }
 0x5c5   :  { %4071 = vrcp.f32 %v922_v38  ;;  %v919_v39 = vpop.xlane.xlu0 %918 }
 0x5c6   :  { %4073 = vrcp.f32 %v919_v39 }
 0x5c8   :  { %v592_v50 = vpop.permute.xlu1 %591 }
 0x5c9   :  { %v3998_v40 = vpop.permute.xlu0 %3997  ;;  %v597_v53 = vsel %vm177_vm1, %v373_v12, %v592_v50 }
 0x5ca   :  { %v4000_v43 = vunpack.i.h.bf16 %v3998_v40  ;;  %v3999_v44 = vunpack.i.l.bf16 %v3998_v40 }
 0x5cc   :  { %v3805_v45 = vpack.c.bf16 %v4000_v43, %v3999_v44  ;;  %v594_v55 = vpop.permute.xlu1 %593  ;;  %v1238_v43 = vld [vmem:[%s5058_s9] sm:$0xff]  ;;  %v1239_v44 = vld [vmem:[%s5058_s9 + $0x8] sm:$0xff] }
 0x5cd   :  { %v598_v19 = vsel %vm177_vm1, %v4391_v11, %v594_v55 }
 0x5ce   :  { %3806 = vmatprep.subr.bf16.mxu0 %v3805_v45 }
 0x5cf   :  { %v4072_v47 = vpop.eup %4071  ;;  %3808 = vmatpush3.bf16.msra.mxu0 %v3805_v45  ;;  %v1240_v45 = vld [vmem:[%s5058_s9 + $0x10] sm:$0xff] }
 0x5d0   :  { %v4074_v49 = vpop.eup %4073  ;;  %v926_v17 = vmul.f32 %v4072_v47, %v4068_v35  ;;  %3810 = vmatprep.subr.bf16.mxu0 %v3809_v46  ;;  %v1241_v47 = vld [vmem:[%s5058_s9 + $0x18] sm:$0xff] }
 0x5d1   :  { %v925_v51 = vmul.f32 %v4074_v49, %v4070_v36  ;;  %v3821_v20 = vpack.c.bf16 %v1241_v47, %v1240_v45  ;;  %v1243_v49 = vld [vmem:[%s5058_s9 + $0x28] sm:$0xff] }
 0x5d2   :  { %3223 = vst.msk [vmem:[%s5054_s16 + $0x38] sm:$0xff] %vm177_vm1, %v926_v17 }
 0x5d3   :  { %3222 = vst.msk [vmem:[%s5054_s16 + $0x30] sm:$0xff] %vm177_vm1, %v925_v51  ;;  %3556 = vmatprep.mubr.msk.f32.mxu0 %vm177_vm1, %v925_v51 }
 0x5d4   :  { %3557 = vmatmul.mubr.msk.f32.vlgmr.msra.gmra.mrb[8].mxu0 %vm177_vm1, %v926_v17  ;;  %v3825_v17 = vpack.c.bf16 %v1243_v49, %v1242_v48 }
 0x5d5   :  { %3812 = vmatpush3.bf16.msra.mxu0 %v3809_v46  ;;  %3567 = vmatprep.mubr.msk.f32.mxu0 %vm73_vm0, %v597_v53  ;;  %v3817_v46 = vpack.c.bf16 %v1239_v44, %v1238_v43 }
 0x5d6   :  { %3814 = vmatprep.subr.bf16.mxu0 %v3813_v52 }
 0x5d7   :  { %3818 = vmatprep.subr.bf16.mxu1 %v3817_v46 }
 0x5d8   :  { %3820 = vmatpush3.bf16.msra.mxu1 %v3817_v46 }
 0x5d9   :  { %3816 = vmatpush3.bf16.msra.mxu0 %v3813_v52  ;;  %3822 = vmatprep.subr.bf16.mxu1 %v3821_v20 }
 0x5dc   :  { %3568 = vmatmul.mubr.msk.f32.vlgmr.msra.gmra.mrb[10].mxu0 %vm73_vm0, %v598_v19  ;;  %3824 = vmatpush3.bf16.msra.mxu1 %v3821_v20 }
 0x5dd   :  { %3826 = vmatprep.subr.bf16.mxu1 %v3825_v17 }
 0x5e0   :  { %3828 = vmatpush3.bf16.msra.mxu1 %v3825_v17 }
 0x6a7   :  { %v3558_v56 = vpop.f32.mrb[8].mxu0 }
 0x6a8   :  { %1021 = vrot.lane.b32.xlu1 %v3558_v56, %s5068_s21  ;;  %v1008_v57 = vpop.f32.mrb[9].mxu0 }
 0x6a9   :  { %1019 = vrot.lane.b32.xlu0 %v1008_v57, %s5068_s21 }
 0x6af   :  { %v3569_v58 = vpop.f32.mrb[10].mxu0 }
 0x6b0   :  { %v1116_v59 = vpop.f32.mrb[11].mxu0  ;;  %v1122_v62 = vadd.f32 %v3569_v58, %v3226_v60 }
 0x6b1   :  { %v1117_v61 = vadd.f32 %v3226_v60, %v1116_v59 }
 0x6b2   :  { %v1136_v1 = vadd.f32 %v1122_v62, %v4256_v7 }
 0x6b3   :  { %v1135_v63 = vadd.f32 %v1117_v61, %v4249_v5 }
 0x6b4   :  { %v1144_v2 = vsel %vm73_vm0, %v1136_v1, 0.0 }
 0x6b5   :  { %v1141_v0 = vsel %vm73_vm0, %v1135_v63, 0.0 }
 0x6c8   :  { %1142 = vadd.xlane.f32.xlu0 %v1141_v0 }
 0x6cc   :  { %1145 = vadd.xlane.f32.xlu1 %v1144_v2 }
 0x71a   :  { %v1022_v4 = vpop.permute.xlu1 %1021 }
 0x71b   :  { %v1020_v6 = vpop.permute.xlu0 %1019  ;;  %v1026_v11 = vsel %vm177_vm1, %v4393_v16, %v1022_v4  ;;  %v60_v16 = vld [vmem:[%s5057_s2 + $0x10] sm:$0xff] }
 0x71c   :  { %v1025_v10 = vsel %vm177_vm1, %v4395_v18, %v1020_v6  ;;  %v58_v18 = vld [vmem:[%s5057_s2] sm:$0xff] }
 0x71d   :  { %3570 = vmatprep.mubr.msk.f32.mxu0 %vm73_vm0, %v1025_v10 }
 0x71e   :  { %3571 = vmatmul.mubr.msk.f32.gmra.mrb[12].mxu0 %vm73_vm0, %v1026_v11 }
 0x755   :  { %v1143_v5 = vpop.xlane.xlu0 %1142 }
 0x756   :  { %v1154_v7 = vmul.f32 0.03125, %v1143_v5 }
 0x758   :  { %v4449_v12 = vsub.f32 %v1135_v63, %v1154_v7  ;;  %v3232_v63 = vld [vmem:[%s5060_s8] ss:$0 sm:$0xff] }
 0x759   :  { %v1146_v15 = vpop.xlane.xlu1 %1145 }
 0x75a   :  { %v1162_v13 = vmul.f32 %v4449_v12, %v4449_v12  ;;  %v1155_v23 = vmul.f32 0.03125, %v1146_v15  ;;  %v1246_v15 = vld [vmem:[%s5058_s9 + $0x40] sm:$0xff] }
 0x75c   :  { %v1166_v14 = vsel %vm73_vm0, %v1162_v13, 0.0  ;;  %v4461_v28 = vsub.f32 %v1136_v1, %v1155_v23  ;;  %v1245_v13 = vld [vmem:[%s5058_s9 + $0x38] sm:$0xff] }
 0x75d   :  { %1167 = vadd.xlane.f32.xlu1 %v1166_v14 }
 0x75e   :  { %v1163_v32 = vmul.f32 %v4461_v28, %v4461_v28 }
 0x760   :  { %v1169_v33 = vsel %vm73_vm0, %v1163_v32, 0.0 }
 0x76e   :  { %1216 = vperm.xlu1 %4001, %v58_v18  }
 0x772   :  { %1226 = vperm.xlu1 %4001, %v60_v16  }
 0x7ea   :  { %v1168_v50 = vpop.xlane.xlu1 %1167 }
 0x7eb   :  { %v1178_v51 = vmul.f32 0.03125, %v1168_v50 }
 0x7ed   :  { %v1182_v52 = vadd.f32 1e-05, %v1178_v51 }
 0x7ee   :  { %v4503_v56 = vpop.permute.xlu1 %1216 }
 0x7ef   :  { %4075 = vrsqrt.f32 %v1182_v52 }
 0x7f1   :  { %v3572_v21 = vpop.f32.mrb[12].mxu0 }
 0x7f2   :  { %v1126_v22 = vpop.f32.mrb[13].mxu0  ;;  %v1132_v24 = vadd.f32 %v3572_v21, %v3226_v60  ;;  %v4505_v58 = vpop.permute.xlu1 %1226  ;;  %v1247_v21 = vld [vmem:[%s5058_s9 + $0x48] sm:$0xff] }
 0x7f3   :  { %v1127_v26 = vadd.f32 %v3226_v60, %v1126_v22  ;;  %v3231_v60 = vld [vmem:[%s5059_s7] ss:$0 sm:$0xff]  ;;  %v3833_v23 = vpack.c.bf16 %v1247_v21, %v1246_v15 }
 0x7f4   :  { %v1138_v30 = vadd.f32 %v1132_v24, %v4270_v9 }
 0x7f5   :  { %v1137_v27 = vadd.f32 %v1127_v26, %v4261_v8 }
 0x7f6   :  { %v1150_v31 = vsel %vm73_vm0, %v1138_v30, 0.0 }
 0x7f7   :  { %v1147_v29 = vsel %vm73_vm0, %v1137_v27, 0.0 }
 0x7f8   :  { %1148 = vadd.xlane.f32.xlu0 %v1147_v29  ;;  %v1248_v29 = vld [vmem:[%s5058_s9 + $0x50] sm:$0xff] }
 0x7f9   :  { %v4076_v57 = vpop.eup %4075 }
 0x7fa   :  { %v1190_v59 = vmul.f32 %v4076_v57, %v4449_v12  ;;  %v1244_v12 = vld [vmem:[%s5058_s9 + $0x30] sm:$0xff] }
 0x7fb   :  { %v3829_v14 = vpack.c.bf16 %v1245_v13, %v1244_v12 }
 0x7fc   :  { %1151 = vadd.xlane.f32.xlu0 %v1150_v31  ;;  %v1200_v61 = vmul.f32 %v3231_v60, %v1190_v59 }
 0x7fd   :  { %3830 = vmatprep.subr.bf16.mxu1 %v3829_v14 }
 0x7fe   :  { %v1210_v2 = vadd.f32 %v3232_v63, %v1200_v61  ;;  %3832 = vmatpush3.bf16.msra.mxu1 %v3829_v14  ;;  %v1439_v61 = vld [vmem:[%s5061_s11] sm:$0xff] }
 0x7ff   :  { %3834 = vmatprep.subr.bf16.mxu1 %v3833_v23 }
 0x800   :  { %1170 = vadd.xlane.f32.xlu0 %v1169_v33  ;;  %v4516_v11 = vmul.f32 %v4503_v56, %v1210_v2 }
 0x802   :  { %v1256_v18 = vrot.slane %v4516_v11, 7  ;;  %3836 = vmatpush3.bf16.msra.mxu1 %v3833_v23 }
 0x885   :  { %v1149_v34 = vpop.xlane.xlu0 %1148 }
 0x886   :  { %v1156_v35 = vmul.f32 0.03125, %v1149_v34 }
 0x888   :  { %v4469_v36 = vsub.f32 %v1137_v27, %v1156_v35 }
 0x889   :  { %v1152_v8 = vpop.xlane.xlu0 %1151 }
 0x88a   :  { %v1157_v37 = vmul.f32 0.03125, %v1152_v8  ;;  %v1164_v54 = vmul.f32 %v4469_v36, %v4469_v36 }
 0x88c   :  { %v4473_v9 = vsub.f32 %v1138_v30, %v1157_v37  ;;  %v1172_v38 = vsel %vm73_vm0, %v1164_v54, 0.0  ;;  %v1249_v30 = vld [vmem:[%s5058_s9 + $0x58] sm:$0xff] }
 0x88d   :  { %1173 = vadd.xlane.f32.xlu1 %v1172_v38  ;;  %v1171_v53 = vpop.xlane.xlu0 %1170  ;;  %v3837_v32 = vpack.c.bf16 %v1249_v30, %v1248_v29 }
 0x88e   :  { %v1165_v39 = vmul.f32 %v4473_v9, %v4473_v9  ;;  %v1179_v55 = vmul.f32 0.03125, %v1171_v53 }
 0x88f   :  { %3838 = vmatprep.subr.bf16.mxu1 %v3837_v32 }
 0x890   :  { %v1175_v40 = vsel %vm73_vm0, %v1165_v39, 0.0  ;;  %v1183_v19 = vadd.f32 1e-05, %v1179_v55  ;;  %3840 = vmatpush3.bf16.msra.mxu1 %v3837_v32 }
 0x891   :  { %1176 = vadd.xlane.f32.xlu0 %v1175_v40 }
 0x892   :  { %4077 = vrsqrt.f32 %v1183_v19 }
 0x89c   :  { %v4078_v62 = vpop.eup %4077 }
 0x89d   :  { %v1191_v4 = vmul.f32 %v4078_v62, %v4461_v28  ;;  %v4538_v28 = vsel %vm1255_vm3, 0.0, %v1256_v18  ;;  %v1440_v62 = vld [vmem:[%s5061_s11 + $0x8] sm:$0xff] }
 0x89e   :  { %1231 = vperm.xlu1 %4001, %v61_v41   ;;  %v1277_v8 = vrot.slane %v4538_v28, 1  ;;  %v1300_v20 = vrot.slane %v4538_v28, 2 }
 0x89f   :  { %v1201_v7 = vmul.f32 %v3231_v60, %v1191_v4 }
 0x8a1   :  { %v1211_v16 = vadd.f32 %v3232_v63, %v1201_v7 }
 0x8a7   :  { %1221 = vperm.xlu0 %4002, %v59_v42  }
 0x91a   :  { %v1174_v0 = vpop.xlane.xlu1 %1173 }
 0x91b   :  { %v1180_v1 = vmul.f32 0.03125, %v1174_v0  ;;  %v3841_v0 = vpack.c.bf16 %v1440_v62, %v1439_v61 }
 0x91d   :  { %v1184_v3 = vadd.f32 1e-05, %v1180_v1  ;;  %v1442_v1 = vld [vmem:[%s5061_s11 + $0x18] sm:$0xff]  ;;  %3842 = vmatprep.subr.bf16.mxu0 %v3841_v0 }
 0x91e   :  { %v1177_v6 = vpop.xlane.xlu0 %1176  ;;  %v4561_v46 = vpop.permute.xlu1 %1231  ;;  %3844 = vmatpush3.bf16.msra.mxu0 %v3841_v0 }
 0x91f   :  { %4079 = vrsqrt.f32 %v1184_v3  ;;  %v1181_v10 = vmul.f32 0.03125, %v1177_v6  ;;  %v1443_v6 = vld [vmem:[%s5061_s11 + $0x20] sm:$0xff] }
 0x921   :  { %v1185_v5 = vadd.f32 1e-05, %v1181_v10  ;;  %v1444_v10 = vld [vmem:[%s5061_s11 + $0x28] sm:$0xff] }
 0x923   :  { %4081 = vrsqrt.f32 %v1185_v5  ;;  %v3849_v5 = vpack.c.bf16 %v1444_v10, %v1443_v6 }
 0x926   :  { %v4531_v22 = vpop.permute.xlu0 %1221 }
 0x927   :  { %v4534_v24 = vmul.f32 %v4531_v22, %v1211_v16 }
 0x929   :  { %v4080_v26 = vpop.eup %4079  ;;  %v1257_v27 = vrot.slane %v4534_v24, 7 }
 0x92a   :  { %v1192_v31 = vmul.f32 %v4080_v26, %v4469_v36 }
 0x92b   :  { %v4548_v33 = vsel %vm1255_vm3, %v1256_v18, %v1257_v27  ;;  %v1270_v34 = vsel %vm1255_vm3, %v1257_v27, 0.0 }
 0x92c   :  { %v1202_v35 = vmul.f32 %v3231_v60, %v1192_v31  ;;  %v1278_v37 = vrot.slane %v4548_v33, 1  ;;  %v1280_v36 = vrot.slane %v1270_v34, 1  ;;  %v1301_v45 = vrot.slane %v4548_v33, 2 }
 0x92d   :  { %v4082_v54 = vpop.eup %4081  ;;  %v1303_v17 = vrot.slane %v1270_v34, 2 }
 0x92e   :  { %v1193_v38 = vmul.f32 %v4082_v54, %v4473_v9  ;;  %v1279_v39 = vsel %vm1276_vm4, %v1277_v8, %v1278_v37  ;;  %v1212_v40 = vadd.f32 %v3232_v63, %v1202_v35  ;;  %v1281_v44 = vsel %vm1276_vm4, %v1278_v37, %v1280_v36  ;;  %v1446_v37 = vld [vmem:[%s5061_s11 + $0x38] sm:$0xff] }
 0x92f   :  { %1287 = vrot.lane.b32.xlu1 %v1279_v39, %s4148_s22  ;;  %v1302_v49 = vsel %vm1299_vm5, %v1300_v20, %v1301_v45  ;;  %v1304_v55 = vsel %vm1299_vm5, %v1301_v45, %v1303_v17 }
 0x930   :  { %v1203_v41 = vmul.f32 %v3231_v60, %v1193_v38  ;;  %v4557_v42 = vmul.f32 %v4505_v58, %v1212_v40  ;;  %v3233_v38 = vld [vmem:[%s5062_s10] ss:$0 sm:$0xff] }
 0x932   :  { %v1213_v43 = vadd.f32 %v3232_v63, %v1203_v41  ;;  %v1259_v9 = vrot.slane %v4557_v42, 7  ;;  %v1441_v63 = vld [vmem:[%s5061_s11 + $0x10] sm:$0xff] }
 0x933   :  { %1289 = vrot.lane.b32.xlu1 %v1281_v44, %s4148_s22  ;;  %v3845_v4 = vpack.c.bf16 %v1442_v1, %v1441_v63 }
 0x934   :  { %v4566_v47 = vmul.f32 %v4561_v46, %v1213_v43  ;;  %v1269_v50 = vsel %vm1255_vm3, 0.0, %v1259_v9 }
 0x935   :  { %v1305_v52 = vrot.slane %v1269_v50, 2  ;;  %v1282_v60 = vrot.slane %v1269_v50, 1  ;;  %3846 = vmatprep.subr.bf16.mxu0 %v3845_v4 }
 0x936   :  { %v1260_v48 = vrot.slane %v4566_v47, 7  ;;  %3848 = vmatpush3.bf16.msra.mxu0 %v3845_v4 }
 0x937   :  { %1310 = vrot.lane.b32.xlu1 %v1302_v49, %s4145_s18  ;;  %3850 = vmatprep.subr.bf16.mxu0 %v3849_v5 }
 0x938   :  { %v1261_v51 = vsel %vm1255_vm3, %v1259_v9, %v1260_v48  ;;  %v1271_v59 = vsel %vm1255_vm3, %v1260_v48, 0.0 }
 0x939   :  { %v1306_v53 = vrot.slane %v1261_v51, 2  ;;  %v1283_v19 = vrot.slane %v1261_v51, 1  ;;  %v1285_v3 = vrot.slane %v1271_v59, 1  ;;  %v1308_v12 = vrot.slane %v1271_v59, 2 }
 0x93a   :  { %3852 = vmatpush3.bf16.msra.mxu0 %v3849_v5 }
 0x93b   :  { %1312 = vrot.lane.b32.xlu1 %v1304_v55, %s4145_s18  ;;  %v1307_v57 = vsel %vm1299_vm5, %v1305_v52, %v1306_v53  ;;  %v1284_v2 = vsel %vm1276_vm4, %v1282_v60, %v1283_v19  ;;  %v1286_v7 = vsel %vm1276_vm4, %v1283_v19, %v1285_v3  ;;  %v1309_v13 = vsel %vm1299_vm5, %v1306_v53, %v1308_v12 }
 0x93c   :  { %1314 = vrot.lane.b32.xlu0 %v1307_v57, %s4145_s18 }
 0x93f   :  { %1291 = vrot.lane.b32.xlu1 %v1284_v2, %s4148_s22 }
 0x943   :  { %1293 = vrot.lane.b32.xlu1 %v1286_v7, %s4148_s22 }
 0x947   :  { %1316 = vrot.lane.b32.xlu1 %v1309_v13, %s4145_s18 }
 0x9a1   :  { %v1288_v14 = vpop.permute.xlu1 %1287 }
 0x9a2   :  { %v1322_v16 = vsel %vm73_vm0, %v4538_v28, %v1288_v14 }
 0x9a5   :  { %v1290_v18 = vpop.permute.xlu1 %1289 }
 0x9a6   :  { %v1323_v23 = vsel %vm73_vm0, %v4548_v33, %v1290_v18  ;;  %v1445_v33 = vld [vmem:[%s5061_s11 + $0x30] sm:$0xff] }
 0x9a7   :  { %v3853_v54 = vpack.c.bf16 %v1446_v37, %v1445_v33 }
 0x9a9   :  { %v1311_v15 = vpop.permute.xlu1 %1310  ;;  %3854 = vmatprep.subr.bf16.mxu0 %v3853_v54 }
 0x9aa   :  { %v1327_v21 = vsel %vm1326_vm6, %v1322_v16, %v1311_v15  ;;  %3856 = vmatpush3.bf16.msra.mxu0 %v3853_v54 }
 0x9ab   :  { %3597 = vmatprep.mubr.msk.f32.mxu1 %vm1337_vm7, %v1327_v21 }
 0x9ad   :  { %v1313_v26 = vpop.permute.xlu1 %1312 }
 0x9ae   :  { %v1328_v27 = vsel %vm1326_vm6, %v1323_v23, %v1313_v26  ;;  %v1315_v30 = vpop.permute.xlu0 %1314 }
 0x9af   :  { %3598 = vmatmul.mubr.msk.f32.vlgmr.msra.gmra.mrb[10].mxu1 %vm1337_vm7, %v1328_v27 }
 0x9b1   :  { %v1292_v29 = vpop.permute.xlu1 %1291 }
 0x9b2   :  { %v1324_v31 = vsel %vm73_vm0, %v1269_v50, %v1292_v29  ;;  %v3238_v50 = vld [vmem:[%s5063_s12] ss:$0 sm:$0xff] }
 0x9b3   :  { %v1329_v32 = vsel %vm1326_vm6, %v1324_v31, %v1315_v30  ;;  %v3245_v31 = vld [vmem:[%s5071_s23 + $0x20] sm:$0xff] }
 0x9b4   :  { %3600 = vmatprep.mubr.msk.f32.mxu1 %vm1337_vm7, %v1329_v32  ;;  %v3246_v32 = vld [vmem:[%s5071_s23 + $0x28] sm:$0xff] }
 0x9b5   :  { %v1294_v28 = vpop.permute.xlu1 %1293 }
 0x9b6   :  { %v1325_v34 = vsel %vm73_vm0, %v1261_v51, %v1294_v28  ;;  %v3857_v28 = vpack.c.bf16 %v3246_v32, %v3245_v31 }
 0x9b8   :  { %3858 = vmatprep.subr.bf16.mxu0 %v3857_v28 }
 0x9b9   :  { %v1317_v35 = vpop.permute.xlu1 %1316 }
 0x9ba   :  { %v1330_v8 = vsel %vm1326_vm6, %v1325_v34, %v1317_v35  ;;  %v3247_v34 = vld [vmem:[%s5071_s23 + $0x30] sm:$0xff]  ;;  %v3248_v35 = vld [vmem:[%s5071_s23 + $0x38] sm:$0xff] }
 0x9bb   :  { %3601 = vmatmul.mubr.msk.f32.gmra.mrb[12].mxu1 %vm1337_vm7, %v1330_v8  ;;  %v3861_v8 = vpack.c.bf16 %v3248_v35, %v3247_v34 }
 0xa82   :  { %v3599_v39 = vpop.f32.mrb[10].mxu1 }
 0xa83   :  { %v1422_v36 = vadd.f32 %v3599_v39, %v3233_v38  ;;  %v1416_v40 = vpop.f32.mrb[11].mxu1 }
 0xa84   :  { %v1417_v41 = vadd.f32 %v3233_v38, %v1416_v40 }
 0xa85   :  { %v1436_v44 = vmax.f32 %v1422_v36, 0.0 }
 0xa86   :  { %v1435_v43 = vmax.f32 %v1417_v41, 0.0 }
 0xa88   :  { %3619 = vmatprep.mubr.msk.f32.mxu0 %vm1326_vm6, %v1435_v43 }
 0xa89   :  { %3620 = vmatmul.mubr.msk.f32.vlgmr.msra.gmra.mrb[14].mxu0 %vm1326_vm6, %v1436_v44  ;;  %v3243_v44 = vld [vmem:[%s5064_s13] ss:$0 sm:$0xff] }
 0xa8a   :  { %3860 = vmatpush3.bf16.msra.mxu0 %v3857_v28 }
 0xa8b   :  { %3862 = vmatprep.subr.bf16.mxu0 %v3861_v8 }
 0xa8e   :  { %v3602_v45 = vpop.f32.mrb[12].mxu1  ;;  %3864 = vmatpush3.bf16.msra.mxu0 %v3861_v8 }
 0xa8f   :  { %v1432_v9 = vadd.f32 %v3602_v45, %v3233_v38  ;;  %v1426_v20 = vpop.f32.mrb[13].mxu1 }
 0xa90   :  { %v1427_v48 = vadd.f32 %v3233_v38, %v1426_v20 }
 0xa91   :  { %v1438_v17 = vmax.f32 %v1432_v9, 0.0 }
 0xa92   :  { %v1437_v49 = vmax.f32 %v1427_v48, 0.0 }
 0xa94   :  { %3622 = vmatprep.mubr.msk.f32.mxu0 %vm1326_vm6, %v1437_v49 }
 0xa95   :  { %3623 = vmatmul.mubr.msk.f32.gmra.mrb[16].mxu0 %vm1326_vm6, %v1438_v17  ;;  %v3244_v17 = vld [vmem:[%s5065_s14] ss:$0 sm:$0xff] }
 0xb5c   :  { %v3621_v51 = vpop.f32.mrb[14].mxu0 }
 0xb5d   :  { %v1538_v52 = vadd.f32 %v3621_v51, %v3238_v50  ;;  %v1532_v53 = vpop.f32.mrb[15].mxu0 }
 0xb5e   :  { %v1533_v55 = vadd.f32 %v3238_v50, %v1532_v53 }
 0xb5f   :  { %v1552_v19 = vadd.f32 %v1538_v52, %v4534_v24 }
 0xb60   :  { %v1551_v57 = vadd.f32 %v1533_v55, %v4516_v11 }
 0xb61   :  { %v1560_v59 = vsel %vm73_vm0, %v1552_v19, 0.0 }
 0xb62   :  { %1561 = vadd.xlane.f32.xlu1 %v1560_v59  ;;  %v1557_v60 = vsel %vm73_vm0, %v1551_v57, 0.0 }
 0xb63   :  { %1558 = vadd.xlane.f32.xlu0 %v1557_v60 }
 0xb68   :  { %v3624_v61 = vpop.f32.mrb[16].mxu0 }
 0xb69   :  { %v1542_v62 = vpop.f32.mrb[17].mxu0  ;;  %v1548_v63 = vadd.f32 %v3624_v61, %v3238_v50 }
 0xb6a   :  { %v1543_v0 = vadd.f32 %v3238_v50, %v1542_v62 }
 0xb6b   :  { %v1554_v3 = vadd.f32 %v1548_v63, %v4566_v47 }
 0xb6c   :  { %v1553_v1 = vadd.f32 %v1543_v0, %v4557_v42 }
 0xb6d   :  { %v1566_v24 = vsel %vm73_vm0, %v1554_v3, 0.0 }
 0xb6e   :  { %v1563_v2 = vsel %vm73_vm0, %v1553_v1, 0.0 }
 0xb6f   :  { %1564 = vadd.xlane.f32.xlu0 %v1563_v2 }
 0xb73   :  { %1567 = vadd.xlane.f32.xlu0 %v1566_v24 }
 0xbef   :  { %v1562_v11 = vpop.xlane.xlu1 %1561 }
 0xbf0   :  { %v1570_v4 = vmul.f32 0.03125, %v1562_v11  ;;  %v1559_v6 = vpop.xlane.xlu0 %1558 }
 0xbf1   :  { %v1569_v10 = vmul.f32 0.03125, %v1559_v6 }
 0xbf2   :  { %v1574_v5 = vsub.f32 %v1552_v19, %v1570_v4  ;;  %v3250_v4 = vld [vmem:[%s5052_s4 + $0x1] ss:$0 sm:$0xff]  ;;  %s5074_s4 = smov 16  }
 0xbf3   :  { %v1573_v7 = vsub.f32 %v1551_v57, %v1569_v10 }
 0xbf4   :  { %v1578_v12 = vmul.f32 %v1574_v5, %v1574_v5 }
 0xbf5   :  { %v1577_v13 = vmul.f32 %v1573_v7, %v1573_v7 }
 0xbf6   :  { %v1584_v14 = vsel %vm73_vm0, %v1578_v12, 0.0 }
 0xbf7   :  { %1585 = vadd.xlane.f32.xlu0 %v1584_v14  ;;  %v1581_v42 = vsel %vm73_vm0, %v1577_v13, 0.0 }
 0xbf8   :  { %1582 = vadd.xlane.f32.xlu1 %v1581_v42 }
 0xbfc   :  { %v1565_v18 = vpop.xlane.xlu0 %1564 }
 0xbfd   :  { %v1571_v47 = vmul.f32 0.03125, %v1565_v18 }
 0xbff   :  { %v1575_v16 = vsub.f32 %v1553_v1, %v1571_v47 }
 0xc00   :  { %v1568_v15 = vpop.xlane.xlu0 %1567 }
 0xc01   :  { %v1572_v21 = vmul.f32 0.03125, %v1568_v15  ;;  %v1579_v23 = vmul.f32 %v1575_v16, %v1575_v16 }
 0xc03   :  { %v1576_v26 = vsub.f32 %v1554_v3, %v1572_v21  ;;  %v1587_v27 = vsel %vm73_vm0, %v1579_v23, 0.0 }
 0xc04   :  { %1588 = vadd.xlane.f32.xlu1 %v1587_v27 }
 0xc05   :  { %v1580_v29 = vmul.f32 %v1576_v26, %v1576_v26 }
 0xc07   :  { %v1590_v30 = vsel %vm73_vm0, %v1580_v29, 0.0 }
 0xc08   :  { %1591 = vadd.xlane.f32.xlu0 %v1590_v30 }
 0xc84   :  { %v1586_v33 = vpop.xlane.xlu0 %1585 }
 0xc85   :  { %v1594_v37 = vmul.f32 0.03125, %v1586_v33  ;;  %v1583_v54 = vpop.xlane.xlu1 %1582 }
 0xc86   :  { %v1593_v38 = vmul.f32 0.03125, %v1583_v54 }
 0xc87   :  { %v1598_v39 = vadd.f32 1e-05, %v1594_v37 }
 0xc88   :  { %v1597_v36 = vadd.f32 1e-05, %v1593_v38 }
 0xc89   :  { %4083 = vrsqrt.f32 %v1598_v39 }
 0xc8a   :  { %4085 = vrsqrt.f32 %v1597_v36 }
 0xc91   :  { %v1589_v40 = vpop.xlane.xlu1 %1588 }
 0xc92   :  { %v1595_v41 = vmul.f32 0.03125, %v1589_v40 }
 0xc93   :  { %v4084_v43 = vpop.eup %4083 }
 0xc94   :  { %v4086_v45 = vpop.eup %4085  ;;  %v1606_v9 = vmul.f32 %v4084_v43, %v1574_v5  ;;  %v1599_v20 = vadd.f32 1e-05, %v1595_v41  ;;  %v4139_v43 = vld [vmem:[%s5053_s1] ss:$0 sm:$0xff] }
 0xc95   :  { %v1605_v48 = vmul.f32 %v4086_v45, %v1573_v7  ;;  %v1592_v49 = vpop.xlane.xlu0 %1591 }
 0xc96   :  { %v1616_v50 = vmul.f32 %v3243_v44, %v1606_v9  ;;  %4087 = vrsqrt.f32 %v1599_v20  ;;  %v1596_v51 = vmul.f32 0.03125, %v1592_v49 }
 0xc97   :  { %v1615_v52 = vmul.f32 %v3243_v44, %v1605_v48 }
 0xc98   :  { %v1600_v53 = vadd.f32 1e-05, %v1596_v51  ;;  %v1626_v55 = vadd.f32 %v3244_v17, %v1616_v50 }
 0xc99   :  { %v1625_v19 = vadd.f32 %v3244_v17, %v1615_v52 }
 0xc9a   :  { %4089 = vrsqrt.f32 %v1600_v53  ;;  %v4667_v59 = vmul.f32 %v1626_v55, %v4531_v22 }
 0xc9b   :  { %v4664_v57 = vmul.f32 %v1625_v19, %v4503_v56  ;;  %v4734_v19 = vld [vmem:[%s5053_s1 + $0x1] ss:$0 sm:$0xff] }
 0xc9d   :  { %3633 = vmatprep.mubr.msk.f32.mxu0 %vm73_vm0, %v4664_v57 }
 0xc9e   :  { %3634 = vmatmul.mubr.msk.f32.vlgmr.msra.gmra.mrb[18].mxu0 %vm73_vm0, %v4667_v59 }
 0xca0   :  { %v4088_v60 = vpop.eup %4087 }
 0xca1   :  { %v1607_v61 = vmul.f32 %v4088_v60, %v1575_v16 }
 0xca3   :  { %v1617_v62 = vmul.f32 %v3243_v44, %v1607_v61 }
 0xca4   :  { %v4090_v63 = vpop.eup %4089 }
 0xca5   :  { %v1608_v0 = vmul.f32 %v4090_v63, %v1576_v26  ;;  %v1627_v1 = vadd.f32 %v3244_v17, %v1617_v62 }
 0xca7   :  { %v4674_v2 = vmul.f32 %v1627_v1, %v4505_v58  ;;  %v1618_v3 = vmul.f32 %v3243_v44, %v1608_v0 }
 0xca9   :  { %3636 = vmatprep.mubr.msk.f32.mxu0 %vm73_vm0, %v4674_v2  ;;  %v1628_v24 = vadd.f32 %v3244_v17, %v1618_v3 }
 0xcab   :  { %v4679_v11 = vmul.f32 %v1628_v24, %v4561_v46 }
 0xcad   :  { %3637 = vmatmul.mubr.msk.f32.gmra.mrb[20].mxu0 %vm73_vm0, %v4679_v11 }
 0xd71   :  { %v3635_v6 = vpop.f32.mrb[18].mxu0 }
 0xd72   :  { %v1730_v10 = vadd.f32 %v3635_v6, %v3250_v4  ;;  %v1724_v5 = vpop.f32.mrb[19].mxu0 }
 0xd73   :  { %v1725_v7 = vadd.f32 %v3250_v4, %v1724_v5 }
 0xd75   :  { %3643 = vmatprep.mubr.msk.f32.mxu1 %vm177_vm1, %v1725_v7  ;;  %v4687_v12 = vpack.i.bf16 %v1730_v10, %v1725_v7 }
 0xd77   :  { %4009 = vrot.lane.b32.xlu0 %v4687_v12, %s4143_s27  ;;  %4004 = vrot.lane.b32.xlu1 %v4687_v12, %s4142_s0 }
 0xd7b   :  { %1950 = vrot.lane.b32.xlu0 %v1730_v10, %s4141_s26  ;;  %1948 = vrot.lane.b32.xlu1 %v1725_v7, %s4141_s26 }
 0xd80   :  { %v3638_v13 = vpop.f32.mrb[20].mxu0 }
 0xd81   :  { %v4695_v14 = vadd.f32 %v3638_v13, %v3250_v4  ;;  %v1734_v42 = vpop.f32.mrb[21].mxu0 }
 0xd82   :  { %v4697_v18 = vadd.f32 %v3250_v4, %v1734_v42 }
 0xd84   :  { %v4701_v47 = vpack.i.bf16 %v4695_v14, %v4697_v18 }
 0xd86   :  { %4014 = vrot.lane.b32.xlu1 %v4701_v47, %s4142_s0 }
 0xde9   :  { %v4010_v16 = vpop.permute.xlu0 %4009  ;;  %v4005_v15 = vpop.permute.xlu1 %4004 }
 0xdea   :  { %v4012_v21 = vunpack.i.h.bf16 %v4010_v16  ;;  %v4011_v23 = vunpack.i.l.bf16 %v4010_v16  ;;  %v4007_v26 = vunpack.i.h.bf16 %v4005_v15  ;;  %v4006_v27 = vunpack.i.l.bf16 %v4005_v15 }
 0xdec   :  { %v3875_v29 = vpack.c.bf16 %v4012_v21, %v4011_v23  ;;  %v3865_v30 = vpack.c.bf16 %v4007_v26, %v4006_v27 }
 0xded   :  { %v1949_v31 = vpop.permute.xlu1 %1948  ;;  %v1951_v32 = vpop.permute.xlu0 %1950 }
 0xdee   :  { %3867 = vmatprep.subr.msk.bf16.mxu1 %vm4299_vm2, %v3865_v30  ;;  %3877 = vmatprep.subr.msk.bf16.mxu0 %vm4299_vm2, %v3875_v29 }
 0xdef   :  { %3657 = vmatprep.mubr.msk.f32.mxu0 %vm177_vm1, %v1949_v31  ;;  %3870 = vmatpush3.bf16.xpose.msk.msra.mxu1 %vm4299_vm2, %v3865_v30 }
 0xdf0   :  { %3880 = vmatpush3.bf16.xpose.msk.msra.mxu0 %vm4299_vm2, %v3875_v29 }
 0xdf6   :  { %3644 = vmatmul.mubr.msk.f32.vlgmr.msra.gmra.mrb[14].mxu1 %vm177_vm1, %v1730_v10 }
 0xdf7   :  { %3658 = vmatmul.mubr.msk.f32.vlgmr.msra.gmra.mrb[22].mxu0 %vm177_vm1, %v1951_v32 }
 0xdf8   :  { %3671 = vmatprep.mubr.msk.f32.mxu0 %vm177_vm1, %v4697_v18  ;;  %v4015_v28 = vpop.permute.xlu1 %4014 }
 0xdf9   :  { %v4017_v34 = vunpack.i.h.bf16 %v4015_v28  ;;  %v4016_v35 = vunpack.i.l.bf16 %v4015_v28 }
 0xdfb   :  { %v3885_v8 = vpack.c.bf16 %v4017_v34, %v4016_v35 }
 0xdfd   :  { %3887 = vmatprep.subr.msk.bf16.mxu0 %vm4299_vm2, %v3885_v8 }
 0xdfe   :  { %3890 = vmatpush3.bf16.xpose.msk.msra.mxu0 %vm4299_vm2, %v3885_v8 }
 0xe05   :  { %3672 = vmatmul.mubr.msk.f32.vlgmr.msra.gmra.mrb[24].mxu0 %vm177_vm1, %v4695_v14 }
 0xec9   :  { %v3645_v33 = vpop.f32.mrb[14].mxu1 }
 0xeca   :  { %v1833_v37 = vmul.f32 0.25, %v3645_v33  ;;  %v3659_v54 = vpop.f32.mrb[22].mxu0  ;;  %v1823_v38 = vpop.f32.mrb[15].mxu1 }
 0xecb   :  { %v2040_v39 = vmul.f32 0.25, %v3659_v54  ;;  %v1832_v36 = vmul.f32 0.25, %v1823_v38  ;;  %v2030_v40 = vpop.f32.mrb[23].mxu0 }
 0xecc   :  { %v2039_v41 = vmul.f32 0.25, %v2030_v40  ;;  %v1835_v44 = vadd.f32 %v4139_v43, %v1833_v37 }
 0xecd   :  { %v1834_v45 = vadd.f32 %v4139_v43, %v1832_v36  ;;  %v2042_v49 = vadd.f32 %v4139_v43, %v2040_v39 }
 0xece   :  { %v1839_v9 = vsel %vm177_vm1, %v1835_v44, -inf  ;;  %v2041_v20 = vadd.f32 %v4139_v43, %v2039_v41 }
 0xecf   :  { %1840 = vmax.xlane.f32.xlu0 %v1839_v9  ;;  %v1836_v48 = vsel %vm177_vm1, %v1834_v45, -inf  ;;  %v2046_v50 = vsel %vm177_vm1, %v2042_v49, -inf }
 0xed0   :  { %1837 = vmax.xlane.f32.xlu1 %v1836_v48  ;;  %v2043_v17 = vsel %vm177_vm1, %v2041_v20, -inf }
 0xed3   :  { %2044 = vmax.xlane.f32.xlu0 %v2043_v17 }
 0xed4   :  { %2047 = vmax.xlane.f32.xlu1 %v2046_v50 }
 0xed8   :  { %v3673_v51 = vpop.f32.mrb[24].mxu0 }
 0xed9   :  { %v2255_v52 = vmul.f32 0.25, %v3673_v51  ;;  %v2245_v53 = vpop.f32.mrb[25].mxu0 }
 0xeda   :  { %v2254_v55 = vmul.f32 0.25, %v2245_v53 }
 0xedb   :  { %v2257_v60 = vadd.f32 %v4734_v19, %v2255_v52 }
 0xedc   :  { %v2256_v61 = vadd.f32 %v4734_v19, %v2254_v55 }
 0xedd   :  { %v2261_v62 = vsel %vm177_vm1, %v2257_v60, -inf }
 0xede   :  { %2262 = vmax.xlane.f32.xlu1 %v2261_v62  ;;  %v2258_v63 = vsel %vm177_vm1, %v2256_v61, -inf }
 0xedf   :  { %2259 = vmax.xlane.f32.xlu0 %v2258_v63 }
 0xf5c   :  { %v1841_v0 = vpop.xlane.xlu0 %1840 }
 0xf5d   :  { %v1843_v1 = vsub.f32 %v1835_v44, %v1841_v0  ;;  %v1838_v3 = vpop.xlane.xlu1 %1837 }
 0xf5e   :  { %v1842_v24 = vsub.f32 %v1834_v45, %v1838_v3 }
 0xf5f   :  { %v1846_v4 = vmul.f32 1.442695, %v1843_v1 }
 0xf60   :  { %v1844_v6 = vmul.f32 1.442695, %v1842_v24  ;;  %v2045_v10 = vpop.xlane.xlu0 %2044 }
 0xf61   :  { %4091 = vpow2.f32 %v1846_v4  ;;  %v2049_v5 = vsub.f32 %v2041_v20, %v2045_v10  ;;  %v2048_v7 = vpop.xlane.xlu1 %2047 }
 0xf62   :  { %4093 = vpow2.f32 %v1844_v6  ;;  %v2050_v13 = vsub.f32 %v2042_v49, %v2048_v7 }
 0xf63   :  { %v2051_v42 = vmul.f32 1.442695, %v2049_v5 }
 0xf64   :  { %v2053_v16 = vmul.f32 1.442695, %v2050_v13 }
 0xf65   :  { %4095 = vpow2.f32 %v2051_v42 }
 0xf66   :  { %4097 = vpow2.f32 %v2053_v16 }
 0xf6b   :  { %v4092_v15 = vpop.eup %4091  ;;  %v2263_v34 = vpop.xlane.xlu1 %2262 }
 0xf6c   :  { %v4094_v21 = vpop.eup %4093  ;;  %v1851_v23 = vsel %vm177_vm1, %v4092_v15, 0.0  ;;  %v2260_v32 = vpop.xlane.xlu0 %2259  ;;  %v2265_v35 = vsub.f32 %v2257_v60, %v2263_v34 }
 0xf6d   :  { %1852 = vadd.xlane.f32.xlu1 %v1851_v23  ;;  %v1848_v26 = vsel %vm177_vm1, %v4094_v21, 0.0  ;;  %v2264_v28 = vsub.f32 %v2256_v61, %v2260_v32 }
 0xf6e   :  { %1849 = vadd.xlane.f32.xlu0 %v1848_v26  ;;  %v2268_v33 = vmul.f32 1.442695, %v2265_v35 }
 0xf6f   :  { %v4096_v27 = vpop.eup %4095  ;;  %v2266_v8 = vmul.f32 1.442695, %v2264_v28 }
 0xf70   :  { %v4098_v29 = vpop.eup %4097  ;;  %v2055_v30 = vsel %vm177_vm1, %v4096_v27, 0.0 }
 0xf71   :  { %v2058_v31 = vsel %vm177_vm1, %v4098_v29, 0.0  ;;  %4099 = vpow2.f32 %v2266_v8 }
 0xf72   :  { %2056 = vadd.xlane.f32.xlu0 %v2055_v30  ;;  %2059 = vadd.xlane.f32.xlu1 %v2058_v31  ;;  %4101 = vpow2.f32 %v2268_v33 }
 0xf7b   :  { %v4100_v37 = vpop.eup %4099 }
 0xf7c   :  { %v2270_v54 = vsel %vm177_vm1, %v4100_v37, 0.0  ;;  %v4751_v38 = vpop.eup %4101 }
 0xf7d   :  { %v2273_v39 = vsel %vm177_vm1, %v4751_v38, 0.0 }
 0xf83   :  { %4024 = vrot.lane.b32.xlu1 %v4687_v12, %s4144_s17 }
 0xf87   :  { %4029 = vrot.lane.b32.xlu1 %v4701_v47, %s4145_s18 }
 0xf88   :  { %4019 = vrot.lane.b32.xlu0 %v4687_v12, %s4145_s18 }
 0xfa7   :  { %2271 = vadd.xlane.f32.xlu0 %v2270_v54 }
 0xfab   :  { %2274 = vadd.xlane.f32.xlu1 %v2273_v39 }
 0xfbc   :  { %2370 = vrot.lane.b32.xlu1 %v4697_v18, %s4141_s26 }
 0xfbd   :  { %4034 = vrot.lane.b32.xlu0 %v4701_v47, %s4143_s27 }
 0xfc1   :  { %2372 = vrot.lane.b32.xlu0 %v4695_v14, %s4141_s26 }
 0xffa   :  { %v1853_v12 = vpop.xlane.xlu1 %1852 }
 0xffb   :  { %4103 = vrcp.f32 %v1853_v12  ;;  %v1850_v36 = vpop.xlane.xlu0 %1849 }
 0xffc   :  { %4105 = vrcp.f32 %v1850_v36 }
 0xfff   :  { %v2057_v40 = vpop.xlane.xlu0 %2056  ;;  %v2060_v41 = vpop.xlane.xlu1 %2059 }
0x1000   :  { %4107 = vrcp.f32 %v2057_v40 }
0x1001   :  { %4109 = vrcp.f32 %v2060_v41 }
0x1003   :  { %v4020_v43 = vpop.permute.xlu0 %4019  ;;  %v4025_v44 = vpop.permute.xlu1 %4024 }
0x1004   :  { %v4022_v45 = vunpack.i.h.bf16 %v4020_v43  ;;  %v4021_v9 = vunpack.i.l.bf16 %v4020_v43  ;;  %v4027_v20 = vunpack.i.h.bf16 %v4025_v44  ;;  %v4026_v18 = vunpack.i.l.bf16 %v4025_v44 }
0x1005   :  { %v4104_v48 = vpop.eup %4103 }
0x1006   :  { %v4106_v49 = vpop.eup %4105  ;;  %v1857_v17 = vmul.f32 %v4104_v48, %v4092_v15  ;;  %v3871_v50 = vpack.c.bf16 %v4022_v45, %v4021_v9  ;;  %v3881_v52 = vpack.c.bf16 %v4027_v20, %v4026_v18  ;;  %v3287_v20 = vld [vmem:[%s5055_s5 + $0x20] sm:$0xff]  ;;  %v3288_v18 = vld [vmem:[%s5055_s5 + $0x28] sm:$0xff] }
0x1007   :  { %v4030_v51 = vpop.permute.xlu1 %4029  ;;  %v1856_v14 = vmul.f32 %v4106_v49, %v4094_v21 }
0x1008   :  { %3260 = vst.msk [vmem:[%s5054_s16 + $0x48] sm:$0xff] %vm177_vm1, %v1857_v17  ;;  %v4032_v53 = vunpack.i.h.bf16 %v4030_v51  ;;  %v4031_v55 = vunpack.i.l.bf16 %v4030_v51  ;;  %3872 = vmatprep.subr.bf16.mxu1 %v3871_v50 }
0x1009   :  { %3874 = vmatpush3.bf16.msra.mxu1 %v3871_v50  ;;  %3259 = vst.msk [vmem:[%s5054_s16 + $0x40] sm:$0xff] %vm177_vm1, %v1856_v14  ;;  %3650 = vmatprep.mubr.msk.f32.mxu1 %vm177_vm1, %v1856_v14  ;;  %v3905_v50 = vpack.c.bf16 %v3288_v18, %v3287_v20  ;;  %v3290_v14 = vld [vmem:[%s5055_s5 + $0x38] sm:$0xff] }
0x100a   :  { %v4108_v60 = vpop.eup %4107  ;;  %3882 = vmatprep.subr.bf16.mxu1 %v3881_v52  ;;  %v3891_v0 = vpack.c.bf16 %v4032_v53, %v4031_v55 }
0x100b   :  { %v4110_v61 = vpop.eup %4109  ;;  %v2063_v62 = vmul.f32 %v4108_v60, %v4096_v27 }
0x100c   :  { %v2064_v63 = vmul.f32 %v4110_v61, %v4098_v29  ;;  %3651 = vmatmul.mubr.msk.f32.vlgmr.msra.gmra.mrb[16].mxu1 %vm177_vm1, %v1857_v17 }
0x100d   :  { %3884 = vmatpush3.bf16.msra.mxu1 %v3881_v52  ;;  %3267 = vst.msk [vmem:[%s5054_s16 + $0x50] sm:$0xff] %vm177_vm1, %v2063_v62  ;;  %3664 = vmatprep.mubr.msk.f32.mxu1 %vm177_vm1, %v2063_v62 }
0x100e   :  { %3268 = vst.msk [vmem:[%s5054_s16 + $0x58] sm:$0xff] %vm177_vm1, %v2064_v63  ;;  %3892 = vmatprep.subr.bf16.mxu1 %v3891_v0 }
0x1010   :  { %3665 = vmatmul.mubr.msk.f32.vlgmr.msra.gmra.mrb[18].mxu1 %vm177_vm1, %v2064_v63 }
0x1011   :  { %3894 = vmatpush3.bf16.msra.mxu1 %v3891_v0 }
0x1034   :  { %v2272_v1 = vpop.xlane.xlu0 %2271 }
0x1035   :  { %4111 = vrcp.f32 %v2272_v1 }
0x1038   :  { %v4035_v3 = vpop.permute.xlu0 %4034  ;;  %v2275_v24 = vpop.xlane.xlu1 %2274 }
0x1039   :  { %v4037_v4 = vunpack.i.h.bf16 %v4035_v3  ;;  %v4036_v6 = vunpack.i.l.bf16 %v4035_v3  ;;  %4113 = vrcp.f32 %v2275_v24 }
0x103b   :  { %v3895_v10 = vpack.c.bf16 %v4037_v4, %v4036_v6  ;;  %v3292_v6 = vld [vmem:[%s5056_s6 + $0x1] ss:$0 sm:$0xff] }
0x103c   :  { %v2371_v16 = vpop.permute.xlu1 %2370  ;;  %v2373_v15 = vpop.permute.xlu0 %2372 }
0x103d   :  { %3897 = vmatprep.subr.msk.bf16.mxu1 %vm4299_vm2, %v3895_v10 }
0x103f   :  { %v4112_v5 = vpop.eup %4111 }
0x1040   :  { %v2278_v7 = vmul.f32 %v4112_v5, %v4100_v37 }
0x1042   :  { %3275 = vst.msk [vmem:[%s5054_s16 + $0x60] sm:$0xff] %vm177_vm1, %v2278_v7  ;;  %3678 = vmatprep.mubr.msk.f32.mxu1 %vm177_vm1, %v2278_v7 }
0x1043   :  { %v4114_v13 = vpop.eup %4113 }
0x1044   :  { %v2279_v42 = vmul.f32 %v4114_v13, %v4751_v38 }
0x1046   :  { %3276 = vst.msk [vmem:[%s5054_s16 + $0x68] sm:$0xff] %vm177_vm1, %v2279_v42  ;;  %3679 = vmatmul.mubr.msk.f32.vlgmr.msra.gmra.mrb[20].mxu1 %vm177_vm1, %v2279_v42 }
0x1047   :  { %3900 = vmatpush3.bf16.xpose.msk.msra.mxu1 %vm4299_vm2, %v3895_v10  ;;  %3685 = vmatprep.mubr.msk.f32.mxu1 %vm177_vm1, %v2371_v16 }
0x104e   :  { %3686 = vmatmul.mubr.msk.f32.vlgmr.msra.gmra.mrb[22].mxu1 %vm177_vm1, %v2373_v15 }
0x10df   :  { %v4798_v21 = vpop.f32.mrb[16].mxu1 }
0x10e0   :  { %v1939_v23 = vpop.f32.mrb[17].mxu1 }
0x10e3   :  { %v3666_v26 = vpop.f32.mrb[18].mxu1 }
0x10e4   :  { %v2146_v27 = vpop.f32.mrb[19].mxu1 }
0x1119   :  { %v4800_v29 = vpop.f32.mrb[20].mxu1 }
0x111a   :  { %v4802_v30 = vpop.f32.mrb[21].mxu1 }
0x1121   :  { %v3687_v31 = vpop.f32.mrb[22].mxu1 }
0x1122   :  { %v2462_v32 = vmul.f32 0.25, %v3687_v31  ;;  %v2452_v28 = vpop.f32.mrb[23].mxu1 }
0x1123   :  { %v2461_v34 = vmul.f32 0.25, %v2452_v28 }
0x1124   :  { %v2464_v25 = vadd.f32 %v4734_v19, %v2462_v32 }
0x1125   :  { %v2463_v35 = vadd.f32 %v4734_v19, %v2461_v34 }
0x1126   :  { %v2468_v8 = vsel %vm177_vm1, %v2464_v25, -inf }
0x1127   :  { %2469 = vmax.xlane.f32.xlu0 %v2468_v8  ;;  %v2465_v33 = vsel %vm177_vm1, %v2463_v35, -inf }
0x1128   :  { %2466 = vmax.xlane.f32.xlu1 %v2465_v33 }
0x11b4   :  { %v2470_v37 = vpop.xlane.xlu0 %2469 }
0x11b5   :  { %v2472_v54 = vsub.f32 %v2464_v25, %v2470_v37  ;;  %v2467_v38 = vpop.xlane.xlu1 %2466 }
0x11b6   :  { %v2471_v39 = vsub.f32 %v2463_v35, %v2467_v38 }
0x11b7   :  { %v2475_v12 = vmul.f32 1.442695, %v2472_v54 }
0x11b8   :  { %v2473_v36 = vmul.f32 1.442695, %v2471_v39 }
0x11b9   :  { %4115 = vpow2.f32 %v2475_v12 }
0x11ba   :  { %4117 = vpow2.f32 %v2473_v36  ;;  %v3301_v36 = vld [vmem:[%s5058_s9 + $0x60] sm:$0xff] }
0x11c3   :  { %v4116_v40 = vpop.eup %4115 }
0x11c4   :  { %v4118_v41 = vpop.eup %4117  ;;  %v2480_v43 = vsel %vm177_vm1, %v4116_v40, 0.0 }
0x11c5   :  { %2481 = vadd.xlane.f32.xlu1 %v2480_v43  ;;  %v2477_v19 = vsel %vm177_vm1, %v4118_v41, 0.0 }
0x11c6   :  { %2478 = vadd.xlane.f32.xlu0 %v2477_v19  ;;  %v3305_v19 = vld [vmem:[%s5058_s9 + $0x80] sm:$0xff] }
0x11d6   :  { %2157 = vrot.lane.b32.xlu1 %v2146_v27, %s5074_s4 }
0x11da   :  { %2159 = vrot.lane.b32.xlu1 %v3666_v26, %s5074_s4 }
0x11dc   :  { %4039 = vrot.lane.b32.xlu0 %v4701_v47, %s4144_s17  ;;  %v3289_v47 = vld [vmem:[%s5055_s5 + $0x30] sm:$0xff] }
0x11dd   :  { %v3909_v61 = vpack.c.bf16 %v3290_v14, %v3289_v47 }
0x1252   :  { %v2482_v44 = vpop.xlane.xlu1 %2481 }
0x1253   :  { %4119 = vrcp.f32 %v2482_v44  ;;  %v2479_v45 = vpop.xlane.xlu0 %2478  ;;  %v3306_v44 = vld [vmem:[%s5058_s9 + $0x88] sm:$0xff] }
0x1254   :  { %4121 = vrcp.f32 %v2479_v45  ;;  %v3921_v45 = vpack.c.bf16 %v3306_v44, %v3305_v19 }
0x1256   :  { %v2158_v55 = vpop.permute.xlu1 %2157 }
0x1257   :  { %v4040_v9 = vpop.permute.xlu0 %4039  ;;  %v2163_v62 = vsel %vm177_vm1, %v1939_v23, %v2158_v55 }
0x1258   :  { %v4042_v48 = vunpack.i.h.bf16 %v4040_v9  ;;  %v4041_v49 = vunpack.i.l.bf16 %v4040_v9 }
0x125a   :  { %v3901_v17 = vpack.c.bf16 %v4042_v48, %v4041_v49  ;;  %v2160_v63 = vpop.permute.xlu1 %2159 }
0x125b   :  { %v2164_v0 = vsel %vm177_vm1, %v4798_v21, %v2160_v63 }
0x125c   :  { %3902 = vmatprep.subr.bf16.mxu0 %v3901_v17 }
0x125d   :  { %v4120_v51 = vpop.eup %4119  ;;  %3904 = vmatpush3.bf16.msra.mxu0 %v3901_v17 }
0x125e   :  { %v4122_v52 = vpop.eup %4121  ;;  %v2486_v53 = vmul.f32 %v4120_v51, %v4116_v40  ;;  %3906 = vmatprep.subr.bf16.mxu0 %v3905_v50 }
0x125f   :  { %v2485_v60 = vmul.f32 %v4122_v52, %v4118_v41  ;;  %v3304_v41 = vld [vmem:[%s5058_s9 + $0x78] sm:$0xff] }
0x1260   :  { %3284 = vst.msk [vmem:[%s5054_s16 + $0x78] sm:$0xff] %vm177_vm1, %v2486_v53 }
0x1261   :  { %3283 = vst.msk [vmem:[%s5054_s16 + $0x70] sm:$0xff] %vm177_vm1, %v2485_v60  ;;  %3692 = vmatprep.mubr.msk.f32.mxu0 %vm177_vm1, %v2485_v60 }
0x1262   :  { %3693 = vmatmul.mubr.msk.f32.vlgmr.msra.gmra.mrb[26].mxu0 %vm177_vm1, %v2486_v53 }
0x1263   :  { %3908 = vmatpush3.bf16.msra.mxu0 %v3905_v50  ;;  %3703 = vmatprep.mubr.msk.f32.mxu0 %vm73_vm0, %v2163_v62 }
0x1264   :  { %3910 = vmatprep.subr.bf16.mxu0 %v3909_v61 }
0x1267   :  { %3912 = vmatpush3.bf16.msra.mxu0 %v3909_v61 }
0x126a   :  { %3704 = vmatmul.mubr.msk.f32.vlgmr.msra.gmra.mrb[28].mxu0 %vm73_vm0, %v2164_v0 }
0x1335   :  { %v3694_v1 = vpop.f32.mrb[26].mxu0 }
0x1336   :  { %2581 = vrot.lane.b32.xlu1 %v3694_v1, %s5074_s4  ;;  %v2568_v3 = vpop.f32.mrb[27].mxu0  ;;  %v4893_v1 = vld [vmem:[%s5059_s7 + $0x1] ss:$0 sm:$0xff] }
0x1337   :  { %2579 = vrot.lane.b32.xlu0 %v2568_v3, %s5074_s4 }
0x133d   :  { %v3705_v24 = vpop.f32.mrb[28].mxu0 }
0x133e   :  { %v2678_v4 = vpop.f32.mrb[29].mxu0  ;;  %v2684_v5 = vadd.f32 %v3705_v24, %v3292_v6  ;;  %v4899_v24 = vld [vmem:[%s5060_s8 + $0x1] ss:$0 sm:$0xff] }
0x133f   :  { %v2679_v10 = vadd.f32 %v3292_v6, %v2678_v4 }
0x1340   :  { %v2698_v13 = vadd.f32 %v2684_v5, %v4667_v59 }
0x1341   :  { %v2697_v7 = vadd.f32 %v2679_v10, %v4664_v57  ;;  %v3308_v10 = vld [vmem:[%s5058_s9 + $0x98] sm:$0xff] }
0x1342   :  { %v2708_v16 = vsel %vm73_vm0, %v2698_v13, 0.0 }
0x1343   :  { %v2705_v42 = vsel %vm73_vm0, %v2697_v7, 0.0 }
0x1356   :  { %2706 = vadd.xlane.f32.xlu0 %v2705_v42 }
0x135a   :  { %2709 = vadd.xlane.f32.xlu1 %v2708_v16  ;;  %v3309_v16 = vld [vmem:[%s5058_s9 + $0xa0] sm:$0xff] }
0x13a8   :  { %v2582_v15 = vpop.permute.xlu1 %2581 }
0x13a9   :  { %v2580_v21 = vpop.permute.xlu0 %2579  ;;  %v2586_v26 = vsel %vm177_vm1, %v4800_v29, %v2582_v15  ;;  %v3310_v15 = vld [vmem:[%s5058_s9 + $0xa8] sm:$0xff] }
0x13aa   :  { %v2585_v23 = vsel %vm177_vm1, %v4802_v30, %v2580_v21 }
0x13ab   :  { %3706 = vmatprep.mubr.msk.f32.mxu0 %vm73_vm0, %v2585_v23  ;;  %v3929_v23 = vpack.c.bf16 %v3310_v15, %v3309_v16 }
0x13ac   :  { %3707 = vmatmul.mubr.msk.f32.gmra.mrb[30].mxu0 %vm73_vm0, %v2586_v26 }
0x13e3   :  { %v2707_v57 = vpop.xlane.xlu0 %2706 }
0x13e4   :  { %v2717_v59 = vmul.f32 0.03125, %v2707_v57 }
0x13e6   :  { %v2721_v27 = vsub.f32 %v2697_v7, %v2717_v59  ;;  %v3311_v59 = vld [vmem:[%s5058_s9 + $0xb0] sm:$0xff] }
0x13e7   :  { %v2710_v28 = vpop.xlane.xlu1 %2709 }
0x13e8   :  { %v2725_v31 = vmul.f32 %v2721_v27, %v2721_v27  ;;  %v2718_v35 = vmul.f32 0.03125, %v2710_v28 }
0x13ea   :  { %v2729_v32 = vsel %vm73_vm0, %v2725_v31, 0.0  ;;  %v2722_v29 = vsub.f32 %v2698_v13, %v2718_v35 }
0x13eb   :  { %2730 = vadd.xlane.f32.xlu1 %v2729_v32 }
0x13ec   :  { %v2726_v39 = vmul.f32 %v2722_v29, %v2722_v29 }
0x13ee   :  { %v2732_v12 = vsel %vm73_vm0, %v2726_v39, 0.0 }
0x1478   :  { %v2731_v9 = vpop.xlane.xlu1 %2730 }
0x1479   :  { %v2741_v20 = vmul.f32 0.03125, %v2731_v9 }
0x147b   :  { %v2745_v18 = vadd.f32 1e-05, %v2741_v20 }
0x147d   :  { %4123 = vrsqrt.f32 %v2745_v18 }
0x147f   :  { %v3708_v34 = vpop.f32.mrb[30].mxu0 }
0x1480   :  { %v2688_v25 = vpop.f32.mrb[31].mxu0  ;;  %v2694_v8 = vadd.f32 %v3708_v34, %v3292_v6 }
0x1481   :  { %v2689_v30 = vadd.f32 %v3292_v6, %v2688_v25  ;;  %v3307_v6 = vld [vmem:[%s5058_s9 + $0x90] sm:$0xff] }
0x1482   :  { %v2700_v54 = vadd.f32 %v2694_v8, %v4679_v11  ;;  %v3303_v11 = vld [vmem:[%s5058_s9 + $0x70] sm:$0xff]  ;;  %v3925_v5 = vpack.c.bf16 %v3308_v10, %v3307_v6  ;;  %v3322_v10 = vld [vmem:[%s5061_s11 + $0x58] sm:$0xff] }
0x1483   :  { %v2699_v33 = vadd.f32 %v2689_v30, %v4674_v2  ;;  %v3302_v2 = vld [vmem:[%s5058_s9 + $0x68] sm:$0xff]  ;;  %v3917_v43 = vpack.c.bf16 %v3304_v41, %v3303_v11 }
0x1484   :  { %v2714_v38 = vsel %vm73_vm0, %v2700_v54, 0.0  ;;  %v3913_v40 = vpack.c.bf16 %v3302_v2, %v3301_v36 }
0x1485   :  { %v2711_v37 = vsel %vm73_vm0, %v2699_v33, 0.0 }
0x1486   :  { %2712 = vadd.xlane.f32.xlu0 %v2711_v37  ;;  %3914 = vmatprep.subr.bf16.mxu1 %v3913_v40 }
0x1487   :  { %3916 = vmatpush3.bf16.msra.mxu1 %v3913_v40  ;;  %v4124_v55 = vpop.eup %4123 }
0x1488   :  { %3918 = vmatprep.subr.bf16.mxu1 %v3917_v43  ;;  %v2753_v0 = vmul.f32 %v4124_v55, %v2721_v27  ;;  %v3312_v27 = vld [vmem:[%s5058_s9 + $0xb8] sm:$0xff] }
0x1489   :  { %v3933_v32 = vpack.c.bf16 %v3312_v27, %v3311_v59 }
0x148a   :  { %2715 = vadd.xlane.f32.xlu0 %v2714_v38  ;;  %v2763_v3 = vmul.f32 %v4893_v1, %v2753_v0 }
0x148b   :  { %3920 = vmatpush3.bf16.msra.mxu1 %v3917_v43 }
0x148c   :  { %3922 = vmatprep.subr.bf16.mxu1 %v3921_v45  ;;  %v2773_v4 = vadd.f32 %v4899_v24, %v2763_v3 }
0x148e   :  { %2733 = vadd.xlane.f32.xlu0 %v2732_v12  ;;  %v4909_v42 = vmul.f32 %v2773_v4, %v4503_v56 }
0x148f   :  { %3924 = vmatpush3.bf16.msra.mxu1 %v3921_v45 }
0x1490   :  { %3926 = vmatprep.subr.bf16.mxu1 %v3925_v5  ;;  %v2800_v57 = vrot.slane %v4909_v42, 7 }
0x1492   :  { %v2812_v34 = vsel %vm1255_vm3, 0.0, %v2800_v57 }
0x1493   :  { %3928 = vmatpush3.bf16.msra.mxu1 %v3925_v5  ;;  %v2842_v38 = vrot.slane %v2812_v34, 2 }
0x1494   :  { %3930 = vmatprep.subr.bf16.mxu1 %v3929_v23 }
0x1497   :  { %3932 = vmatpush3.bf16.msra.mxu1 %v3929_v23 }
0x1498   :  { %3934 = vmatprep.subr.bf16.mxu1 %v3933_v32 }
0x149b   :  { %3936 = vmatpush3.bf16.msra.mxu1 %v3933_v32 }
0x1513   :  { %v2713_v48 = vpop.xlane.xlu0 %2712 }
0x1514   :  { %v2719_v49 = vmul.f32 0.03125, %v2713_v48 }
0x1516   :  { %v4880_v17 = vsub.f32 %v2699_v33, %v2719_v49  ;;  %v2820_v33 = vrot.slane %v2812_v34, 1 }
0x1517   :  { %v2716_v50 = vpop.xlane.xlu0 %2715 }
0x1518   :  { %v2720_v51 = vmul.f32 0.03125, %v2716_v50  ;;  %v2727_v47 = vmul.f32 %v4880_v17, %v4880_v17 }
0x151a   :  { %v4884_v14 = vsub.f32 %v2700_v54, %v2720_v51  ;;  %v2735_v52 = vsel %vm73_vm0, %v2727_v47, 0.0 }
0x151b   :  { %2736 = vadd.xlane.f32.xlu1 %v2735_v52  ;;  %v2734_v53 = vpop.xlane.xlu0 %2733 }
0x151c   :  { %v2742_v60 = vmul.f32 0.03125, %v2734_v53  ;;  %v2728_v61 = vmul.f32 %v4884_v14, %v4884_v14 }
0x151e   :  { %v2746_v62 = vadd.f32 1e-05, %v2742_v60  ;;  %v2738_v63 = vsel %vm73_vm0, %v2728_v61, 0.0 }
0x151f   :  { %2739 = vadd.xlane.f32.xlu0 %v2738_v63 }
0x1520   :  { %4125 = vrsqrt.f32 %v2746_v62 }
0x152a   :  { %v4126_v7 = vpop.eup %4125 }
0x152b   :  { %v2754_v13 = vmul.f32 %v4126_v7, %v2722_v29  ;;  %v3323_v7 = vld [vmem:[%s5061_s11 + $0x60] sm:$0xff] }
0x152d   :  { %v2764_v21 = vmul.f32 %v4893_v1, %v2754_v13  ;;  %v3324_v13 = vld [vmem:[%s5061_s11 + $0x68] sm:$0xff] }
0x152f   :  { %v2774_v26 = vadd.f32 %v4899_v24, %v2764_v21 }
0x1531   :  { %v4927_v31 = vmul.f32 %v2774_v26, %v4531_v22 }
0x1533   :  { %v2801_v28 = vrot.slane %v4927_v31, 7 }
0x1535   :  { %v2802_v25 = vsel %vm1255_vm3, %v2800_v57, %v2801_v28  ;;  %v2814_v35 = vsel %vm1255_vm3, %v2801_v28, 0.0  ;;  %v3945_v57 = vpack.c.bf16 %v3324_v13, %v3323_v7 }
0x1536   :  { %v2821_v8 = vrot.slane %v2802_v25, 1  ;;  %v2823_v30 = vrot.slane %v2814_v35, 1  ;;  %v2843_v54 = vrot.slane %v2802_v25, 2  ;;  %v2845_v12 = vrot.slane %v2814_v35, 2 }
0x1538   :  { %v2824_v29 = vsel %vm1276_vm4, %v2821_v8, %v2823_v30  ;;  %v2822_v37 = vsel %vm1276_vm4, %v2820_v33, %v2821_v8  ;;  %v2844_v39 = vsel %vm1299_vm5, %v2842_v38, %v2843_v54  ;;  %v2846_v36 = vsel %vm1299_vm5, %v2843_v54, %v2845_v12  ;;  %v3325_v8 = vld [vmem:[%s5061_s11 + $0x70] sm:$0xff]  ;;  %v3326_v30 = vld [vmem:[%s5061_s11 + $0x78] sm:$0xff] }
0x1539   :  { %2832 = vrot.lane.b32.xlu0 %v2824_v29, %s4148_s22  ;;  %2830 = vrot.lane.b32.xlu1 %v2822_v37, %s4148_s22  ;;  %v3949_v33 = vpack.c.bf16 %v3326_v30, %v3325_v8 }
0x153d   :  { %2852 = vrot.lane.b32.xlu1 %v2844_v39, %s4145_s18 }
0x1541   :  { %2854 = vrot.lane.b32.xlu1 %v2846_v36, %s4145_s18 }
0x15a8   :  { %v2737_v2 = vpop.xlane.xlu1 %2736 }
0x15a9   :  { %v2743_v11 = vmul.f32 0.03125, %v2737_v2 }
0x15ab   :  { %v2747_v40 = vadd.f32 1e-05, %v2743_v11  ;;  %v3314_v11 = vld [vmem:[%s5062_s10 + $0x1] ss:$0 sm:$0xff] }
0x15ac   :  { %v2740_v41 = vpop.xlane.xlu0 %2739  ;;  %v2831_v43 = vpop.permute.xlu1 %2830 }
0x15ad   :  { %4127 = vrsqrt.f32 %v2747_v40  ;;  %v2744_v19 = vmul.f32 0.03125, %v2740_v41  ;;  %v2864_v45 = vsel %vm73_vm0, %v2812_v34, %v2831_v43 }
0x15af   :  { %v2748_v44 = vadd.f32 1e-05, %v2744_v19 }
0x15b0   :  { %v2853_v9 = vpop.permute.xlu1 %2852  ;;  %v2833_v20 = vpop.permute.xlu0 %2832 }
0x15b1   :  { %4129 = vrsqrt.f32 %v2748_v44  ;;  %v2868_v18 = vsel %vm1326_vm6, %v2864_v45, %v2853_v9  ;;  %v2865_v48 = vsel %vm73_vm0, %v2802_v25, %v2833_v20 }
0x15b2   :  { %3733 = vmatprep.mubr.msk.f32.mxu1 %vm1337_vm7, %v2868_v18 }
0x15b4   :  { %v2855_v49 = vpop.permute.xlu1 %2854 }
0x15b5   :  { %v2869_v50 = vsel %vm1326_vm6, %v2865_v48, %v2855_v49 }
0x15b6   :  { %3734 = vmatmul.mubr.msk.f32.vlgmr.msra.gmra.mrb[24].mxu1 %vm1337_vm7, %v2869_v50 }
0x15b7   :  { %v4128_v51 = vpop.eup %4127 }
0x15b8   :  { %v2755_v47 = vmul.f32 %v4128_v51, %v4880_v17  ;;  %v3319_v17 = vld [vmem:[%s5061_s11 + $0x40] sm:$0xff] }
0x15b9   :  { %v3328_v51 = vld [vmem:[%s5063_s12 + $0x1] ss:$0 sm:$0xff] }
0x15ba   :  { %v2765_v52 = vmul.f32 %v4893_v1, %v2755_v47 }
0x15bb   :  { %v4130_v53 = vpop.eup %4129 }
0x15bc   :  { %v2775_v55 = vadd.f32 %v4899_v24, %v2765_v52  ;;  %v2756_v60 = vmul.f32 %v4130_v53, %v4884_v14  ;;  %v3320_v14 = vld [vmem:[%s5061_s11 + $0x48] sm:$0xff] }
0x15bd   :  { %v3937_v6 = vpack.c.bf16 %v3320_v14, %v3319_v17 }
0x15be   :  { %v2766_v61 = vmul.f32 %v4893_v1, %v2756_v60  ;;  %v4953_v62 = vmul.f32 %v2775_v55, %v4505_v58  ;;  %v3321_v1 = vld [vmem:[%s5061_s11 + $0x50] sm:$0xff] }
0x15bf   :  { %v3941_v5 = vpack.c.bf16 %v3322_v10, %v3321_v1  ;;  %3938 = vmatprep.subr.bf16.mxu0 %v3937_v6 }
0x15c0   :  { %v2776_v63 = vadd.f32 %v4899_v24, %v2766_v61  ;;  %v2803_v0 = vrot.slane %v4953_v62, 7  ;;  %3940 = vmatpush3.bf16.msra.mxu0 %v3937_v6 }
0x15c1   :  { %3942 = vmatprep.subr.bf16.mxu0 %v3941_v5 }
0x15c2   :  { %v4958_v3 = vmul.f32 %v2776_v63, %v4561_v46  ;;  %v2813_v24 = vsel %vm1255_vm3, 0.0, %v2803_v0 }
0x15c3   :  { %v2825_v26 = vrot.slane %v2813_v24, 1  ;;  %v2847_v34 = vrot.slane %v2813_v24, 2 }
0x15c4   :  { %v2804_v4 = vrot.slane %v4958_v3, 7  ;;  %3944 = vmatpush3.bf16.msra.mxu0 %v3941_v5 }
0x15c5   :  { %3946 = vmatprep.subr.bf16.mxu0 %v3945_v57 }
0x15c6   :  { %v2805_v16 = vsel %vm1255_vm3, %v2803_v0, %v2804_v4  ;;  %v2815_v15 = vsel %vm1255_vm3, %v2804_v4, 0.0 }
0x15c7   :  { %v2826_v21 = vrot.slane %v2805_v16, 1  ;;  %v2828_v23 = vrot.slane %v2815_v15, 1  ;;  %v2848_v32 = vrot.slane %v2805_v16, 2  ;;  %v2850_v28 = vrot.slane %v2815_v15, 2 }
0x15c8   :  { %3948 = vmatpush3.bf16.msra.mxu0 %v3945_v57 }
0x15c9   :  { %v2829_v59 = vsel %vm1276_vm4, %v2826_v21, %v2828_v23  ;;  %v2827_v27 = vsel %vm1276_vm4, %v2825_v26, %v2826_v21  ;;  %v2851_v25 = vsel %vm1299_vm5, %v2848_v32, %v2850_v28  ;;  %v2849_v35 = vsel %vm1299_vm5, %v2847_v34, %v2848_v32  ;;  %3950 = vmatprep.subr.bf16.mxu0 %v3949_v33 }
0x15ca   :  { %2836 = vrot.lane.b32.xlu1 %v2829_v59, %s4148_s22  ;;  %2834 = vrot.lane.b32.xlu0 %v2827_v27, %s4148_s22 }
0x15cc   :  { %3952 = vmatpush3.bf16.msra.mxu0 %v3949_v33 }
0x15ce   :  { %2858 = vrot.lane.b32.xlu1 %v2851_v25, %s4145_s18  ;;  %2856 = vrot.lane.b32.xlu0 %v2849_v35, %s4145_s18 }
0x163c   :  { %v2835_v29 = vpop.permute.xlu0 %2834  ;;  %v2837_v37 = vpop.permute.xlu1 %2836 }
0x163d   :  { %v2866_v54 = vsel %vm73_vm0, %v2813_v24, %v2835_v29  ;;  %v2867_v38 = vsel %vm73_vm0, %v2805_v16, %v2837_v37 }
0x1640   :  { %v2857_v39 = vpop.permute.xlu0 %2856  ;;  %v2859_v12 = vpop.permute.xlu1 %2858 }
0x1641   :  { %v2870_v36 = vsel %vm1326_vm6, %v2866_v54, %v2857_v39  ;;  %v2871_v2 = vsel %vm1326_vm6, %v2867_v38, %v2859_v12  ;;  %v3335_v12 = vld [vmem:[%s5064_s13 + $0x1] ss:$0 sm:$0xff] }
0x1642   :  { %3736 = vmatprep.mubr.msk.f32.mxu1 %vm1337_vm7, %v2870_v36 }
0x1643   :  { %3737 = vmatmul.mubr.msk.f32.gmra.mrb[26].mxu1 %vm1337_vm7, %v2871_v2 }
0x1689   :  { %v3735_v40 = vpop.f32.mrb[24].mxu1 }
0x168a   :  { %v2962_v41 = vadd.f32 %v3735_v40, %v3314_v11  ;;  %v2956_v43 = vpop.f32.mrb[25].mxu1 }
0x168b   :  { %v2957_v19 = vadd.f32 %v3314_v11, %v2956_v43 }
0x168c   :  { %v2976_v45 = vmax.f32 %v2962_v41, 0.0 }
0x168d   :  { %v2975_v44 = vmax.f32 %v2957_v19, 0.0 }
0x168f   :  { %3755 = vmatprep.mubr.msk.f32.mxu0 %vm1326_vm6, %v2975_v44 }
0x1690   :  { %3756 = vmatmul.mubr.msk.f32.vlgmr.msra.gmra.mrb[32].mxu0 %vm1326_vm6, %v2976_v45 }
0x1716   :  { %v3738_v9 = vpop.f32.mrb[26].mxu1 }
0x1717   :  { %v2972_v20 = vadd.f32 %v3738_v9, %v3314_v11  ;;  %v2966_v18 = vpop.f32.mrb[27].mxu1 }
0x1718   :  { %v2967_v48 = vadd.f32 %v3314_v11, %v2966_v18  ;;  %v3336_v11 = vld [vmem:[%s5065_s14 + $0x1] ss:$0 sm:$0xff] }
0x1719   :  { %v2978_v50 = vmax.f32 %v2972_v20, 0.0 }
0x171a   :  { %v2977_v49 = vmax.f32 %v2967_v48, 0.0 }
0x171c   :  { %3758 = vmatprep.mubr.msk.f32.mxu0 %vm1326_vm6, %v2977_v49 }
0x171d   :  { %3759 = vmatmul.mubr.msk.f32.gmra.mrb[34].mxu0 %vm1326_vm6, %v2978_v50 }
0x1763   :  { %v3757_v47 = vpop.f32.mrb[32].mxu0 }
0x1764   :  { %v3080_v52 = vadd.f32 %v3757_v47, %v3328_v51  ;;  %v3074_v53 = vpop.f32.mrb[33].mxu0 }
0x1765   :  { %v3075_v55 = vadd.f32 %v3328_v51, %v3074_v53 }
0x1766   :  { %v3094_v60 = vadd.f32 %v3080_v52, %v4927_v31 }
0x1767   :  { %v3093_v61 = vadd.f32 %v3075_v55, %v4909_v42 }
0x1768   :  { %v3104_v63 = vsel %vm73_vm0, %v3094_v60, 0.0 }
0x1769   :  { %3105 = vadd.xlane.f32.xlu1 %v3104_v63  ;;  %v3101_v0 = vsel %vm73_vm0, %v3093_v61, 0.0 }
0x176a   :  { %3102 = vadd.xlane.f32.xlu0 %v3101_v0 }
0x17f0   :  { %v3760_v17 = vpop.f32.mrb[34].mxu0 }
0x17f1   :  { %v3084_v14 = vpop.f32.mrb[35].mxu0  ;;  %v3090_v1 = vadd.f32 %v3760_v17, %v3328_v51 }
0x17f2   :  { %v3085_v4 = vadd.f32 %v3328_v51, %v3084_v14 }
0x17f3   :  { %v3096_v6 = vadd.f32 %v3090_v1, %v4958_v3 }
0x17f4   :  { %v3095_v24 = vadd.f32 %v3085_v4, %v4953_v62 }
0x17f5   :  { %v3110_v15 = vsel %vm73_vm0, %v3096_v6, 0.0 }
0x17f6   :  { %v3106_v10 = vpop.xlane.xlu1 %3105  ;;  %v3107_v5 = vsel %vm73_vm0, %v3095_v24, 0.0 }
0x17f7   :  { %v3114_v31 = vmul.f32 0.03125, %v3106_v10  ;;  %v3103_v7 = vpop.xlane.xlu0 %3102  ;;  %3108 = vadd.xlane.f32.xlu0 %v3107_v5 }
0x17f8   :  { %v3113_v42 = vmul.f32 0.03125, %v3103_v7 }
0x17f9   :  { %v3118_v13 = vsub.f32 %v3094_v60, %v3114_v31 }
0x17fa   :  { %v3117_v16 = vsub.f32 %v3093_v61, %v3113_v42 }
0x17fb   :  { %3111 = vadd.xlane.f32.xlu0 %v3110_v15  ;;  %v3122_v21 = vmul.f32 %v3118_v13, %v3118_v13 }
0x17fc   :  { %v3121_v23 = vmul.f32 %v3117_v16, %v3117_v16 }
0x17fd   :  { %v3128_v26 = vsel %vm73_vm0, %v3122_v21, 0.0 }
0x17fe   :  { %v3125_v62 = vsel %vm73_vm0, %v3121_v23, 0.0 }
0x17ff   :  { %3126 = vadd.xlane.f32.xlu1 %v3125_v62  ;;  %3129 = vadd.xlane.f32.xlu0 %v3128_v26 }
0x1884   :  { %v3109_v3 = vpop.xlane.xlu0 %3108 }
0x1885   :  { %v3115_v57 = vmul.f32 0.03125, %v3109_v3 }
0x1887   :  { %v3119_v59 = vsub.f32 %v3095_v24, %v3115_v57 }
0x1888   :  { %v3112_v27 = vpop.xlane.xlu0 %3111 }
0x1889   :  { %v3116_v32 = vmul.f32 0.03125, %v3112_v27  ;;  %v3123_v28 = vmul.f32 %v3119_v59, %v3119_v59 }
0x188b   :  { %v3120_v34 = vsub.f32 %v3096_v6, %v3116_v32  ;;  %v3131_v25 = vsel %vm73_vm0, %v3123_v28, 0.0 }
0x188c   :  { %3132 = vadd.xlane.f32.xlu1 %v3131_v25  ;;  %v3130_v35 = vpop.xlane.xlu0 %3129  ;;  %v3127_v8 = vpop.xlane.xlu1 %3126 }
0x188d   :  { %v3138_v30 = vmul.f32 0.03125, %v3130_v35  ;;  %v3137_v33 = vmul.f32 0.03125, %v3127_v8  ;;  %v3124_v29 = vmul.f32 %v3120_v34, %v3120_v34 }
0x188f   :  { %v3142_v37 = vadd.f32 1e-05, %v3138_v30  ;;  %v3141_v54 = vadd.f32 1e-05, %v3137_v33  ;;  %v3134_v38 = vsel %vm73_vm0, %v3124_v29, 0.0 }
0x1890   :  { %3135 = vadd.xlane.f32.xlu0 %v3134_v38 }
0x1891   :  { %4131 = vrsqrt.f32 %v3142_v37 }
0x1892   :  { %4133 = vrsqrt.f32 %v3141_v54 }
0x189b   :  { %v4132_v39 = vpop.eup %4131 }
0x189c   :  { %v4134_v36 = vpop.eup %4133  ;;  %v3150_v2 = vmul.f32 %v4132_v39, %v3118_v13 }
0x189d   :  { %v3149_v40 = vmul.f32 %v4134_v36, %v3117_v16 }
0x189e   :  { %v3160_v41 = vmul.f32 %v3335_v12, %v3150_v2 }
0x189f   :  { %v3159_v43 = vmul.f32 %v3335_v12, %v3149_v40 }
0x18a0   :  { %v3170_v19 = vadd.f32 %v3336_v11, %v3160_v41 }
0x18a1   :  { %v3169_v44 = vadd.f32 %v3336_v11, %v3159_v43 }
0x18a2   :  { %v3174_v45 = vmul.f32 %v3170_v19, %v4531_v22 }
0x18a3   :  { %v3173_v9 = vmul.f32 %v3169_v44, %v4503_v56 }
0x18a4   :  { %3178 = vst.msk [vmem:[%s5066_s15 + $0x8] sm:$0xff] %vm73_vm0, %v3174_v45 }
0x18a5   :  { %3177 = vst.msk [vmem:[%s5066_s15] sm:$0xff] %vm73_vm0, %v3173_v9 }
0x1919   :  { %v3133_v20 = vpop.xlane.xlu1 %3132 }
0x191a   :  { %v3139_v18 = vmul.f32 0.03125, %v3133_v20 }
0x191c   :  { %v3143_v48 = vadd.f32 1e-05, %v3139_v18 }
0x191d   :  { %v3136_v49 = vpop.xlane.xlu0 %3135 }
0x191e   :  { %4135 = vrsqrt.f32 %v3143_v48  ;;  %v3140_v50 = vmul.f32 0.03125, %v3136_v49 }
0x1920   :  { %v3144_v51 = vadd.f32 1e-05, %v3140_v50 }
0x1922   :  { %4137 = vrsqrt.f32 %v3144_v51 }
0x1928   :  { %v4136_v22 = vpop.eup %4135 }
0x1929   :  { %v3151_v56 = vmul.f32 %v4136_v22, %v3119_v59 }
0x192b   :  { %v3161_v47 = vmul.f32 %v3335_v12, %v3151_v56 }
0x192c   :  { %v4138_v52 = vpop.eup %4137 }
0x192d   :  { %v3171_v53 = vadd.f32 %v3336_v11, %v3161_v47  ;;  %v3152_v55 = vmul.f32 %v4138_v52, %v3120_v34 }
0x192f   :  { %v3175_v60 = vmul.f32 %v3171_v53, %v4505_v58  ;;  %v3162_v61 = vmul.f32 %v3335_v12, %v3152_v55 }
0x1931   :  { %3179 = vst.msk [vmem:[%s5066_s15 + $0x10] sm:$0xff] %vm73_vm0, %v3175_v60  ;;  %v3172_v63 = vadd.f32 %v3336_v11, %v3162_v61 }
0x1933   :  { %v3176_v0 = vmul.f32 %v3172_v63, %v4561_v46 }
0x1935   :  { %3180 = vst.msk [vmem:[%s5066_s15 + $0x18] sm:$0xff] %vm73_vm0, %v3176_v0 }

</bundles_post_ra>
